<compile_context>
chip_gen: v5e
topology: v5e:2x2
jax: 0.10.0
libtpu: 0.0.40
codegen_flags: <defaults>
</compile_context>

<pallas_src>
import random

import jax
import jax.numpy as jnp
from jax import lax
from jax.experimental import pallas as pl
from jax.experimental.pallas import tpu as pltpu

# ---------------------------------------------------------------------------
# Config (small, deterministic)
# ---------------------------------------------------------------------------
EN_VOCAB = 50
CN_VOCAB = 60
EMB = 32
HID = 32            # encoder per-direction hidden
HID2 = 2 * HID      # decoder hidden (= concat of fwd/bwd encoder hidden)
BATCH = 2
T_IN = 8
T_OUT = 8

HIDP = 128          # padded lane width for hidden state / each GRU gate
VOCABP = 128        # padded lane width for logits / one-hot
BG = 8              # batch-group (sublane tile); kernel processes BG rows per grid step
assert HID2 <= HIDP and CN_VOCAB <= VOCABP


# ---------------------------------------------------------------------------
# Single fused kernel: encoder bidirectional GRU recurrence + full decoder loop
# (one grid step handles one batch group of BG sequences)
# ---------------------------------------------------------------------------
def seq2seq_kernel(gi_ref,                  # (T_in, BG, 3*HP) f32  encoder input gates (pre-projected)
                   ewh_ref, ebh_ref,        # (HP, 3*HP) bf16, (1, 3*HP) f32  block-diag fwd|bwd recurrent
                   tgt_ref,                 # (T_out, BG, 1) int32
                   tf_ref,                  # (T_out, 1, 1) int32  teacher-forcing mask
                   embwi_ref,               # (VP, 3*HP) bf16  decoder emb @ W_ih (padded)
                   dbi_ref,                 # (1, 3*HP) f32
                   dwh_ref, dbh_ref,        # (HP, 3*HP) bf16, (1, 3*HP) f32
                   whead_ref, bhead_ref,    # (HP, VP) bf16, (1, VP) f32  collapsed 3-layer head
                   logits_ref,              # out (T_out, BG, VP) f32
                   preds_ref):              # out (T_out, BG, 1) int32
    T_in, B, GATES = gi_ref.shape
    T_out = tgt_ref.shape[0]
    HP = ewh_ref.shape[0]
    VP = whead_ref.shape[1]

    # ----- loop-invariant loads / broadcasts, hoisted once --------------------
    ebh = jnp.broadcast_to(ebh_ref[...], (B, GATES))
    dbi = jnp.broadcast_to(dbi_ref[...], (B, GATES))
    dbh = jnp.broadcast_to(dbh_ref[...], (B, GATES))
    bhead = jnp.broadcast_to(bhead_ref[...], (B, VP))
    lane = lax.broadcasted_iota(jnp.int32, (B, VP), 1)        # reused: one-hot + argmax
    inv_lane = jnp.int32(VP - 1) - lane

    def gru_step(gi, h, wh_ref, bh):
        # fused-gate GRU update; bf16 MXU operands, f32 accumulate.
        gh = jnp.dot(h.astype(jnp.bfloat16), wh_ref[...],
                     preferred_element_type=jnp.float32) + bh
        r = jax.nn.sigmoid(gi[:, 0:HP] + gh[:, 0:HP])
        z = jax.nn.sigmoid(gi[:, HP:2 * HP] + gh[:, HP:2 * HP])
        n = jnp.tanh(gi[:, 2 * HP:3 * HP] + r * gh[:, 2 * HP:3 * HP])
        return (1.0 - z) * n + z * h

    # ----- encoder: fwd & bwd directions fused into one 128-lane state --------
    # lanes [0:HID)=forward state (reads x[t]), [HID:2*HID)=backward state
    # (reads x[T-1-t], pre-arranged in gi), padded lanes stay exactly 0.
    def enc_body(t, h):
        return gru_step(gi_ref[t], h, ewh_ref, ebh)

    h = lax.fori_loop(0, T_in, enc_body,
                      jnp.zeros((B, HP), jnp.float32), unroll=True)
    # h == [h_fwd_final | h_bwd_final | 0...]  == decoder initial hidden

    # ----- decoder: full output loop in-kernel ---------------------------------
    logits_ref[0] = jnp.zeros((B, VP), jnp.float32)   # outputs[:, 0] stays zero
    preds_ref[0] = jnp.zeros((B, 1), jnp.int32)

    def dec_body(t, carry):
        h, tok = carry                                 # h (B,HP) f32, tok (B,1) i32
        # embedding lookup as one-hot matmul (emb already folded into W_ih)
        onehot = (lane == tok).astype(jnp.bfloat16)
        gi = jnp.dot(onehot, embwi_ref[...],
                     preferred_element_type=jnp.float32) + dbi
        h_new = gru_step(gi, h, dwh_ref, dbh)
        logits = jnp.dot(h_new.astype(jnp.bfloat16), whead_ref[...],
                         preferred_element_type=jnp.float32) + bhead
        logits_ref[t] = logits
        # greedy argmax with ONE cross-lane reduce:
        #  - bitcast f32 -> int32 and make it order-preserving (flip low 31 bits
        #    for negatives),
        #  - replace the low 7 bits with the inverted lane index,
        #  - a single max-reduce then yields the max value AND the smallest lane
        #    achieving it (ties -> first index, like torch.argmax).
        # Padded lanes hold -1e30 so they can never win.
        bits = pltpu.bitcast(logits, jnp.int32)
        key = jnp.where(bits < 0, bits ^ jnp.int32(0x7FFFFFFF), bits)
        key = (key & jnp.int32(-128)) | inv_lane
        best = jnp.max(key, axis=1, keepdims=True)
        top1 = jnp.int32(VP - 1) - (best & jnp.int32(0x7F))
        preds_ref[t] = top1
        tok_next = jnp.where(tf_ref[t] > 0, tgt_ref[t], top1)
        return h_new, tok_next

    lax.fori_loop(1, T_out, dec_body, (h, tgt_ref[0]), unroll=True)


def run_seq2seq_kernel(gi_enc, enc_p, tgt, tf_mask, dec_p):
    T_in, B_pad, GATES = gi_enc.shape
    T_out = tgt.shape[0]
    HP = dec_p["wh"].shape[0]
    VP = dec_p["w_head"].shape[1]
    n_groups = B_pad // BG

    def full2(shape):
        return pl.BlockSpec(shape, lambda g: (0, 0))

    def full3(shape):
        return pl.BlockSpec(shape, lambda g: (0, 0, 0))

    def batched3(t, c):
        return pl.BlockSpec((t, BG, c), lambda g: (0, g, 0))

    return pl.pallas_call(
        seq2seq_kernel,
        out_shape=(jax.ShapeDtypeStruct((T_out, B_pad, VP), jnp.float32),
                   jax.ShapeDtypeStruct((T_out, B_pad, 1), jnp.int32)),
        grid=(n_groups,),
        in_specs=[
            batched3(T_in, GATES),                      # encoder input gates
            full2((HP, GATES)), full2((1, GATES)),      # ewh (bf16), ebh (f32)
            batched3(T_out, 1),                         # target tokens
            full3((T_out, 1, 1)),                       # teacher-forcing mask
            full2((VP, GATES)), full2((1, GATES)),      # emb@Wi (bf16), bi (f32)
            full2((HP, GATES)), full2((1, GATES)),      # dwh (bf16), dbh (f32)
            full2((HP, VP)), full2((1, VP)),            # w_head (bf16), b_head (f32)
        ],
        out_specs=(batched3(T_out, VP), batched3(T_out, 1)),
        compiler_params=pltpu.CompilerParams(
            dimension_semantics=("parallel",)),
    )(gi_enc, enc_p["wh"], enc_p["bh"], tgt, tf_mask,
      dec_p["emb_wi"], dec_p["bi"], dec_p["wh"], dec_p["bh"],
      dec_p["w_head"], dec_p["b_head"])


# ---------------------------------------------------------------------------
# Seq2Seq.forward equivalent (jitted; TF mask precomputed host-side)
# ---------------------------------------------------------------------------
@jax.jit
def _forward_jit(enc_p, dec_p, inp, target, tf_mask):
    B = inp.shape[0]
    B_pad = ((B + BG - 1) // BG) * BG
    pad = B_pad - B
    inp_p = jnp.pad(inp, ((0, pad), (0, 0)))
    tgt_p = jnp.pad(target, ((0, pad), (0, 0)))

    # Encoder embedding gather + hoisted (non-recurrent) input projection: XLA glue.
    x = jnp.take(enc_p["emb"], inp_p, axis=0)          # (B_pad, T_in, E)
    x = jnp.transpose(x, (1, 0, 2))                    # time-major (T_in, B_pad, E)
    x_cat = jnp.concatenate([x, x[::-1]], axis=-1)     # (T_in, B_pad, 2E): [x_t | x_{T-1-t}]
    gi_enc = jnp.einsum("tbe,eg->tbg", x_cat, enc_p["wi"]) + enc_p["bi"]   # (T_in, B_pad, 3*HP)

    tgt = jnp.transpose(tgt_p.astype(jnp.int32), (1, 0))[:, :, None]       # (T_out, B_pad, 1)
    logits_all, preds_all = run_seq2seq_kernel(gi_enc, enc_p, tgt, tf_mask, dec_p)

    outputs = jnp.transpose(logits_all, (1, 0, 2))[:B, :, :CN_VOCAB]        # (B, T_out, V)
    preds = jnp.transpose(preds_all[1:, :, 0], (1, 0))[:B]                  # (B, T_out-1)
    return outputs, preds


def seq2seq_forward(enc_p, dec_p, inp, target, teacher_forcing_ratio):
    """inp: (B, T_in) int32, target: (B, T_out) int32."""
    target_len = int(target.shape[1])
    # Same host-random mechanism / call order as the PyTorch code, but folded
    # into an int32 mask so the rest of the forward can be jitted.
    tf = [0] + [1 if random.random() < teacher_forcing_ratio else 0
                for _ in range(1, target_len)]
    tf_mask = jnp.asarray(tf, dtype=jnp.int32).reshape(target_len, 1, 1)
    return _forward_jit(enc_p, dec_p, inp, target, tf_mask)


# ---------------------------------------------------------------------------
# Deterministic "torch-like" parameters + host-side fusion / padding
# ---------------------------------------------------------------------------
def make_params(key):
    ks = iter(jax.random.split(key, 40))

    def init(shape, scale=0.1):
        return scale * jax.random.normal(next(ks), shape, dtype=jnp.float32)

    enc = {
        "emb": init((EN_VOCAB, EMB)),
        # gate order r, z, n along leading axis; weights stored (in, out)
        "wif": init((3, EMB, HID)), "whf": init((3, HID, HID)),
        "bif": init((3, HID)),      "bhf": init((3, HID)),
        "wib": init((3, EMB, HID)), "whb": init((3, HID, HID)),
        "bib": init((3, HID)),      "bhb": init((3, HID)),
    }
    dec = {
        "emb": init((CN_VOCAB, EMB)),
        "wi": init((3, EMB, HID2)), "wh": init((3, HID2, HID2)),
        "bi": init((3, HID2)),      "bh": init((3, HID2)),
        "w1": init((HID2, 4 * HID)),     "b1": init((4 * HID,)),
        "w2": init((4 * HID, 8 * HID)),  "b2": init((8 * HID,)),
        "w3": init((8 * HID, CN_VOCAB)), "b3": init((CN_VOCAB,)),
    }
    return enc, dec


def prepare_encoder(p):
    """Fuse gates + pack fwd/bwd directions block-diagonally, pad to 128 lanes.

    Recurrent matrix is stored in bf16 (MXU-native); biases stay f32."""
    E, H, HP = EMB, HID, HIDP
    wi = jnp.zeros((2 * E, 3 * HP), jnp.float32)   # rows: [x_t | x_{T-1-t}]
    bi = jnp.zeros((1, 3 * HP), jnp.float32)
    wh = jnp.zeros((HP, 3 * HP), jnp.float32)      # rows: [h_fwd | h_bwd | pad]
    bh = jnp.zeros((1, 3 * HP), jnp.float32)
    for g in range(3):
        c = g * HP
        wi = (wi.at[0:E, c:c + H].set(p["wif"][g])
                .at[E:2 * E, c + H:c + 2 * H].set(p["wib"][g]))
        bi = (bi.at[0, c:c + H].set(p["bif"][g])
                .at[0, c + H:c + 2 * H].set(p["bib"][g]))
        wh = (wh.at[0:H, c:c + H].set(p["whf"][g])
                .at[H:2 * H, c + H:c + 2 * H].set(p["whb"][g]))
        bh = (bh.at[0, c:c + H].set(p["bhf"][g])
                .at[0, c + H:c + 2 * H].set(p["bhb"][g]))
    return {"emb": p["emb"], "wi": wi, "bi": bi,
            "wh": wh.astype(jnp.bfloat16), "bh": bh}


def prepare_decoder(p):
    """Fuse gates, fold emb into W_ih, collapse the 3 Linear layers, pad lanes.

    Matmul weights stored in bf16; biases (incl. -1e30 logit padding) stay f32."""
    H2, HP, V, VP = HID2, HIDP, CN_VOCAB, VOCABP
    emb_wi = jnp.zeros((VP, 3 * HP), jnp.float32)
    bi = jnp.zeros((1, 3 * HP), jnp.float32)
    wh = jnp.zeros((HP, 3 * HP), jnp.float32)
    bh = jnp.zeros((1, 3 * HP), jnp.float32)
    for g in range(3):
        c = g * HP
        emb_wi = emb_wi.at[0:V, c:c + H2].set(p["emb"] @ p["wi"][g])
        bi = bi.at[0, c:c + H2].set(p["bi"][g])
        wh = wh.at[0:H2, c:c + H2].set(p["wh"][g])
        bh = bh.at[0, c:c + H2].set(p["bh"][g])
    # No nonlinearity between the 3 Linear layers -> exact algebraic collapse.
    w_head_real = p["w1"] @ p["w2"] @ p["w3"]                           # (H2, V)
    b_head_real = (p["b1"] @ p["w2"] + p["b2"]) @ p["w3"] + p["b3"]      # (V,)
    w_head = jnp.zeros((HP, VP), jnp.float32).at[0:H2, 0:V].set(w_head_real)
    b_head = jnp.full((1, VP), -1e30, jnp.float32).at[0, 0:V].set(b_head_real)
    return {"emb_wi": emb_wi.astype(jnp.bfloat16), "bi": bi,
            "wh": wh.astype(jnp.bfloat16), "bh": bh,
            "w_head": w_head.astype(jnp.bfloat16), "b_head": b_head}


# TODO(synk): the attention-enabled decoder (encoder_outputs) and the
# beam-search inference() path are not implemented; only the single-layer,
# no-attention hw8 forward() configuration is covered.  Explicit MXU RHS
# staging (pltpu.matmul_push_rhs) / zero-K-row pruning left for a future pass.

if __name__ == "__main__":
    key = jax.random.PRNGKey(0)
    k_par, k_in, k_tgt = jax.random.split(key, 3)
    enc_raw, dec_raw = make_params(k_par)
    enc_params = prepare_encoder(enc_raw)
    dec_params = prepare_decoder(dec_raw)

    inp = jax.random.randint(k_in, (BATCH, T_IN), 0, EN_VOCAB, dtype=jnp.int32)
    target = jax.random.randint(k_tgt, (BATCH, T_OUT), 0, CN_VOCAB, dtype=jnp.int32)

    random.seed(0)  # deterministic teacher forcing, same mechanism as torch code
    outputs, preds = seq2seq_forward(enc_params, dec_params, inp, target,
                                     teacher_forcing_ratio=0.5)
    jax.block_until_ready(outputs)
    jax.block_until_ready(preds)

    assert outputs.shape == (BATCH, T_OUT, CN_VOCAB)
    assert preds.shape == (BATCH, T_OUT - 1)
    assert bool(jnp.isfinite(outputs).all())
    assert bool((preds >= 0).all()) and bool((preds < CN_VOCAB).all())
    print("KERNEL_OK")
</pallas_src>

<mosaic_0001>
module attributes {stable_mosaic.version = 11 : i64} {
  func.func @seq2seq_kernel(%arg0: i32, %arg1: memref<8x8x384xf32, #tpu.memory_space<vmem>>, %arg2: memref<128x384xbf16, #tpu.memory_space<vmem>>, %arg3: memref<1x384xf32, #tpu.memory_space<vmem>>, %arg4: memref<8x8x1xi32, #tpu.memory_space<vmem>>, %arg5: memref<8x1x1xi32, #tpu.memory_space<vmem>>, %arg6: memref<128x384xbf16, #tpu.memory_space<vmem>>, %arg7: memref<1x384xf32, #tpu.memory_space<vmem>>, %arg8: memref<128x384xbf16, #tpu.memory_space<vmem>>, %arg9: memref<1x384xf32, #tpu.memory_space<vmem>>, %arg10: memref<128x128xbf16, #tpu.memory_space<vmem>>, %arg11: memref<1x128xf32, #tpu.memory_space<vmem>>, %arg12: memref<8x8x128xf32, #tpu.memory_space<vmem>>, %arg13: memref<8x8x1xi32, #tpu.memory_space<vmem>>) attributes {dimension_semantics = [#tpu.dimension_semantics<parallel>], iteration_bounds = array<i64: 1>, scalar_prefetch = 0 : i64, scratch_operands = 0 : i64, tpu.core_type = #tpu.core_type<tc>, window_params = [{transform_indices = @transform_0, window_bounds = array<i64: 8, 8, 384>}, {pipeline_mode = #tpu.pipeline_mode<synchronous>, transform_indices = @transform_1, window_bounds = array<i64: 128, 384>}, {pipeline_mode = #tpu.pipeline_mode<synchronous>, transform_indices = @transform_2, window_bounds = array<i64: 1, 384>}, {transform_indices = @transform_3, window_bounds = array<i64: 8, 8, 1>}, {pipeline_mode = #tpu.pipeline_mode<synchronous>, transform_indices = @transform_4, window_bounds = array<i64: 8, 1, 1>}, {pipeline_mode = #tpu.pipeline_mode<synchronous>, transform_indices = @transform_5, window_bounds = array<i64: 128, 384>}, {pipeline_mode = #tpu.pipeline_mode<synchronous>, transform_indices = @transform_6, window_bounds = array<i64: 1, 384>}, {pipeline_mode = #tpu.pipeline_mode<synchronous>, transform_indices = @transform_7, window_bounds = array<i64: 128, 384>}, {pipeline_mode = #tpu.pipeline_mode<synchronous>, transform_indices = @transform_8, window_bounds = array<i64: 1, 384>}, {pipeline_mode = #tpu.pipeline_mode<synchronous>, transform_indices = @transform_9, window_bounds = array<i64: 128, 128>}, {pipeline_mode = #tpu.pipeline_mode<synchronous>, transform_indices = @transform_10, window_bounds = array<i64: 1, 128>}, {transform_indices = @transform_11, window_bounds = array<i64: 8, 8, 128>}, {transform_indices = @transform_12, window_bounds = array<i64: 8, 8, 1>}]} {
    %c0 = arith.constant 0 : index
    %c0_0 = arith.constant 0 : index
    %0 = vector.load %arg3[%c0, %c0_0] : memref<1x384xf32, #tpu.memory_space<vmem>>, vector<1x384xf32>
    %1 = vector.shape_cast %0 : vector<1x384xf32> to vector<1x384xf32>
    %2 = vector.broadcast %1 : vector<1x384xf32> to vector<8x384xf32>
    %c0_1 = arith.constant 0 : index
    %c0_2 = arith.constant 0 : index
    %3 = vector.load %arg7[%c0_1, %c0_2] : memref<1x384xf32, #tpu.memory_space<vmem>>, vector<1x384xf32>
    %4 = vector.shape_cast %3 : vector<1x384xf32> to vector<1x384xf32>
    %5 = vector.broadcast %4 : vector<1x384xf32> to vector<8x384xf32>
    %c0_3 = arith.constant 0 : index
    %c0_4 = arith.constant 0 : index
    %6 = vector.load %arg9[%c0_3, %c0_4] : memref<1x384xf32, #tpu.memory_space<vmem>>, vector<1x384xf32>
    %7 = vector.shape_cast %6 : vector<1x384xf32> to vector<1x384xf32>
    %8 = vector.broadcast %7 : vector<1x384xf32> to vector<8x384xf32>
    %c0_5 = arith.constant 0 : index
    %c0_6 = arith.constant 0 : index
    %9 = vector.load %arg11[%c0_5, %c0_6] : memref<1x128xf32, #tpu.memory_space<vmem>>, vector<1x128xf32>
    %10 = vector.shape_cast %9 : vector<1x128xf32> to vector<1x128xf32>
    %11 = vector.broadcast %10 : vector<1x128xf32> to vector<8x128xf32>
    %12 = tpu.iota {dimensions = array<i32: 1>} : vector<8x128xi32>
    %c127_i32 = arith.constant 127 : i32
    %13 = vector.broadcast %c127_i32 : i32 to vector<8x128xi32>
    %14 = arith.subi %13, %12 : vector<8x128xi32>
    %cst = arith.constant 0.000000e+00 : f32
    %15 = vector.broadcast %cst : f32 to vector<8x128xf32>
    %c0_i32 = arith.constant 0 : i32
    %16 = arith.index_cast %c0_i32 : i32 to index
    %c0_7 = arith.constant 0 : index
    %c0_8 = arith.constant 0 : index
    %17 = vector.load %arg1[%16, %c0_7, %c0_8] : memref<8x8x384xf32, #tpu.memory_space<vmem>>, vector<1x8x384xf32>
    %18 = vector.shape_cast %17 : vector<1x8x384xf32> to vector<8x384xf32>
    %19 = arith.truncf %15 : vector<8x128xf32> to vector<8x128xbf16>
    %c0_9 = arith.constant 0 : index
    %c0_10 = arith.constant 0 : index
    %20 = vector.load %arg2[%c0_9, %c0_10] : memref<128x384xbf16, #tpu.memory_space<vmem>>, vector<128x384xbf16>
    %cst_11 = arith.constant dense<0.000000e+00> : vector<8x384xf32>
    %21 = tpu.matmul %19, %20, %cst_11 {dimension_numbers = #tpu.dot_dimension_numbers<[1], [0], [0], [1], [0, 0, 1, 1], [], []>} : vector<8x128xbf16>, vector<128x384xbf16>, vector<8x384xf32> -> vector<8x384xf32>
    %22 = arith.addf %21, %2 : vector<8x384xf32>
    %23 = vector.extract_strided_slice %18 {offsets = [0, 0], sizes = [8, 128], strides = [1, 1]} : vector<8x384xf32> to vector<8x128xf32>
    %24 = vector.extract_strided_slice %22 {offsets = [0, 0], sizes = [8, 128], strides = [1, 1]} : vector<8x384xf32> to vector<8x128xf32>
    %25 = arith.addf %23, %24 : vector<8x128xf32>
    %26 = arith.negf %25 : vector<8x128xf32>
    %27 = math.exp %26 : vector<8x128xf32>
    %cst_12 = arith.constant 1.000000e+00 : f32
    %28 = vector.broadcast %cst_12 : f32 to vector<8x128xf32>
    %29 = arith.addf %28, %27 : vector<8x128xf32>
    %30 = arith.divf %28, %29 : vector<8x128xf32>
    %31 = vector.extract_strided_slice %18 {offsets = [0, 128], sizes = [8, 128], strides = [1, 1]} : vector<8x384xf32> to vector<8x128xf32>
    %32 = vector.extract_strided_slice %22 {offsets = [0, 128], sizes = [8, 128], strides = [1, 1]} : vector<8x384xf32> to vector<8x128xf32>
    %33 = arith.addf %31, %32 : vector<8x128xf32>
    %34 = arith.negf %33 : vector<8x128xf32>
    %35 = math.exp %34 : vector<8x128xf32>
    %cst_13 = arith.constant 1.000000e+00 : f32
    %36 = vector.broadcast %cst_13 : f32 to vector<8x128xf32>
    %37 = arith.addf %36, %35 : vector<8x128xf32>
    %38 = arith.divf %36, %37 : vector<8x128xf32>
    %39 = vector.extract_strided_slice %18 {offsets = [0, 256], sizes = [8, 128], strides = [1, 1]} : vector<8x384xf32> to vector<8x128xf32>
    %40 = vector.extract_strided_slice %22 {offsets = [0, 256], sizes = [8, 128], strides = [1, 1]} : vector<8x384xf32> to vector<8x128xf32>
    %41 = arith.mulf %30, %40 : vector<8x128xf32>
    %42 = arith.addf %39, %41 : vector<8x128xf32>
    %43 = math.tanh %42 : vector<8x128xf32>
    %cst_14 = arith.constant 1.000000e+00 : f32
    %44 = vector.broadcast %cst_14 : f32 to vector<8x128xf32>
    %45 = arith.subf %44, %38 : vector<8x128xf32>
    %46 = arith.mulf %45, %43 : vector<8x128xf32>
    %47 = arith.mulf %38, %15 : vector<8x128xf32>
    %48 = arith.addf %46, %47 : vector<8x128xf32>
    %c1_i32 = arith.constant 1 : i32
    %49 = arith.index_cast %c1_i32 : i32 to index
    %c0_15 = arith.constant 0 : index
    %c0_16 = arith.constant 0 : index
    %50 = vector.load %arg1[%49, %c0_15, %c0_16] : memref<8x8x384xf32, #tpu.memory_space<vmem>>, vector<1x8x384xf32>
    %51 = vector.shape_cast %50 : vector<1x8x384xf32> to vector<8x384xf32>
    %52 = arith.truncf %48 : vector<8x128xf32> to vector<8x128xbf16>
    %c0_17 = arith.constant 0 : index
    %c0_18 = arith.constant 0 : index
    %53 = vector.load %arg2[%c0_17, %c0_18] : memref<128x384xbf16, #tpu.memory_space<vmem>>, vector<128x384xbf16>
    %cst_19 = arith.constant dense<0.000000e+00> : vector<8x384xf32>
    %54 = tpu.matmul %52, %53, %cst_19 {dimension_numbers = #tpu.dot_dimension_numbers<[1], [0], [0], [1], [0, 0, 1, 1], [], []>} : vector<8x128xbf16>, vector<128x384xbf16>, vector<8x384xf32> -> vector<8x384xf32>
    %55 = arith.addf %54, %2 : vector<8x384xf32>
    %56 = vector.extract_strided_slice %51 {offsets = [0, 0], sizes = [8, 128], strides = [1, 1]} : vector<8x384xf32> to vector<8x128xf32>
    %57 = vector.extract_strided_slice %55 {offsets = [0, 0], sizes = [8, 128], strides = [1, 1]} : vector<8x384xf32> to vector<8x128xf32>
    %58 = arith.addf %56, %57 : vector<8x128xf32>
    %59 = arith.negf %58 : vector<8x128xf32>
    %60 = math.exp %59 : vector<8x128xf32>
    %cst_20 = arith.constant 1.000000e+00 : f32
    %61 = vector.broadcast %cst_20 : f32 to vector<8x128xf32>
    %62 = arith.addf %61, %60 : vector<8x128xf32>
    %63 = arith.divf %61, %62 : vector<8x128xf32>
    %64 = vector.extract_strided_slice %51 {offsets = [0, 128], sizes = [8, 128], strides = [1, 1]} : vector<8x384xf32> to vector<8x128xf32>
    %65 = vector.extract_strided_slice %55 {offsets = [0, 128], sizes = [8, 128], strides = [1, 1]} : vector<8x384xf32> to vector<8x128xf32>
    %66 = arith.addf %64, %65 : vector<8x128xf32>
    %67 = arith.negf %66 : vector<8x128xf32>
    %68 = math.exp %67 : vector<8x128xf32>
    %cst_21 = arith.constant 1.000000e+00 : f32
    %69 = vector.broadcast %cst_21 : f32 to vector<8x128xf32>
    %70 = arith.addf %69, %68 : vector<8x128xf32>
    %71 = arith.divf %69, %70 : vector<8x128xf32>
    %72 = vector.extract_strided_slice %51 {offsets = [0, 256], sizes = [8, 128], strides = [1, 1]} : vector<8x384xf32> to vector<8x128xf32>
    %73 = vector.extract_strided_slice %55 {offsets = [0, 256], sizes = [8, 128], strides = [1, 1]} : vector<8x384xf32> to vector<8x128xf32>
    %74 = arith.mulf %63, %73 : vector<8x128xf32>
    %75 = arith.addf %72, %74 : vector<8x128xf32>
    %76 = math.tanh %75 : vector<8x128xf32>
    %cst_22 = arith.constant 1.000000e+00 : f32
    %77 = vector.broadcast %cst_22 : f32 to vector<8x128xf32>
    %78 = arith.subf %77, %71 : vector<8x128xf32>
    %79 = arith.mulf %78, %76 : vector<8x128xf32>
    %80 = arith.mulf %71, %48 : vector<8x128xf32>
    %81 = arith.addf %79, %80 : vector<8x128xf32>
    %c2_i32 = arith.constant 2 : i32
    %82 = arith.index_cast %c2_i32 : i32 to index
    %c0_23 = arith.constant 0 : index
    %c0_24 = arith.constant 0 : index
    %83 = vector.load %arg1[%82, %c0_23, %c0_24] : memref<8x8x384xf32, #tpu.memory_space<vmem>>, vector<1x8x384xf32>
    %84 = vector.shape_cast %83 : vector<1x8x384xf32> to vector<8x384xf32>
    %85 = arith.truncf %81 : vector<8x128xf32> to vector<8x128xbf16>
    %c0_25 = arith.constant 0 : index
    %c0_26 = arith.constant 0 : index
    %86 = vector.load %arg2[%c0_25, %c0_26] : memref<128x384xbf16, #tpu.memory_space<vmem>>, vector<128x384xbf16>
    %cst_27 = arith.constant dense<0.000000e+00> : vector<8x384xf32>
    %87 = tpu.matmul %85, %86, %cst_27 {dimension_numbers = #tpu.dot_dimension_numbers<[1], [0], [0], [1], [0, 0, 1, 1], [], []>} : vector<8x128xbf16>, vector<128x384xbf16>, vector<8x384xf32> -> vector<8x384xf32>
    %88 = arith.addf %87, %2 : vector<8x384xf32>
    %89 = vector.extract_strided_slice %84 {offsets = [0, 0], sizes = [8, 128], strides = [1, 1]} : vector<8x384xf32> to vector<8x128xf32>
    %90 = vector.extract_strided_slice %88 {offsets = [0, 0], sizes = [8, 128], strides = [1, 1]} : vector<8x384xf32> to vector<8x128xf32>
    %91 = arith.addf %89, %90 : vector<8x128xf32>
    %92 = arith.negf %91 : vector<8x128xf32>
    %93 = math.exp %92 : vector<8x128xf32>
    %cst_28 = arith.constant 1.000000e+00 : f32
    %94 = vector.broadcast %cst_28 : f32 to vector<8x128xf32>
    %95 = arith.addf %94, %93 : vector<8x128xf32>
    %96 = arith.divf %94, %95 : vector<8x128xf32>
    %97 = vector.extract_strided_slice %84 {offsets = [0, 128], sizes = [8, 128], strides = [1, 1]} : vector<8x384xf32> to vector<8x128xf32>
    %98 = vector.extract_strided_slice %88 {offsets = [0, 128], sizes = [8, 128], strides = [1, 1]} : vector<8x384xf32> to vector<8x128xf32>
    %99 = arith.addf %97, %98 : vector<8x128xf32>
    %100 = arith.negf %99 : vector<8x128xf32>
    %101 = math.exp %100 : vector<8x128xf32>
    %cst_29 = arith.constant 1.000000e+00 : f32
    %102 = vector.broadcast %cst_29 : f32 to vector<8x128xf32>
    %103 = arith.addf %102, %101 : vector<8x128xf32>
    %104 = arith.divf %102, %103 : vector<8x128xf32>
    %105 = vector.extract_strided_slice %84 {offsets = [0, 256], sizes = [8, 128], strides = [1, 1]} : vector<8x384xf32> to vector<8x128xf32>
    %106 = vector.extract_strided_slice %88 {offsets = [0, 256], sizes = [8, 128], strides = [1, 1]} : vector<8x384xf32> to vector<8x128xf32>
    %107 = arith.mulf %96, %106 : vector<8x128xf32>
    %108 = arith.addf %105, %107 : vector<8x128xf32>
    %109 = math.tanh %108 : vector<8x128xf32>
    %cst_30 = arith.constant 1.000000e+00 : f32
    %110 = vector.broadcast %cst_30 : f32 to vector<8x128xf32>
    %111 = arith.subf %110, %104 : vector<8x128xf32>
    %112 = arith.mulf %111, %109 : vector<8x128xf32>
    %113 = arith.mulf %104, %81 : vector<8x128xf32>
    %114 = arith.addf %112, %113 : vector<8x128xf32>
    %c3_i32 = arith.constant 3 : i32
    %115 = arith.index_cast %c3_i32 : i32 to index
    %c0_31 = arith.constant 0 : index
    %c0_32 = arith.constant 0 : index
    %116 = vector.load %arg1[%115, %c0_31, %c0_32] : memref<8x8x384xf32, #tpu.memory_space<vmem>>, vector<1x8x384xf32>
    %117 = vector.shape_cast %116 : vector<1x8x384xf32> to vector<8x384xf32>
    %118 = arith.truncf %114 : vector<8x128xf32> to vector<8x128xbf16>
    %c0_33 = arith.constant 0 : index
    %c0_34 = arith.constant 0 : index
    %119 = vector.load %arg2[%c0_33, %c0_34] : memref<128x384xbf16, #tpu.memory_space<vmem>>, vector<128x384xbf16>
    %cst_35 = arith.constant dense<0.000000e+00> : vector<8x384xf32>
    %120 = tpu.matmul %118, %119, %cst_35 {dimension_numbers = #tpu.dot_dimension_numbers<[1], [0], [0], [1], [0, 0, 1, 1], [], []>} : vector<8x128xbf16>, vector<128x384xbf16>, vector<8x384xf32> -> vector<8x384xf32>
    %121 = arith.addf %120, %2 : vector<8x384xf32>
    %122 = vector.extract_strided_slice %117 {offsets = [0, 0], sizes = [8, 128], strides = [1, 1]} : vector<8x384xf32> to vector<8x128xf32>
    %123 = vector.extract_strided_slice %121 {offsets = [0, 0], sizes = [8, 128], strides = [1, 1]} : vector<8x384xf32> to vector<8x128xf32>
    %124 = arith.addf %122, %123 : vector<8x128xf32>
    %125 = arith.negf %124 : vector<8x128xf32>
    %126 = math.exp %125 : vector<8x128xf32>
    %cst_36 = arith.constant 1.000000e+00 : f32
    %127 = vector.broadcast %cst_36 : f32 to vector<8x128xf32>
    %128 = arith.addf %127, %126 : vector<8x128xf32>
    %129 = arith.divf %127, %128 : vector<8x128xf32>
    %130 = vector.extract_strided_slice %117 {offsets = [0, 128], sizes = [8, 128], strides = [1, 1]} : vector<8x384xf32> to vector<8x128xf32>
    %131 = vector.extract_strided_slice %121 {offsets = [0, 128], sizes = [8, 128], strides = [1, 1]} : vector<8x384xf32> to vector<8x128xf32>
    %132 = arith.addf %130, %131 : vector<8x128xf32>
    %133 = arith.negf %132 : vector<8x128xf32>
    %134 = math.exp %133 : vector<8x128xf32>
    %cst_37 = arith.constant 1.000000e+00 : f32
    %135 = vector.broadcast %cst_37 : f32 to vector<8x128xf32>
    %136 = arith.addf %135, %134 : vector<8x128xf32>
    %137 = arith.divf %135, %136 : vector<8x128xf32>
    %138 = vector.extract_strided_slice %117 {offsets = [0, 256], sizes = [8, 128], strides = [1, 1]} : vector<8x384xf32> to vector<8x128xf32>
    %139 = vector.extract_strided_slice %121 {offsets = [0, 256], sizes = [8, 128], strides = [1, 1]} : vector<8x384xf32> to vector<8x128xf32>
    %140 = arith.mulf %129, %139 : vector<8x128xf32>
    %141 = arith.addf %138, %140 : vector<8x128xf32>
    %142 = math.tanh %141 : vector<8x128xf32>
    %cst_38 = arith.constant 1.000000e+00 : f32
    %143 = vector.broadcast %cst_38 : f32 to vector<8x128xf32>
    %144 = arith.subf %143, %137 : vector<8x128xf32>
    %145 = arith.mulf %144, %142 : vector<8x128xf32>
    %146 = arith.mulf %137, %114 : vector<8x128xf32>
    %147 = arith.addf %145, %146 : vector<8x128xf32>
    %c4_i32 = arith.constant 4 : i32
    %148 = arith.index_cast %c4_i32 : i32 to index
    %c0_39 = arith.constant 0 : index
    %c0_40 = arith.constant 0 : index
    %149 = vector.load %arg1[%148, %c0_39, %c0_40] : memref<8x8x384xf32, #tpu.memory_space<vmem>>, vector<1x8x384xf32>
    %150 = vector.shape_cast %149 : vector<1x8x384xf32> to vector<8x384xf32>
    %151 = arith.truncf %147 : vector<8x128xf32> to vector<8x128xbf16>
    %c0_41 = arith.constant 0 : index
    %c0_42 = arith.constant 0 : index
    %152 = vector.load %arg2[%c0_41, %c0_42] : memref<128x384xbf16, #tpu.memory_space<vmem>>, vector<128x384xbf16>
    %cst_43 = arith.constant dense<0.000000e+00> : vector<8x384xf32>
    %153 = tpu.matmul %151, %152, %cst_43 {dimension_numbers = #tpu.dot_dimension_numbers<[1], [0], [0], [1], [0, 0, 1, 1], [], []>} : vector<8x128xbf16>, vector<128x384xbf16>, vector<8x384xf32> -> vector<8x384xf32>
    %154 = arith.addf %153, %2 : vector<8x384xf32>
    %155 = vector.extract_strided_slice %150 {offsets = [0, 0], sizes = [8, 128], strides = [1, 1]} : vector<8x384xf32> to vector<8x128xf32>
    %156 = vector.extract_strided_slice %154 {offsets = [0, 0], sizes = [8, 128], strides = [1, 1]} : vector<8x384xf32> to vector<8x128xf32>
    %157 = arith.addf %155, %156 : vector<8x128xf32>
    %158 = arith.negf %157 : vector<8x128xf32>
    %159 = math.exp %158 : vector<8x128xf32>
    %cst_44 = arith.constant 1.000000e+00 : f32
    %160 = vector.broadcast %cst_44 : f32 to vector<8x128xf32>
    %161 = arith.addf %160, %159 : vector<8x128xf32>
    %162 = arith.divf %160, %161 : vector<8x128xf32>
    %163 = vector.extract_strided_slice %150 {offsets = [0, 128], sizes = [8, 128], strides = [1, 1]} : vector<8x384xf32> to vector<8x128xf32>
    %164 = vector.extract_strided_slice %154 {offsets = [0, 128], sizes = [8, 128], strides = [1, 1]} : vector<8x384xf32> to vector<8x128xf32>
    %165 = arith.addf %163, %164 : vector<8x128xf32>
    %166 = arith.negf %165 : vector<8x128xf32>
    %167 = math.exp %166 : vector<8x128xf32>
    %cst_45 = arith.constant 1.000000e+00 : f32
    %168 = vector.broadcast %cst_45 : f32 to vector<8x128xf32>
    %169 = arith.addf %168, %167 : vector<8x128xf32>
    %170 = arith.divf %168, %169 : vector<8x128xf32>
    %171 = vector.extract_strided_slice %150 {offsets = [0, 256], sizes = [8, 128], strides = [1, 1]} : vector<8x384xf32> to vector<8x128xf32>
    %172 = vector.extract_strided_slice %154 {offsets = [0, 256], sizes = [8, 128], strides = [1, 1]} : vector<8x384xf32> to vector<8x128xf32>
    %173 = arith.mulf %162, %172 : vector<8x128xf32>
    %174 = arith.addf %171, %173 : vector<8x128xf32>
    %175 = math.tanh %174 : vector<8x128xf32>
    %cst_46 = arith.constant 1.000000e+00 : f32
    %176 = vector.broadcast %cst_46 : f32 to vector<8x128xf32>
    %177 = arith.subf %176, %170 : vector<8x128xf32>
    %178 = arith.mulf %177, %175 : vector<8x128xf32>
    %179 = arith.mulf %170, %147 : vector<8x128xf32>
    %180 = arith.addf %178, %179 : vector<8x128xf32>
    %c5_i32 = arith.constant 5 : i32
    %181 = arith.index_cast %c5_i32 : i32 to index
    %c0_47 = arith.constant 0 : index
    %c0_48 = arith.constant 0 : index
    %182 = vector.load %arg1[%181, %c0_47, %c0_48] : memref<8x8x384xf32, #tpu.memory_space<vmem>>, vector<1x8x384xf32>
    %183 = vector.shape_cast %182 : vector<1x8x384xf32> to vector<8x384xf32>
    %184 = arith.truncf %180 : vector<8x128xf32> to vector<8x128xbf16>
    %c0_49 = arith.constant 0 : index
    %c0_50 = arith.constant 0 : index
    %185 = vector.load %arg2[%c0_49, %c0_50] : memref<128x384xbf16, #tpu.memory_space<vmem>>, vector<128x384xbf16>
    %cst_51 = arith.constant dense<0.000000e+00> : vector<8x384xf32>
    %186 = tpu.matmul %184, %185, %cst_51 {dimension_numbers = #tpu.dot_dimension_numbers<[1], [0], [0], [1], [0, 0, 1, 1], [], []>} : vector<8x128xbf16>, vector<128x384xbf16>, vector<8x384xf32> -> vector<8x384xf32>
    %187 = arith.addf %186, %2 : vector<8x384xf32>
    %188 = vector.extract_strided_slice %183 {offsets = [0, 0], sizes = [8, 128], strides = [1, 1]} : vector<8x384xf32> to vector<8x128xf32>
    %189 = vector.extract_strided_slice %187 {offsets = [0, 0], sizes = [8, 128], strides = [1, 1]} : vector<8x384xf32> to vector<8x128xf32>
    %190 = arith.addf %188, %189 : vector<8x128xf32>
    %191 = arith.negf %190 : vector<8x128xf32>
    %192 = math.exp %191 : vector<8x128xf32>
    %cst_52 = arith.constant 1.000000e+00 : f32
    %193 = vector.broadcast %cst_52 : f32 to vector<8x128xf32>
    %194 = arith.addf %193, %192 : vector<8x128xf32>
    %195 = arith.divf %193, %194 : vector<8x128xf32>
    %196 = vector.extract_strided_slice %183 {offsets = [0, 128], sizes = [8, 128], strides = [1, 1]} : vector<8x384xf32> to vector<8x128xf32>
    %197 = vector.extract_strided_slice %187 {offsets = [0, 128], sizes = [8, 128], strides = [1, 1]} : vector<8x384xf32> to vector<8x128xf32>
    %198 = arith.addf %196, %197 : vector<8x128xf32>
    %199 = arith.negf %198 : vector<8x128xf32>
    %200 = math.exp %199 : vector<8x128xf32>
    %cst_53 = arith.constant 1.000000e+00 : f32
    %201 = vector.broadcast %cst_53 : f32 to vector<8x128xf32>
    %202 = arith.addf %201, %200 : vector<8x128xf32>
    %203 = arith.divf %201, %202 : vector<8x128xf32>
    %204 = vector.extract_strided_slice %183 {offsets = [0, 256], sizes = [8, 128], strides = [1, 1]} : vector<8x384xf32> to vector<8x128xf32>
    %205 = vector.extract_strided_slice %187 {offsets = [0, 256], sizes = [8, 128], strides = [1, 1]} : vector<8x384xf32> to vector<8x128xf32>
    %206 = arith.mulf %195, %205 : vector<8x128xf32>
    %207 = arith.addf %204, %206 : vector<8x128xf32>
    %208 = math.tanh %207 : vector<8x128xf32>
    %cst_54 = arith.constant 1.000000e+00 : f32
    %209 = vector.broadcast %cst_54 : f32 to vector<8x128xf32>
    %210 = arith.subf %209, %203 : vector<8x128xf32>
    %211 = arith.mulf %210, %208 : vector<8x128xf32>
    %212 = arith.mulf %203, %180 : vector<8x128xf32>
    %213 = arith.addf %211, %212 : vector<8x128xf32>
    %c6_i32 = arith.constant 6 : i32
    %214 = arith.index_cast %c6_i32 : i32 to index
    %c0_55 = arith.constant 0 : index
    %c0_56 = arith.constant 0 : index
    %215 = vector.load %arg1[%214, %c0_55, %c0_56] : memref<8x8x384xf32, #tpu.memory_space<vmem>>, vector<1x8x384xf32>
    %216 = vector.shape_cast %215 : vector<1x8x384xf32> to vector<8x384xf32>
    %217 = arith.truncf %213 : vector<8x128xf32> to vector<8x128xbf16>
    %c0_57 = arith.constant 0 : index
    %c0_58 = arith.constant 0 : index
    %218 = vector.load %arg2[%c0_57, %c0_58] : memref<128x384xbf16, #tpu.memory_space<vmem>>, vector<128x384xbf16>
    %cst_59 = arith.constant dense<0.000000e+00> : vector<8x384xf32>
    %219 = tpu.matmul %217, %218, %cst_59 {dimension_numbers = #tpu.dot_dimension_numbers<[1], [0], [0], [1], [0, 0, 1, 1], [], []>} : vector<8x128xbf16>, vector<128x384xbf16>, vector<8x384xf32> -> vector<8x384xf32>
    %220 = arith.addf %219, %2 : vector<8x384xf32>
    %221 = vector.extract_strided_slice %216 {offsets = [0, 0], sizes = [8, 128], strides = [1, 1]} : vector<8x384xf32> to vector<8x128xf32>
    %222 = vector.extract_strided_slice %220 {offsets = [0, 0], sizes = [8, 128], strides = [1, 1]} : vector<8x384xf32> to vector<8x128xf32>
    %223 = arith.addf %221, %222 : vector<8x128xf32>
    %224 = arith.negf %223 : vector<8x128xf32>
    %225 = math.exp %224 : vector<8x128xf32>
    %cst_60 = arith.constant 1.000000e+00 : f32
    %226 = vector.broadcast %cst_60 : f32 to vector<8x128xf32>
    %227 = arith.addf %226, %225 : vector<8x128xf32>
    %228 = arith.divf %226, %227 : vector<8x128xf32>
    %229 = vector.extract_strided_slice %216 {offsets = [0, 128], sizes = [8, 128], strides = [1, 1]} : vector<8x384xf32> to vector<8x128xf32>
    %230 = vector.extract_strided_slice %220 {offsets = [0, 128], sizes = [8, 128], strides = [1, 1]} : vector<8x384xf32> to vector<8x128xf32>
    %231 = arith.addf %229, %230 : vector<8x128xf32>
    %232 = arith.negf %231 : vector<8x128xf32>
    %233 = math.exp %232 : vector<8x128xf32>
    %cst_61 = arith.constant 1.000000e+00 : f32
    %234 = vector.broadcast %cst_61 : f32 to vector<8x128xf32>
    %235 = arith.addf %234, %233 : vector<8x128xf32>
    %236 = arith.divf %234, %235 : vector<8x128xf32>
    %237 = vector.extract_strided_slice %216 {offsets = [0, 256], sizes = [8, 128], strides = [1, 1]} : vector<8x384xf32> to vector<8x128xf32>
    %238 = vector.extract_strided_slice %220 {offsets = [0, 256], sizes = [8, 128], strides = [1, 1]} : vector<8x384xf32> to vector<8x128xf32>
    %239 = arith.mulf %228, %238 : vector<8x128xf32>
    %240 = arith.addf %237, %239 : vector<8x128xf32>
    %241 = math.tanh %240 : vector<8x128xf32>
    %cst_62 = arith.constant 1.000000e+00 : f32
    %242 = vector.broadcast %cst_62 : f32 to vector<8x128xf32>
    %243 = arith.subf %242, %236 : vector<8x128xf32>
    %244 = arith.mulf %243, %241 : vector<8x128xf32>
    %245 = arith.mulf %236, %213 : vector<8x128xf32>
    %246 = arith.addf %244, %245 : vector<8x128xf32>
    %c7_i32 = arith.constant 7 : i32
    %247 = arith.index_cast %c7_i32 : i32 to index
    %c0_63 = arith.constant 0 : index
    %c0_64 = arith.constant 0 : index
    %248 = vector.load %arg1[%247, %c0_63, %c0_64] : memref<8x8x384xf32, #tpu.memory_space<vmem>>, vector<1x8x384xf32>
    %249 = vector.shape_cast %248 : vector<1x8x384xf32> to vector<8x384xf32>
    %250 = arith.truncf %246 : vector<8x128xf32> to vector<8x128xbf16>
    %c0_65 = arith.constant 0 : index
    %c0_66 = arith.constant 0 : index
    %251 = vector.load %arg2[%c0_65, %c0_66] : memref<128x384xbf16, #tpu.memory_space<vmem>>, vector<128x384xbf16>
    %cst_67 = arith.constant dense<0.000000e+00> : vector<8x384xf32>
    %252 = tpu.matmul %250, %251, %cst_67 {dimension_numbers = #tpu.dot_dimension_numbers<[1], [0], [0], [1], [0, 0, 1, 1], [], []>} : vector<8x128xbf16>, vector<128x384xbf16>, vector<8x384xf32> -> vector<8x384xf32>
    %253 = arith.addf %252, %2 : vector<8x384xf32>
    %254 = vector.extract_strided_slice %249 {offsets = [0, 0], sizes = [8, 128], strides = [1, 1]} : vector<8x384xf32> to vector<8x128xf32>
    %255 = vector.extract_strided_slice %253 {offsets = [0, 0], sizes = [8, 128], strides = [1, 1]} : vector<8x384xf32> to vector<8x128xf32>
    %256 = arith.addf %254, %255 : vector<8x128xf32>
    %257 = arith.negf %256 : vector<8x128xf32>
    %258 = math.exp %257 : vector<8x128xf32>
    %cst_68 = arith.constant 1.000000e+00 : f32
    %259 = vector.broadcast %cst_68 : f32 to vector<8x128xf32>
    %260 = arith.addf %259, %258 : vector<8x128xf32>
    %261 = arith.divf %259, %260 : vector<8x128xf32>
    %262 = vector.extract_strided_slice %249 {offsets = [0, 128], sizes = [8, 128], strides = [1, 1]} : vector<8x384xf32> to vector<8x128xf32>
    %263 = vector.extract_strided_slice %253 {offsets = [0, 128], sizes = [8, 128], strides = [1, 1]} : vector<8x384xf32> to vector<8x128xf32>
    %264 = arith.addf %262, %263 : vector<8x128xf32>
    %265 = arith.negf %264 : vector<8x128xf32>
    %266 = math.exp %265 : vector<8x128xf32>
    %cst_69 = arith.constant 1.000000e+00 : f32
    %267 = vector.broadcast %cst_69 : f32 to vector<8x128xf32>
    %268 = arith.addf %267, %266 : vector<8x128xf32>
    %269 = arith.divf %267, %268 : vector<8x128xf32>
    %270 = vector.extract_strided_slice %249 {offsets = [0, 256], sizes = [8, 128], strides = [1, 1]} : vector<8x384xf32> to vector<8x128xf32>
    %271 = vector.extract_strided_slice %253 {offsets = [0, 256], sizes = [8, 128], strides = [1, 1]} : vector<8x384xf32> to vector<8x128xf32>
    %272 = arith.mulf %261, %271 : vector<8x128xf32>
    %273 = arith.addf %270, %272 : vector<8x128xf32>
    %274 = math.tanh %273 : vector<8x128xf32>
    %cst_70 = arith.constant 1.000000e+00 : f32
    %275 = vector.broadcast %cst_70 : f32 to vector<8x128xf32>
    %276 = arith.subf %275, %269 : vector<8x128xf32>
    %277 = arith.mulf %276, %274 : vector<8x128xf32>
    %278 = arith.mulf %269, %246 : vector<8x128xf32>
    %279 = arith.addf %277, %278 : vector<8x128xf32>
    %c8_i32 = arith.constant 8 : i32
    %cst_71 = arith.constant 0.000000e+00 : f32
    %280 = vector.broadcast %cst_71 : f32 to vector<8x128xf32>
    %c0_72 = arith.constant 0 : index
    %c0_73 = arith.constant 0 : index
    %c0_74 = arith.constant 0 : index
    %281 = vector.load %arg12[%c0_72, %c0_73, %c0_74] : memref<8x8x128xf32, #tpu.memory_space<vmem>>, vector<1x8x128xf32>
    %282 = vector.shape_cast %281 : vector<1x8x128xf32> to vector<8x128xf32>
    %283 = vector.shape_cast %280 : vector<8x128xf32> to vector<1x8x128xf32>
    tpu.vector_store %arg12[%c0_72, %c0_73, %c0_74], %283 {strides = array<i32>} : memref<8x8x128xf32, #tpu.memory_space<vmem>>, vector<1x8x128xf32>,
    %c0_i32_75 = arith.constant 0 : i32
    %284 = vector.broadcast %c0_i32_75 : i32 to vector<8x1xi32>
    %c0_76 = arith.constant 0 : index
    %c0_77 = arith.constant 0 : index
    %c0_78 = arith.constant 0 : index
    %285 = vector.load %arg13[%c0_76, %c0_77, %c0_78] : memref<8x8x1xi32, #tpu.memory_space<vmem>>, vector<1x8x1xi32>
    %286 = vector.shape_cast %285 : vector<1x8x1xi32> to vector<8x1xi32>
    %287 = vector.shape_cast %284 : vector<8x1xi32> to vector<1x8x1xi32>
    tpu.vector_store %arg13[%c0_76, %c0_77, %c0_78], %287 {strides = array<i32>} : memref<8x8x1xi32, #tpu.memory_space<vmem>>, vector<1x8x1xi32>,
    %c0_79 = arith.constant 0 : index
    %c0_80 = arith.constant 0 : index
    %c0_81 = arith.constant 0 : index
    %288 = vector.load %arg4[%c0_79, %c0_80, %c0_81] : memref<8x8x1xi32, #tpu.memory_space<vmem>>, vector<1x8x1xi32>
    %289 = vector.shape_cast %288 : vector<1x8x1xi32> to vector<8x1xi32>
    %c1_i32_82 = arith.constant 1 : i32
    %290 = vector.broadcast %289 : vector<8x1xi32> to vector<8x128xi32>
    %291 = arith.cmpi eq, %12, %290 : vector<8x128xi32>
    %292 = arith.extui %291 : vector<8x128xi1> to vector<8x128xi32>
    %293 = arith.sitofp %292 : vector<8x128xi32> to vector<8x128xf32>
    %294 = arith.truncf %293 : vector<8x128xf32> to vector<8x128xbf16>
    %c0_83 = arith.constant 0 : index
    %c0_84 = arith.constant 0 : index
    %295 = vector.load %arg6[%c0_83, %c0_84] : memref<128x384xbf16, #tpu.memory_space<vmem>>, vector<128x384xbf16>
    %cst_85 = arith.constant dense<0.000000e+00> : vector<8x384xf32>
    %296 = tpu.matmul %294, %295, %cst_85 {dimension_numbers = #tpu.dot_dimension_numbers<[1], [0], [0], [1], [0, 0, 1, 1], [], []>} : vector<8x128xbf16>, vector<128x384xbf16>, vector<8x384xf32> -> vector<8x384xf32>
    %297 = arith.addf %296, %5 : vector<8x384xf32>
    %298 = arith.truncf %279 : vector<8x128xf32> to vector<8x128xbf16>
    %c0_86 = arith.constant 0 : index
    %c0_87 = arith.constant 0 : index
    %299 = vector.load %arg8[%c0_86, %c0_87] : memref<128x384xbf16, #tpu.memory_space<vmem>>, vector<128x384xbf16>
    %cst_88 = arith.constant dense<0.000000e+00> : vector<8x384xf32>
    %300 = tpu.matmul %298, %299, %cst_88 {dimension_numbers = #tpu.dot_dimension_numbers<[1], [0], [0], [1], [0, 0, 1, 1], [], []>} : vector<8x128xbf16>, vector<128x384xbf16>, vector<8x384xf32> -> vector<8x384xf32>
    %301 = arith.addf %300, %8 : vector<8x384xf32>
    %302 = vector.extract_strided_slice %297 {offsets = [0, 0], sizes = [8, 128], strides = [1, 1]} : vector<8x384xf32> to vector<8x128xf32>
    %303 = vector.extract_strided_slice %301 {offsets = [0, 0], sizes = [8, 128], strides = [1, 1]} : vector<8x384xf32> to vector<8x128xf32>
    %304 = arith.addf %302, %303 : vector<8x128xf32>
    %305 = arith.negf %304 : vector<8x128xf32>
    %306 = math.exp %305 : vector<8x128xf32>
    %cst_89 = arith.constant 1.000000e+00 : f32
    %307 = vector.broadcast %cst_89 : f32 to vector<8x128xf32>
    %308 = arith.addf %307, %306 : vector<8x128xf32>
    %309 = arith.divf %307, %308 : vector<8x128xf32>
    %310 = vector.extract_strided_slice %297 {offsets = [0, 128], sizes = [8, 128], strides = [1, 1]} : vector<8x384xf32> to vector<8x128xf32>
    %311 = vector.extract_strided_slice %301 {offsets = [0, 128], sizes = [8, 128], strides = [1, 1]} : vector<8x384xf32> to vector<8x128xf32>
    %312 = arith.addf %310, %311 : vector<8x128xf32>
    %313 = arith.negf %312 : vector<8x128xf32>
    %314 = math.exp %313 : vector<8x128xf32>
    %cst_90 = arith.constant 1.000000e+00 : f32
    %315 = vector.broadcast %cst_90 : f32 to vector<8x128xf32>
    %316 = arith.addf %315, %314 : vector<8x128xf32>
    %317 = arith.divf %315, %316 : vector<8x128xf32>
    %318 = vector.extract_strided_slice %297 {offsets = [0, 256], sizes = [8, 128], strides = [1, 1]} : vector<8x384xf32> to vector<8x128xf32>
    %319 = vector.extract_strided_slice %301 {offsets = [0, 256], sizes = [8, 128], strides = [1, 1]} : vector<8x384xf32> to vector<8x128xf32>
    %320 = arith.mulf %309, %319 : vector<8x128xf32>
    %321 = arith.addf %318, %320 : vector<8x128xf32>
    %322 = math.tanh %321 : vector<8x128xf32>
    %cst_91 = arith.constant 1.000000e+00 : f32
    %323 = vector.broadcast %cst_91 : f32 to vector<8x128xf32>
    %324 = arith.subf %323, %317 : vector<8x128xf32>
    %325 = arith.mulf %324, %322 : vector<8x128xf32>
    %326 = arith.mulf %317, %279 : vector<8x128xf32>
    %327 = arith.addf %325, %326 : vector<8x128xf32>
    %328 = arith.truncf %327 : vector<8x128xf32> to vector<8x128xbf16>
    %c0_92 = arith.constant 0 : index
    %c0_93 = arith.constant 0 : index
    %329 = vector.load %arg10[%c0_92, %c0_93] : memref<128x128xbf16, #tpu.memory_space<vmem>>, vector<128x128xbf16>
    %cst_94 = arith.constant dense<0.000000e+00> : vector<8x128xf32>
    %330 = tpu.matmul %328, %329, %cst_94 {dimension_numbers = #tpu.dot_dimension_numbers<[1], [0], [0], [1], [0, 0, 1, 1], [], []>} : vector<8x128xbf16>, vector<128x128xbf16>, vector<8x128xf32> -> vector<8x128xf32>
    %331 = arith.addf %330, %11 : vector<8x128xf32>
    %332 = arith.index_cast %c1_i32_82 : i32 to index
    %c0_95 = arith.constant 0 : index
    %c0_96 = arith.constant 0 : index
    %333 = vector.load %arg12[%332, %c0_95, %c0_96] : memref<8x8x128xf32, #tpu.memory_space<vmem>>, vector<1x8x128xf32>
    %334 = vector.shape_cast %333 : vector<1x8x128xf32> to vector<8x128xf32>
    %335 = vector.shape_cast %331 : vector<8x128xf32> to vector<1x8x128xf32>
    tpu.vector_store %arg12[%332, %c0_95, %c0_96], %335 {strides = array<i32>} : memref<8x8x128xf32, #tpu.memory_space<vmem>>, vector<1x8x128xf32>,
    %336 = tpu.bitcast %331 : vector<8x128xf32> -> vector<8x128xi32>
    %c0_i32_97 = arith.constant 0 : i32
    %337 = vector.broadcast %c0_i32_97 : i32 to vector<8x128xi32>
    %338 = arith.cmpi slt, %336, %337 : vector<8x128xi32>
    %c2147483647_i32 = arith.constant 2147483647 : i32
    %339 = vector.broadcast %c2147483647_i32 : i32 to vector<8x128xi32>
    %340 = arith.xori %336, %339 : vector<8x128xi32>
    %341 = arith.select %338, %340, %336 : vector<8x128xi1>, vector<8x128xi32>
    %c-128_i32 = arith.constant -128 : i32
    %342 = vector.broadcast %c-128_i32 : i32 to vector<8x128xi32>
    %343 = arith.andi %341, %342 : vector<8x128xi32>
    %344 = arith.ori %343, %14 : vector<8x128xi32>
    %cst_98 = arith.constant dense<-2147483648> : vector<8xi32>
    %345 = vector.multi_reduction <maxsi>, %344, %cst_98 [1] : vector<8x128xi32> to vector<8xi32>
    %346 = vector.shape_cast %345 : vector<8xi32> to vector<8x1xi32>
    %c127_i32_99 = arith.constant 127 : i32
    %347 = vector.broadcast %c127_i32_99 : i32 to vector<8x1xi32>
    %348 = arith.andi %346, %347 : vector<8x1xi32>
    %c127_i32_100 = arith.constant 127 : i32
    %349 = vector.broadcast %c127_i32_100 : i32 to vector<8x1xi32>
    %350 = arith.subi %349, %348 : vector<8x1xi32>
    %351 = arith.index_cast %c1_i32_82 : i32 to index
    %c0_101 = arith.constant 0 : index
    %c0_102 = arith.constant 0 : index
    %352 = vector.load %arg13[%351, %c0_101, %c0_102] : memref<8x8x1xi32, #tpu.memory_space<vmem>>, vector<1x8x1xi32>
    %353 = vector.shape_cast %352 : vector<1x8x1xi32> to vector<8x1xi32>
    %354 = vector.shape_cast %350 : vector<8x1xi32> to vector<1x8x1xi32>
    tpu.vector_store %arg13[%351, %c0_101, %c0_102], %354 {strides = array<i32>} : memref<8x8x1xi32, #tpu.memory_space<vmem>>, vector<1x8x1xi32>,
    %355 = arith.index_cast %c1_i32_82 : i32 to index
    %c0_103 = arith.constant 0 : index
    %c0_104 = arith.constant 0 : index
    %356 = vector.load %arg5[%355, %c0_103, %c0_104] : memref<8x1x1xi32, #tpu.memory_space<vmem>>, vector<1x1x1xi32>
    %357 = vector.shape_cast %356 : vector<1x1x1xi32> to vector<1x1xi32>
    %c0_i32_105 = arith.constant 0 : i32
    %358 = vector.broadcast %c0_i32_105 : i32 to vector<1x1xi32>
    %359 = arith.cmpi sgt, %357, %358 : vector<1x1xi32>
    %360 = arith.index_cast %c1_i32_82 : i32 to index
    %c0_106 = arith.constant 0 : index
    %c0_107 = arith.constant 0 : index
    %361 = vector.load %arg4[%360, %c0_106, %c0_107] : memref<8x8x1xi32, #tpu.memory_space<vmem>>, vector<1x8x1xi32>
    %362 = vector.shape_cast %361 : vector<1x8x1xi32> to vector<8x1xi32>
    %363 = vector.shape_cast %359 : vector<1x1xi1> to vector<1x1xi1>
    %364 = vector.broadcast %363 : vector<1x1xi1> to vector<8x1xi1>
    %365 = arith.select %364, %362, %350 : vector<8x1xi1>, vector<8x1xi32>
    %c2_i32_108 = arith.constant 2 : i32
    %366 = vector.broadcast %365 : vector<8x1xi32> to vector<8x128xi32>
    %367 = arith.cmpi eq, %12, %366 : vector<8x128xi32>
    %368 = arith.extui %367 : vector<8x128xi1> to vector<8x128xi32>
    %369 = arith.sitofp %368 : vector<8x128xi32> to vector<8x128xf32>
    %370 = arith.truncf %369 : vector<8x128xf32> to vector<8x128xbf16>
    %c0_109 = arith.constant 0 : index
    %c0_110 = arith.constant 0 : index
    %371 = vector.load %arg6[%c0_109, %c0_110] : memref<128x384xbf16, #tpu.memory_space<vmem>>, vector<128x384xbf16>
    %cst_111 = arith.constant dense<0.000000e+00> : vector<8x384xf32>
    %372 = tpu.matmul %370, %371, %cst_111 {dimension_numbers = #tpu.dot_dimension_numbers<[1], [0], [0], [1], [0, 0, 1, 1], [], []>} : vector<8x128xbf16>, vector<128x384xbf16>, vector<8x384xf32> -> vector<8x384xf32>
    %373 = arith.addf %372, %5 : vector<8x384xf32>
    %374 = arith.truncf %327 : vector<8x128xf32> to vector<8x128xbf16>
    %c0_112 = arith.constant 0 : index
    %c0_113 = arith.constant 0 : index
    %375 = vector.load %arg8[%c0_112, %c0_113] : memref<128x384xbf16, #tpu.memory_space<vmem>>, vector<128x384xbf16>
    %cst_114 = arith.constant dense<0.000000e+00> : vector<8x384xf32>
    %376 = tpu.matmul %374, %375, %cst_114 {dimension_numbers = #tpu.dot_dimension_numbers<[1], [0], [0], [1], [0, 0, 1, 1], [], []>} : vector<8x128xbf16>, vector<128x384xbf16>, vector<8x384xf32> -> vector<8x384xf32>
    %377 = arith.addf %376, %8 : vector<8x384xf32>
    %378 = vector.extract_strided_slice %373 {offsets = [0, 0], sizes = [8, 128], strides = [1, 1]} : vector<8x384xf32> to vector<8x128xf32>
    %379 = vector.extract_strided_slice %377 {offsets = [0, 0], sizes = [8, 128], strides = [1, 1]} : vector<8x384xf32> to vector<8x128xf32>
    %380 = arith.addf %378, %379 : vector<8x128xf32>
    %381 = arith.negf %380 : vector<8x128xf32>
    %382 = math.exp %381 : vector<8x128xf32>
    %cst_115 = arith.constant 1.000000e+00 : f32
    %383 = vector.broadcast %cst_115 : f32 to vector<8x128xf32>
    %384 = arith.addf %383, %382 : vector<8x128xf32>
    %385 = arith.divf %383, %384 : vector<8x128xf32>
    %386 = vector.extract_strided_slice %373 {offsets = [0, 128], sizes = [8, 128], strides = [1, 1]} : vector<8x384xf32> to vector<8x128xf32>
    %387 = vector.extract_strided_slice %377 {offsets = [0, 128], sizes = [8, 128], strides = [1, 1]} : vector<8x384xf32> to vector<8x128xf32>
    %388 = arith.addf %386, %387 : vector<8x128xf32>
    %389 = arith.negf %388 : vector<8x128xf32>
    %390 = math.exp %389 : vector<8x128xf32>
    %cst_116 = arith.constant 1.000000e+00 : f32
    %391 = vector.broadcast %cst_116 : f32 to vector<8x128xf32>
    %392 = arith.addf %391, %390 : vector<8x128xf32>
    %393 = arith.divf %391, %392 : vector<8x128xf32>
    %394 = vector.extract_strided_slice %373 {offsets = [0, 256], sizes = [8, 128], strides = [1, 1]} : vector<8x384xf32> to vector<8x128xf32>
    %395 = vector.extract_strided_slice %377 {offsets = [0, 256], sizes = [8, 128], strides = [1, 1]} : vector<8x384xf32> to vector<8x128xf32>
    %396 = arith.mulf %385, %395 : vector<8x128xf32>
    %397 = arith.addf %394, %396 : vector<8x128xf32>
    %398 = math.tanh %397 : vector<8x128xf32>
    %cst_117 = arith.constant 1.000000e+00 : f32
    %399 = vector.broadcast %cst_117 : f32 to vector<8x128xf32>
    %400 = arith.subf %399, %393 : vector<8x128xf32>
    %401 = arith.mulf %400, %398 : vector<8x128xf32>
    %402 = arith.mulf %393, %327 : vector<8x128xf32>
    %403 = arith.addf %401, %402 : vector<8x128xf32>
    %404 = arith.truncf %403 : vector<8x128xf32> to vector<8x128xbf16>
    %c0_118 = arith.constant 0 : index
    %c0_119 = arith.constant 0 : index
    %405 = vector.load %arg10[%c0_118, %c0_119] : memref<128x128xbf16, #tpu.memory_space<vmem>>, vector<128x128xbf16>
    %cst_120 = arith.constant dense<0.000000e+00> : vector<8x128xf32>
    %406 = tpu.matmul %404, %405, %cst_120 {dimension_numbers = #tpu.dot_dimension_numbers<[1], [0], [0], [1], [0, 0, 1, 1], [], []>} : vector<8x128xbf16>, vector<128x128xbf16>, vector<8x128xf32> -> vector<8x128xf32>
    %407 = arith.addf %406, %11 : vector<8x128xf32>
    %408 = arith.index_cast %c2_i32_108 : i32 to index
    %c0_121 = arith.constant 0 : index
    %c0_122 = arith.constant 0 : index
    %409 = vector.load %arg12[%408, %c0_121, %c0_122] : memref<8x8x128xf32, #tpu.memory_space<vmem>>, vector<1x8x128xf32>
    %410 = vector.shape_cast %409 : vector<1x8x128xf32> to vector<8x128xf32>
    %411 = vector.shape_cast %407 : vector<8x128xf32> to vector<1x8x128xf32>
    tpu.vector_store %arg12[%408, %c0_121, %c0_122], %411 {strides = array<i32>} : memref<8x8x128xf32, #tpu.memory_space<vmem>>, vector<1x8x128xf32>,
    %412 = tpu.bitcast %407 : vector<8x128xf32> -> vector<8x128xi32>
    %c0_i32_123 = arith.constant 0 : i32
    %413 = vector.broadcast %c0_i32_123 : i32 to vector<8x128xi32>
    %414 = arith.cmpi slt, %412, %413 : vector<8x128xi32>
    %c2147483647_i32_124 = arith.constant 2147483647 : i32
    %415 = vector.broadcast %c2147483647_i32_124 : i32 to vector<8x128xi32>
    %416 = arith.xori %412, %415 : vector<8x128xi32>
    %417 = arith.select %414, %416, %412 : vector<8x128xi1>, vector<8x128xi32>
    %c-128_i32_125 = arith.constant -128 : i32
    %418 = vector.broadcast %c-128_i32_125 : i32 to vector<8x128xi32>
    %419 = arith.andi %417, %418 : vector<8x128xi32>
    %420 = arith.ori %419, %14 : vector<8x128xi32>
    %cst_126 = arith.constant dense<-2147483648> : vector<8xi32>
    %421 = vector.multi_reduction <maxsi>, %420, %cst_126 [1] : vector<8x128xi32> to vector<8xi32>
    %422 = vector.shape_cast %421 : vector<8xi32> to vector<8x1xi32>
    %c127_i32_127 = arith.constant 127 : i32
    %423 = vector.broadcast %c127_i32_127 : i32 to vector<8x1xi32>
    %424 = arith.andi %422, %423 : vector<8x1xi32>
    %c127_i32_128 = arith.constant 127 : i32
    %425 = vector.broadcast %c127_i32_128 : i32 to vector<8x1xi32>
    %426 = arith.subi %425, %424 : vector<8x1xi32>
    %427 = arith.index_cast %c2_i32_108 : i32 to index
    %c0_129 = arith.constant 0 : index
    %c0_130 = arith.constant 0 : index
    %428 = vector.load %arg13[%427, %c0_129, %c0_130] : memref<8x8x1xi32, #tpu.memory_space<vmem>>, vector<1x8x1xi32>
    %429 = vector.shape_cast %428 : vector<1x8x1xi32> to vector<8x1xi32>
    %430 = vector.shape_cast %426 : vector<8x1xi32> to vector<1x8x1xi32>
    tpu.vector_store %arg13[%427, %c0_129, %c0_130], %430 {strides = array<i32>} : memref<8x8x1xi32, #tpu.memory_space<vmem>>, vector<1x8x1xi32>,
    %431 = arith.index_cast %c2_i32_108 : i32 to index
    %c0_131 = arith.constant 0 : index
    %c0_132 = arith.constant 0 : index
    %432 = vector.load %arg5[%431, %c0_131, %c0_132] : memref<8x1x1xi32, #tpu.memory_space<vmem>>, vector<1x1x1xi32>
    %433 = vector.shape_cast %432 : vector<1x1x1xi32> to vector<1x1xi32>
    %c0_i32_133 = arith.constant 0 : i32
    %434 = vector.broadcast %c0_i32_133 : i32 to vector<1x1xi32>
    %435 = arith.cmpi sgt, %433, %434 : vector<1x1xi32>
    %436 = arith.index_cast %c2_i32_108 : i32 to index
    %c0_134 = arith.constant 0 : index
    %c0_135 = arith.constant 0 : index
    %437 = vector.load %arg4[%436, %c0_134, %c0_135] : memref<8x8x1xi32, #tpu.memory_space<vmem>>, vector<1x8x1xi32>
    %438 = vector.shape_cast %437 : vector<1x8x1xi32> to vector<8x1xi32>
    %439 = vector.shape_cast %435 : vector<1x1xi1> to vector<1x1xi1>
    %440 = vector.broadcast %439 : vector<1x1xi1> to vector<8x1xi1>
    %441 = arith.select %440, %438, %426 : vector<8x1xi1>, vector<8x1xi32>
    %c3_i32_136 = arith.constant 3 : i32
    %442 = vector.broadcast %441 : vector<8x1xi32> to vector<8x128xi32>
    %443 = arith.cmpi eq, %12, %442 : vector<8x128xi32>
    %444 = arith.extui %443 : vector<8x128xi1> to vector<8x128xi32>
    %445 = arith.sitofp %444 : vector<8x128xi32> to vector<8x128xf32>
    %446 = arith.truncf %445 : vector<8x128xf32> to vector<8x128xbf16>
    %c0_137 = arith.constant 0 : index
    %c0_138 = arith.constant 0 : index
    %447 = vector.load %arg6[%c0_137, %c0_138] : memref<128x384xbf16, #tpu.memory_space<vmem>>, vector<128x384xbf16>
    %cst_139 = arith.constant dense<0.000000e+00> : vector<8x384xf32>
    %448 = tpu.matmul %446, %447, %cst_139 {dimension_numbers = #tpu.dot_dimension_numbers<[1], [0], [0], [1], [0, 0, 1, 1], [], []>} : vector<8x128xbf16>, vector<128x384xbf16>, vector<8x384xf32> -> vector<8x384xf32>
    %449 = arith.addf %448, %5 : vector<8x384xf32>
    %450 = arith.truncf %403 : vector<8x128xf32> to vector<8x128xbf16>
    %c0_140 = arith.constant 0 : index
    %c0_141 = arith.constant 0 : index
    %451 = vector.load %arg8[%c0_140, %c0_141] : memref<128x384xbf16, #tpu.memory_space<vmem>>, vector<128x384xbf16>
    %cst_142 = arith.constant dense<0.000000e+00> : vector<8x384xf32>
    %452 = tpu.matmul %450, %451, %cst_142 {dimension_numbers = #tpu.dot_dimension_numbers<[1], [0], [0], [1], [0, 0, 1, 1], [], []>} : vector<8x128xbf16>, vector<128x384xbf16>, vector<8x384xf32> -> vector<8x384xf32>
    %453 = arith.addf %452, %8 : vector<8x384xf32>
    %454 = vector.extract_strided_slice %449 {offsets = [0, 0], sizes = [8, 128], strides = [1, 1]} : vector<8x384xf32> to vector<8x128xf32>
    %455 = vector.extract_strided_slice %453 {offsets = [0, 0], sizes = [8, 128], strides = [1, 1]} : vector<8x384xf32> to vector<8x128xf32>
    %456 = arith.addf %454, %455 : vector<8x128xf32>
    %457 = arith.negf %456 : vector<8x128xf32>
    %458 = math.exp %457 : vector<8x128xf32>
    %cst_143 = arith.constant 1.000000e+00 : f32
    %459 = vector.broadcast %cst_143 : f32 to vector<8x128xf32>
    %460 = arith.addf %459, %458 : vector<8x128xf32>
    %461 = arith.divf %459, %460 : vector<8x128xf32>
    %462 = vector.extract_strided_slice %449 {offsets = [0, 128], sizes = [8, 128], strides = [1, 1]} : vector<8x384xf32> to vector<8x128xf32>
    %463 = vector.extract_strided_slice %453 {offsets = [0, 128], sizes = [8, 128], strides = [1, 1]} : vector<8x384xf32> to vector<8x128xf32>
    %464 = arith.addf %462, %463 : vector<8x128xf32>
    %465 = arith.negf %464 : vector<8x128xf32>
    %466 = math.exp %465 : vector<8x128xf32>
    %cst_144 = arith.constant 1.000000e+00 : f32
    %467 = vector.broadcast %cst_144 : f32 to vector<8x128xf32>
    %468 = arith.addf %467, %466 : vector<8x128xf32>
    %469 = arith.divf %467, %468 : vector<8x128xf32>
    %470 = vector.extract_strided_slice %449 {offsets = [0, 256], sizes = [8, 128], strides = [1, 1]} : vector<8x384xf32> to vector<8x128xf32>
    %471 = vector.extract_strided_slice %453 {offsets = [0, 256], sizes = [8, 128], strides = [1, 1]} : vector<8x384xf32> to vector<8x128xf32>
    %472 = arith.mulf %461, %471 : vector<8x128xf32>
    %473 = arith.addf %470, %472 : vector<8x128xf32>
    %474 = math.tanh %473 : vector<8x128xf32>
    %cst_145 = arith.constant 1.000000e+00 : f32
    %475 = vector.broadcast %cst_145 : f32 to vector<8x128xf32>
    %476 = arith.subf %475, %469 : vector<8x128xf32>
    %477 = arith.mulf %476, %474 : vector<8x128xf32>
    %478 = arith.mulf %469, %403 : vector<8x128xf32>
    %479 = arith.addf %477, %478 : vector<8x128xf32>
    %480 = arith.truncf %479 : vector<8x128xf32> to vector<8x128xbf16>
    %c0_146 = arith.constant 0 : index
    %c0_147 = arith.constant 0 : index
    %481 = vector.load %arg10[%c0_146, %c0_147] : memref<128x128xbf16, #tpu.memory_space<vmem>>, vector<128x128xbf16>
    %cst_148 = arith.constant dense<0.000000e+00> : vector<8x128xf32>
    %482 = tpu.matmul %480, %481, %cst_148 {dimension_numbers = #tpu.dot_dimension_numbers<[1], [0], [0], [1], [0, 0, 1, 1], [], []>} : vector<8x128xbf16>, vector<128x128xbf16>, vector<8x128xf32> -> vector<8x128xf32>
    %483 = arith.addf %482, %11 : vector<8x128xf32>
    %484 = arith.index_cast %c3_i32_136 : i32 to index
    %c0_149 = arith.constant 0 : index
    %c0_150 = arith.constant 0 : index
    %485 = vector.load %arg12[%484, %c0_149, %c0_150] : memref<8x8x128xf32, #tpu.memory_space<vmem>>, vector<1x8x128xf32>
    %486 = vector.shape_cast %485 : vector<1x8x128xf32> to vector<8x128xf32>
    %487 = vector.shape_cast %483 : vector<8x128xf32> to vector<1x8x128xf32>
    tpu.vector_store %arg12[%484, %c0_149, %c0_150], %487 {strides = array<i32>} : memref<8x8x128xf32, #tpu.memory_space<vmem>>, vector<1x8x128xf32>,
    %488 = tpu.bitcast %483 : vector<8x128xf32> -> vector<8x128xi32>
    %c0_i32_151 = arith.constant 0 : i32
    %489 = vector.broadcast %c0_i32_151 : i32 to vector<8x128xi32>
    %490 = arith.cmpi slt, %488, %489 : vector<8x128xi32>
    %c2147483647_i32_152 = arith.constant 2147483647 : i32
    %491 = vector.broadcast %c2147483647_i32_152 : i32 to vector<8x128xi32>
    %492 = arith.xori %488, %491 : vector<8x128xi32>
    %493 = arith.select %490, %492, %488 : vector<8x128xi1>, vector<8x128xi32>
    %c-128_i32_153 = arith.constant -128 : i32
    %494 = vector.broadcast %c-128_i32_153 : i32 to vector<8x128xi32>
    %495 = arith.andi %493, %494 : vector<8x128xi32>
    %496 = arith.ori %495, %14 : vector<8x128xi32>
    %cst_154 = arith.constant dense<-2147483648> : vector<8xi32>
    %497 = vector.multi_reduction <maxsi>, %496, %cst_154 [1] : vector<8x128xi32> to vector<8xi32>
    %498 = vector.shape_cast %497 : vector<8xi32> to vector<8x1xi32>
    %c127_i32_155 = arith.constant 127 : i32
    %499 = vector.broadcast %c127_i32_155 : i32 to vector<8x1xi32>
    %500 = arith.andi %498, %499 : vector<8x1xi32>
    %c127_i32_156 = arith.constant 127 : i32
    %501 = vector.broadcast %c127_i32_156 : i32 to vector<8x1xi32>
    %502 = arith.subi %501, %500 : vector<8x1xi32>
    %503 = arith.index_cast %c3_i32_136 : i32 to index
    %c0_157 = arith.constant 0 : index
    %c0_158 = arith.constant 0 : index
    %504 = vector.load %arg13[%503, %c0_157, %c0_158] : memref<8x8x1xi32, #tpu.memory_space<vmem>>, vector<1x8x1xi32>
    %505 = vector.shape_cast %504 : vector<1x8x1xi32> to vector<8x1xi32>
    %506 = vector.shape_cast %502 : vector<8x1xi32> to vector<1x8x1xi32>
    tpu.vector_store %arg13[%503, %c0_157, %c0_158], %506 {strides = array<i32>} : memref<8x8x1xi32, #tpu.memory_space<vmem>>, vector<1x8x1xi32>,
    %507 = arith.index_cast %c3_i32_136 : i32 to index
    %c0_159 = arith.constant 0 : index
    %c0_160 = arith.constant 0 : index
    %508 = vector.load %arg5[%507, %c0_159, %c0_160] : memref<8x1x1xi32, #tpu.memory_space<vmem>>, vector<1x1x1xi32>
    %509 = vector.shape_cast %508 : vector<1x1x1xi32> to vector<1x1xi32>
    %c0_i32_161 = arith.constant 0 : i32
    %510 = vector.broadcast %c0_i32_161 : i32 to vector<1x1xi32>
    %511 = arith.cmpi sgt, %509, %510 : vector<1x1xi32>
    %512 = arith.index_cast %c3_i32_136 : i32 to index
    %c0_162 = arith.constant 0 : index
    %c0_163 = arith.constant 0 : index
    %513 = vector.load %arg4[%512, %c0_162, %c0_163] : memref<8x8x1xi32, #tpu.memory_space<vmem>>, vector<1x8x1xi32>
    %514 = vector.shape_cast %513 : vector<1x8x1xi32> to vector<8x1xi32>
    %515 = vector.shape_cast %511 : vector<1x1xi1> to vector<1x1xi1>
    %516 = vector.broadcast %515 : vector<1x1xi1> to vector<8x1xi1>
    %517 = arith.select %516, %514, %502 : vector<8x1xi1>, vector<8x1xi32>
    %c4_i32_164 = arith.constant 4 : i32
    %518 = vector.broadcast %517 : vector<8x1xi32> to vector<8x128xi32>
    %519 = arith.cmpi eq, %12, %518 : vector<8x128xi32>
    %520 = arith.extui %519 : vector<8x128xi1> to vector<8x128xi32>
    %521 = arith.sitofp %520 : vector<8x128xi32> to vector<8x128xf32>
    %522 = arith.truncf %521 : vector<8x128xf32> to vector<8x128xbf16>
    %c0_165 = arith.constant 0 : index
    %c0_166 = arith.constant 0 : index
    %523 = vector.load %arg6[%c0_165, %c0_166] : memref<128x384xbf16, #tpu.memory_space<vmem>>, vector<128x384xbf16>
    %cst_167 = arith.constant dense<0.000000e+00> : vector<8x384xf32>
    %524 = tpu.matmul %522, %523, %cst_167 {dimension_numbers = #tpu.dot_dimension_numbers<[1], [0], [0], [1], [0, 0, 1, 1], [], []>} : vector<8x128xbf16>, vector<128x384xbf16>, vector<8x384xf32> -> vector<8x384xf32>
    %525 = arith.addf %524, %5 : vector<8x384xf32>
    %526 = arith.truncf %479 : vector<8x128xf32> to vector<8x128xbf16>
    %c0_168 = arith.constant 0 : index
    %c0_169 = arith.constant 0 : index
    %527 = vector.load %arg8[%c0_168, %c0_169] : memref<128x384xbf16, #tpu.memory_space<vmem>>, vector<128x384xbf16>
    %cst_170 = arith.constant dense<0.000000e+00> : vector<8x384xf32>
    %528 = tpu.matmul %526, %527, %cst_170 {dimension_numbers = #tpu.dot_dimension_numbers<[1], [0], [0], [1], [0, 0, 1, 1], [], []>} : vector<8x128xbf16>, vector<128x384xbf16>, vector<8x384xf32> -> vector<8x384xf32>
    %529 = arith.addf %528, %8 : vector<8x384xf32>
    %530 = vector.extract_strided_slice %525 {offsets = [0, 0], sizes = [8, 128], strides = [1, 1]} : vector<8x384xf32> to vector<8x128xf32>
    %531 = vector.extract_strided_slice %529 {offsets = [0, 0], sizes = [8, 128], strides = [1, 1]} : vector<8x384xf32> to vector<8x128xf32>
    %532 = arith.addf %530, %531 : vector<8x128xf32>
    %533 = arith.negf %532 : vector<8x128xf32>
    %534 = math.exp %533 : vector<8x128xf32>
    %cst_171 = arith.constant 1.000000e+00 : f32
    %535 = vector.broadcast %cst_171 : f32 to vector<8x128xf32>
    %536 = arith.addf %535, %534 : vector<8x128xf32>
    %537 = arith.divf %535, %536 : vector<8x128xf32>
    %538 = vector.extract_strided_slice %525 {offsets = [0, 128], sizes = [8, 128], strides = [1, 1]} : vector<8x384xf32> to vector<8x128xf32>
    %539 = vector.extract_strided_slice %529 {offsets = [0, 128], sizes = [8, 128], strides = [1, 1]} : vector<8x384xf32> to vector<8x128xf32>
    %540 = arith.addf %538, %539 : vector<8x128xf32>
    %541 = arith.negf %540 : vector<8x128xf32>
    %542 = math.exp %541 : vector<8x128xf32>
    %cst_172 = arith.constant 1.000000e+00 : f32
    %543 = vector.broadcast %cst_172 : f32 to vector<8x128xf32>
    %544 = arith.addf %543, %542 : vector<8x128xf32>
    %545 = arith.divf %543, %544 : vector<8x128xf32>
    %546 = vector.extract_strided_slice %525 {offsets = [0, 256], sizes = [8, 128], strides = [1, 1]} : vector<8x384xf32> to vector<8x128xf32>
    %547 = vector.extract_strided_slice %529 {offsets = [0, 256], sizes = [8, 128], strides = [1, 1]} : vector<8x384xf32> to vector<8x128xf32>
    %548 = arith.mulf %537, %547 : vector<8x128xf32>
    %549 = arith.addf %546, %548 : vector<8x128xf32>
    %550 = math.tanh %549 : vector<8x128xf32>
    %cst_173 = arith.constant 1.000000e+00 : f32
    %551 = vector.broadcast %cst_173 : f32 to vector<8x128xf32>
    %552 = arith.subf %551, %545 : vector<8x128xf32>
    %553 = arith.mulf %552, %550 : vector<8x128xf32>
    %554 = arith.mulf %545, %479 : vector<8x128xf32>
    %555 = arith.addf %553, %554 : vector<8x128xf32>
    %556 = arith.truncf %555 : vector<8x128xf32> to vector<8x128xbf16>
    %c0_174 = arith.constant 0 : index
    %c0_175 = arith.constant 0 : index
    %557 = vector.load %arg10[%c0_174, %c0_175] : memref<128x128xbf16, #tpu.memory_space<vmem>>, vector<128x128xbf16>
    %cst_176 = arith.constant dense<0.000000e+00> : vector<8x128xf32>
    %558 = tpu.matmul %556, %557, %cst_176 {dimension_numbers = #tpu.dot_dimension_numbers<[1], [0], [0], [1], [0, 0, 1, 1], [], []>} : vector<8x128xbf16>, vector<128x128xbf16>, vector<8x128xf32> -> vector<8x128xf32>
    %559 = arith.addf %558, %11 : vector<8x128xf32>
    %560 = arith.index_cast %c4_i32_164 : i32 to index
    %c0_177 = arith.constant 0 : index
    %c0_178 = arith.constant 0 : index
    %561 = vector.load %arg12[%560, %c0_177, %c0_178] : memref<8x8x128xf32, #tpu.memory_space<vmem>>, vector<1x8x128xf32>
    %562 = vector.shape_cast %561 : vector<1x8x128xf32> to vector<8x128xf32>
    %563 = vector.shape_cast %559 : vector<8x128xf32> to vector<1x8x128xf32>
    tpu.vector_store %arg12[%560, %c0_177, %c0_178], %563 {strides = array<i32>} : memref<8x8x128xf32, #tpu.memory_space<vmem>>, vector<1x8x128xf32>,
    %564 = tpu.bitcast %559 : vector<8x128xf32> -> vector<8x128xi32>
    %c0_i32_179 = arith.constant 0 : i32
    %565 = vector.broadcast %c0_i32_179 : i32 to vector<8x128xi32>
    %566 = arith.cmpi slt, %564, %565 : vector<8x128xi32>
    %c2147483647_i32_180 = arith.constant 2147483647 : i32
    %567 = vector.broadcast %c2147483647_i32_180 : i32 to vector<8x128xi32>
    %568 = arith.xori %564, %567 : vector<8x128xi32>
    %569 = arith.select %566, %568, %564 : vector<8x128xi1>, vector<8x128xi32>
    %c-128_i32_181 = arith.constant -128 : i32
    %570 = vector.broadcast %c-128_i32_181 : i32 to vector<8x128xi32>
    %571 = arith.andi %569, %570 : vector<8x128xi32>
    %572 = arith.ori %571, %14 : vector<8x128xi32>
    %cst_182 = arith.constant dense<-2147483648> : vector<8xi32>
    %573 = vector.multi_reduction <maxsi>, %572, %cst_182 [1] : vector<8x128xi32> to vector<8xi32>
    %574 = vector.shape_cast %573 : vector<8xi32> to vector<8x1xi32>
    %c127_i32_183 = arith.constant 127 : i32
    %575 = vector.broadcast %c127_i32_183 : i32 to vector<8x1xi32>
    %576 = arith.andi %574, %575 : vector<8x1xi32>
    %c127_i32_184 = arith.constant 127 : i32
    %577 = vector.broadcast %c127_i32_184 : i32 to vector<8x1xi32>
    %578 = arith.subi %577, %576 : vector<8x1xi32>
    %579 = arith.index_cast %c4_i32_164 : i32 to index
    %c0_185 = arith.constant 0 : index
    %c0_186 = arith.constant 0 : index
    %580 = vector.load %arg13[%579, %c0_185, %c0_186] : memref<8x8x1xi32, #tpu.memory_space<vmem>>, vector<1x8x1xi32>
    %581 = vector.shape_cast %580 : vector<1x8x1xi32> to vector<8x1xi32>
    %582 = vector.shape_cast %578 : vector<8x1xi32> to vector<1x8x1xi32>
    tpu.vector_store %arg13[%579, %c0_185, %c0_186], %582 {strides = array<i32>} : memref<8x8x1xi32, #tpu.memory_space<vmem>>, vector<1x8x1xi32>,
    %583 = arith.index_cast %c4_i32_164 : i32 to index
    %c0_187 = arith.constant 0 : index
    %c0_188 = arith.constant 0 : index
    %584 = vector.load %arg5[%583, %c0_187, %c0_188] : memref<8x1x1xi32, #tpu.memory_space<vmem>>, vector<1x1x1xi32>
    %585 = vector.shape_cast %584 : vector<1x1x1xi32> to vector<1x1xi32>
    %c0_i32_189 = arith.constant 0 : i32
    %586 = vector.broadcast %c0_i32_189 : i32 to vector<1x1xi32>
    %587 = arith.cmpi sgt, %585, %586 : vector<1x1xi32>
    %588 = arith.index_cast %c4_i32_164 : i32 to index
    %c0_190 = arith.constant 0 : index
    %c0_191 = arith.constant 0 : index
    %589 = vector.load %arg4[%588, %c0_190, %c0_191] : memref<8x8x1xi32, #tpu.memory_space<vmem>>, vector<1x8x1xi32>
    %590 = vector.shape_cast %589 : vector<1x8x1xi32> to vector<8x1xi32>
    %591 = vector.shape_cast %587 : vector<1x1xi1> to vector<1x1xi1>
    %592 = vector.broadcast %591 : vector<1x1xi1> to vector<8x1xi1>
    %593 = arith.select %592, %590, %578 : vector<8x1xi1>, vector<8x1xi32>
    %c5_i32_192 = arith.constant 5 : i32
    %594 = vector.broadcast %593 : vector<8x1xi32> to vector<8x128xi32>
    %595 = arith.cmpi eq, %12, %594 : vector<8x128xi32>
    %596 = arith.extui %595 : vector<8x128xi1> to vector<8x128xi32>
    %597 = arith.sitofp %596 : vector<8x128xi32> to vector<8x128xf32>
    %598 = arith.truncf %597 : vector<8x128xf32> to vector<8x128xbf16>
    %c0_193 = arith.constant 0 : index
    %c0_194 = arith.constant 0 : index
    %599 = vector.load %arg6[%c0_193, %c0_194] : memref<128x384xbf16, #tpu.memory_space<vmem>>, vector<128x384xbf16>
    %cst_195 = arith.constant dense<0.000000e+00> : vector<8x384xf32>
    %600 = tpu.matmul %598, %599, %cst_195 {dimension_numbers = #tpu.dot_dimension_numbers<[1], [0], [0], [1], [0, 0, 1, 1], [], []>} : vector<8x128xbf16>, vector<128x384xbf16>, vector<8x384xf32> -> vector<8x384xf32>
    %601 = arith.addf %600, %5 : vector<8x384xf32>
    %602 = arith.truncf %555 : vector<8x128xf32> to vector<8x128xbf16>
    %c0_196 = arith.constant 0 : index
    %c0_197 = arith.constant 0 : index
    %603 = vector.load %arg8[%c0_196, %c0_197] : memref<128x384xbf16, #tpu.memory_space<vmem>>, vector<128x384xbf16>
    %cst_198 = arith.constant dense<0.000000e+00> : vector<8x384xf32>
    %604 = tpu.matmul %602, %603, %cst_198 {dimension_numbers = #tpu.dot_dimension_numbers<[1], [0], [0], [1], [0, 0, 1, 1], [], []>} : vector<8x128xbf16>, vector<128x384xbf16>, vector<8x384xf32> -> vector<8x384xf32>
    %605 = arith.addf %604, %8 : vector<8x384xf32>
    %606 = vector.extract_strided_slice %601 {offsets = [0, 0], sizes = [8, 128], strides = [1, 1]} : vector<8x384xf32> to vector<8x128xf32>
    %607 = vector.extract_strided_slice %605 {offsets = [0, 0], sizes = [8, 128], strides = [1, 1]} : vector<8x384xf32> to vector<8x128xf32>
    %608 = arith.addf %606, %607 : vector<8x128xf32>
    %609 = arith.negf %608 : vector<8x128xf32>
    %610 = math.exp %609 : vector<8x128xf32>
    %cst_199 = arith.constant 1.000000e+00 : f32
    %611 = vector.broadcast %cst_199 : f32 to vector<8x128xf32>
    %612 = arith.addf %611, %610 : vector<8x128xf32>
    %613 = arith.divf %611, %612 : vector<8x128xf32>
    %614 = vector.extract_strided_slice %601 {offsets = [0, 128], sizes = [8, 128], strides = [1, 1]} : vector<8x384xf32> to vector<8x128xf32>
    %615 = vector.extract_strided_slice %605 {offsets = [0, 128], sizes = [8, 128], strides = [1, 1]} : vector<8x384xf32> to vector<8x128xf32>
    %616 = arith.addf %614, %615 : vector<8x128xf32>
    %617 = arith.negf %616 : vector<8x128xf32>
    %618 = math.exp %617 : vector<8x128xf32>
    %cst_200 = arith.constant 1.000000e+00 : f32
    %619 = vector.broadcast %cst_200 : f32 to vector<8x128xf32>
    %620 = arith.addf %619, %618 : vector<8x128xf32>
    %621 = arith.divf %619, %620 : vector<8x128xf32>
    %622 = vector.extract_strided_slice %601 {offsets = [0, 256], sizes = [8, 128], strides = [1, 1]} : vector<8x384xf32> to vector<8x128xf32>
    %623 = vector.extract_strided_slice %605 {offsets = [0, 256], sizes = [8, 128], strides = [1, 1]} : vector<8x384xf32> to vector<8x128xf32>
    %624 = arith.mulf %613, %623 : vector<8x128xf32>
    %625 = arith.addf %622, %624 : vector<8x128xf32>
    %626 = math.tanh %625 : vector<8x128xf32>
    %cst_201 = arith.constant 1.000000e+00 : f32
    %627 = vector.broadcast %cst_201 : f32 to vector<8x128xf32>
    %628 = arith.subf %627, %621 : vector<8x128xf32>
    %629 = arith.mulf %628, %626 : vector<8x128xf32>
    %630 = arith.mulf %621, %555 : vector<8x128xf32>
    %631 = arith.addf %629, %630 : vector<8x128xf32>
    %632 = arith.truncf %631 : vector<8x128xf32> to vector<8x128xbf16>
    %c0_202 = arith.constant 0 : index
    %c0_203 = arith.constant 0 : index
    %633 = vector.load %arg10[%c0_202, %c0_203] : memref<128x128xbf16, #tpu.memory_space<vmem>>, vector<128x128xbf16>
    %cst_204 = arith.constant dense<0.000000e+00> : vector<8x128xf32>
    %634 = tpu.matmul %632, %633, %cst_204 {dimension_numbers = #tpu.dot_dimension_numbers<[1], [0], [0], [1], [0, 0, 1, 1], [], []>} : vector<8x128xbf16>, vector<128x128xbf16>, vector<8x128xf32> -> vector<8x128xf32>
    %635 = arith.addf %634, %11 : vector<8x128xf32>
    %636 = arith.index_cast %c5_i32_192 : i32 to index
    %c0_205 = arith.constant 0 : index
    %c0_206 = arith.constant 0 : index
    %637 = vector.load %arg12[%636, %c0_205, %c0_206] : memref<8x8x128xf32, #tpu.memory_space<vmem>>, vector<1x8x128xf32>
    %638 = vector.shape_cast %637 : vector<1x8x128xf32> to vector<8x128xf32>
    %639 = vector.shape_cast %635 : vector<8x128xf32> to vector<1x8x128xf32>
    tpu.vector_store %arg12[%636, %c0_205, %c0_206], %639 {strides = array<i32>} : memref<8x8x128xf32, #tpu.memory_space<vmem>>, vector<1x8x128xf32>,
    %640 = tpu.bitcast %635 : vector<8x128xf32> -> vector<8x128xi32>
    %c0_i32_207 = arith.constant 0 : i32
    %641 = vector.broadcast %c0_i32_207 : i32 to vector<8x128xi32>
    %642 = arith.cmpi slt, %640, %641 : vector<8x128xi32>
    %c2147483647_i32_208 = arith.constant 2147483647 : i32
    %643 = vector.broadcast %c2147483647_i32_208 : i32 to vector<8x128xi32>
    %644 = arith.xori %640, %643 : vector<8x128xi32>
    %645 = arith.select %642, %644, %640 : vector<8x128xi1>, vector<8x128xi32>
    %c-128_i32_209 = arith.constant -128 : i32
    %646 = vector.broadcast %c-128_i32_209 : i32 to vector<8x128xi32>
    %647 = arith.andi %645, %646 : vector<8x128xi32>
    %648 = arith.ori %647, %14 : vector<8x128xi32>
    %cst_210 = arith.constant dense<-2147483648> : vector<8xi32>
    %649 = vector.multi_reduction <maxsi>, %648, %cst_210 [1] : vector<8x128xi32> to vector<8xi32>
    %650 = vector.shape_cast %649 : vector<8xi32> to vector<8x1xi32>
    %c127_i32_211 = arith.constant 127 : i32
    %651 = vector.broadcast %c127_i32_211 : i32 to vector<8x1xi32>
    %652 = arith.andi %650, %651 : vector<8x1xi32>
    %c127_i32_212 = arith.constant 127 : i32
    %653 = vector.broadcast %c127_i32_212 : i32 to vector<8x1xi32>
    %654 = arith.subi %653, %652 : vector<8x1xi32>
    %655 = arith.index_cast %c5_i32_192 : i32 to index
    %c0_213 = arith.constant 0 : index
    %c0_214 = arith.constant 0 : index
    %656 = vector.load %arg13[%655, %c0_213, %c0_214] : memref<8x8x1xi32, #tpu.memory_space<vmem>>, vector<1x8x1xi32>
    %657 = vector.shape_cast %656 : vector<1x8x1xi32> to vector<8x1xi32>
    %658 = vector.shape_cast %654 : vector<8x1xi32> to vector<1x8x1xi32>
    tpu.vector_store %arg13[%655, %c0_213, %c0_214], %658 {strides = array<i32>} : memref<8x8x1xi32, #tpu.memory_space<vmem>>, vector<1x8x1xi32>,
    %659 = arith.index_cast %c5_i32_192 : i32 to index
    %c0_215 = arith.constant 0 : index
    %c0_216 = arith.constant 0 : index
    %660 = vector.load %arg5[%659, %c0_215, %c0_216] : memref<8x1x1xi32, #tpu.memory_space<vmem>>, vector<1x1x1xi32>
    %661 = vector.shape_cast %660 : vector<1x1x1xi32> to vector<1x1xi32>
    %c0_i32_217 = arith.constant 0 : i32
    %662 = vector.broadcast %c0_i32_217 : i32 to vector<1x1xi32>
    %663 = arith.cmpi sgt, %661, %662 : vector<1x1xi32>
    %664 = arith.index_cast %c5_i32_192 : i32 to index
    %c0_218 = arith.constant 0 : index
    %c0_219 = arith.constant 0 : index
    %665 = vector.load %arg4[%664, %c0_218, %c0_219] : memref<8x8x1xi32, #tpu.memory_space<vmem>>, vector<1x8x1xi32>
    %666 = vector.shape_cast %665 : vector<1x8x1xi32> to vector<8x1xi32>
    %667 = vector.shape_cast %663 : vector<1x1xi1> to vector<1x1xi1>
    %668 = vector.broadcast %667 : vector<1x1xi1> to vector<8x1xi1>
    %669 = arith.select %668, %666, %654 : vector<8x1xi1>, vector<8x1xi32>
    %c6_i32_220 = arith.constant 6 : i32
    %670 = vector.broadcast %669 : vector<8x1xi32> to vector<8x128xi32>
    %671 = arith.cmpi eq, %12, %670 : vector<8x128xi32>
    %672 = arith.extui %671 : vector<8x128xi1> to vector<8x128xi32>
    %673 = arith.sitofp %672 : vector<8x128xi32> to vector<8x128xf32>
    %674 = arith.truncf %673 : vector<8x128xf32> to vector<8x128xbf16>
    %c0_221 = arith.constant 0 : index
    %c0_222 = arith.constant 0 : index
    %675 = vector.load %arg6[%c0_221, %c0_222] : memref<128x384xbf16, #tpu.memory_space<vmem>>, vector<128x384xbf16>
    %cst_223 = arith.constant dense<0.000000e+00> : vector<8x384xf32>
    %676 = tpu.matmul %674, %675, %cst_223 {dimension_numbers = #tpu.dot_dimension_numbers<[1], [0], [0], [1], [0, 0, 1, 1], [], []>} : vector<8x128xbf16>, vector<128x384xbf16>, vector<8x384xf32> -> vector<8x384xf32>
    %677 = arith.addf %676, %5 : vector<8x384xf32>
    %678 = arith.truncf %631 : vector<8x128xf32> to vector<8x128xbf16>
    %c0_224 = arith.constant 0 : index
    %c0_225 = arith.constant 0 : index
    %679 = vector.load %arg8[%c0_224, %c0_225] : memref<128x384xbf16, #tpu.memory_space<vmem>>, vector<128x384xbf16>
    %cst_226 = arith.constant dense<0.000000e+00> : vector<8x384xf32>
    %680 = tpu.matmul %678, %679, %cst_226 {dimension_numbers = #tpu.dot_dimension_numbers<[1], [0], [0], [1], [0, 0, 1, 1], [], []>} : vector<8x128xbf16>, vector<128x384xbf16>, vector<8x384xf32> -> vector<8x384xf32>
    %681 = arith.addf %680, %8 : vector<8x384xf32>
    %682 = vector.extract_strided_slice %677 {offsets = [0, 0], sizes = [8, 128], strides = [1, 1]} : vector<8x384xf32> to vector<8x128xf32>
    %683 = vector.extract_strided_slice %681 {offsets = [0, 0], sizes = [8, 128], strides = [1, 1]} : vector<8x384xf32> to vector<8x128xf32>
    %684 = arith.addf %682, %683 : vector<8x128xf32>
    %685 = arith.negf %684 : vector<8x128xf32>
    %686 = math.exp %685 : vector<8x128xf32>
    %cst_227 = arith.constant 1.000000e+00 : f32
    %687 = vector.broadcast %cst_227 : f32 to vector<8x128xf32>
    %688 = arith.addf %687, %686 : vector<8x128xf32>
    %689 = arith.divf %687, %688 : vector<8x128xf32>
    %690 = vector.extract_strided_slice %677 {offsets = [0, 128], sizes = [8, 128], strides = [1, 1]} : vector<8x384xf32> to vector<8x128xf32>
    %691 = vector.extract_strided_slice %681 {offsets = [0, 128], sizes = [8, 128], strides = [1, 1]} : vector<8x384xf32> to vector<8x128xf32>
    %692 = arith.addf %690, %691 : vector<8x128xf32>
    %693 = arith.negf %692 : vector<8x128xf32>
    %694 = math.exp %693 : vector<8x128xf32>
    %cst_228 = arith.constant 1.000000e+00 : f32
    %695 = vector.broadcast %cst_228 : f32 to vector<8x128xf32>
    %696 = arith.addf %695, %694 : vector<8x128xf32>
    %697 = arith.divf %695, %696 : vector<8x128xf32>
    %698 = vector.extract_strided_slice %677 {offsets = [0, 256], sizes = [8, 128], strides = [1, 1]} : vector<8x384xf32> to vector<8x128xf32>
    %699 = vector.extract_strided_slice %681 {offsets = [0, 256], sizes = [8, 128], strides = [1, 1]} : vector<8x384xf32> to vector<8x128xf32>
    %700 = arith.mulf %689, %699 : vector<8x128xf32>
    %701 = arith.addf %698, %700 : vector<8x128xf32>
    %702 = math.tanh %701 : vector<8x128xf32>
    %cst_229 = arith.constant 1.000000e+00 : f32
    %703 = vector.broadcast %cst_229 : f32 to vector<8x128xf32>
    %704 = arith.subf %703, %697 : vector<8x128xf32>
    %705 = arith.mulf %704, %702 : vector<8x128xf32>
    %706 = arith.mulf %697, %631 : vector<8x128xf32>
    %707 = arith.addf %705, %706 : vector<8x128xf32>
    %708 = arith.truncf %707 : vector<8x128xf32> to vector<8x128xbf16>
    %c0_230 = arith.constant 0 : index
    %c0_231 = arith.constant 0 : index
    %709 = vector.load %arg10[%c0_230, %c0_231] : memref<128x128xbf16, #tpu.memory_space<vmem>>, vector<128x128xbf16>
    %cst_232 = arith.constant dense<0.000000e+00> : vector<8x128xf32>
    %710 = tpu.matmul %708, %709, %cst_232 {dimension_numbers = #tpu.dot_dimension_numbers<[1], [0], [0], [1], [0, 0, 1, 1], [], []>} : vector<8x128xbf16>, vector<128x128xbf16>, vector<8x128xf32> -> vector<8x128xf32>
    %711 = arith.addf %710, %11 : vector<8x128xf32>
    %712 = arith.index_cast %c6_i32_220 : i32 to index
    %c0_233 = arith.constant 0 : index
    %c0_234 = arith.constant 0 : index
    %713 = vector.load %arg12[%712, %c0_233, %c0_234] : memref<8x8x128xf32, #tpu.memory_space<vmem>>, vector<1x8x128xf32>
    %714 = vector.shape_cast %713 : vector<1x8x128xf32> to vector<8x128xf32>
    %715 = vector.shape_cast %711 : vector<8x128xf32> to vector<1x8x128xf32>
    tpu.vector_store %arg12[%712, %c0_233, %c0_234], %715 {strides = array<i32>} : memref<8x8x128xf32, #tpu.memory_space<vmem>>, vector<1x8x128xf32>,
    %716 = tpu.bitcast %711 : vector<8x128xf32> -> vector<8x128xi32>
    %c0_i32_235 = arith.constant 0 : i32
    %717 = vector.broadcast %c0_i32_235 : i32 to vector<8x128xi32>
    %718 = arith.cmpi slt, %716, %717 : vector<8x128xi32>
    %c2147483647_i32_236 = arith.constant 2147483647 : i32
    %719 = vector.broadcast %c2147483647_i32_236 : i32 to vector<8x128xi32>
    %720 = arith.xori %716, %719 : vector<8x128xi32>
    %721 = arith.select %718, %720, %716 : vector<8x128xi1>, vector<8x128xi32>
    %c-128_i32_237 = arith.constant -128 : i32
    %722 = vector.broadcast %c-128_i32_237 : i32 to vector<8x128xi32>
    %723 = arith.andi %721, %722 : vector<8x128xi32>
    %724 = arith.ori %723, %14 : vector<8x128xi32>
    %cst_238 = arith.constant dense<-2147483648> : vector<8xi32>
    %725 = vector.multi_reduction <maxsi>, %724, %cst_238 [1] : vector<8x128xi32> to vector<8xi32>
    %726 = vector.shape_cast %725 : vector<8xi32> to vector<8x1xi32>
    %c127_i32_239 = arith.constant 127 : i32
    %727 = vector.broadcast %c127_i32_239 : i32 to vector<8x1xi32>
    %728 = arith.andi %726, %727 : vector<8x1xi32>
    %c127_i32_240 = arith.constant 127 : i32
    %729 = vector.broadcast %c127_i32_240 : i32 to vector<8x1xi32>
    %730 = arith.subi %729, %728 : vector<8x1xi32>
    %731 = arith.index_cast %c6_i32_220 : i32 to index
    %c0_241 = arith.constant 0 : index
    %c0_242 = arith.constant 0 : index
    %732 = vector.load %arg13[%731, %c0_241, %c0_242] : memref<8x8x1xi32, #tpu.memory_space<vmem>>, vector<1x8x1xi32>
    %733 = vector.shape_cast %732 : vector<1x8x1xi32> to vector<8x1xi32>
    %734 = vector.shape_cast %730 : vector<8x1xi32> to vector<1x8x1xi32>
    tpu.vector_store %arg13[%731, %c0_241, %c0_242], %734 {strides = array<i32>} : memref<8x8x1xi32, #tpu.memory_space<vmem>>, vector<1x8x1xi32>,
    %735 = arith.index_cast %c6_i32_220 : i32 to index
    %c0_243 = arith.constant 0 : index
    %c0_244 = arith.constant 0 : index
    %736 = vector.load %arg5[%735, %c0_243, %c0_244] : memref<8x1x1xi32, #tpu.memory_space<vmem>>, vector<1x1x1xi32>
    %737 = vector.shape_cast %736 : vector<1x1x1xi32> to vector<1x1xi32>
    %c0_i32_245 = arith.constant 0 : i32
    %738 = vector.broadcast %c0_i32_245 : i32 to vector<1x1xi32>
    %739 = arith.cmpi sgt, %737, %738 : vector<1x1xi32>
    %740 = arith.index_cast %c6_i32_220 : i32 to index
    %c0_246 = arith.constant 0 : index
    %c0_247 = arith.constant 0 : index
    %741 = vector.load %arg4[%740, %c0_246, %c0_247] : memref<8x8x1xi32, #tpu.memory_space<vmem>>, vector<1x8x1xi32>
    %742 = vector.shape_cast %741 : vector<1x8x1xi32> to vector<8x1xi32>
    %743 = vector.shape_cast %739 : vector<1x1xi1> to vector<1x1xi1>
    %744 = vector.broadcast %743 : vector<1x1xi1> to vector<8x1xi1>
    %745 = arith.select %744, %742, %730 : vector<8x1xi1>, vector<8x1xi32>
    %c7_i32_248 = arith.constant 7 : i32
    %746 = vector.broadcast %745 : vector<8x1xi32> to vector<8x128xi32>
    %747 = arith.cmpi eq, %12, %746 : vector<8x128xi32>
    %748 = arith.extui %747 : vector<8x128xi1> to vector<8x128xi32>
    %749 = arith.sitofp %748 : vector<8x128xi32> to vector<8x128xf32>
    %750 = arith.truncf %749 : vector<8x128xf32> to vector<8x128xbf16>
    %c0_249 = arith.constant 0 : index
    %c0_250 = arith.constant 0 : index
    %751 = vector.load %arg6[%c0_249, %c0_250] : memref<128x384xbf16, #tpu.memory_space<vmem>>, vector<128x384xbf16>
    %cst_251 = arith.constant dense<0.000000e+00> : vector<8x384xf32>
    %752 = tpu.matmul %750, %751, %cst_251 {dimension_numbers = #tpu.dot_dimension_numbers<[1], [0], [0], [1], [0, 0, 1, 1], [], []>} : vector<8x128xbf16>, vector<128x384xbf16>, vector<8x384xf32> -> vector<8x384xf32>
    %753 = arith.addf %752, %5 : vector<8x384xf32>
    %754 = arith.truncf %707 : vector<8x128xf32> to vector<8x128xbf16>
    %c0_252 = arith.constant 0 : index
    %c0_253 = arith.constant 0 : index
    %755 = vector.load %arg8[%c0_252, %c0_253] : memref<128x384xbf16, #tpu.memory_space<vmem>>, vector<128x384xbf16>
    %cst_254 = arith.constant dense<0.000000e+00> : vector<8x384xf32>
    %756 = tpu.matmul %754, %755, %cst_254 {dimension_numbers = #tpu.dot_dimension_numbers<[1], [0], [0], [1], [0, 0, 1, 1], [], []>} : vector<8x128xbf16>, vector<128x384xbf16>, vector<8x384xf32> -> vector<8x384xf32>
    %757 = arith.addf %756, %8 : vector<8x384xf32>
    %758 = vector.extract_strided_slice %753 {offsets = [0, 0], sizes = [8, 128], strides = [1, 1]} : vector<8x384xf32> to vector<8x128xf32>
    %759 = vector.extract_strided_slice %757 {offsets = [0, 0], sizes = [8, 128], strides = [1, 1]} : vector<8x384xf32> to vector<8x128xf32>
    %760 = arith.addf %758, %759 : vector<8x128xf32>
    %761 = arith.negf %760 : vector<8x128xf32>
    %762 = math.exp %761 : vector<8x128xf32>
    %cst_255 = arith.constant 1.000000e+00 : f32
    %763 = vector.broadcast %cst_255 : f32 to vector<8x128xf32>
    %764 = arith.addf %763, %762 : vector<8x128xf32>
    %765 = arith.divf %763, %764 : vector<8x128xf32>
    %766 = vector.extract_strided_slice %753 {offsets = [0, 128], sizes = [8, 128], strides = [1, 1]} : vector<8x384xf32> to vector<8x128xf32>
    %767 = vector.extract_strided_slice %757 {offsets = [0, 128], sizes = [8, 128], strides = [1, 1]} : vector<8x384xf32> to vector<8x128xf32>
    %768 = arith.addf %766, %767 : vector<8x128xf32>
    %769 = arith.negf %768 : vector<8x128xf32>
    %770 = math.exp %769 : vector<8x128xf32>
    %cst_256 = arith.constant 1.000000e+00 : f32
    %771 = vector.broadcast %cst_256 : f32 to vector<8x128xf32>
    %772 = arith.addf %771, %770 : vector<8x128xf32>
    %773 = arith.divf %771, %772 : vector<8x128xf32>
    %774 = vector.extract_strided_slice %753 {offsets = [0, 256], sizes = [8, 128], strides = [1, 1]} : vector<8x384xf32> to vector<8x128xf32>
    %775 = vector.extract_strided_slice %757 {offsets = [0, 256], sizes = [8, 128], strides = [1, 1]} : vector<8x384xf32> to vector<8x128xf32>
    %776 = arith.mulf %765, %775 : vector<8x128xf32>
    %777 = arith.addf %774, %776 : vector<8x128xf32>
    %778 = math.tanh %777 : vector<8x128xf32>
    %cst_257 = arith.constant 1.000000e+00 : f32
    %779 = vector.broadcast %cst_257 : f32 to vector<8x128xf32>
    %780 = arith.subf %779, %773 : vector<8x128xf32>
    %781 = arith.mulf %780, %778 : vector<8x128xf32>
    %782 = arith.mulf %773, %707 : vector<8x128xf32>
    %783 = arith.addf %781, %782 : vector<8x128xf32>
    %784 = arith.truncf %783 : vector<8x128xf32> to vector<8x128xbf16>
    %c0_258 = arith.constant 0 : index
    %c0_259 = arith.constant 0 : index
    %785 = vector.load %arg10[%c0_258, %c0_259] : memref<128x128xbf16, #tpu.memory_space<vmem>>, vector<128x128xbf16>
    %cst_260 = arith.constant dense<0.000000e+00> : vector<8x128xf32>
    %786 = tpu.matmul %784, %785, %cst_260 {dimension_numbers = #tpu.dot_dimension_numbers<[1], [0], [0], [1], [0, 0, 1, 1], [], []>} : vector<8x128xbf16>, vector<128x128xbf16>, vector<8x128xf32> -> vector<8x128xf32>
    %787 = arith.addf %786, %11 : vector<8x128xf32>
    %788 = arith.index_cast %c7_i32_248 : i32 to index
    %c0_261 = arith.constant 0 : index
    %c0_262 = arith.constant 0 : index
    %789 = vector.load %arg12[%788, %c0_261, %c0_262] : memref<8x8x128xf32, #tpu.memory_space<vmem>>, vector<1x8x128xf32>
    %790 = vector.shape_cast %789 : vector<1x8x128xf32> to vector<8x128xf32>
    %791 = vector.shape_cast %787 : vector<8x128xf32> to vector<1x8x128xf32>
    tpu.vector_store %arg12[%788, %c0_261, %c0_262], %791 {strides = array<i32>} : memref<8x8x128xf32, #tpu.memory_space<vmem>>, vector<1x8x128xf32>,
    %792 = tpu.bitcast %787 : vector<8x128xf32> -> vector<8x128xi32>
    %c0_i32_263 = arith.constant 0 : i32
    %793 = vector.broadcast %c0_i32_263 : i32 to vector<8x128xi32>
    %794 = arith.cmpi slt, %792, %793 : vector<8x128xi32>
    %c2147483647_i32_264 = arith.constant 2147483647 : i32
    %795 = vector.broadcast %c2147483647_i32_264 : i32 to vector<8x128xi32>
    %796 = arith.xori %792, %795 : vector<8x128xi32>
    %797 = arith.select %794, %796, %792 : vector<8x128xi1>, vector<8x128xi32>
    %c-128_i32_265 = arith.constant -128 : i32
    %798 = vector.broadcast %c-128_i32_265 : i32 to vector<8x128xi32>
    %799 = arith.andi %797, %798 : vector<8x128xi32>
    %800 = arith.ori %799, %14 : vector<8x128xi32>
    %cst_266 = arith.constant dense<-2147483648> : vector<8xi32>
    %801 = vector.multi_reduction <maxsi>, %800, %cst_266 [1] : vector<8x128xi32> to vector<8xi32>
    %802 = vector.shape_cast %801 : vector<8xi32> to vector<8x1xi32>
    %c127_i32_267 = arith.constant 127 : i32
    %803 = vector.broadcast %c127_i32_267 : i32 to vector<8x1xi32>
    %804 = arith.andi %802, %803 : vector<8x1xi32>
    %c127_i32_268 = arith.constant 127 : i32
    %805 = vector.broadcast %c127_i32_268 : i32 to vector<8x1xi32>
    %806 = arith.subi %805, %804 : vector<8x1xi32>
    %807 = arith.index_cast %c7_i32_248 : i32 to index
    %c0_269 = arith.constant 0 : index
    %c0_270 = arith.constant 0 : index
    %808 = vector.load %arg13[%807, %c0_269, %c0_270] : memref<8x8x1xi32, #tpu.memory_space<vmem>>, vector<1x8x1xi32>
    %809 = vector.shape_cast %808 : vector<1x8x1xi32> to vector<8x1xi32>
    %810 = vector.shape_cast %806 : vector<8x1xi32> to vector<1x8x1xi32>
    tpu.vector_store %arg13[%807, %c0_269, %c0_270], %810 {strides = array<i32>} : memref<8x8x1xi32, #tpu.memory_space<vmem>>, vector<1x8x1xi32>,
    %811 = arith.index_cast %c7_i32_248 : i32 to index
    %c0_271 = arith.constant 0 : index
    %c0_272 = arith.constant 0 : index
    %812 = vector.load %arg5[%811, %c0_271, %c0_272] : memref<8x1x1xi32, #tpu.memory_space<vmem>>, vector<1x1x1xi32>
    %813 = vector.shape_cast %812 : vector<1x1x1xi32> to vector<1x1xi32>
    %c0_i32_273 = arith.constant 0 : i32
    %814 = vector.broadcast %c0_i32_273 : i32 to vector<1x1xi32>
    %815 = arith.cmpi sgt, %813, %814 : vector<1x1xi32>
    %816 = arith.index_cast %c7_i32_248 : i32 to index
    %c0_274 = arith.constant 0 : index
    %c0_275 = arith.constant 0 : index
    %817 = vector.load %arg4[%816, %c0_274, %c0_275] : memref<8x8x1xi32, #tpu.memory_space<vmem>>, vector<1x8x1xi32>
    %818 = vector.shape_cast %817 : vector<1x8x1xi32> to vector<8x1xi32>
    %819 = vector.shape_cast %815 : vector<1x1xi1> to vector<1x1xi1>
    %820 = vector.broadcast %819 : vector<1x1xi1> to vector<8x1xi1>
    %821 = arith.select %820, %818, %806 : vector<8x1xi1>, vector<8x1xi32>
    %c7_i32_276 = arith.constant 7 : i32
    return
  }
  func.func @transform_0(%arg0: i32) -> (i32, i32, i32) {
    %c0_i32 = arith.constant 0 : i32
    %c0_i32_0 = arith.constant 0 : i32
    %c0_i32_1 = arith.constant 0 : i32
    return %c0_i32, %arg0, %c0_i32_0 : i32, i32, i32
  }
  func.func @transform_1(%arg0: i32) -> (i32, i32) {
    %c0_i32 = arith.constant 0 : i32
    %c0_i32_0 = arith.constant 0 : i32
    %c0_i32_1 = arith.constant 0 : i32
    return %c0_i32, %c0_i32_0 : i32, i32
  }
  func.func @transform_2(%arg0: i32) -> (i32, i32) {
    %c0_i32 = arith.constant 0 : i32
    %c0_i32_0 = arith.constant 0 : i32
    %c0_i32_1 = arith.constant 0 : i32
    return %c0_i32, %c0_i32_0 : i32, i32
  }
  func.func @transform_3(%arg0: i32) -> (i32, i32, i32) {
    %c0_i32 = arith.constant 0 : i32
    %c0_i32_0 = arith.constant 0 : i32
    %c0_i32_1 = arith.constant 0 : i32
    return %c0_i32, %arg0, %c0_i32_0 : i32, i32, i32
  }
  func.func @transform_4(%arg0: i32) -> (i32, i32, i32) {
    %c0_i32 = arith.constant 0 : i32
    %c0_i32_0 = arith.constant 0 : i32
    %c0_i32_1 = arith.constant 0 : i32
    %c0_i32_2 = arith.constant 0 : i32
    return %c0_i32, %c0_i32_0, %c0_i32_1 : i32, i32, i32
  }
  func.func @transform_5(%arg0: i32) -> (i32, i32) {
    %c0_i32 = arith.constant 0 : i32
    %c0_i32_0 = arith.constant 0 : i32
    %c0_i32_1 = arith.constant 0 : i32
    return %c0_i32, %c0_i32_0 : i32, i32
  }
  func.func @transform_6(%arg0: i32) -> (i32, i32) {
    %c0_i32 = arith.constant 0 : i32
    %c0_i32_0 = arith.constant 0 : i32
    %c0_i32_1 = arith.constant 0 : i32
    return %c0_i32, %c0_i32_0 : i32, i32
  }
  func.func @transform_7(%arg0: i32) -> (i32, i32) {
    %c0_i32 = arith.constant 0 : i32
    %c0_i32_0 = arith.constant 0 : i32
    %c0_i32_1 = arith.constant 0 : i32
    return %c0_i32, %c0_i32_0 : i32, i32
  }
  func.func @transform_8(%arg0: i32) -> (i32, i32) {
    %c0_i32 = arith.constant 0 : i32
    %c0_i32_0 = arith.constant 0 : i32
    %c0_i32_1 = arith.constant 0 : i32
    return %c0_i32, %c0_i32_0 : i32, i32
  }
  func.func @transform_9(%arg0: i32) -> (i32, i32) {
    %c0_i32 = arith.constant 0 : i32
    %c0_i32_0 = arith.constant 0 : i32
    %c0_i32_1 = arith.constant 0 : i32
    return %c0_i32, %c0_i32_0 : i32, i32
  }
  func.func @transform_10(%arg0: i32) -> (i32, i32) {
    %c0_i32 = arith.constant 0 : i32
    %c0_i32_0 = arith.constant 0 : i32
    %c0_i32_1 = arith.constant 0 : i32
    return %c0_i32, %c0_i32_0 : i32, i32
  }
  func.func @transform_11(%arg0: i32) -> (i32, i32, i32) {
    %c0_i32 = arith.constant 0 : i32
    %c0_i32_0 = arith.constant 0 : i32
    %c0_i32_1 = arith.constant 0 : i32
    return %c0_i32, %arg0, %c0_i32_0 : i32, i32, i32
  }
  func.func @transform_12(%arg0: i32) -> (i32, i32, i32) {
    %c0_i32 = arith.constant 0 : i32
    %c0_i32_0 = arith.constant 0 : i32
    %c0_i32_1 = arith.constant 0 : i32
    return %c0_i32, %arg0, %c0_i32_0 : i32, i32, i32
  }
}

</mosaic_0001>

<bundles_post_ra>
// kernel: _forward_jit.1
= control target key start
LH: loop header
LB: loop body
LE: loop exit
PB: predicated region body
PF: predicated region fallthrough
CT: control target
= control target key end

     0   :  { %v7283_v37 = vmov 0   ;;  %s10491_s1 = inlined_call_operand.vmem [shape: bf16[128,384], index: 1, kind: input, shape index: {}]   ;;  %s10492_s2 = inlined_call_operand.vmem [shape: f32[1,384], index: 2, kind: input, shape index: {}]   ;;  %s10493_s0 = inlined_call_operand.vmem [shape: f32[8,8,384], index: 0, kind: input, shape index: {}]   ;;  %s10494_s3 = inlined_call_operand.vmem [shape: s32[8,8,1], index: 3, kind: input, shape index: {}]   ;;  %s10495_s5 = inlined_call_operand.vmem [shape: bf16[128,384], index: 5, kind: input, shape index: {}]   ;;  %s10496_s7 = inlined_call_operand.vmem [shape: bf16[128,384], index: 7, kind: input, shape index: {}]   ;;  %s10497_s10 = inlined_call_operand.vmem [shape: f32[1,128], index: 10, kind: input, shape index: {}]   ;;  %s10498_s9 = inlined_call_operand.vmem [shape: bf16[128,128], index: 9, kind: input, shape index: {}]   ;;  %s10499_s6 = inlined_call_operand.vmem [shape: f32[1,384], index: 6, kind: input, shape index: {}]   ;;  %s10500_s8 = inlined_call_operand.vmem [shape: f32[1,384], index: 8, kind: input, shape index: {}]   ;;  %s10501_s11 = inlined_call_operand.vmem [shape: f32[8,8,128], index: 11, kind: output, shape index: {0}]   ;;  %s10502_s12 = inlined_call_operand.vmem [shape: s32[8,8,1], index: 12, kind: output, shape index: {1}]   ;;  %s10503_s4 = inlined_call_operand.vmem [shape: s32[8,1,1], index: 4, kind: input, shape index: {}]  }
   0x1   :  { %v5003_v0 = vld [vmem:[%s10491_s1 + $0xa8] sm:$0xf]  ;;  %v6729_v1 = vld [vmem:[%s10491_s1 + $0xb0] sm:$0xf0]  ;;  %v6728_v2 = vld [vmem:[%s10491_s1 + $0xac] sm:$0xf]  ;;  %7126 = vset.pattern.permute.xlu0 %v7283_v37  ;;  %7127 = vset.pattern.permute.xlu1 %v7283_v37 }
   0x2   :  { %v7360_v3 = vor.u32 %v6729_v1, %v5003_v0  ;;  %v5005_v4 = vld [vmem:[%s10491_s1 + $0xb4] sm:$0xf0]  ;;  %v4991_v5 = vld [vmem:[%s10491_s1 + $0x90] sm:$0xf]  ;;  %v6726_v6 = vld [vmem:[%s10491_s1 + $0x98] sm:$0xf0]  ;;  %7128 = vset.pattern.permute.xlu2 %v7283_v37 }
   0x3   :  { %v7371_v7 = vor.u32 %v6728_v2, %v5005_v4  ;;  %v6725_v8 = vld [vmem:[%s10491_s1 + $0x94] sm:$0xf]  ;;  %v4993_v9 = vld [vmem:[%s10491_s1 + $0x9c] sm:$0xf0]  ;;  %v7380_v10 = vor.u32 %v6726_v6, %v4991_v5  ;;  %v4979_v12 = vld [vmem:[%s10491_s1 + $0x78] sm:$0xf] }
   0x4   :  { %235 = vmatpush.bf16.msra.mxu0 %v7360_v3  ;;  %326 = vmatpush.bf16.msra.mxu3 %v7360_v3  ;;  %v7384_v11 = vor.u32 %v6725_v8, %v4993_v9  ;;  %v6723_v13 = vld [vmem:[%s10491_s1 + $0x80] sm:$0xf0]  ;;  %v6722_v14 = vld [vmem:[%s10491_s1 + $0x7c] sm:$0xf]  ;;  %v4981_v15 = vld [vmem:[%s10491_s1 + $0x84] sm:$0xf0] }
   0x5   :  { %248 = vmatpush.bf16.msra.mxu1 %v7371_v7  ;;  %v5011_v16 = vld [vmem:[%s10491_s1 + $0xb0] sm:$0xf]  ;;  %v7402_v17 = vor.u32 %v6723_v13, %v4979_v12  ;;  %v6730_v18 = vld [vmem:[%s10491_s1 + $0xb8] sm:$0xf0]  ;;  %v7409_v19 = vor.u32 %v6722_v14, %v4981_v15  ;;  %v4967_v20 = vld [vmem:[%s10491_s1 + $0x60] sm:$0xf] }
   0x6   :  { %v6720_v21 = vld [vmem:[%s10491_s1 + $0x68] sm:$0xf0]  ;;  %v7417_v22 = vor.u32 %v6730_v18, %v5011_v16  ;;  %v4999_v23 = vld [vmem:[%s10491_s1 + $0x98] sm:$0xf]  ;;  %v6719_v24 = vld [vmem:[%s10491_s1 + $0x64] sm:$0xf] }
   0x7   :  { %v4969_v25 = vld [vmem:[%s10491_s1 + $0x6c] sm:$0xf0]  ;;  %v6727_v26 = vld [vmem:[%s10491_s1 + $0xa0] sm:$0xf0]  ;;  %v7435_v28 = vor.u32 %v6720_v21, %v4967_v20  ;;  %v4987_v29 = vld [vmem:[%s10491_s1 + $0x80] sm:$0xf] }
   0x8   :  { %236 = vmatpush.bf16.msra.mxu0 %v7380_v10  ;;  %327 = vmatpush.bf16.msra.mxu3 %v7380_v10  ;;  %v7432_v27 = vor.u32 %v6727_v26, %v4999_v23  ;;  %v6724_v30 = vld [vmem:[%s10491_s1 + $0x88] sm:$0xf0]  ;;  %v7445_v31 = vor.u32 %v6719_v24, %v4969_v25  ;;  %v4955_v32 = vld [vmem:[%s10491_s1 + $0x48] sm:$0xf]  ;;  %v6717_v33 = vld [vmem:[%s10491_s1 + $0x50] sm:$0xf0] }
   0x9   :  { %249 = vmatpush.bf16.msra.mxu1 %v7384_v11  ;;  %261 = vmatpush.bf16.msra.mxu2 %v7417_v22  ;;  %v6716_v34 = vld [vmem:[%s10491_s1 + $0x4c] sm:$0xf]  ;;  %v4957_v35 = vld [vmem:[%s10491_s1 + $0x54] sm:$0xf0]  ;;  %v7460_v36 = vor.u32 %v6724_v30, %v4987_v29  ;;  %v7464_v38 = vor.u32 %v6717_v33, %v4955_v32  ;;  %v4975_v39 = vld [vmem:[%s10491_s1 + $0x68] sm:$0xf] }
   0xa   :  { %v6721_v40 = vld [vmem:[%s10491_s1 + $0x70] sm:$0xf0]  ;;  %v7474_v41 = vor.u32 %v6716_v34, %v4957_v35  ;;  %v4943_v42 = vld [vmem:[%s10491_s1 + $0x30] sm:$0xf]  ;;  %v6714_v43 = vld [vmem:[%s10491_s1 + $0x38] sm:$0xf0] }
   0xb   :  { %v6713_v44 = vld [vmem:[%s10491_s1 + $0x34] sm:$0xf]  ;;  %v4945_v45 = vld [vmem:[%s10491_s1 + $0x3c] sm:$0xf0]  ;;  %v7491_v46 = vor.u32 %v6721_v40, %v4975_v39  ;;  %v7494_v47 = vor.u32 %v6714_v43, %v4943_v42  ;;  %v4963_v48 = vld [vmem:[%s10491_s1 + $0x50] sm:$0xf] }
   0xc   :  { %237 = vmatpush.bf16.msra.mxu0 %v7402_v17  ;;  %328 = vmatpush.bf16.msra.mxu3 %v7402_v17  ;;  %v6718_v49 = vld [vmem:[%s10491_s1 + $0x58] sm:$0xf0]  ;;  %v7504_v50 = vor.u32 %v6713_v44, %v4945_v45  ;;  %v4931_v51 = vld [vmem:[%s10491_s1 + $0x18] sm:$0xf]  ;;  %v6711_v52 = vld [vmem:[%s10491_s1 + $0x20] sm:$0xf0] }
   0xd   :  { %250 = vmatpush.bf16.msra.mxu1 %v7409_v19  ;;  %262 = vmatpush.bf16.msra.mxu2 %v7432_v27  ;;  %v6710_v53 = vld [vmem:[%s10491_s1 + $0x1c] sm:$0xf]  ;;  %v4933_v54 = vld [vmem:[%s10491_s1 + $0x24] sm:$0xf0]  ;;  %v7519_v55 = vor.u32 %v6718_v49, %v4963_v48  ;;  %v7522_v56 = vor.u32 %v6711_v52, %v4931_v51  ;;  %v4951_v57 = vld [vmem:[%s10491_s1 + $0x38] sm:$0xf] }
   0xe   :  { %v6715_v58 = vld [vmem:[%s10491_s1 + $0x40] sm:$0xf0]  ;;  %v7532_v59 = vor.u32 %v6710_v53, %v4933_v54  ;;  %v4919_v60 = vld [vmem:[%s10491_s1] sm:$0xf]  ;;  %v6708_v61 = vld [vmem:[%s10491_s1 + $0x8] sm:$0xf0] }
   0xf   :  { %v6707_v62 = vld [vmem:[%s10491_s1 + $0x4] sm:$0xf]  ;;  %v4921_v63 = vld [vmem:[%s10491_s1 + $0xc] sm:$0xf0]  ;;  %v7547_v0 = vor.u32 %v6715_v58, %v4951_v57  ;;  %v7550_v1 = vor.u32 %v6708_v61, %v4919_v60  ;;  %v4939_v2 = vld [vmem:[%s10491_s1 + $0x20] sm:$0xf] }
  0x10   :  { %238 = vmatpush.bf16.msra.mxu0 %v7435_v28  ;;  %329 = vmatpush.bf16.msra.mxu3 %v7435_v28  ;;  %v6712_v4 = vld [vmem:[%s10491_s1 + $0x28] sm:$0xf0]  ;;  %v7560_v5 = vor.u32 %v6707_v62, %v4921_v63  ;;  %v4927_v8 = vld [vmem:[%s10491_s1 + $0x8] sm:$0xf]  ;;  %v6709_v9 = vld [vmem:[%s10491_s1 + $0x10] sm:$0xf0] }
  0x11   :  { %251 = vmatpush.bf16.msra.mxu1 %v7445_v31  ;;  %263 = vmatpush.bf16.msra.mxu2 %v7460_v36  ;;  %v7563_v6 = vor.u32 %v6712_v4, %v4939_v2  ;;  %v7579_v12 = vor.u32 %v6709_v9, %v4927_v8  ;;  %v41_v13 = vld [vmem:[%s10492_s2] sm:$0x7]  ;;  %v73_v21 = vld [vmem:[%s10493_s0 + $0x8] sm:$0xff]  ;;  %v74_v4 = vld [vmem:[%s10493_s0 + $0x10] sm:$0xff] }
  0x12   :  { %v7640_v14 = vperm.slane %v41_v13, 0  ;;  %v7642_v15 = vperm.slane %v41_v13, 1  ;;  %v72_v16 = vld [vmem:[%s10493_s0] sm:$0xff]  ;;  %v7652_v51 = vperm.slane %v41_v13, 2 }
  0x14   :  { %239 = vmatpush.bf16.msra.mxu0 %v7464_v38  ;;  %330 = vmatpush.bf16.msra.mxu3 %v7464_v38 }
  0x15   :  { %252 = vmatpush.bf16.msra.mxu1 %v7474_v41  ;;  %264 = vmatpush.bf16.msra.mxu2 %v7491_v46 }
  0x18   :  { %240 = vmatpush.bf16.msra.mxu0 %v7494_v47  ;;  %331 = vmatpush.bf16.msra.mxu3 %v7494_v47 }
  0x19   :  { %253 = vmatpush.bf16.msra.mxu1 %v7504_v50  ;;  %265 = vmatpush.bf16.msra.mxu2 %v7519_v55 }
  0x1c   :  { %241 = vmatpush.bf16.msra.mxu0 %v7522_v56  ;;  %332 = vmatpush.bf16.msra.mxu3 %v7522_v56 }
  0x1d   :  { %254 = vmatpush.bf16.msra.mxu1 %v7532_v59  ;;  %266 = vmatpush.bf16.msra.mxu2 %v7547_v0 }
  0x20   :  { %242 = vmatpush.bf16.msra.mxu0 %v7550_v1  ;;  %333 = vmatpush.bf16.msra.mxu3 %v7550_v1 }
  0x21   :  { %255 = vmatpush.bf16.msra.mxu1 %v7560_v5  ;;  %267 = vmatpush.bf16.msra.mxu2 %v7563_v6 }
  0x23   :  { %243 = vmatmul.bf16.vlgmr.msra.gmra.mxu0 %v7283_v37 }
  0x24   :  { %339 = vmatpush.bf16.msrb.mxu0 %v7371_v7  ;;  %430 = vmatpush.bf16.msrb.mxu3 %v7371_v7 }
  0x25   :  { %352 = vmatpush.bf16.msrb.mxu1 %v7417_v22  ;;  %268 = vmatpush.bf16.msra.mxu2 %v7579_v12 }
  0x26   :  { %256 = vmatmul.bf16.vlgmr.msra.gmra.mxu1 %v7283_v37 }
  0x28   :  { %340 = vmatpush.bf16.msrb.mxu0 %v7384_v11  ;;  %431 = vmatpush.bf16.msrb.mxu3 %v7384_v11 }
  0x29   :  { %353 = vmatpush.bf16.msrb.mxu1 %v7432_v27  ;;  %417 = vmatpush.bf16.msrb.mxu2 %v7360_v3 }
  0x2a   :  { %269 = vmatmul.bf16.vlgmr.msra.gmra.mxu2 %v7283_v37 }
  0x2c   :  { %341 = vmatpush.bf16.msrb.mxu0 %v7409_v19  ;;  %432 = vmatpush.bf16.msrb.mxu3 %v7409_v19 }
  0x2d   :  { %354 = vmatpush.bf16.msrb.mxu1 %v7460_v36  ;;  %418 = vmatpush.bf16.msrb.mxu2 %v7380_v10 }
  0x30   :  { %342 = vmatpush.bf16.msrb.mxu0 %v7445_v31  ;;  %433 = vmatpush.bf16.msrb.mxu3 %v7445_v31 }
  0x31   :  { %355 = vmatpush.bf16.msrb.mxu1 %v7491_v46  ;;  %419 = vmatpush.bf16.msrb.mxu2 %v7402_v17 }
  0x34   :  { %343 = vmatpush.bf16.msrb.mxu0 %v7474_v41  ;;  %434 = vmatpush.bf16.msrb.mxu3 %v7474_v41 }
  0x35   :  { %356 = vmatpush.bf16.msrb.mxu1 %v7519_v55  ;;  %420 = vmatpush.bf16.msrb.mxu2 %v7435_v28 }
  0x38   :  { %344 = vmatpush.bf16.msrb.mxu0 %v7504_v50  ;;  %435 = vmatpush.bf16.msrb.mxu3 %v7504_v50 }
  0x39   :  { %357 = vmatpush.bf16.msrb.mxu1 %v7547_v0  ;;  %421 = vmatpush.bf16.msrb.mxu2 %v7464_v38 }
  0x3c   :  { %345 = vmatpush.bf16.msrb.mxu0 %v7532_v59  ;;  %436 = vmatpush.bf16.msrb.mxu3 %v7532_v59 }
  0x3d   :  { %358 = vmatpush.bf16.msrb.mxu1 %v7563_v6  ;;  %422 = vmatpush.bf16.msrb.mxu2 %v7494_v47 }
  0x40   :  { %346 = vmatpush.bf16.msrb.mxu0 %v7560_v5  ;;  %437 = vmatpush.bf16.msrb.mxu3 %v7560_v5 }
  0x41   :  { %359 = vmatpush.bf16.msrb.mxu1 %v7579_v12  ;;  %423 = vmatpush.bf16.msrb.mxu2 %v7522_v56 }
  0x44   :  { %443 = vmatpush.bf16.msra.mxu0 %v7417_v22 }
  0x45   :  { %508 = vmatpush.bf16.msra.mxu1 %v7360_v3  ;;  %424 = vmatpush.bf16.msrb.mxu2 %v7550_v1 }
  0x48   :  { %444 = vmatpush.bf16.msra.mxu0 %v7432_v27 }
  0x49   :  { %509 = vmatpush.bf16.msra.mxu1 %v7380_v10  ;;  %521 = vmatpush.bf16.msra.mxu2 %v7371_v7 }
  0x4c   :  { %445 = vmatpush.bf16.msra.mxu0 %v7460_v36 }
  0x4d   :  { %510 = vmatpush.bf16.msra.mxu1 %v7402_v17  ;;  %522 = vmatpush.bf16.msra.mxu2 %v7384_v11 }
  0x50   :  { %446 = vmatpush.bf16.msra.mxu0 %v7491_v46 }
  0x51   :  { %511 = vmatpush.bf16.msra.mxu1 %v7435_v28  ;;  %523 = vmatpush.bf16.msra.mxu2 %v7409_v19 }
  0x54   :  { %447 = vmatpush.bf16.msra.mxu0 %v7519_v55 }
  0x55   :  { %512 = vmatpush.bf16.msra.mxu1 %v7464_v38  ;;  %524 = vmatpush.bf16.msra.mxu2 %v7445_v31 }
  0x58   :  { %448 = vmatpush.bf16.msra.mxu0 %v7547_v0 }
  0x59   :  { %513 = vmatpush.bf16.msra.mxu1 %v7494_v47  ;;  %525 = vmatpush.bf16.msra.mxu2 %v7474_v41 }
  0x5c   :  { %449 = vmatpush.bf16.msra.mxu0 %v7563_v6 }
  0x5d   :  { %514 = vmatpush.bf16.msra.mxu1 %v7522_v56  ;;  %526 = vmatpush.bf16.msra.mxu2 %v7504_v50 }
  0x60   :  { %450 = vmatpush.bf16.msra.mxu0 %v7579_v12 }
  0x61   :  { %515 = vmatpush.bf16.msra.mxu1 %v7550_v1  ;;  %527 = vmatpush.bf16.msra.mxu2 %v7532_v59 }
  0x65   :  { %528 = vmatpush.bf16.msra.mxu2 %v7560_v5 }
  0xa0   :  { %v244_v18 = vpop.f32.mrf.mxu0 }
  0xa1   :  { %v245_v20 = vadd.f32 %v244_v18, %v7640_v14 }
  0xa3   :  { %v257_v23 = vpop.f32.mrf.mxu1  ;;  %v274_v25 = vadd.f32 %v245_v20, %v72_v16 }
  0xa4   :  { %v258_v24 = vadd.f32 %v257_v23, %v7642_v15 }
  0xa5   :  { %v5013_v29 = vmul.f32 -1.442695, %v274_v25 }
  0xa6   :  { %v294_v26 = vadd.f32 %v258_v24, %v73_v21 }
  0xa7   :  { %7130 = vpow2.f32 %v5013_v29 }
  0xa8   :  { %v5014_v30 = vmul.f32 -1.442695, %v294_v26  ;;  %v246_v32 = vpop.f32.mrf.mxu0 }
  0xaa   :  { %7132 = vpow2.f32 %v5014_v30 }
  0xab   :  { %v259_v33 = vpop.f32.mrf.mxu1 }
  0xad   :  { %v7131_v34 = vpop.eup %7130  ;;  %v270_v35 = vpop.f32.mrf.mxu2 }
  0xae   :  { %v278_v40 = vadd.f32 1.0, %v7131_v34  ;;  %v271_v61 = vadd.f32 %v270_v35, %v7652_v51  ;;  %v5016_v34 = vld [vmem:[%s10493_s0 + $0x20] sm:$0xff] }
  0xb0   :  { %v7133_v39 = vpop.eup %7132  ;;  %7134 = vrcp.f32 %v278_v40  ;;  %v290_v54 = vand.u32 2147483648, %v278_v40  ;;  %v288_v58 = vand.u32 2147483647, %v278_v40  ;;  %vm284_vm1 = vweird.f32 %v278_v40 }
  0xb1   :  { %v298_v42 = vadd.f32 1.0, %v7133_v39 }
  0xb2   :  { %v291_v63 = vor.u32 1.1754944e-38, %v290_v54  ;;  %vm289_vm3 = vcmp.eq.f32.partialorder %v288_v58, 8.507059e+37 }
  0xb3   :  { %7136 = vrcp.f32 %v298_v42  ;;  %vm304_vm4 = vweird.f32 %v298_v42  ;;  %v310_v16 = vand.u32 2147483648, %v298_v42  ;;  %v308_v18 = vand.u32 2147483647, %v298_v42 }
  0xb5   :  { %v272_v43 = vpop.f32.mrf.mxu2  ;;  %v311_v23 = vor.u32 1.1754944e-38, %v310_v16  ;;  %vm309_vm7 = vcmp.eq.f32.partialorder %v308_v18, 8.507059e+37 }
  0xb6   :  { %v7135_v44 = vpop.eup %7134 }
  0xb7   :  { %v280_v48 = vmul.f32 %v7135_v44, %v278_v40  ;;  %vm285_vm0 = vweird.f32 %v7135_v44 }
  0xb8   :  { %vm286_vm2 = vmor %vm284_vm1, %vm285_vm0 }
  0xb9   :  { %v7137_v45 = vpop.eup %7136  ;;  %v281_v52 = vsub.f32 1.0, %v280_v48 }
  0xba   :  { %v300_v49 = vmul.f32 %v7137_v45, %v298_v42  ;;  %vm305_vm5 = vweird.f32 %v7137_v45 }
  0xbb   :  { %v282_v57 = vmul.f32 %v7135_v44, %v281_v52  ;;  %vm306_vm6 = vmor %vm304_vm4, %vm305_vm5 }
  0xbc   :  { %v301_v53 = vsub.f32 1.0, %v300_v49 }
  0xbd   :  { %v283_v62 = vadd.f32 %v7135_v44, %v282_v57 }
  0xbe   :  { %v302_v60 = vmul.f32 %v7137_v45, %v301_v53 }
  0xbf   :  { %v287_v2 = vsel %vm286_vm2, %v7135_v44, %v283_v62  ;;  %v5015_v44 = vld [vmem:[%s10493_s0 + $0x18] sm:$0xff] }
  0xc0   :  { %v292_v8 = vsel %vm289_vm3, %v291_v63, %v287_v2  ;;  %v303_v9 = vadd.f32 %v7137_v45, %v302_v60 }
  0xc1   :  { %v314_v13 = vmul.f32 %v292_v8, %v271_v61 }
  0xc2   :  { %v307_v21 = vsel %vm306_vm6, %v7137_v45, %v303_v9 }
  0xc3   :  { %v315_v20 = vadd.f32 %v314_v13, %v74_v4  ;;  %v312_v24 = vsel %vm309_vm7, %v311_v23, %v307_v21 }
  0xc4   :  { %v317_v25 = vsub.f32 1.0, %v312_v24  ;;  %v319_v30 = vmul.f32 0.0, %v312_v24 }
  0xc5   :  { %7138 = vtanh.f32 %v315_v20 }
  0xcb   :  { %v7139_v26 = vpop.eup %7138 }
  0xcc   :  { %v318_v29 = vmul.f32 %v7139_v26, %v317_v25 }
  0xce   :  { %v7658_v32 = vadd.f32 %v319_v30, %v318_v29  ;;  %v5017_v29 = vld [vmem:[%s10493_s0 + $0x28] sm:$0xff] }
  0xd0   :  { %v325_v33 = vpack.c.bf16 %v7658_v32, %v7658_v32 }
  0xd2   :  { %334 = vmatmul.bf16.vlgmr.msra.gmra.mxu3 %v325_v33  ;;  %347 = vmatmul.bf16.vlgmr.msrb.gmra.mxu0 %v325_v33 }
  0xd3   :  { %360 = vmatmul.bf16.vlgmr.msrb.gmra.mxu1 %v325_v33  ;;  %534 = vmatpush.bf16.msra.mxu3 %v7417_v22 }
  0xd4   :  { %599 = vmatpush.bf16.msrb.mxu0 %v7360_v3  ;;  %612 = vmatpush.bf16.msrb.mxu1 %v7371_v7 }
  0xd7   :  { %535 = vmatpush.bf16.msra.mxu3 %v7432_v27 }
  0xd8   :  { %600 = vmatpush.bf16.msrb.mxu0 %v7380_v10  ;;  %613 = vmatpush.bf16.msrb.mxu1 %v7384_v11 }
  0xdb   :  { %536 = vmatpush.bf16.msra.mxu3 %v7460_v36 }
  0xdc   :  { %601 = vmatpush.bf16.msrb.mxu0 %v7402_v17  ;;  %614 = vmatpush.bf16.msrb.mxu1 %v7409_v19 }
  0xdf   :  { %537 = vmatpush.bf16.msra.mxu3 %v7491_v46 }
  0xe0   :  { %602 = vmatpush.bf16.msrb.mxu0 %v7435_v28  ;;  %615 = vmatpush.bf16.msrb.mxu1 %v7445_v31 }
  0xe3   :  { %538 = vmatpush.bf16.msra.mxu3 %v7519_v55 }
  0xe4   :  { %603 = vmatpush.bf16.msrb.mxu0 %v7464_v38  ;;  %616 = vmatpush.bf16.msrb.mxu1 %v7474_v41 }
  0xe7   :  { %539 = vmatpush.bf16.msra.mxu3 %v7547_v0 }
  0xe8   :  { %604 = vmatpush.bf16.msrb.mxu0 %v7494_v47  ;;  %617 = vmatpush.bf16.msrb.mxu1 %v7504_v50 }
  0xeb   :  { %540 = vmatpush.bf16.msra.mxu3 %v7563_v6 }
  0xec   :  { %605 = vmatpush.bf16.msrb.mxu0 %v7522_v56  ;;  %618 = vmatpush.bf16.msrb.mxu1 %v7532_v59 }
  0xef   :  { %541 = vmatpush.bf16.msra.mxu3 %v7579_v12 }
  0xf0   :  { %606 = vmatpush.bf16.msrb.mxu0 %v7550_v1  ;;  %619 = vmatpush.bf16.msrb.mxu1 %v7560_v5 }
 0x14f   :  { %v348_v35 = vpop.f32.mrf.mxu0 }
 0x150   :  { %v349_v39 = vadd.f32 %v348_v35, %v7642_v15  ;;  %v361_v40 = vpop.f32.mrf.mxu1 }
 0x151   :  { %v362_v25 = vadd.f32 %v361_v40, %v7652_v51 }
 0x152   :  { %v385_v42 = vadd.f32 %v5016_v34, %v349_v39 }
 0x154   :  { %v5019_v43 = vmul.f32 -1.442695, %v385_v42 }
 0x155   :  { %v335_v45 = vpop.f32.mrf.mxu3 }
 0x156   :  { %7140 = vpow2.f32 %v5019_v43  ;;  %v336_v48 = vadd.f32 %v335_v45, %v7640_v14 }
 0x157   :  { %v350_v49 = vpop.f32.mrf.mxu0 }
 0x158   :  { %v365_v52 = vadd.f32 %v5015_v44, %v336_v48  ;;  %v363_v53 = vpop.f32.mrf.mxu1 }
 0x15a   :  { %v5018_v54 = vmul.f32 -1.442695, %v365_v52 }
 0x15c   :  { %v7141_v57 = vpop.eup %7140  ;;  %7142 = vpow2.f32 %v5018_v54 }
 0x15d   :  { %v389_v58 = vadd.f32 1.0, %v7141_v57  ;;  %v337_v60 = vpop.f32.mrf.mxu3  ;;  %v5020_v57 = vld [vmem:[%s10493_s0 + $0x30] sm:$0xff] }
 0x15e   :  { %v5021_v60 = vld [vmem:[%s10493_s0 + $0x38] sm:$0xff] }
 0x15f   :  { %7144 = vrcp.f32 %v389_v58  ;;  %v401_v34 = vand.u32 2147483648, %v389_v58  ;;  %vm395_vm13 = vweird.f32 %v389_v58  ;;  %v399_v39 = vand.u32 2147483647, %v389_v58 }
 0x161   :  { %v402_v44 = vor.u32 1.1754944e-38, %v401_v34  ;;  %vm400_vm15 = vcmp.eq.f32.partialorder %v399_v39, 8.507059e+37 }
 0x162   :  { %v7143_v61 = vpop.eup %7142 }
 0x163   :  { %v369_v62 = vadd.f32 1.0, %v7143_v61 }
 0x165   :  { %7146 = vrcp.f32 %v369_v62  ;;  %v7145_v63 = vpop.eup %7144  ;;  %v381_v16 = vand.u32 2147483648, %v369_v62  ;;  %v379_v20 = vand.u32 2147483647, %v369_v62  ;;  %vm375_vm9 = vweird.f32 %v369_v62 }
 0x166   :  { %v391_v2 = vmul.f32 %v7145_v63, %v389_v58  ;;  %vm396_vm12 = vweird.f32 %v7145_v63 }
 0x167   :  { %v382_v24 = vor.u32 1.1754944e-38, %v381_v16  ;;  %vm380_vm11 = vcmp.eq.f32.partialorder %v379_v20, 8.507059e+37  ;;  %vm397_vm14 = vmor %vm395_vm13, %vm396_vm12 }
 0x168   :  { %v392_v9 = vsub.f32 1.0, %v391_v2 }
 0x16a   :  { %v393_v21 = vmul.f32 %v7145_v63, %v392_v9 }
 0x16b   :  { %v7147_v4 = vpop.eup %7146 }
 0x16c   :  { %v371_v8 = vmul.f32 %v7147_v4, %v369_v62  ;;  %vm376_vm8 = vweird.f32 %v7147_v4  ;;  %v394_v33 = vadd.f32 %v7145_v63, %v393_v21 }
 0x16d   :  { %vm377_vm10 = vmor %vm375_vm9, %vm376_vm8 }
 0x16e   :  { %v372_v13 = vsub.f32 1.0, %v371_v8  ;;  %v398_v43 = vsel %vm397_vm14, %v7145_v63, %v394_v33 }
 0x16f   :  { %v403_v40 = vsel %vm400_vm15, %v402_v44, %v398_v43 }
 0x170   :  { %v373_v18 = vmul.f32 %v7147_v4, %v372_v13  ;;  %v408_v45 = vsub.f32 1.0, %v403_v40  ;;  %v410_v52 = vmul.f32 %v403_v40, %v7658_v32 }
 0x172   :  { %v374_v23 = vadd.f32 %v7147_v4, %v373_v18 }
 0x174   :  { %v378_v26 = vsel %vm377_vm10, %v7147_v4, %v374_v23 }
 0x175   :  { %v383_v30 = vsel %vm380_vm11, %v382_v24, %v378_v26 }
 0x176   :  { %v405_v35 = vmul.f32 %v383_v30, %v362_v25 }
 0x178   :  { %v406_v42 = vadd.f32 %v5017_v29, %v405_v35 }
 0x17a   :  { %7148 = vtanh.f32 %v406_v42 }
 0x180   :  { %v7149_v48 = vpop.eup %7148 }
 0x181   :  { %v409_v49 = vmul.f32 %v7149_v48, %v408_v45 }
 0x183   :  { %v7699_v53 = vadd.f32 %v410_v52, %v409_v49  ;;  %v5022_v52 = vld [vmem:[%s10493_s0 + $0x40] sm:$0xff] }
 0x185   :  { %v416_v54 = vpack.c.bf16 %v7699_v53, %v7699_v53 }
 0x187   :  { %425 = vmatmul.bf16.vlgmr.msrb.gmra.mxu2 %v416_v54  ;;  %438 = vmatmul.bf16.vlgmr.msrb.gmra.mxu3 %v416_v54 }
 0x188   :  { %451 = vmatmul.bf16.vlgmr.msra.gmra.mxu0 %v416_v54  ;;  %625 = vmatpush.bf16.msrb.mxu2 %v7417_v22 }
 0x189   :  { %690 = vmatpush.bf16.msrb.mxu3 %v7360_v3  ;;  %703 = vmatpush.bf16.msra.mxu0 %v7371_v7 }
 0x18c   :  { %626 = vmatpush.bf16.msrb.mxu2 %v7432_v27 }
 0x18d   :  { %691 = vmatpush.bf16.msrb.mxu3 %v7380_v10  ;;  %704 = vmatpush.bf16.msra.mxu0 %v7384_v11 }
 0x190   :  { %627 = vmatpush.bf16.msrb.mxu2 %v7460_v36 }
 0x191   :  { %692 = vmatpush.bf16.msrb.mxu3 %v7402_v17  ;;  %705 = vmatpush.bf16.msra.mxu0 %v7409_v19 }
 0x194   :  { %628 = vmatpush.bf16.msrb.mxu2 %v7491_v46 }
 0x195   :  { %693 = vmatpush.bf16.msrb.mxu3 %v7435_v28  ;;  %706 = vmatpush.bf16.msra.mxu0 %v7445_v31 }
 0x198   :  { %629 = vmatpush.bf16.msrb.mxu2 %v7519_v55 }
 0x199   :  { %694 = vmatpush.bf16.msrb.mxu3 %v7464_v38  ;;  %707 = vmatpush.bf16.msra.mxu0 %v7474_v41 }
 0x19c   :  { %630 = vmatpush.bf16.msrb.mxu2 %v7547_v0 }
 0x19d   :  { %695 = vmatpush.bf16.msrb.mxu3 %v7494_v47  ;;  %708 = vmatpush.bf16.msra.mxu0 %v7504_v50 }
 0x1a0   :  { %631 = vmatpush.bf16.msrb.mxu2 %v7563_v6 }
 0x1a1   :  { %696 = vmatpush.bf16.msrb.mxu3 %v7522_v56  ;;  %709 = vmatpush.bf16.msra.mxu0 %v7532_v59 }
 0x1a4   :  { %632 = vmatpush.bf16.msrb.mxu2 %v7579_v12 }
 0x1a5   :  { %697 = vmatpush.bf16.msrb.mxu3 %v7550_v1  ;;  %710 = vmatpush.bf16.msra.mxu0 %v7560_v5 }
 0x205   :  { %v452_v32 = vpop.f32.mrf.mxu0 }
 0x206   :  { %v453_v45 = vadd.f32 %v452_v32, %v7652_v51 }
 0x20a   :  { %v426_v58 = vpop.f32.mrf.mxu2  ;;  %v439_v61 = vpop.f32.mrf.mxu3 }
 0x20b   :  { %v427_v62 = vadd.f32 %v426_v58, %v7640_v14  ;;  %v440_v63 = vadd.f32 %v439_v61, %v7642_v15 }
 0x20d   :  { %v456_v2 = vadd.f32 %v5020_v57, %v427_v62  ;;  %v476_v4 = vadd.f32 %v5021_v60, %v440_v63  ;;  %v454_v8 = vpop.f32.mrf.mxu0 }
 0x20f   :  { %v5023_v9 = vmul.f32 -1.442695, %v456_v2  ;;  %v5024_v13 = vmul.f32 -1.442695, %v476_v4 }
 0x211   :  { %7150 = vpow2.f32 %v5023_v9 }
 0x212   :  { %7152 = vpow2.f32 %v5024_v13  ;;  %v428_v16 = vpop.f32.mrf.mxu2  ;;  %v441_v18 = vpop.f32.mrf.mxu3 }
 0x217   :  { %v7151_v20 = vpop.eup %7150 }
 0x218   :  { %v7153_v21 = vpop.eup %7152  ;;  %v460_v23 = vadd.f32 1.0, %v7151_v20 }
 0x219   :  { %v480_v24 = vadd.f32 1.0, %v7153_v21 }
 0x21a   :  { %7154 = vrcp.f32 %v460_v23  ;;  %v472_v34 = vand.u32 2147483648, %v460_v23  ;;  %v470_v42 = vand.u32 2147483647, %v460_v23  ;;  %vm466_vm1 = vweird.f32 %v460_v23 }
 0x21b   :  { %7156 = vrcp.f32 %v480_v24  ;;  %v492_v57 = vand.u32 2147483648, %v480_v24  ;;  %vm486_vm5 = vweird.f32 %v480_v24  ;;  %v490_v60 = vand.u32 2147483647, %v480_v24 }
 0x21c   :  { %v473_v40 = vor.u32 1.1754944e-38, %v472_v34  ;;  %vm471_vm3 = vcmp.eq.f32.partialorder %v470_v42, 8.507059e+37 }
 0x21d   :  { %v493_v63 = vor.u32 1.1754944e-38, %v492_v57  ;;  %vm491_vm7 = vcmp.eq.f32.partialorder %v490_v60, 8.507059e+37 }
 0x220   :  { %v7155_v25 = vpop.eup %7154 }
 0x221   :  { %v7157_v26 = vpop.eup %7156  ;;  %v462_v29 = vmul.f32 %v7155_v25, %v460_v23  ;;  %vm467_vm0 = vweird.f32 %v7155_v25 }
 0x222   :  { %v482_v30 = vmul.f32 %v7157_v26, %v480_v24  ;;  %vm468_vm2 = vmor %vm466_vm1, %vm467_vm0  ;;  %vm487_vm4 = vweird.f32 %v7157_v26  ;;  %v5026_v24 = vld [vmem:[%s10493_s0 + $0x50] sm:$0xff] }
 0x223   :  { %v463_v33 = vsub.f32 1.0, %v462_v29  ;;  %vm488_vm6 = vmor %vm486_vm5, %vm487_vm4 }
 0x224   :  { %v483_v35 = vsub.f32 1.0, %v482_v30 }
 0x225   :  { %v464_v39 = vmul.f32 %v7155_v25, %v463_v33 }
 0x226   :  { %v484_v43 = vmul.f32 %v7157_v26, %v483_v35 }
 0x227   :  { %v465_v44 = vadd.f32 %v7155_v25, %v464_v39 }
 0x228   :  { %v485_v54 = vadd.f32 %v7157_v26, %v484_v43 }
 0x229   :  { %v469_v48 = vsel %vm468_vm2, %v7155_v25, %v465_v44 }
 0x22a   :  { %v474_v49 = vsel %vm471_vm3, %v473_v40, %v469_v48  ;;  %v489_v62 = vsel %vm488_vm6, %v7157_v26, %v485_v54 }
 0x22b   :  { %v496_v58 = vmul.f32 %v474_v49, %v453_v45  ;;  %v494_v32 = vsel %vm491_vm7, %v493_v63, %v489_v62 }
 0x22c   :  { %v499_v2 = vsub.f32 1.0, %v494_v32  ;;  %v501_v9 = vmul.f32 %v494_v32, %v7699_v53  ;;  %v5025_v53 = vld [vmem:[%s10493_s0 + $0x48] sm:$0xff] }
 0x22d   :  { %v497_v61 = vadd.f32 %v5022_v52, %v496_v58 }
 0x22f   :  { %7158 = vtanh.f32 %v497_v61 }
 0x235   :  { %v7159_v4 = vpop.eup %7158 }
 0x236   :  { %v500_v8 = vmul.f32 %v7159_v4, %v499_v2  ;;  %v5027_v4 = vld [vmem:[%s10493_s0 + $0x58] sm:$0xff] }
 0x238   :  { %v7740_v13 = vadd.f32 %v501_v9, %v500_v8 }
 0x23a   :  { %v507_v16 = vpack.c.bf16 %v7740_v13, %v7740_v13 }
 0x23c   :  { %516 = vmatmul.bf16.vlgmr.msra.gmra.mxu1 %v507_v16  ;;  %529 = vmatmul.bf16.vlgmr.msra.gmra.mxu2 %v507_v16 }
 0x23d   :  { %542 = vmatmul.bf16.vlgmr.msra.gmra.mxu3 %v507_v16  ;;  %716 = vmatpush.bf16.msra.mxu1 %v7417_v22 }
 0x23e   :  { %781 = vmatpush.bf16.msra.mxu2 %v7360_v3  ;;  %794 = vmatpush.bf16.msra.mxu3 %v7371_v7 }
 0x241   :  { %717 = vmatpush.bf16.msra.mxu1 %v7432_v27 }
 0x242   :  { %782 = vmatpush.bf16.msra.mxu2 %v7380_v10  ;;  %795 = vmatpush.bf16.msra.mxu3 %v7384_v11 }
 0x245   :  { %718 = vmatpush.bf16.msra.mxu1 %v7460_v36 }
 0x246   :  { %783 = vmatpush.bf16.msra.mxu2 %v7402_v17  ;;  %796 = vmatpush.bf16.msra.mxu3 %v7409_v19 }
 0x249   :  { %719 = vmatpush.bf16.msra.mxu1 %v7491_v46 }
 0x24a   :  { %784 = vmatpush.bf16.msra.mxu2 %v7435_v28  ;;  %797 = vmatpush.bf16.msra.mxu3 %v7445_v31 }
 0x24d   :  { %720 = vmatpush.bf16.msra.mxu1 %v7519_v55 }
 0x24e   :  { %785 = vmatpush.bf16.msra.mxu2 %v7464_v38  ;;  %798 = vmatpush.bf16.msra.mxu3 %v7474_v41 }
 0x251   :  { %721 = vmatpush.bf16.msra.mxu1 %v7547_v0 }
 0x252   :  { %786 = vmatpush.bf16.msra.mxu2 %v7494_v47  ;;  %799 = vmatpush.bf16.msra.mxu3 %v7504_v50 }
 0x255   :  { %722 = vmatpush.bf16.msra.mxu1 %v7563_v6 }
 0x256   :  { %787 = vmatpush.bf16.msra.mxu2 %v7522_v56  ;;  %800 = vmatpush.bf16.msra.mxu3 %v7532_v59 }
 0x259   :  { %723 = vmatpush.bf16.msra.mxu1 %v7579_v12 }
 0x25a   :  { %788 = vmatpush.bf16.msra.mxu2 %v7550_v1  ;;  %801 = vmatpush.bf16.msra.mxu3 %v7560_v5 }
 0x2b9   :  { %v517_v18 = vpop.f32.mrf.mxu1 }
 0x2ba   :  { %v518_v20 = vadd.f32 %v517_v18, %v7640_v14 }
 0x2bc   :  { %v547_v21 = vadd.f32 %v5025_v53, %v518_v20 }
 0x2be   :  { %v5028_v23 = vmul.f32 -1.442695, %v547_v21 }
 0x2bf   :  { %v530_v25 = vpop.f32.mrf.mxu2 }
 0x2c0   :  { %7160 = vpow2.f32 %v5028_v23  ;;  %v531_v26 = vadd.f32 %v530_v25, %v7642_v15  ;;  %v543_v29 = vpop.f32.mrf.mxu3 }
 0x2c1   :  { %v519_v30 = vpop.f32.mrf.mxu1  ;;  %v544_v32 = vadd.f32 %v543_v29, %v7652_v51 }
 0x2c2   :  { %v567_v33 = vadd.f32 %v5026_v24, %v531_v26 }
 0x2c4   :  { %v5029_v34 = vmul.f32 -1.442695, %v567_v33 }
 0x2c6   :  { %v7161_v35 = vpop.eup %7160  ;;  %7162 = vpow2.f32 %v5029_v34 }
 0x2c7   :  { %v551_v39 = vadd.f32 1.0, %v7161_v35  ;;  %v532_v42 = vpop.f32.mrf.mxu2 }
 0x2c8   :  { %v545_v43 = vpop.f32.mrf.mxu3 }
 0x2c9   :  { %7164 = vrcp.f32 %v551_v39  ;;  %v563_v52 = vand.u32 2147483648, %v551_v39  ;;  %v561_v57 = vand.u32 2147483647, %v551_v39  ;;  %vm557_vm9 = vweird.f32 %v551_v39 }
 0x2cb   :  { %v564_v62 = vor.u32 1.1754944e-38, %v563_v52  ;;  %vm562_vm11 = vcmp.eq.f32.partialorder %v561_v57, 8.507059e+37 }
 0x2cc   :  { %v7163_v44 = vpop.eup %7162 }
 0x2cd   :  { %v571_v40 = vadd.f32 1.0, %v7163_v44 }
 0x2cf   :  { %v7165_v45 = vpop.eup %7164  ;;  %7166 = vrcp.f32 %v571_v40  ;;  %v583_v53 = vand.u32 2147483648, %v571_v40  ;;  %v581_v18 = vand.u32 2147483647, %v571_v40  ;;  %vm577_vm13 = vweird.f32 %v571_v40 }
 0x2d0   :  { %v553_v48 = vmul.f32 %v7165_v45, %v551_v39  ;;  %vm558_vm8 = vweird.f32 %v7165_v45 }
 0x2d1   :  { %vm559_vm10 = vmor %vm557_vm9, %vm558_vm8  ;;  %v584_v24 = vor.u32 1.1754944e-38, %v583_v53  ;;  %vm582_vm15 = vcmp.eq.f32.partialorder %v581_v18, 8.507059e+37 }
 0x2d2   :  { %v554_v49 = vsub.f32 1.0, %v553_v48 }
 0x2d4   :  { %v555_v54 = vmul.f32 %v7165_v45, %v554_v49 }
 0x2d5   :  { %v7167_v58 = vpop.eup %7166 }
 0x2d6   :  { %v573_v60 = vmul.f32 %v7167_v58, %v571_v40  ;;  %v556_v61 = vadd.f32 %v7165_v45, %v555_v54  ;;  %vm578_vm12 = vweird.f32 %v7167_v58 }
 0x2d7   :  { %vm579_vm14 = vmor %vm577_vm13, %vm578_vm12 }
 0x2d8   :  { %v574_v63 = vsub.f32 1.0, %v573_v60  ;;  %v560_v2 = vsel %vm559_vm10, %v7165_v45, %v556_v61 }
 0x2d9   :  { %v565_v8 = vsel %vm562_vm11, %v564_v62, %v560_v2 }
 0x2da   :  { %v575_v9 = vmul.f32 %v7167_v58, %v574_v63  ;;  %v587_v16 = vmul.f32 %v565_v8, %v544_v32  ;;  %v5032_v63 = vld [vmem:[%s10493_s0 + $0x70] sm:$0xff] }
 0x2dc   :  { %v588_v20 = vadd.f32 %v5027_v4, %v587_v16  ;;  %v576_v21 = vadd.f32 %v7167_v58, %v575_v9 }
 0x2de   :  { %7168 = vtanh.f32 %v588_v20  ;;  %v580_v23 = vsel %vm579_vm14, %v7167_v58, %v576_v21 }
 0x2df   :  { %v585_v25 = vsel %vm582_vm15, %v584_v24, %v580_v23 }
 0x2e0   :  { %v590_v26 = vsub.f32 1.0, %v585_v25  ;;  %v592_v33 = vmul.f32 %v585_v25, %v7740_v13 }
 0x2e4   :  { %v7169_v29 = vpop.eup %7168 }
 0x2e5   :  { %v591_v30 = vmul.f32 %v7169_v29, %v590_v26 }
 0x2e7   :  { %v7781_v34 = vadd.f32 %v592_v33, %v591_v30  ;;  %v5036_v30 = vld [vmem:[%s10493_s0 + $0x80] sm:$0xff] }
 0x2e9   :  { %v598_v35 = vpack.c.bf16 %v7781_v34, %v7781_v34 }
 0x2eb   :  { %607 = vmatmul.bf16.vlgmr.msrb.gmra.mxu0 %v598_v35  ;;  %620 = vmatmul.bf16.vlgmr.msrb.gmra.mxu1 %v598_v35 }
 0x2ec   :  { %633 = vmatmul.bf16.vlgmr.msrb.gmra.mxu2 %v598_v35  ;;  %807 = vmatpush.bf16.msrb.mxu0 %v7417_v22 }
 0x2ed   :  { %872 = vmatpush.bf16.msrb.mxu1 %v7360_v3  ;;  %885 = vmatpush.bf16.msrb.mxu2 %v7371_v7  ;;  %v5030_v3 = vld [vmem:[%s10493_s0 + $0x60] sm:$0xff] }
 0x2f0   :  { %808 = vmatpush.bf16.msrb.mxu0 %v7432_v27 }
 0x2f1   :  { %873 = vmatpush.bf16.msrb.mxu1 %v7380_v10  ;;  %886 = vmatpush.bf16.msrb.mxu2 %v7384_v11  ;;  %v5031_v10 = vld [vmem:[%s10493_s0 + $0x68] sm:$0xff] }
 0x2f4   :  { %809 = vmatpush.bf16.msrb.mxu0 %v7460_v36 }
 0x2f5   :  { %874 = vmatpush.bf16.msrb.mxu1 %v7402_v17  ;;  %887 = vmatpush.bf16.msrb.mxu2 %v7409_v19 }
 0x2f8   :  { %810 = vmatpush.bf16.msrb.mxu0 %v7491_v46 }
 0x2f9   :  { %875 = vmatpush.bf16.msrb.mxu1 %v7435_v28  ;;  %888 = vmatpush.bf16.msrb.mxu2 %v7445_v31 }
 0x2fc   :  { %811 = vmatpush.bf16.msrb.mxu0 %v7519_v55 }
 0x2fd   :  { %876 = vmatpush.bf16.msrb.mxu1 %v7464_v38  ;;  %889 = vmatpush.bf16.msrb.mxu2 %v7474_v41 }
 0x300   :  { %812 = vmatpush.bf16.msrb.mxu0 %v7547_v0 }
 0x301   :  { %877 = vmatpush.bf16.msrb.mxu1 %v7494_v47  ;;  %890 = vmatpush.bf16.msrb.mxu2 %v7504_v50 }
 0x304   :  { %813 = vmatpush.bf16.msrb.mxu0 %v7563_v6 }
 0x305   :  { %878 = vmatpush.bf16.msrb.mxu1 %v7522_v56  ;;  %891 = vmatpush.bf16.msrb.mxu2 %v7532_v59 }
 0x308   :  { %814 = vmatpush.bf16.msrb.mxu0 %v7579_v12 }
 0x309   :  { %879 = vmatpush.bf16.msrb.mxu1 %v7550_v1  ;;  %892 = vmatpush.bf16.msrb.mxu2 %v7560_v5 }
 0x368   :  { %v608_v7 = vpop.f32.mrf.mxu0  ;;  %v621_v11 = vpop.f32.mrf.mxu1 }
 0x369   :  { %v609_v17 = vadd.f32 %v608_v7, %v7640_v14  ;;  %v622_v19 = vadd.f32 %v621_v11, %v7642_v15 }
 0x36b   :  { %v638_v28 = vadd.f32 %v5030_v3, %v609_v17  ;;  %v658_v31 = vadd.f32 %v5031_v10, %v622_v19 }
 0x36d   :  { %v5033_v38 = vmul.f32 -1.442695, %v638_v28  ;;  %v5034_v41 = vmul.f32 -1.442695, %v658_v31 }
 0x36f   :  { %7170 = vpow2.f32 %v5033_v38  ;;  %v634_v47 = vpop.f32.mrf.mxu2 }
 0x370   :  { %7172 = vpow2.f32 %v5034_v41  ;;  %v610_v50 = vpop.f32.mrf.mxu0  ;;  %v623_v56 = vpop.f32.mrf.mxu1  ;;  %v635_v61 = vadd.f32 %v634_v47, %v7652_v51 }
 0x375   :  { %v7171_v59 = vpop.eup %7170 }
 0x376   :  { %v7173_v1 = vpop.eup %7172  ;;  %v642_v5 = vadd.f32 1.0, %v7171_v59 }
 0x377   :  { %v662_v13 = vadd.f32 1.0, %v7173_v1  ;;  %v636_v39 = vpop.f32.mrf.mxu2 }
 0x378   :  { %7174 = vrcp.f32 %v642_v5  ;;  %v654_v49 = vand.u32 2147483648, %v642_v5  ;;  %v652_v54 = vand.u32 2147483647, %v642_v5  ;;  %vm648_vm1 = vweird.f32 %v642_v5 }
 0x379   :  { %7176 = vrcp.f32 %v662_v13  ;;  %v674_v8 = vand.u32 2147483648, %v662_v13  ;;  %vm668_vm5 = vweird.f32 %v662_v13  ;;  %v672_v9 = vand.u32 2147483647, %v662_v13 }
 0x37a   :  { %v655_v60 = vor.u32 1.1754944e-38, %v654_v49  ;;  %vm653_vm3 = vcmp.eq.f32.partialorder %v652_v54, 8.507059e+37 }
 0x37b   :  { %v675_v18 = vor.u32 1.1754944e-38, %v674_v8  ;;  %vm673_vm7 = vcmp.eq.f32.partialorder %v672_v9, 8.507059e+37  ;;  %v5040_v9 = vld [vmem:[%s10493_s0 + $0x90] sm:$0xff] }
 0x37e   :  { %v7175_v42 = vpop.eup %7174 }
 0x37f   :  { %v7177_v43 = vpop.eup %7176  ;;  %v644_v44 = vmul.f32 %v7175_v42, %v642_v5  ;;  %vm649_vm0 = vweird.f32 %v7175_v42 }
 0x380   :  { %v664_v40 = vmul.f32 %v7177_v43, %v662_v13  ;;  %vm650_vm2 = vmor %vm648_vm1, %vm649_vm0  ;;  %vm669_vm4 = vweird.f32 %v7177_v43 }
 0x381   :  { %v645_v45 = vsub.f32 1.0, %v644_v44  ;;  %vm670_vm6 = vmor %vm668_vm5, %vm669_vm4 }
 0x382   :  { %v665_v48 = vsub.f32 1.0, %v664_v40  ;;  %v5037_v40 = vld [vmem:[%s10493_s0 + $0x88] sm:$0xff] }
 0x383   :  { %v646_v52 = vmul.f32 %v7175_v42, %v645_v45 }
 0x384   :  { %v666_v57 = vmul.f32 %v7177_v43, %v665_v48 }
 0x385   :  { %v647_v58 = vadd.f32 %v7175_v42, %v646_v52 }
 0x386   :  { %v667_v2 = vadd.f32 %v7177_v43, %v666_v57 }
 0x387   :  { %v651_v62 = vsel %vm650_vm2, %v7175_v42, %v647_v58 }
 0x388   :  { %v656_v32 = vsel %vm653_vm3, %v655_v60, %v651_v62  ;;  %v671_v53 = vsel %vm670_vm6, %v7177_v43, %v667_v2 }
 0x389   :  { %v678_v4 = vmul.f32 %v656_v32, %v635_v61  ;;  %v676_v20 = vsel %vm673_vm7, %v675_v18, %v671_v53  ;;  %v5041_v53 = vld [vmem:[%s10493_s0 + $0x98] sm:$0xff] }
 0x38a   :  { %v681_v21 = vsub.f32 1.0, %v676_v20  ;;  %v683_v25 = vmul.f32 %v676_v20, %v7781_v34 }
 0x38b   :  { %v679_v16 = vadd.f32 %v5032_v63, %v678_v4 }
 0x38d   :  { %7178 = vtanh.f32 %v679_v16 }
 0x393   :  { %v7179_v23 = vpop.eup %7178 }
 0x394   :  { %v682_v24 = vmul.f32 %v7179_v23, %v681_v21 }
 0x396   :  { %v7822_v26 = vadd.f32 %v683_v25, %v682_v24 }
 0x398   :  { %v689_v29 = vpack.c.bf16 %v7822_v26, %v7822_v26 }
 0x39a   :  { %698 = vmatmul.bf16.vlgmr.msrb.gmra.mxu3 %v689_v29  ;;  %711 = vmatmul.bf16.vlgmr.msra.gmra.mxu0 %v689_v29 }
 0x39b   :  { %724 = vmatmul.bf16.vlgmr.msra.gmra.mxu1 %v689_v29  ;;  %898 = vmatpush.bf16.msrb.mxu3 %v7417_v22 }
 0x39f   :  { %899 = vmatpush.bf16.msrb.mxu3 %v7432_v27 }
 0x3a3   :  { %900 = vmatpush.bf16.msrb.mxu3 %v7460_v36 }
 0x3a7   :  { %901 = vmatpush.bf16.msrb.mxu3 %v7491_v46  ;;  %v5035_v46 = vld [vmem:[%s10493_s0 + $0x78] sm:$0xff] }
 0x3ab   :  { %902 = vmatpush.bf16.msrb.mxu3 %v7519_v55 }
 0x3af   :  { %903 = vmatpush.bf16.msrb.mxu3 %v7547_v0 }
 0x3b3   :  { %904 = vmatpush.bf16.msrb.mxu3 %v7563_v6 }
 0x3b7   :  { %905 = vmatpush.bf16.msrb.mxu3 %v7579_v12 }
 0x417   :  { %v712_v33 = vpop.f32.mrf.mxu0 }
 0x418   :  { %v713_v22 = vadd.f32 %v712_v33, %v7642_v15  ;;  %v725_v27 = vpop.f32.mrf.mxu1 }
 0x419   :  { %v726_v42 = vadd.f32 %v725_v27, %v7652_v51 }
 0x41a   :  { %v749_v34 = vadd.f32 %v5036_v30, %v713_v22 }
 0x41c   :  { %v5039_v36 = vmul.f32 -1.442695, %v749_v34 }
 0x41d   :  { %v699_v55 = vpop.f32.mrf.mxu3 }
 0x41e   :  { %7180 = vpow2.f32 %v5039_v36  ;;  %v700_v0 = vadd.f32 %v699_v55, %v7640_v14  ;;  %v5137_v55 = vld [vmem:[%s10495_s5 + $0xa8] sm:$0xf] }
 0x41f   :  { %v714_v6 = vpop.f32.mrf.mxu0 }
 0x420   :  { %v729_v12 = vadd.f32 %v5035_v46, %v700_v0  ;;  %v727_v35 = vpop.f32.mrf.mxu1  ;;  %v961_v46 = vld [vmem:[%s10494_s3] sm:$0xff]  ;;  %v6753_v0 = vld [vmem:[%s10495_s5 + $0xb0] sm:$0xf0]  ;;  %v6752_v6 = vld [vmem:[%s10495_s5 + $0xac] sm:$0xf] }
 0x421   :  { %963 = vperm.xlu0 %7126, %v961_v46   ;;  %v5138_v35 = vor.u32 %v6753_v0, %v5137_v55  ;;  %v5077_v55 = vld [vmem:[%s10495_s5 + $0x30] sm:$0xf]  ;;  %v6738_v0 = vld [vmem:[%s10495_s5 + $0x38] sm:$0xf0] }
 0x422   :  { %v5038_v3 = vmul.f32 -1.442695, %v729_v12  ;;  %v5139_v12 = vld [vmem:[%s10495_s5 + $0xb4] sm:$0xf0] }
 0x423   :  { %1129 = vmatpush.bf16.msra.mxu0 %v5138_v35  ;;  %v5079_v35 = vld [vmem:[%s10495_s5 + $0x3c] sm:$0xf0] }
 0x424   :  { %v7181_v7 = vpop.eup %7180  ;;  %7182 = vpow2.f32 %v5038_v3  ;;  %v5142_v3 = vor.u32 %v6752_v6, %v5139_v12  ;;  %v6737_v6 = vld [vmem:[%s10495_s5 + $0x34] sm:$0xf]  ;;  %v5078_v12 = vor.u32 %v6738_v0, %v5077_v55  ;;  %v5085_v0 = vld [vmem:[%s10495_s5 + $0x38] sm:$0xf] }
 0x425   :  { %v753_v10 = vadd.f32 1.0, %v7181_v7  ;;  %v701_v11 = vpop.f32.mrf.mxu3  ;;  %v5125_v7 = vld [vmem:[%s10495_s5 + $0x90] sm:$0xf] }
 0x426   :  { %v6749_v11 = vld [vmem:[%s10495_s5 + $0x94] sm:$0xf]  ;;  %1142 = vmatpush.bf16.msra.mxu1 %v5142_v3  ;;  %v5145_v3 = vld [vmem:[%s10495_s5 + $0xb0] sm:$0xf] }
 0x427   :  { %7184 = vrcp.f32 %v753_v10  ;;  %v765_v48 = vand.u32 2147483648, %v753_v10  ;;  %vm759_vm13 = vweird.f32 %v753_v10  ;;  %v763_v52 = vand.u32 2147483647, %v753_v10 }
 0x429   :  { %v766_v58 = vor.u32 1.1754944e-38, %v765_v48  ;;  %vm764_vm15 = vcmp.eq.f32.partialorder %v763_v52, 8.507059e+37 }
 0x42a   :  { %v7183_v17 = vpop.eup %7182 }
 0x42b   :  { %v733_v19 = vadd.f32 1.0, %v7183_v17 }
 0x42d   :  { %7186 = vrcp.f32 %v733_v19  ;;  %v7185_v28 = vpop.eup %7184  ;;  %v745_v56 = vand.u32 2147483648, %v733_v19  ;;  %v743_v1 = vand.u32 2147483647, %v733_v19  ;;  %vm739_vm9 = vweird.f32 %v733_v19 }
 0x42e   :  { %v755_v31 = vmul.f32 %v7185_v28, %v753_v10  ;;  %vm760_vm12 = vweird.f32 %v7185_v28  ;;  %v6750_v10 = vld [vmem:[%s10495_s5 + $0x98] sm:$0xf0] }
 0x42f   :  { %v746_v39 = vor.u32 1.1754944e-38, %v745_v56  ;;  %vm744_vm11 = vcmp.eq.f32.partialorder %v743_v1, 8.507059e+37  ;;  %vm761_vm14 = vmor %vm759_vm13, %vm760_vm12  ;;  %v6747_v56 = vld [vmem:[%s10495_s5 + $0x80] sm:$0xf0]  ;;  %v5115_v1 = vld [vmem:[%s10495_s5 + $0x84] sm:$0xf0] }
 0x430   :  { %v756_v47 = vsub.f32 1.0, %v755_v31 }
 0x432   :  { %v757_v5 = vmul.f32 %v7185_v28, %v756_v47  ;;  %v5113_v47 = vld [vmem:[%s10495_s5 + $0x78] sm:$0xf] }
 0x433   :  { %v7187_v38 = vpop.eup %7186 }
 0x434   :  { %v735_v41 = vmul.f32 %v7187_v38, %v733_v19  ;;  %vm740_vm8 = vweird.f32 %v7187_v38  ;;  %v758_v45 = vadd.f32 %v7185_v28, %v757_v5  ;;  %v5127_v19 = vld [vmem:[%s10495_s5 + $0x9c] sm:$0xf0] }
 0x435   :  { %vm741_vm10 = vmor %vm739_vm9, %vm740_vm8 }
 0x436   :  { %v736_v50 = vsub.f32 1.0, %v735_v41  ;;  %v762_v57 = vsel %vm761_vm14, %v7185_v28, %v758_v45  ;;  %v5130_v41 = vor.u32 %v6749_v11, %v5127_v19  ;;  %v6735_v19 = vld [vmem:[%s10495_s5 + $0x20] sm:$0xf0] }
 0x437   :  { %v767_v60 = vsel %vm764_vm15, %v766_v58, %v762_v57  ;;  %v5042_v58 = vld [vmem:[%s10493_s0 + $0xa0] sm:$0xff] }
 0x438   :  { %v737_v59 = vmul.f32 %v7187_v38, %v736_v50  ;;  %v772_v61 = vsub.f32 1.0, %v767_v60  ;;  %v774_v32 = vmul.f32 %v767_v60, %v7822_v26  ;;  %1143 = vmatpush.bf16.msra.mxu1 %v5130_v41  ;;  %v5133_v41 = vld [vmem:[%s10495_s5 + $0x98] sm:$0xf] }
 0x43a   :  { %v738_v13 = vadd.f32 %v7187_v38, %v737_v59  ;;  %v6746_v59 = vld [vmem:[%s10495_s5 + $0x7c] sm:$0xf] }
 0x43c   :  { %v742_v43 = vsel %vm741_vm10, %v7187_v38, %v738_v13  ;;  %v5126_v38 = vor.u32 %v6750_v10, %v5125_v7  ;;  %v5082_v7 = vor.u32 %v6737_v6, %v5079_v35  ;;  %v6754_v10 = vld [vmem:[%s10495_s5 + $0xb8] sm:$0xf0]  ;;  %v6739_v6 = vld [vmem:[%s10495_s5 + $0x40] sm:$0xf0]  ;;  %v69_v35 = vlaneseq }
 0x43d   :  { %v747_v44 = vsel %vm744_vm11, %v746_v39, %v742_v43  ;;  %v5146_v11 = vor.u32 %v6754_v10, %v5145_v3  ;;  %v5203_v3 = vld [vmem:[%s10496_s7 + $0x60] sm:$0xf]  ;;  %v6767_v10 = vld [vmem:[%s10496_s7 + $0x64] sm:$0xf] }
 0x43e   :  { %v769_v49 = vmul.f32 %v747_v44, %v726_v42  ;;  %1130 = vmatpush.bf16.msra.mxu0 %v5126_v38  ;;  %v5114_v44 = vor.u32 %v6747_v56, %v5113_v47  ;;  %v5067_v38 = vld [vmem:[%s10495_s5 + $0x24] sm:$0xf0]  ;;  %v6751_v47 = vld [vmem:[%s10495_s5 + $0xa0] sm:$0xf0] }
 0x43f   :  { %v5134_v56 = vor.u32 %v6751_v47, %v5133_v41  ;;  %v5045_v47 = vld [vmem:[%s10493_s0 + $0xa8] sm:$0xff] }
 0x440   :  { %v770_v54 = vadd.f32 %v5037_v40, %v769_v49  ;;  %v5118_v40 = vor.u32 %v6746_v59, %v5115_v1  ;;  %v5053_v59 = vld [vmem:[%s10495_s5] sm:$0xf]  ;;  %v6732_v1 = vld [vmem:[%s10495_s5 + $0x8] sm:$0xf0] }
 0x442   :  { %7188 = vtanh.f32 %v770_v54  ;;  %1131 = vmatpush.bf16.msra.mxu0 %v5114_v44  ;;  %1144 = vmatpush.bf16.msra.mxu1 %v5118_v40 }
 0x448   :  { %v7189_v62 = vpop.eup %7188 }
 0x449   :  { %v773_v63 = vmul.f32 %v7189_v62, %v772_v61 }
 0x44b   :  { %v7847_v2 = vadd.f32 %v774_v32, %v773_v63 }
 0x44d   :  { %v780_v4 = vpack.c.bf16 %v7847_v2, %v7847_v2 }
 0x44f   :  { %789 = vmatmul.bf16.vlgmr.msra.gmra.mxu2 %v780_v4  ;;  %802 = vmatmul.bf16.vlgmr.msra.gmra.mxu3 %v780_v4 }
 0x450   :  { %815 = vmatmul.bf16.vlgmr.msrb.gmra.mxu0 %v780_v4  ;;  %1155 = vmatpush.bf16.msra.mxu2 %v5146_v11 }
 0x454   :  { %1156 = vmatpush.bf16.msra.mxu2 %v5134_v56 }
 0x493   :  { %v964_v56 = vpop.permute.xlu0 %963 }
 0x4cd   :  { %v7851_v8 = vpop.f32.mrf.mxu0 }
 0x4ce   :  { %v817_v52 = vadd.f32 %v7851_v8, %v7652_v51 }
 0x4d2   :  { %v790_v16 = vpop.f32.mrf.mxu2  ;;  %v803_v18 = vpop.f32.mrf.mxu3 }
 0x4d3   :  { %v791_v20 = vadd.f32 %v790_v16, %v7640_v14  ;;  %v804_v21 = vadd.f32 %v803_v18, %v7642_v15 }
 0x4d5   :  { %v820_v23 = vadd.f32 %v5040_v9, %v791_v20  ;;  %v840_v24 = vadd.f32 %v5041_v53, %v804_v21  ;;  %v818_v25 = vpop.f32.mrf.mxu0 }
 0x4d6   :  { %v6744_v25 = vld [vmem:[%s10495_s5 + $0x68] sm:$0xf0] }
 0x4d7   :  { %v5043_v26 = vmul.f32 -1.442695, %v820_v23  ;;  %v5044_v29 = vmul.f32 -1.442695, %v840_v24  ;;  %v5101_v24 = vld [vmem:[%s10495_s5 + $0x60] sm:$0xf] }
 0x4d9   :  { %7190 = vpow2.f32 %v5043_v26  ;;  %v5102_v26 = vor.u32 %v6744_v25, %v5101_v24  ;;  %v5097_v25 = vld [vmem:[%s10495_s5 + $0x50] sm:$0xf] }
 0x4da   :  { %7192 = vpow2.f32 %v5044_v29  ;;  %v792_v30 = vpop.f32.mrf.mxu2  ;;  %v805_v33 = vpop.f32.mrf.mxu3  ;;  %v5103_v29 = vld [vmem:[%s10495_s5 + $0x6c] sm:$0xf0] }
 0x4db   :  { %1132 = vmatpush.bf16.msra.mxu0 %v5102_v26  ;;  %v5089_v33 = vld [vmem:[%s10495_s5 + $0x48] sm:$0xf] }
 0x4df   :  { %v7191_v22 = vpop.eup %7190 }
 0x4e0   :  { %v7193_v27 = vpop.eup %7192  ;;  %v824_v34 = vadd.f32 1.0, %v7191_v22  ;;  %v6741_v22 = vld [vmem:[%s10495_s5 + $0x50] sm:$0xf0] }
 0x4e1   :  { %v844_v36 = vadd.f32 1.0, %v7193_v27  ;;  %v6740_v27 = vld [vmem:[%s10495_s5 + $0x4c] sm:$0xf] }
 0x4e2   :  { %7194 = vrcp.f32 %v824_v34  ;;  %v834_v13 = vand.u32 2147483647, %v824_v34  ;;  %v836_v39 = vand.u32 2147483648, %v824_v34  ;;  %vm830_vm1 = vweird.f32 %v824_v34 }
 0x4e3   :  { %7196 = vrcp.f32 %v844_v36  ;;  %v856_v61 = vand.u32 2147483648, %v844_v36  ;;  %vm850_vm5 = vweird.f32 %v844_v36  ;;  %v854_v63 = vand.u32 2147483647, %v844_v36 }
 0x4e4   :  { %v837_v49 = vor.u32 1.1754944e-38, %v836_v39  ;;  %vm835_vm3 = vcmp.eq.f32.partialorder %v834_v13, 8.507059e+37  ;;  %v5054_v13 = vor.u32 %v6732_v1, %v5053_v59  ;;  %v5055_v39 = vld [vmem:[%s10495_s5 + $0xc] sm:$0xf0]  ;;  %v5073_v59 = vld [vmem:[%s10495_s5 + $0x20] sm:$0xf] }
 0x4e5   :  { %v857_v9 = vor.u32 1.1754944e-38, %v856_v61  ;;  %vm855_vm7 = vcmp.eq.f32.partialorder %v854_v63, 8.507059e+37  ;;  %v6745_v63 = vld [vmem:[%s10495_s5 + $0x70] sm:$0xf0]  ;;  %v6736_v1 = vld [vmem:[%s10495_s5 + $0x28] sm:$0xf0] }
 0x4e8   :  { %v7195_v17 = vpop.eup %7194 }
 0x4e9   :  { %v7197_v28 = vpop.eup %7196  ;;  %v826_v31 = vmul.f32 %v7195_v17, %v824_v34  ;;  %vm831_vm0 = vweird.f32 %v7195_v17  ;;  %v5090_v34 = vor.u32 %v6741_v22, %v5089_v33  ;;  %v6770_v33 = vld [vmem:[%s10496_s7 + $0x7c] sm:$0xf] }
 0x4ea   :  { %v846_v50 = vmul.f32 %v7197_v28, %v844_v36  ;;  %vm832_vm2 = vmor %vm830_vm1, %vm831_vm0  ;;  %vm851_vm4 = vweird.f32 %v7197_v28  ;;  %v5091_v36 = vld [vmem:[%s10495_s5 + $0x54] sm:$0xf0] }
 0x4eb   :  { %v827_v5 = vsub.f32 1.0, %v826_v31  ;;  %vm852_vm6 = vmor %vm850_vm5, %vm851_vm4  ;;  %v5094_v46 = vor.u32 %v6740_v27, %v5091_v36  ;;  %1133 = vmatpush.bf16.msra.mxu0 %v5090_v34  ;;  %v5217_v27 = vld [vmem:[%s10496_s7 + $0x84] sm:$0xf0]  ;;  %v5223_v34 = vld [vmem:[%s10496_s7 + $0x80] sm:$0xf] }
 0x4ec   :  { %v847_v42 = vsub.f32 1.0, %v846_v50  ;;  %v6772_v36 = vld [vmem:[%s10496_s7 + $0x88] sm:$0xf0] }
 0x4ed   :  { %v828_v43 = vmul.f32 %v7195_v17, %v827_v5  ;;  %v6731_v5 = vld [vmem:[%s10495_s5 + $0x4] sm:$0xf]  ;;  %v5224_v55 = vor.u32 %v6772_v36, %v5223_v34  ;;  %v6760_v36 = vld [vmem:[%s10496_s7 + $0x28] sm:$0xf0] }
 0x4ee   :  { %v848_v45 = vmul.f32 %v7197_v28, %v847_v42  ;;  %v5121_v42 = vld [vmem:[%s10495_s5 + $0x80] sm:$0xf]  ;;  %v5058_v44 = vor.u32 %v6731_v5, %v5055_v39  ;;  %v5191_v39 = vld [vmem:[%s10496_s7 + $0x48] sm:$0xf] }
 0x4ef   :  { %v829_v48 = vadd.f32 %v7195_v17, %v828_v43  ;;  %1134 = vmatpush.bf16.msra.mxu0 %v5078_v12  ;;  %v6748_v43 = vld [vmem:[%s10495_s5 + $0x88] sm:$0xf0]  ;;  %v5086_v12 = vor.u32 %v6739_v6, %v5085_v0 }
 0x4f0   :  { %v849_v60 = vadd.f32 %v7197_v28, %v848_v45  ;;  %v5122_v40 = vor.u32 %v6748_v43, %v5121_v42  ;;  %v5239_v45 = vld [vmem:[%s10496_s7 + $0xa8] sm:$0xf]  ;;  %v6765_v42 = vld [vmem:[%s10496_s7 + $0x50] sm:$0xf0]  ;;  %v6756_v6 = vld [vmem:[%s10496_s7 + $0x8] sm:$0xf0] }
 0x4f1   :  { %v833_v54 = vsel %vm832_vm2, %v7195_v17, %v829_v48  ;;  %v5065_v17 = vld [vmem:[%s10495_s5 + $0x18] sm:$0xf]  ;;  %v6777_v48 = vld [vmem:[%s10496_s7 + $0xb0] sm:$0xf0] }
 0x4f2   :  { %v838_v57 = vsel %vm835_vm3, %v837_v49, %v833_v54  ;;  %v853_v4 = vsel %vm852_vm6, %v7197_v28, %v849_v60  ;;  %v6734_v28 = vld [vmem:[%s10495_s5 + $0x1c] sm:$0xf]  ;;  %v5066_v31 = vor.u32 %v6735_v19, %v5065_v17  ;;  %v6776_v49 = vld [vmem:[%s10496_s7 + $0xac] sm:$0xf]  ;;  %v5241_v54 = vld [vmem:[%s10496_s7 + $0xb4] sm:$0xf0]  ;;  %1157 = vmatpush.bf16.msra.mxu2 %v5122_v40 }
 0x4f3   :  { %v860_v62 = vmul.f32 %v838_v57, %v817_v52  ;;  %v858_v8 = vsel %vm855_vm7, %v857_v9, %v853_v4  ;;  %v5070_v50 = vor.u32 %v6734_v28, %v5067_v38  ;;  %v5240_v52 = vor.u32 %v6777_v48, %v5239_v45  ;;  %v5247_v57 = vld [vmem:[%s10496_s7 + $0xb0] sm:$0xf]  ;;  %v6774_v9 = vld [vmem:[%s10496_s7 + $0x98] sm:$0xf0]  ;;  %v5211_v19 = vld [vmem:[%s10496_s7 + $0x68] sm:$0xf] }
 0x4f4   :  { %v863_v16 = vsub.f32 1.0, %v858_v8  ;;  %v865_v20 = vmul.f32 %v858_v8, %v7847_v2  ;;  %v6743_v2 = vld [vmem:[%s10495_s5 + $0x64] sm:$0xf]  ;;  %1135 = vmatpush.bf16.msra.mxu0 %v5066_v31  ;;  %v5244_v60 = vor.u32 %v6776_v49, %v5241_v54  ;;  %v5227_v4 = vld [vmem:[%s10496_s7 + $0x90] sm:$0xf]  ;;  %v8078_v31 = vand.u32 127, %v69_v35 }
 0x4f5   :  { %v861_v32 = vadd.f32 %v5042_v58, %v860_v62  ;;  %v5106_v30 = vor.u32 %v6743_v2, %v5103_v29  ;;  %v6778_v58 = vld [vmem:[%s10496_s7 + $0xb8] sm:$0xf0]  ;;  %v5109_v62 = vld [vmem:[%s10495_s5 + $0x68] sm:$0xf]  ;;  %1329 = vmatpush.bf16.msra.mxu3 %v5240_v52  ;;  %v6773_v8 = vld [vmem:[%s10496_s7 + $0x94] sm:$0xf] }
 0x4f6   :  { %v5248_v61 = vor.u32 %v6778_v58, %v5247_v57  ;;  %v6742_v2 = vld [vmem:[%s10495_s5 + $0x58] sm:$0xf0]  ;;  %v5215_v29 = vld [vmem:[%s10496_s7 + $0x78] sm:$0xf]  ;;  %v5205_v17 = vld [vmem:[%s10496_s7 + $0x6c] sm:$0xf0]  ;;  %vm965_vm8 = vcmp.eq.s32.totalorder %v8078_v31, %v964_v56 }
 0x4f7   :  { %7198 = vtanh.f32 %v861_v32  ;;  %1145 = vmatpush.bf16.msra.mxu1 %v5106_v30  ;;  %v5110_v32 = vor.u32 %v6745_v63, %v5109_v62  ;;  %v5098_v26 = vor.u32 %v6742_v2, %v5097_v25  ;;  %v6771_v30 = vld [vmem:[%s10496_s7 + $0x80] sm:$0xf0]  ;;  %v6769_v28 = vld [vmem:[%s10496_s7 + $0x70] sm:$0xf0]  ;;  %v5208_v38 = vor.u32 %v6767_v10, %v5205_v17  ;;  %vm8097_vm9 = vmpackc.low %vm965_vm8, %vm965_vm8 }
 0x4f8   :  { %1136 = vmatpush.bf16.msra.mxu0 %v5054_v13  ;;  %v5216_v22 = vor.u32 %v6771_v30, %v5215_v29  ;;  %v5212_v41 = vor.u32 %v6769_v28, %v5211_v19  ;;  %v5074_v13 = vor.u32 %v6736_v1, %v5073_v59  ;;  %v5193_v40 = vld [vmem:[%s10496_s7 + $0x54] sm:$0xf0]  ;;  %v7284_v48 = vmov 1.0|1.0   ;;  %v5199_v52 = vld [vmem:[%s10496_s7 + $0x50] sm:$0xf] }
 0x4f9   :  { %1158 = vmatpush.bf16.msra.mxu2 %v5110_v32  ;;  %v6766_v54 = vld [vmem:[%s10496_s7 + $0x58] sm:$0xf0]  ;;  %v5046_v57 = vld [vmem:[%s10493_s0 + $0xb0] sm:$0xff]  ;;  %v6763_v25 = vld [vmem:[%s10496_s7 + $0x40] sm:$0xf0] }
 0x4fa   :  { %v5200_v58 = vor.u32 %v6766_v54, %v5199_v52  ;;  %v5179_v32 = vld [vmem:[%s10496_s7 + $0x30] sm:$0xf]  ;;  %v5167_v2 = vld [vmem:[%s10496_s7 + $0x18] sm:$0xf]  ;;  %v6757_v10 = vld [vmem:[%s10496_s7 + $0x10] sm:$0xf0] }
 0x4fb   :  { %1146 = vmatpush.bf16.msra.mxu1 %v5094_v46  ;;  %v5220_v46 = vor.u32 %v6770_v33, %v5217_v27  ;;  %5148 = vmatmul.msk.bf16.vlgmr.msra.gmra.mxu0 %vm8097_vm9, %v7284_v48  ;;  %v5169_v33 = vld [vmem:[%s10496_s7 + $0x24] sm:$0xf0]  ;;  %v5157_v35 = vld [vmem:[%s10496_s7 + $0xc] sm:$0xf0]  ;;  %v5047_v54 = vld [vmem:[%s10493_s0 + $0xb8] sm:$0xff] }
 0x4fc   :  { %1342 = vmatpush.bf16.msrb.mxu0 %v5244_v60  ;;  %v5061_v60 = vld [vmem:[%s10495_s5 + $0x8] sm:$0xf] }
 0x4fd   :  { %v7199_v53 = vpop.eup %7198  ;;  %1159 = vmatpush.bf16.msra.mxu2 %v5098_v26  ;;  %v6759_v26 = vld [vmem:[%s10496_s7 + $0x20] sm:$0xf0] }
 0x4fe   :  { %v864_v18 = vmul.f32 %v7199_v53, %v863_v16  ;;  %v5228_v16 = vor.u32 %v6774_v9, %v5227_v4  ;;  %v5229_v53 = vld [vmem:[%s10496_s7 + $0x9c] sm:$0xf0]  ;;  %v6762_v4 = vld [vmem:[%s10496_s7 + $0x38] sm:$0xf0]  ;;  %v5168_v34 = vor.u32 %v6759_v26, %v5167_v2 }
 0x4ff   :  { %1147 = vmatpush.bf16.msra.mxu1 %v5082_v7  ;;  %v6768_v7 = vld [vmem:[%s10496_s7 + $0x68] sm:$0xf0] }
 0x500   :  { %v7906_v21 = vadd.f32 %v865_v20, %v864_v18  ;;  %v5235_v18 = vld [vmem:[%s10496_s7 + $0x98] sm:$0xf]  ;;  %v6775_v20 = vld [vmem:[%s10496_s7 + $0xa0] sm:$0xf0]  ;;  %1330 = vmatpush.bf16.msra.mxu3 %v5228_v16  ;;  %v5204_v11 = vor.u32 %v6768_v7, %v5203_v3  ;;  %v6761_v16 = vld [vmem:[%s10496_s7 + $0x34] sm:$0xf] }
 0x501   :  { %v5236_v24 = vor.u32 %v6775_v20, %v5235_v18  ;;  %1160 = vmatpush.bf16.msra.mxu2 %v5086_v12  ;;  %v5187_v18 = vld [vmem:[%s10496_s7 + $0x38] sm:$0xf]  ;;  %v6755_v12 = vld [vmem:[%s10496_s7 + $0x4] sm:$0xf]  ;;  %v5163_v7 = vld [vmem:[%s10496_s7 + $0x8] sm:$0xf] }
 0x502   :  { %v871_v23 = vpack.c.bf16 %v7906_v21, %v7906_v21  ;;  %v5188_v30 = vor.u32 %v6763_v25, %v5187_v18 }
 0x503   :  { %1148 = vmatpush.bf16.msra.mxu1 %v5070_v50 }
 0x504   :  { %880 = vmatmul.bf16.vlgmr.msrb.gmra.mxu1 %v871_v23  ;;  %893 = vmatmul.bf16.vlgmr.msrb.gmra.mxu2 %v871_v23 }
 0x505   :  { %906 = vmatmul.bf16.vlgmr.msrb.gmra.mxu3 %v871_v23  ;;  %v5232_v23 = vor.u32 %v6773_v8, %v5229_v53  ;;  %1161 = vmatpush.bf16.msra.mxu2 %v5074_v13  ;;  %v5180_v8 = vor.u32 %v6762_v4, %v5179_v32  ;;  %v5181_v53 = vld [vmem:[%s10496_s7 + $0x3c] sm:$0xf0] }
 0x506   :  { %1331 = vmatpush.bf16.msra.mxu3 %v5216_v22  ;;  %v5175_v22 = vld [vmem:[%s10496_s7 + $0x20] sm:$0xf] }
 0x507   :  { %1149 = vmatpush.bf16.msra.mxu1 %v5058_v44  ;;  %1343 = vmatpush.bf16.msrb.mxu0 %v5232_v23  ;;  %v6764_v44 = vld [vmem:[%s10496_s7 + $0x4c] sm:$0xf]  ;;  %v5176_v0 = vor.u32 %v6760_v36, %v5175_v22  ;;  %v6783_v22 = vld [vmem:[%s10498_s9 + $0x20] sm:$0xff] }
 0x508   :  { %v5196_v49 = vor.u32 %v6764_v44, %v5193_v40 }
 0x50a   :  { %1332 = vmatpush.bf16.msra.mxu3 %v5204_v11 }
 0x50b   :  { %1355 = vmatpush.bf16.msrb.mxu1 %v5248_v61  ;;  %1344 = vmatpush.bf16.msrb.mxu0 %v5220_v46  ;;  %v6733_v61 = vld [vmem:[%s10495_s5 + $0x10] sm:$0xf0]  ;;  %v5155_v46 = vld [vmem:[%s10496_s7] sm:$0xf] }
 0x50c   :  { %v5062_v63 = vor.u32 %v6733_v61, %v5061_v60  ;;  %v5156_v17 = vor.u32 %v6756_v6, %v5155_v46  ;;  %v6782_v46 = vld [vmem:[%s10498_s9 + $0x18] sm:$0xff]  ;;  %v6781_v6 = vld [vmem:[%s10498_s9 + $0x10] sm:$0xff] }
 0x50e   :  { %1162 = vmatpush.bf16.msra.mxu2 %v5062_v63 }
 0x50f   :  { %1356 = vmatpush.bf16.msrb.mxu1 %v5236_v24  ;;  %1345 = vmatpush.bf16.msrb.mxu0 %v5208_v38  ;;  %v5184_v24 = vor.u32 %v6761_v16, %v5181_v53  ;;  %v5160_v38 = vor.u32 %v6755_v12, %v5157_v35 }
 0x513   :  { %1357 = vmatpush.bf16.msrb.mxu1 %v5224_v55  ;;  %1346 = vmatpush.bf16.msrb.mxu0 %v5196_v49 }
 0x514   :  { %5150 = vmatmul.msk.bf16.vlgmr.msra.gmra.mxu1 %vm8097_vm9, %v7284_v48  ;;  %5152 = vmatmul.msk.bf16.vlgmr.msra.gmra.mxu2 %vm8097_vm9, %v7284_v48 }
 0x517   :  { %1358 = vmatpush.bf16.msrb.mxu1 %v5212_v41  ;;  %1347 = vmatpush.bf16.msrb.mxu0 %v5184_v24  ;;  %v5164_v41 = vor.u32 %v6757_v10, %v5163_v7 }
 0x51b   :  { %1359 = vmatpush.bf16.msrb.mxu1 %v5200_v58 }
 0x51f   :  { %1360 = vmatpush.bf16.msrb.mxu1 %v5188_v30 }
 0x523   :  { %1361 = vmatpush.bf16.msrb.mxu1 %v5176_v0 }
 0x527   :  { %1362 = vmatpush.bf16.msrb.mxu1 %v5164_v41  ;;  %v5476_v41 = vld [vmem:[%s10496_s7 + $0xa8] sm:$0xf] }
 0x578   :  { %v1138_v24 = vpop.f32.mrf.mxu0 }
 0x580   :  { %v1140_v2 = vpop.f32.mrf.mxu0 }
 0x581   :  { %v881_v50 = vpop.f32.mrf.mxu1 }
 0x582   :  { %v882_v5 = vadd.f32 %v881_v50, %v7640_v14  ;;  %v5192_v14 = vor.u32 %v6765_v42, %v5191_v39 }
 0x584   :  { %v911_v45 = vadd.f32 %v5045_v47, %v882_v5  ;;  %1333 = vmatpush.bf16.msra.mxu3 %v5192_v14 }
 0x586   :  { %v5048_v62 = vmul.f32 -1.442695, %v911_v45 }
 0x587   :  { %v894_v9 = vpop.f32.mrf.mxu2 }
 0x588   :  { %7200 = vpow2.f32 %v5048_v62  ;;  %v895_v20 = vadd.f32 %v894_v9, %v7642_v15  ;;  %v907_v23 = vpop.f32.mrf.mxu3  ;;  %v6758_v15 = vld [vmem:[%s10496_s7 + $0x1c] sm:$0xf]  ;;  %1334 = vmatpush.bf16.msra.mxu3 %v5180_v8 }
 0x589   :  { %v883_v29 = vpop.f32.mrf.mxu1  ;;  %v5172_v55 = vor.u32 %v6758_v15, %v5169_v33  ;;  %v908_v49 = vadd.f32 %v907_v23, %v7652_v51  ;;  %v6786_v15 = vld [vmem:[%s10498_s9 + $0x38] sm:$0xff]  ;;  %v6784_v33 = vld [vmem:[%s10498_s9 + $0x28] sm:$0xff] }
 0x58a   :  { %v931_v27 = vadd.f32 %v5046_v57, %v895_v20  ;;  %1480 = vmatpush.bf16.msrb.mxu2 %v6786_v15  ;;  %v5392_v15 = vld [vmem:[%s10496_s7] sm:$0xf] }
 0x58b   :  { %1348 = vmatpush.bf16.msrb.mxu0 %v5172_v55 }
 0x58c   :  { %v5049_v3 = vmul.f32 -1.442695, %v931_v27  ;;  %1335 = vmatpush.bf16.msra.mxu3 %v5168_v34  ;;  %v8212_v27 = vld [vmem:[%s10499_s6] sm:$0x7] }
 0x58d   :  { %v8217_v34 = vld [vmem:[%s10500_s8] sm:$0x7]  ;;  %v8220_v36 = vperm.slane %v8212_v27, 1  ;;  %v8236_v7 = vperm.slane %v8212_v27, 0 }
 0x58e   :  { %v7201_v11 = vpop.eup %7200  ;;  %7202 = vpow2.f32 %v5049_v3  ;;  %v8226_v55 = vperm.slane %v8217_v34, 1 }
 0x58f   :  { %v915_v19 = vadd.f32 1.0, %v7201_v11  ;;  %v896_v28 = vpop.f32.mrf.mxu2  ;;  %1349 = vmatpush.bf16.msrb.mxu0 %v5160_v38  ;;  %v8239_v11 = vperm.slane %v8217_v34, 0  ;;  %v6779_v38 = vld [vmem:[%s10498_s9] sm:$0xff] }
 0x590   :  { %v909_v47 = vpop.f32.mrf.mxu3  ;;  %1336 = vmatpush.bf16.msra.mxu3 %v5156_v17  ;;  %v6780_v17 = vld [vmem:[%s10498_s9 + $0x8] sm:$0xff] }
 0x591   :  { %7204 = vrcp.f32 %v915_v19  ;;  %v927_v13 = vand.u32 2147483648, %v915_v19  ;;  %v925_v42 = vand.u32 2147483647, %v915_v19  ;;  %vm921_vm11 = vweird.f32 %v915_v19  ;;  %v1151_v25 = vpop.f32.mrf.mxu1  ;;  %v6833_v47 = vld [vmem:[%s10496_s7 + $0xb0] sm:$0xf0] }
 0x592   :  { %v1152_v0 = vadd.f32 %v1151_v25, %v8220_v36 }
 0x593   :  { %v928_v40 = vor.u32 1.1754944e-38, %v927_v13  ;;  %vm926_vm13 = vcmp.eq.f32.partialorder %v925_v42, 8.507059e+37 }
 0x594   :  { %v7203_v50 = vpop.eup %7202 }
 0x595   :  { %v935_v56 = vadd.f32 1.0, %v7203_v50  ;;  %v1139_v50 = vadd.f32 %v1138_v24, %v8236_v7 }
 0x597   :  { %v7205_v59 = vpop.eup %7204  ;;  %7206 = vrcp.f32 %v935_v56  ;;  %v947_v61 = vand.u32 2147483648, %v935_v56  ;;  %v945_v62 = vand.u32 2147483647, %v935_v56  ;;  %vm941_vm15 = vweird.f32 %v935_v56  ;;  %v8195_v29 = vpop.f32.mrf.mxu2 }
 0x598   :  { %v917_v1 = vmul.f32 %v7205_v59, %v915_v19  ;;  %vm922_vm10 = vweird.f32 %v7205_v59 }
 0x599   :  { %vm923_vm12 = vmor %vm921_vm11, %vm922_vm10  ;;  %v948_v9 = vor.u32 1.1754944e-38, %v947_v61  ;;  %vm946_vm1 = vcmp.eq.f32.partialorder %v945_v62, 8.507059e+37  ;;  %v1153_v26 = vpop.f32.mrf.mxu1  ;;  %vm959_vm11 = vcmask 7168  }
 0x59a   :  { %v918_v5 = vsub.f32 1.0, %v917_v1  ;;  %v5464_v1 = vld [vmem:[%s10496_s7 + $0x90] sm:$0xf]  ;;  %960 = vst.msk [vmem:[%s10502_s12] sm:$0xff] %vm959_vm11, %v7283_v37 }
 0x59c   :  { %v919_v39 = vmul.f32 %v7205_v59, %v918_v5  ;;  %v6830_v5 = vld [vmem:[%s10496_s7 + $0x98] sm:$0xf0] }
 0x59d   :  { %v7207_v43 = vpop.eup %7206 }
 0x59e   :  { %v937_v14 = vmul.f32 %v7207_v43, %v935_v56  ;;  %v920_v44 = vadd.f32 %v7205_v59, %v919_v39  ;;  %vm942_vm14 = vweird.f32 %v7207_v43 }
 0x59f   :  { %vm943_vm0 = vmor %vm941_vm15, %vm942_vm14  ;;  %v1166_v30 = vpop.f32.mrf.mxu2 }
 0x5a0   :  { %v938_v45 = vsub.f32 1.0, %v937_v14  ;;  %v924_v52 = vsel %vm923_vm12, %v7205_v59, %v920_v44  ;;  %v5477_v59 = vor.u32 %v6833_v47, %v5476_v41  ;;  %v5452_v44 = vld [vmem:[%s10496_s7 + $0x78] sm:$0xf] }
 0x5a1   :  { %v929_v57 = vsel %vm926_vm13, %v928_v40, %v924_v52  ;;  %v6827_v40 = vld [vmem:[%s10496_s7 + $0x80] sm:$0xf0] }
 0x5a2   :  { %v939_v58 = vmul.f32 %v7207_v43, %v938_v45  ;;  %v951_v60 = vmul.f32 %v929_v57, %v908_v49  ;;  %v5440_v57 = vld [vmem:[%s10496_s7 + $0x60] sm:$0xf] }
 0x5a4   :  { %v952_v63 = vadd.f32 %v5047_v54, %v951_v60  ;;  %v940_v32 = vadd.f32 %v7207_v43, %v939_v58  ;;  %v5453_v54 = vor.u32 %v6827_v40, %v5452_v44  ;;  %v6824_v58 = vld [vmem:[%s10496_s7 + $0x68] sm:$0xf0]  ;;  %v8329_v44 = vld [vmem:[%s10497_s10] ss:$0 sm:$0xff] }
 0x5a5   :  { %v5441_v60 = vor.u32 %v6824_v58, %v5440_v57 }
 0x5a6   :  { %7208 = vtanh.f32 %v952_v63  ;;  %v944_v4 = vsel %vm943_vm0, %v7207_v43, %v940_v32  ;;  %v5465_v43 = vor.u32 %v6830_v5, %v5464_v1  ;;  %v5428_v32 = vld [vmem:[%s10496_s7 + $0x48] sm:$0xf] }
 0x5a7   :  { %v949_v51 = vsel %vm946_vm1, %v948_v9, %v944_v4  ;;  %v6821_v4 = vld [vmem:[%s10496_s7 + $0x50] sm:$0xf0] }
 0x5a8   :  { %v954_v8 = vsub.f32 1.0, %v949_v51  ;;  %v956_v18 = vmul.f32 %v949_v51, %v7906_v21  ;;  %v6785_v21 = vld [vmem:[%s10498_s9 + $0x30] sm:$0xff]  ;;  %v5429_v9 = vor.u32 %v6821_v4, %v5428_v32 }
 0x5a9   :  { %1481 = vmatpush.bf16.msrb.mxu2 %v6785_v21  ;;  %v5416_v51 = vld [vmem:[%s10496_s7 + $0x30] sm:$0xf]  ;;  %v6812_v21 = vld [vmem:[%s10496_s7 + $0x8] sm:$0xf0] }
 0x5ac   :  { %v7209_v16 = vpop.eup %7208 }
 0x5ad   :  { %v955_v53 = vmul.f32 %v7209_v16, %v954_v8  ;;  %1482 = vmatpush.bf16.msrb.mxu2 %v6784_v33  ;;  %v6818_v8 = vld [vmem:[%s10496_s7 + $0x38] sm:$0xf0] }
 0x5af   :  { %v8191_v20 = vadd.f32 %v956_v18, %v955_v53  ;;  %v5417_v53 = vor.u32 %v6818_v8, %v5416_v51  ;;  %v5404_v18 = vld [vmem:[%s10496_s7 + $0x18] sm:$0xf]  ;;  %v5374_v8 = vld [vmem:[%s10495_s5 + $0xa8] sm:$0xf] }
 0x5b1   :  { %v1168_v23 = vpack.c.bf16 %v8191_v20, %v8191_v20  ;;  %1483 = vmatpush.bf16.msrb.mxu2 %v6783_v22  ;;  %v8302_v22 = vperm.slane %v8217_v34, 2 }
 0x5b3   :  { %1337 = vmatmul.bf16.vlgmr.msra.gmra.mxu3 %v1168_v23  ;;  %1350 = vmatmul.bf16.vlgmr.msrb.gmra.mxu0 %v1168_v23 }
 0x5b4   :  { %1363 = vmatmul.bf16.vlgmr.msrb.gmra.mxu1 %v1168_v23  ;;  %v6815_v23 = vld [vmem:[%s10496_s7 + $0x20] sm:$0xf0] }
 0x5b5   :  { %1484 = vmatpush.bf16.msrb.mxu2 %v6782_v46  ;;  %v5405_v26 = vor.u32 %v6815_v23, %v5404_v18  ;;  %v5376_v23 = vld [vmem:[%s10495_s5 + $0xb4] sm:$0xf0] }
 0x5b9   :  { %1485 = vmatpush.bf16.msrb.mxu2 %v6781_v6 }
 0x5bd   :  { %1486 = vmatpush.bf16.msrb.mxu2 %v6780_v17 }
 0x5c1   :  { %1487 = vmatpush.bf16.msrb.mxu2 %v6779_v38 }
 0x5c5   :  { %1894 = vmatpush.bf16.msra.mxu2 %v5477_v59  ;;  %v7285_v59 = vmov 0.0  }
 0x5c6   :  { %958 = vst [vmem:[%s10501_s11] sm:$0xff] %v7285_v59  ;;  %v5358_v59 = vld [vmem:[%s10495_s5 + $0x80] sm:$0xf] }
 0x5c9   :  { %1895 = vmatpush.bf16.msra.mxu2 %v5465_v43 }
 0x5cd   :  { %1896 = vmatpush.bf16.msra.mxu2 %v5453_v54 }
 0x5d1   :  { %1897 = vmatpush.bf16.msra.mxu2 %v5441_v60 }
 0x5d5   :  { %1898 = vmatpush.bf16.msra.mxu2 %v5429_v9 }
 0x5d9   :  { %1899 = vmatpush.bf16.msra.mxu2 %v5417_v53  ;;  %v6808_v53 = vld [vmem:[%s10495_s5 + $0xac] sm:$0xf] }
 0x5dd   :  { %1900 = vmatpush.bf16.msra.mxu2 %v5405_v26  ;;  %v6805_v26 = vld [vmem:[%s10495_s5 + $0x94] sm:$0xf] }
 0x630   :  { %v1351_v12 = vpop.f32.mrf.mxu0 }
 0x631   :  { %v1352_v35 = vadd.f32 %v1351_v12, %v8226_v55  ;;  %v8233_v3 = vpop.f32.mrf.mxu1  ;;  %v5393_v12 = vor.u32 %v6812_v21, %v5392_v15 }
 0x633   :  { %v1388_v10 = vadd.f32 %v1352_v35, %v1152_v0  ;;  %v8305_v35 = vperm.slane %v8212_v27, 2  ;;  %1901 = vmatpush.bf16.msra.mxu2 %v5393_v12  ;;  %v5382_v12 = vld [vmem:[%s10495_s5 + $0xb0] sm:$0xf] }
 0x635   :  { %v5250_v19 = vmul.f32 -1.442695, %v1388_v10  ;;  %v1165_v41 = vadd.f32 %v8195_v29, %v8305_v35 }
 0x636   :  { %v1338_v28 = vpop.f32.mrf.mxu3 }
 0x637   :  { %7210 = vpow2.f32 %v5250_v19  ;;  %v1339_v56 = vadd.f32 %v1338_v28, %v8239_v11  ;;  %v1365_v19 = vadd.f32 %v8233_v3, %v8302_v22 }
 0x638   :  { %v1353_v13 = vpop.f32.mrf.mxu0 }
 0x639   :  { %v1368_v39 = vadd.f32 %v1339_v56, %v1139_v50  ;;  %v1366_v42 = vpop.f32.mrf.mxu1 }
 0x63b   :  { %v5249_v14 = vmul.f32 -1.442695, %v1368_v39 }
 0x63d   :  { %v7211_v45 = vpop.eup %7210  ;;  %7212 = vpow2.f32 %v5249_v14 }
 0x63e   :  { %v8267_v49 = vadd.f32 1.0, %v7211_v45  ;;  %v1340_v52 = vpop.f32.mrf.mxu3 }
 0x640   :  { %7214 = vrcp.f32 %v8267_v49  ;;  %v1404_v47 = vand.u32 2147483648, %v8267_v49  ;;  %vm1398_vm7 = vweird.f32 %v8267_v49  ;;  %v1402_v50 = vand.u32 2147483647, %v8267_v49 }
 0x642   :  { %v1405_v1 = vor.u32 1.1754944e-38, %v1404_v47  ;;  %vm1403_vm9 = vcmp.eq.f32.partialorder %v1402_v50, 8.507059e+37  ;;  %v6800_v47 = vld [vmem:[%s10495_s5 + $0x68] sm:$0xf0] }
 0x643   :  { %v7213_v61 = vpop.eup %7212 }
 0x644   :  { %v1372_v62 = vadd.f32 1.0, %v7213_v61 }
 0x646   :  { %7216 = vrcp.f32 %v1372_v62  ;;  %v7215_v63 = vpop.eup %7214  ;;  %v1384_v33 = vand.u32 2147483648, %v1372_v62  ;;  %v1382_v0 = vand.u32 2147483647, %v1372_v62  ;;  %vm1378_vm3 = vweird.f32 %v1372_v62 }
 0x647   :  { %v1394_v16 = vmul.f32 %v7215_v63, %v8267_v49  ;;  %vm1399_vm6 = vweird.f32 %v7215_v63  ;;  %v8336_v49 = vsub.s32 127, %v8078_v31 }
 0x648   :  { %v1385_v17 = vor.u32 1.1754944e-38, %v1384_v33  ;;  %vm1383_vm5 = vcmp.eq.f32.partialorder %v1382_v0, 8.507059e+37  ;;  %vm1400_vm8 = vmor %vm1398_vm7, %vm1399_vm6  ;;  %v5350_v33 = vld [vmem:[%s10495_s5 + $0x78] sm:$0xf]  ;;  %v6802_v0 = vld [vmem:[%s10495_s5 + $0x7c] sm:$0xf] }
 0x649   :  { %v1395_v2 = vsub.f32 1.0, %v1394_v16  ;;  %v6809_v16 = vld [vmem:[%s10495_s5 + $0xb0] sm:$0xf0] }
 0x64a   :  { %v5375_v18 = vor.u32 %v6809_v16, %v5374_v8 }
 0x64b   :  { %v1396_v6 = vmul.f32 %v7215_v63, %v1395_v2  ;;  %v5379_v2 = vor.u32 %v6808_v53, %v5376_v23  ;;  %v5302_v23 = vld [vmem:[%s10495_s5 + $0x18] sm:$0xf] }
 0x64c   :  { %v7217_v24 = vpop.eup %7216  ;;  %1695 = vmatpush.bf16.msrb.mxu3 %v5375_v18 }
 0x64d   :  { %v1374_v25 = vmul.f32 %v7217_v24, %v1372_v62  ;;  %vm1379_vm2 = vweird.f32 %v7217_v24  ;;  %v1397_v38 = vadd.f32 %v7215_v63, %v1396_v6  ;;  %1708 = vmatpush.bf16.msra.mxu0 %v5379_v2  ;;  %v5352_v6 = vld [vmem:[%s10495_s5 + $0x84] sm:$0xf0] }
 0x64e   :  { %vm1380_vm4 = vmor %vm1378_vm3, %vm1379_vm2  ;;  %v5304_v2 = vld [vmem:[%s10495_s5 + $0x24] sm:$0xf0] }
 0x64f   :  { %v1375_v30 = vsub.f32 1.0, %v1374_v25  ;;  %v1401_v3 = vsel %vm1400_vm8, %v7215_v63, %v1397_v38  ;;  %v6806_v25 = vld [vmem:[%s10495_s5 + $0x98] sm:$0xf0]  ;;  %v5355_v38 = vor.u32 %v6802_v0, %v5352_v6 }
 0x650   :  { %v1406_v5 = vsel %vm1403_vm9, %v1405_v1, %v1401_v3  ;;  %v6804_v3 = vld [vmem:[%s10495_s5 + $0x88] sm:$0xf0]  ;;  %v5285_v1 = vld [vmem:[%s10503_s4 + $0x1] sm:$0x1] }
 0x651   :  { %v1376_v46 = vmul.f32 %v7217_v24, %v1375_v30  ;;  %v1411_v29 = vsub.f32 1.0, %v1406_v5  ;;  %v1413_v42 = vmul.f32 %v1406_v5, %v8191_v20  ;;  %v5364_v30 = vld [vmem:[%s10495_s5 + $0x9c] sm:$0xf0]  ;;  %vm1521_vm13 = vcmp.gt.s32.totalorder %v5285_v1, 0  ;;  %v5286_v1 = vld [vmem:[%s10494_s3 + $0x8] sm:$0xff] }
 0x652   :  { %v5367_v21 = vor.u32 %v6805_v26, %v5364_v30  ;;  %v1524_v16 = vsel %vm1521_vm13, 1, %v7283_v37  ;;  %v5322_v26 = vld [vmem:[%s10495_s5 + $0x38] sm:$0xf]  ;;  %v6795_v30 = vld [vmem:[%s10495_s5 + $0x40] sm:$0xf0] }
 0x653   :  { %v1377_v10 = vadd.f32 %v7217_v24, %v1376_v46  ;;  %v6803_v46 = vld [vmem:[%s10495_s5 + $0x80] sm:$0xf0]  ;;  %v1525_v0 = vperm.slane %v1524_v16, 0 }
 0x654   :  { %1709 = vmatpush.bf16.msra.mxu0 %v5367_v21 }
 0x655   :  { %v1381_v28 = vsel %vm1380_vm4, %v7217_v24, %v1377_v10  ;;  %v5362_v24 = vld [vmem:[%s10495_s5 + $0x90] sm:$0xf]  ;;  %v6810_v10 = vld [vmem:[%s10495_s5 + $0xb8] sm:$0xf0]  ;;  %vm8507_vm14 = vcmp.eq.s32.totalorder %v1525_v0, 1 }
 0x656   :  { %v1386_v34 = vsel %vm1383_vm5, %v1385_v17, %v1381_v28  ;;  %v5363_v15 = vor.u32 %v6806_v25, %v5362_v24  ;;  %v5383_v17 = vor.u32 %v6810_v10, %v5382_v12  ;;  %v5370_v28 = vld [vmem:[%s10495_s5 + $0x98] sm:$0xf]  ;;  %v6791_v24 = vld [vmem:[%s10495_s5 + $0x20] sm:$0xf0]  ;;  %v6790_v25 = vld [vmem:[%s10495_s5 + $0x1c] sm:$0xf] }
 0x657   :  { %v1408_v27 = vmul.f32 %v1386_v34, %v1365_v19  ;;  %v5351_v19 = vor.u32 %v6803_v46, %v5350_v33  ;;  %v6807_v34 = vld [vmem:[%s10495_s5 + $0xa0] sm:$0xf0]  ;;  %v5303_v46 = vor.u32 %v6791_v24, %v5302_v23  ;;  %v5307_v6 = vor.u32 %v6790_v25, %v5304_v2  ;;  %v5290_v12 = vld [vmem:[%s10495_s5] sm:$0xf]  ;;  %v6788_v10 = vld [vmem:[%s10495_s5 + $0x8] sm:$0xf0] }
 0x658   :  { %1696 = vmatpush.bf16.msrb.mxu3 %v5363_v15  ;;  %1721 = vmatpush.bf16.msra.mxu1 %v5383_v17  ;;  %v5371_v50 = vor.u32 %v6807_v34, %v5370_v28  ;;  %v5323_v17 = vor.u32 %v6795_v30, %v5322_v26  ;;  %v6787_v28 = vld [vmem:[%s10495_s5 + $0x4] sm:$0xf]  ;;  %v5292_v34 = vld [vmem:[%s10495_s5 + $0xc] sm:$0xf0]  ;;  %v5448_v25 = vld [vmem:[%s10496_s7 + $0x68] sm:$0xf] }
 0x659   :  { %v1409_v56 = vadd.f32 %v1408_v27, %v1165_v41  ;;  %v5338_v41 = vld [vmem:[%s10495_s5 + $0x60] sm:$0xf]  ;;  %v6799_v27 = vld [vmem:[%s10495_s5 + $0x64] sm:$0xf]  ;;  %1710 = vmatpush.bf16.msra.mxu0 %v5355_v38  ;;  %v6832_v38 = vld [vmem:[%s10496_s7 + $0xac] sm:$0xf] }
 0x65a   :  { %v5339_v5 = vor.u32 %v6800_v47, %v5338_v41  ;;  %v5478_v41 = vld [vmem:[%s10496_s7 + $0xb4] sm:$0xf0]  ;;  %v5484_v47 = vld [vmem:[%s10496_s7 + $0xb0] sm:$0xf]  ;;  %v6823_v23 = vld [vmem:[%s10496_s7 + $0x64] sm:$0xf] }
 0x65b   :  { %7218 = vtanh.f32 %v1409_v56  ;;  %v5340_v56 = vld [vmem:[%s10495_s5 + $0x6c] sm:$0xf0]  ;;  %v6820_v30 = vld [vmem:[%s10496_s7 + $0x4c] sm:$0xf] }
 0x65c   :  { %1697 = vmatpush.bf16.msrb.mxu3 %v5351_v19  ;;  %1722 = vmatpush.bf16.msra.mxu1 %v5371_v50  ;;  %v5442_v24 = vld [vmem:[%s10496_s7 + $0x6c] sm:$0xf0] }
 0x65d   :  { %v5445_v2 = vor.u32 %v6823_v23, %v5442_v24  ;;  %v5701_v24 = vld [vmem:[%s10496_s7 + $0x90] sm:$0xf] }
 0x660   :  { %1698 = vmatpush.bf16.msrb.mxu3 %v5339_v5 }
 0x661   :  { %v7219_v13 = vpop.eup %7218 }
 0x662   :  { %v1412_v39 = vmul.f32 %v7219_v13, %v1411_v29  ;;  %v5343_v29 = vor.u32 %v6799_v27, %v5340_v56  ;;  %v5326_v13 = vld [vmem:[%s10495_s5 + $0x48] sm:$0xf]  ;;  %v6834_v27 = vld [vmem:[%s10496_s7 + $0xb8] sm:$0xf0]  ;;  %v5291_v56 = vor.u32 %v6788_v10, %v5290_v12  ;;  %v5418_v12 = vld [vmem:[%s10496_s7 + $0x3c] sm:$0xf0] }
 0x663   :  { %v5424_v10 = vld [vmem:[%s10496_s7 + $0x38] sm:$0xf] }
 0x664   :  { %v8318_v43 = vadd.f32 %v1413_v42, %v1412_v39  ;;  %v6797_v39 = vld [vmem:[%s10495_s5 + $0x50] sm:$0xf0]  ;;  %v6796_v42 = vld [vmem:[%s10495_s5 + $0x4c] sm:$0xf]  ;;  %1711 = vmatpush.bf16.msra.mxu0 %v5343_v29  ;;  %v5295_v29 = vor.u32 %v6787_v28, %v5292_v34  ;;  %v6814_v34 = vld [vmem:[%s10496_s7 + $0x1c] sm:$0xf] }
 0x666   :  { %v8322_v14 = vpack.c.bf16 %v8318_v43, %v8318_v43 }
 0x668   :  { %1488 = vmatmul.bf16.vlgmr.msrb.gmra.mxu2 %v8322_v14 }
 0x678   :  { %1902 = vmatmul.bf16.vlgmr.msra.gmra.mxu2 %v8322_v14 }
 0x6eb   :  { %v1489_v40 = vpop.f32.mrf.mxu2 }
 0x6ec   :  { %v1490_v45 = vadd.f32 %v8329_v44, %v1489_v40  ;;  %v5359_v40 = vor.u32 %v6804_v3, %v5358_v59  ;;  %v5310_v59 = vld [vmem:[%s10495_s5 + $0x20] sm:$0xf]  ;;  %v6792_v3 = vld [vmem:[%s10495_s5 + $0x28] sm:$0xf0] }
 0x6ee   :  { %5283 = vst [vmem:[%s10501_s11 + $0x8] sm:$0xff] %v1490_v45  ;;  %v1497_v20 = vxor.u32 2147483647, %v1490_v45  ;;  %vm1496_vm10 = vcmp.lt.s32.totalorder %v1490_v45, 0  ;;  %1723 = vmatpush.bf16.msra.mxu1 %v5359_v40  ;;  %v6829_v40 = vld [vmem:[%s10496_s7 + $0x94] sm:$0xf] }
 0x6f0   :  { %v1498_v52 = vsel %vm1496_vm10, %v1497_v20, %v1490_v45  ;;  %v5328_v45 = vld [vmem:[%s10495_s5 + $0x54] sm:$0xf0]  ;;  %v5346_v20 = vld [vmem:[%s10495_s5 + $0x68] sm:$0xf] }
 0x6f1   :  { %v1499_v54 = vand.u32 4294967168, %v1498_v52  ;;  %v6801_v52 = vld [vmem:[%s10495_s5 + $0x70] sm:$0xf0] }
 0x6f3   :  { %v1491_v57 = vpop.f32.mrf.mxu2  ;;  %v1500_v58 = vor.u32 %v1499_v54, %v8336_v49  ;;  %v5327_v54 = vor.u32 %v6797_v39, %v5326_v13  ;;  %v5481_v39 = vor.u32 %v6832_v38, %v5478_v41  ;;  %v5406_v38 = vld [vmem:[%s10496_s7 + $0x24] sm:$0xf0]  ;;  %v5412_v41 = vld [vmem:[%s10496_s7 + $0x20] sm:$0xf] }
 0x6f4   :  { %v5331_v57 = vor.u32 %v6796_v42, %v5328_v45  ;;  %v5485_v42 = vor.u32 %v6834_v27, %v5484_v47  ;;  %v5466_v45 = vld [vmem:[%s10496_s7 + $0x9c] sm:$0xf0]  ;;  %v6816_v47 = vld [vmem:[%s10496_s7 + $0x28] sm:$0xf0]  ;;  %v5409_v27 = vor.u32 %v6814_v34, %v5406_v38 }
 0x6f5   :  { %v1502_v60 = vshra.s32 %v1500_v58, 16  ;;  %v1501_v32 = vand.u32 65535, %v1500_v58  ;;  %v5314_v58 = vld [vmem:[%s10495_s5 + $0x30] sm:$0xf]  ;;  %1699 = vmatpush.bf16.msrb.mxu3 %v5327_v54  ;;  %v5311_v54 = vor.u32 %v6792_v3, %v5310_v59  ;;  %v5400_v3 = vld [vmem:[%s10496_s7 + $0x8] sm:$0xf] }
 0x6f6   :  { %1712 = vmatpush.bf16.msra.mxu0 %v5331_v57  ;;  %v5394_v59 = vld [vmem:[%s10496_s7 + $0xc] sm:$0xf0] }
 0x6f7   :  { %v1504_v61 = vcvt.s32.f32 %v1502_v60  ;;  %v1503_v9 = vcvt.s32.f32 %v1501_v32  ;;  %v6794_v60 = vld [vmem:[%s10495_s5 + $0x38] sm:$0xf0]  ;;  %v5316_v32 = vld [vmem:[%s10495_s5 + $0x3c] sm:$0xf0] }
 0x6f8   :  { %v5315_v53 = vor.u32 %v6794_v60, %v5314_v58  ;;  %v5298_v58 = vld [vmem:[%s10495_s5 + $0x8] sm:$0xf]  ;;  %v6789_v60 = vld [vmem:[%s10495_s5 + $0x10] sm:$0xf0] }
 0x6f9   :  { %1505 = vmax.xlane.f32.xlu0 %v1504_v61  ;;  %v5299_v16 = vor.u32 %v6789_v60, %v5298_v58 }
 0x6fa   :  { %1700 = vmatpush.bf16.msrb.mxu3 %v5315_v53 }
 0x6fb   :  { %v8339_v62 = vpop.f32.mrf.mxu2 }
 0x6fc   :  { %v1904_v58 = vadd.f32 %v8339_v62, %v8239_v11  ;;  %v5713_v62 = vld [vmem:[%s10496_s7 + $0xa8] sm:$0xf] }
 0x6fe   :  { %1701 = vmatpush.bf16.msrb.mxu3 %v5303_v46  ;;  %v6822_v46 = vld [vmem:[%s10496_s7 + $0x58] sm:$0xf0] }
 0x702   :  { %1702 = vmatpush.bf16.msrb.mxu3 %v5291_v56  ;;  %v6811_v56 = vld [vmem:[%s10496_s7 + $0x4] sm:$0xf] }
 0x703   :  { %v1905_v63 = vpop.f32.mrf.mxu2  ;;  %v5397_v5 = vor.u32 %v6811_v56, %v5394_v59  ;;  %v5653_v59 = vld [vmem:[%s10496_s7 + $0x30] sm:$0xf] }
 0x704   :  { %v5347_v63 = vor.u32 %v6801_v52, %v5346_v20  ;;  %v5472_v20 = vld [vmem:[%s10496_s7 + $0x98] sm:$0xf]  ;;  %v6831_v52 = vld [vmem:[%s10496_s7 + $0xa0] sm:$0xf0] }
 0x706   :  { %1724 = vmatpush.bf16.msra.mxu1 %v5347_v63  ;;  %1907 = vmatpush.bf16.msra.mxu3 %v5481_v39  ;;  %v5473_v63 = vor.u32 %v6831_v52, %v5472_v20  ;;  %v6842_v39 = vld [vmem:[%s10498_s9 + $0x38] sm:$0xff] }
 0x707   :  { %v6838_v52 = vld [vmem:[%s10498_s9 + $0x18] sm:$0xff] }
 0x76c   :  { %v8346_v4 = vpop.xlane.xlu0 %1505 }
 0x76d   :  { %vm1507_vm12 = vcmp.eq.f32.partialorder %v1504_v61, %v8346_v4  ;;  %v6793_v61 = vld [vmem:[%s10495_s5 + $0x34] sm:$0xf]  ;;  %v1512_v8 = vcvt.f32.s32 %v8346_v4 }
 0x76e   :  { %v1508_v51 = vsel %vm1507_vm12, %v1503_v9, -inf  ;;  %v5334_v9 = vld [vmem:[%s10495_s5 + $0x50] sm:$0xf]  ;;  %v5319_v18 = vor.u32 %v6793_v61, %v5316_v32  ;;  %v5469_v61 = vor.u32 %v6829_v40, %v5466_v45  ;;  %v6826_v32 = vld [vmem:[%s10496_s7 + $0x7c] sm:$0xf]  ;;  %v6840_v40 = vld [vmem:[%s10498_s9 + $0x28] sm:$0xff] }
 0x76f   :  { %1509 = vmax.xlane.f32.xlu1 %v1508_v51  ;;  %v6798_v51 = vld [vmem:[%s10495_s5 + $0x58] sm:$0xf0]  ;;  %v1513_v21 = vshll.u32 %v1512_v8, 16  ;;  %v6828_v8 = vld [vmem:[%s10496_s7 + $0x88] sm:$0xf0]  ;;  %v6839_v45 = vld [vmem:[%s10498_s9 + $0x20] sm:$0xff] }
 0x770   :  { %v5335_v4 = vor.u32 %v6798_v51, %v5334_v9  ;;  %1713 = vmatpush.bf16.msra.mxu0 %v5319_v18  ;;  %v5454_v9 = vld [vmem:[%s10496_s7 + $0x84] sm:$0xf0]  ;;  %v5460_v51 = vld [vmem:[%s10496_s7 + $0x80] sm:$0xf]  ;;  %1908 = vmatpush.bf16.msra.mxu3 %v5469_v61 }
 0x771   :  { %v5457_v53 = vor.u32 %v6826_v32, %v5454_v9  ;;  %v5461_v18 = vor.u32 %v6828_v8, %v5460_v51  ;;  %v6836_v9 = vld [vmem:[%s10498_s9 + $0x8] sm:$0xff] }
 0x772   :  { %1725 = vmatpush.bf16.msra.mxu1 %v5335_v4  ;;  %v6825_v4 = vld [vmem:[%s10496_s7 + $0x70] sm:$0xf0] }
 0x773   :  { %v5449_v26 = vor.u32 %v6825_v4, %v5448_v25  ;;  %v6886_v25 = vld [vmem:[%s10496_s7 + $0x98] sm:$0xf0] }
 0x774   :  { %1714 = vmatpush.bf16.msra.mxu0 %v5307_v6  ;;  %1909 = vmatpush.bf16.msra.mxu3 %v5457_v53  ;;  %v6817_v6 = vld [vmem:[%s10496_s7 + $0x34] sm:$0xf]  ;;  %v5702_v4 = vor.u32 %v6886_v25, %v5701_v24 }
 0x775   :  { %v6889_v53 = vld [vmem:[%s10496_s7 + $0xb0] sm:$0xf0] }
 0x776   :  { %1726 = vmatpush.bf16.msra.mxu1 %v5323_v17  ;;  %v5421_v17 = vor.u32 %v6817_v6, %v5418_v12 }
 0x778   :  { %1715 = vmatpush.bf16.msra.mxu0 %v5295_v29  ;;  %1910 = vmatpush.bf16.msra.mxu3 %v5445_v2  ;;  %v5689_v2 = vld [vmem:[%s10496_s7 + $0x78] sm:$0xf] }
 0x77a   :  { %1727 = vmatpush.bf16.msra.mxu1 %v5311_v54 }
 0x77c   :  { %1920 = vmatpush.bf16.msrb.mxu0 %v5485_v42  ;;  %v6841_v42 = vld [vmem:[%s10498_s9 + $0x30] sm:$0xff] }
 0x77e   :  { %1728 = vmatpush.bf16.msra.mxu1 %v5299_v16  ;;  %v6835_v16 = vld [vmem:[%s10498_s9] sm:$0xff] }
 0x780   :  { %1921 = vmatpush.bf16.msrb.mxu0 %v5473_v63 }
 0x782   :  { %2045 = vmatpush.bf16.msrb.mxu1 %v6842_v39  ;;  %v5641_v39 = vld [vmem:[%s10496_s7 + $0x18] sm:$0xf] }
 0x784   :  { %1922 = vmatpush.bf16.msrb.mxu0 %v5461_v18  ;;  %v5714_v18 = vor.u32 %v6889_v53, %v5713_v62 }
 0x786   :  { %2046 = vmatpush.bf16.msrb.mxu1 %v6841_v42  ;;  %v6871_v42 = vld [vmem:[%s10496_s7 + $0x20] sm:$0xf0] }
 0x788   :  { %1923 = vmatpush.bf16.msrb.mxu0 %v5449_v26  ;;  %v6883_v26 = vld [vmem:[%s10496_s7 + $0x80] sm:$0xf0] }
 0x78a   :  { %2047 = vmatpush.bf16.msrb.mxu1 %v6840_v40 }
 0x78e   :  { %2048 = vmatpush.bf16.msrb.mxu1 %v6839_v45 }
 0x792   :  { %2049 = vmatpush.bf16.msrb.mxu1 %v6838_v52 }
 0x7e2   :  { %v1510_v15 = vpop.xlane.xlu1 %1509 }
 0x7e3   :  { %v1511_v33 = vcvt.f32.s32 %v1510_v15  ;;  %v5430_v15 = vld [vmem:[%s10496_s7 + $0x54] sm:$0xf0] }
 0x7e5   :  { %v1514_v19 = vadd.s32 %v1513_v21, %v1511_v33  ;;  %v5436_v21 = vld [vmem:[%s10496_s7 + $0x50] sm:$0xf]  ;;  %v5433_v33 = vor.u32 %v6820_v30, %v5430_v15 }
 0x7e6   :  { %v5437_v0 = vor.u32 %v6822_v46, %v5436_v21  ;;  %v5690_v21 = vor.u32 %v6883_v26, %v5689_v2  ;;  %v5677_v46 = vld [vmem:[%s10496_s7 + $0x60] sm:$0xf] }
 0x7e7   :  { %v1515_v50 = vand.u32 127, %v1514_v19  ;;  %1911 = vmatpush.bf16.msra.mxu3 %v5433_v33  ;;  %v6819_v19 = vld [vmem:[%s10496_s7 + $0x40] sm:$0xf0] }
 0x7e8   :  { %1924 = vmatpush.bf16.msrb.mxu0 %v5437_v0  ;;  %v5425_v28 = vor.u32 %v6819_v19, %v5424_v10  ;;  %v6880_v0 = vld [vmem:[%s10496_s7 + $0x68] sm:$0xf0] }
 0x7e9   :  { %v1516_v13 = vsub.s32 127, %v1515_v50  ;;  %v5413_v50 = vor.u32 %v6816_v47, %v5412_v41  ;;  %v5678_v19 = vor.u32 %v6880_v0, %v5677_v46  ;;  %v5665_v47 = vld [vmem:[%s10496_s7 + $0x48] sm:$0xf] }
 0x7eb   :  { %5284 = vst.msk [vmem:[%s10502_s12 + $0x8] sm:$0xff] %vm959_vm11, %v1516_v13  ;;  %v1527_v57 = vsel %vm8507_vm14, %v5286_v1, %v1516_v13  ;;  %1912 = vmatpush.bf16.msra.mxu3 %v5421_v17  ;;  %v6813_v1 = vld [vmem:[%s10496_s7 + $0x10] sm:$0xf0] }
 0x7ec   :  { %1529 = vperm.xlu1 %7127, %v1527_v57   ;;  %1925 = vmatpush.bf16.msrb.mxu0 %v5425_v28  ;;  %v5401_v29 = vor.u32 %v6813_v1, %v5400_v3  ;;  %v6837_v57 = vld [vmem:[%s10498_s9 + $0x10] sm:$0xff]  ;;  %v6874_v3 = vld [vmem:[%s10496_s7 + $0x38] sm:$0xf0] }
 0x7ed   :  { %2050 = vmatpush.bf16.msrb.mxu1 %v6837_v57  ;;  %v5642_v57 = vor.u32 %v6871_v42, %v5641_v39  ;;  %v6861_v42 = vld [vmem:[%s10495_s5 + $0x94] sm:$0xf] }
 0x7ef   :  { %1913 = vmatpush.bf16.msra.mxu3 %v5409_v27  ;;  %v6877_v27 = vld [vmem:[%s10496_s7 + $0x50] sm:$0xf0] }
 0x7f0   :  { %1926 = vmatpush.bf16.msrb.mxu0 %v5413_v50  ;;  %v5666_v56 = vor.u32 %v6877_v27, %v5665_v47 }
 0x7f1   :  { %2051 = vmatpush.bf16.msrb.mxu1 %v6836_v9 }
 0x7f3   :  { %1914 = vmatpush.bf16.msra.mxu3 %v5397_v5 }
 0x7f4   :  { %1927 = vmatpush.bf16.msrb.mxu0 %v5401_v29  ;;  %v5654_v29 = vor.u32 %v6874_v3, %v5653_v59  ;;  %v6865_v59 = vld [vmem:[%s10495_s5 + $0xb0] sm:$0xf0]  ;;  %v6864_v3 = vld [vmem:[%s10495_s5 + $0xac] sm:$0xf] }
 0x7f5   :  { %2052 = vmatpush.bf16.msrb.mxu1 %v6835_v16 }
 0x85e   :  { %v1530_v13 = vpop.permute.xlu1 %1529 }
 0x85f   :  { %vm1531_vm15 = vcmp.eq.s32.totalorder %v8078_v31, %v1530_v13 }
 0x860   :  { %vm5384_vm0 = vmpackc.low %vm1531_vm15, %vm1531_vm15 }
 0x861   :  { %5385 = vmatmul.msk.bf16.vlgmr.msrb.gmra.mxu3 %vm5384_vm0, %v7284_v48  ;;  %5387 = vmatmul.msk.bf16.vlgmr.msra.gmra.mxu0 %vm5384_vm0, %v7284_v48 }
 0x862   :  { %5389 = vmatmul.msk.bf16.vlgmr.msra.gmra.mxu1 %vm5384_vm0, %v7284_v48 }
 0x863   :  { %2459 = vmatpush.bf16.msra.mxu1 %v5714_v18 }
 0x867   :  { %2460 = vmatpush.bf16.msra.mxu1 %v5702_v4 }
 0x86b   :  { %2461 = vmatpush.bf16.msra.mxu1 %v5690_v21 }
 0x86f   :  { %2462 = vmatpush.bf16.msra.mxu1 %v5678_v19 }
 0x871   :  { %1915 = vmatmul.bf16.vlgmr.msra.gmra.mxu3 %v8322_v14  ;;  %1928 = vmatmul.bf16.vlgmr.msrb.gmra.mxu0 %v8322_v14 }
 0x873   :  { %2463 = vmatpush.bf16.msra.mxu1 %v5666_v56  ;;  %v5611_v56 = vld [vmem:[%s10495_s5 + $0xa8] sm:$0xf] }
 0x877   :  { %2464 = vmatpush.bf16.msra.mxu1 %v5654_v29  ;;  %v5599_v29 = vld [vmem:[%s10495_s5 + $0x90] sm:$0xf] }
 0x87b   :  { %2465 = vmatpush.bf16.msra.mxu1 %v5642_v57  ;;  %v6858_v57 = vld [vmem:[%s10495_s5 + $0x7c] sm:$0xf] }
 0x8de   :  { %v1717_v14 = vpop.f32.mrf.mxu0 }
 0x8df   :  { %v8625_v20 = vpop.f32.mrf.mxu1  ;;  %v1718_v6 = vadd.f32 %v1717_v14, %v8220_v36 }
 0x8e4   :  { %v1704_v54 = vpop.f32.mrf.mxu3 }
 0x8e5   :  { %v1705_v60 = vadd.f32 %v1704_v54, %v8236_v7 }
 0x8e6   :  { %v1719_v61 = vpop.f32.mrf.mxu0 }
 0x8e7   :  { %v1933_v63 = vadd.f32 %v1904_v58, %v1705_v60  ;;  %v1732_v32 = vpop.f32.mrf.mxu1  ;;  %v5629_v58 = vld [vmem:[%s10496_s7] sm:$0xf]  ;;  %v6868_v60 = vld [vmem:[%s10496_s7 + $0x8] sm:$0xf0] }
 0x8e8   :  { %v5630_v32 = vor.u32 %v6868_v60, %v5629_v58  ;;  %v5589_v58 = vld [vmem:[%s10495_s5 + $0x84] sm:$0xf0]  ;;  %v5619_v60 = vld [vmem:[%s10495_s5 + $0xb0] sm:$0xf] }
 0x8e9   :  { %v5486_v51 = vmul.f32 -1.442695, %v1933_v63 }
 0x8ea   :  { %2466 = vmatpush.bf16.msra.mxu1 %v5630_v32 }
 0x8eb   :  { %7220 = vpow2.f32 %v5486_v51 }
 0x8ec   :  { %v1706_v8 = vpop.f32.mrf.mxu3 }
 0x8ed   :  { %v1731_v8 = vadd.f32 %v8625_v20, %v8305_v35 }
 0x8ee   :  { %v1929_v23 = vpop.f32.mrf.mxu0 }
 0x8ef   :  { %v1930_v63 = vadd.f32 %v1929_v23, %v8302_v22 }
 0x8f1   :  { %v7221_v30 = vpop.eup %7220 }
 0x8f2   :  { %v1937_v15 = vadd.f32 1.0, %v7221_v30 }
 0x8f4   :  { %7222 = vrcp.f32 %v1937_v15  ;;  %v1916_v33 = vpop.f32.mrf.mxu3  ;;  %v1949_v5 = vand.u32 2147483648, %v1937_v15  ;;  %v1947_v13 = vand.u32 2147483647, %v1937_v15  ;;  %vm1943_vm2 = vweird.f32 %v1937_v15 }
 0x8f5   :  { %v1917_v12 = vadd.f32 %v1916_v33, %v8226_v55 }
 0x8f6   :  { %v1931_v10 = vpop.f32.mrf.mxu0  ;;  %v1950_v54 = vor.u32 1.1754944e-38, %v1949_v5  ;;  %vm1948_vm4 = vcmp.eq.f32.partialorder %v1947_v13, 8.507059e+37  ;;  %v5613_v5 = vld [vmem:[%s10495_s5 + $0xb4] sm:$0xf0]  ;;  %v6862_v13 = vld [vmem:[%s10495_s5 + $0x98] sm:$0xf0] }
 0x8f7   :  { %v1953_v17 = vadd.f32 %v1917_v12, %v1718_v6  ;;  %v5616_v39 = vor.u32 %v6864_v3, %v5613_v5  ;;  %v6847_v5 = vld [vmem:[%s10495_s5 + $0x20] sm:$0xf0] }
 0x8f9   :  { %v5487_v28 = vmul.f32 -1.442695, %v1953_v17  ;;  %2273 = vmatpush.bf16.msrb.mxu3 %v5616_v39  ;;  %v5559_v39 = vld [vmem:[%s10495_s5 + $0x38] sm:$0xf] }
 0x8fa   :  { %v7223_v34 = vpop.eup %7222 }
 0x8fb   :  { %v1939_v38 = vmul.f32 %v7223_v34, %v1937_v15  ;;  %7224 = vpow2.f32 %v5487_v28  ;;  %vm1944_vm1 = vweird.f32 %v7223_v34 }
 0x8fc   :  { %v1918_v41 = vpop.f32.mrf.mxu3  ;;  %vm1945_vm3 = vmor %vm1943_vm2, %vm1944_vm1 }
 0x8fd   :  { %v1940_v50 = vsub.f32 1.0, %v1939_v38 }
 0x8ff   :  { %v1941_v1 = vmul.f32 %v7223_v34, %v1940_v50 }
 0x901   :  { %v7225_v40 = vpop.eup %7224  ;;  %v1942_v45 = vadd.f32 %v7223_v34, %v1941_v1  ;;  %v5612_v1 = vor.u32 %v6865_v59, %v5611_v56 }
 0x902   :  { %v1957_v14 = vadd.f32 1.0, %v7225_v40  ;;  %v5601_v40 = vld [vmem:[%s10495_s5 + $0x9c] sm:$0xf0] }
 0x903   :  { %v1946_v52 = vsel %vm1945_vm3, %v7223_v34, %v1942_v45  ;;  %2260 = vmatpush.bf16.msrb.mxu2 %v5612_v1  ;;  %v5600_v45 = vor.u32 %v6862_v13, %v5599_v29  ;;  %v5539_v1 = vld [vmem:[%s10495_s5 + $0x18] sm:$0xf]  ;;  %v6846_v29 = vld [vmem:[%s10495_s5 + $0x1c] sm:$0xf]  ;;  %v5541_v13 = vld [vmem:[%s10495_s5 + $0x24] sm:$0xf0] }
 0x904   :  { %7226 = vrcp.f32 %v1957_v14  ;;  %v1951_v61 = vsel %vm1948_vm4, %v1950_v54, %v1946_v52  ;;  %v1969_v18 = vand.u32 2147483648, %v1957_v14  ;;  %v1967_v25 = vand.u32 2147483647, %v1957_v14  ;;  %v5587_v52 = vld [vmem:[%s10495_s5 + $0x78] sm:$0xf] }
 0x905   :  { %v1973_v9 = vmul.f32 %v1951_v61, %v1930_v63  ;;  %vm1963_vm6 = vweird.f32 %v1957_v14  ;;  %v6859_v54 = vld [vmem:[%s10495_s5 + $0x80] sm:$0xf0]  ;;  %v6866_v61 = vld [vmem:[%s10495_s5 + $0xb8] sm:$0xf0] }
 0x906   :  { %v1970_v23 = vor.u32 1.1754944e-38, %v1969_v18  ;;  %vm1968_vm8 = vcmp.eq.f32.partialorder %v1967_v25, 8.507059e+37  ;;  %v5620_v63 = vor.u32 %v6866_v61, %v5619_v60  ;;  %v5588_v32 = vor.u32 %v6859_v54, %v5587_v52  ;;  %v5595_v25 = vld [vmem:[%s10495_s5 + $0x80] sm:$0xf]  ;;  %v6844_v60 = vld [vmem:[%s10495_s5 + $0x8] sm:$0xf0] }
 0x907   :  { %v1974_v62 = vadd.f32 %v1973_v9, %v1731_v8  ;;  %2261 = vmatpush.bf16.msrb.mxu2 %v5600_v45  ;;  %v5607_v9 = vld [vmem:[%s10495_s5 + $0x98] sm:$0xf]  ;;  %v5592_v8 = vor.u32 %v6858_v57, %v5589_v58  ;;  %v5540_v52 = vor.u32 %v6847_v5, %v5539_v1  ;;  %v5544_v57 = vor.u32 %v6846_v29, %v5541_v13  ;;  %v5527_v58 = vld [vmem:[%s10495_s5] sm:$0xf]  ;;  %v5679_v1 = vld [vmem:[%s10496_s7 + $0x6c] sm:$0xf0] }
 0x908   :  { %2286 = vmatpush.bf16.msra.mxu0 %v5620_v63  ;;  %v5685_v5 = vld [vmem:[%s10496_s7 + $0x68] sm:$0xf]  ;;  %v6881_v29 = vld [vmem:[%s10496_s7 + $0x70] sm:$0xf0] }
 0x909   :  { %7228 = vtanh.f32 %v1974_v62  ;;  %v6856_v62 = vld [vmem:[%s10495_s5 + $0x68] sm:$0xf0]  ;;  %v5686_v13 = vor.u32 %v6881_v29, %v5685_v5  ;;  %v5926_v5 = vld [vmem:[%s10496_s7 + $0x78] sm:$0xf]  ;;  %v6939_v29 = vld [vmem:[%s10496_s7 + $0x80] sm:$0xf0] }
 0x90a   :  { %v7227_v51 = vpop.eup %7226 }
 0x90b   :  { %v1959_v16 = vmul.f32 %v7227_v51, %v1957_v14  ;;  %vm1964_vm5 = vweird.f32 %v7227_v51  ;;  %v5604_v14 = vor.u32 %v6861_v42, %v5601_v40  ;;  %2262 = vmatpush.bf16.msrb.mxu2 %v5588_v32  ;;  %v6851_v42 = vld [vmem:[%s10495_s5 + $0x40] sm:$0xf0] }
 0x90c   :  { %vm1965_vm7 = vmor %vm1963_vm6, %vm1964_vm5  ;;  %v5560_v61 = vor.u32 %v6851_v42, %v5559_v39  ;;  %v6843_v32 = vld [vmem:[%s10495_s5 + $0x4] sm:$0xf]  ;;  %v6876_v39 = vld [vmem:[%s10496_s7 + $0x4c] sm:$0xf] }
 0x90d   :  { %v1960_v53 = vsub.f32 1.0, %v1959_v16  ;;  %2274 = vmatpush.bf16.msrb.mxu3 %v5604_v14  ;;  %v5575_v16 = vld [vmem:[%s10495_s5 + $0x60] sm:$0xf]  ;;  %v5667_v42 = vld [vmem:[%s10496_s7 + $0x54] sm:$0xf0] }
 0x90f   :  { %v1961_v24 = vmul.f32 %v7227_v51, %v1960_v53  ;;  %v7229_v15 = vpop.eup %7228  ;;  %v6855_v53 = vld [vmem:[%s10495_s5 + $0x64] sm:$0xf] }
 0x911   :  { %v1962_v4 = vadd.f32 %v7227_v51, %v1961_v24  ;;  %v5577_v24 = vld [vmem:[%s10495_s5 + $0x6c] sm:$0xf0]  ;;  %2275 = vmatpush.bf16.msrb.mxu3 %v5592_v8  ;;  %v5715_v8 = vld [vmem:[%s10496_s7 + $0xb4] sm:$0xf0] }
 0x913   :  { %v1966_v2 = vsel %vm1965_vm7, %v7227_v51, %v1962_v4  ;;  %v6863_v51 = vld [vmem:[%s10495_s5 + $0xa0] sm:$0xf0]  ;;  %v6860_v4 = vld [vmem:[%s10495_s5 + $0x88] sm:$0xf0] }
 0x914   :  { %v1971_v26 = vsel %vm1968_vm8, %v1970_v23, %v1966_v2  ;;  %v5608_v18 = vor.u32 %v6863_v51, %v5607_v9  ;;  %v5522_v23 = vld [vmem:[%s10503_s4 + $0x2] sm:$0x1]  ;;  %v5576_v2 = vor.u32 %v6856_v62, %v5575_v16  ;;  %v5529_v9 = vld [vmem:[%s10495_s5 + $0xc] sm:$0xf0]  ;;  %v6888_v51 = vld [vmem:[%s10496_s7 + $0xac] sm:$0xf] }
 0x915   :  { %v1976_v30 = vsub.f32 1.0, %v1971_v26  ;;  %v1978_v20 = vmul.f32 %v1971_v26, %v8318_v43  ;;  %v5580_v26 = vor.u32 %v6855_v53, %v5577_v24  ;;  %vm2086_vm12 = vcmp.gt.s32.totalorder %v5522_v23, 0  ;;  %v5721_v16 = vld [vmem:[%s10496_s7 + $0xb0] sm:$0xf]  ;;  %v6890_v62 = vld [vmem:[%s10496_s7 + $0xb8] sm:$0xf0] }
 0x916   :  { %2287 = vmatpush.bf16.msra.mxu0 %v5608_v18  ;;  %2263 = vmatpush.bf16.msrb.mxu2 %v5576_v2  ;;  %v2089_v56 = vsel %vm2086_vm12, 1, %v7283_v37  ;;  %v5528_v18 = vor.u32 %v6844_v60, %v5527_v58  ;;  %v5547_v24 = vld [vmem:[%s10495_s5 + $0x20] sm:$0xf]  ;;  %v5532_v2 = vor.u32 %v6843_v32, %v5529_v9  ;;  %v5661_v58 = vld [vmem:[%s10496_s7 + $0x38] sm:$0xf] }
 0x917   :  { %v1977_v21 = vmul.f32 %v7229_v15, %v1976_v30  ;;  %v5563_v30 = vld [vmem:[%s10495_s5 + $0x48] sm:$0xf]  ;;  %v6853_v15 = vld [vmem:[%s10495_s5 + $0x50] sm:$0xf0]  ;;  %2276 = vmatpush.bf16.msrb.mxu3 %v5580_v26  ;;  %v2090_v54 = vperm.slane %v2089_v56, 0 }
 0x918   :  { %v6870_v32 = vld [vmem:[%s10496_s7 + $0x1c] sm:$0xf]  ;;  %v5643_v9 = vld [vmem:[%s10496_s7 + $0x24] sm:$0xf0] }
 0x919   :  { %v8696_v33 = vadd.f32 %v1978_v20, %v1977_v21  ;;  %v6852_v21 = vld [vmem:[%s10495_s5 + $0x4c] sm:$0xf]  ;;  %v5596_v20 = vor.u32 %v6860_v4, %v5595_v25  ;;  %v5523_v4 = vld [vmem:[%s10494_s3 + $0x10] sm:$0xff]  ;;  %vm8872_vm13 = vcmp.eq.s32.totalorder %v2090_v54, 1 }
 0x91a   :  { %v6848_v25 = vld [vmem:[%s10495_s5 + $0x28] sm:$0xf0]  ;;  %v6873_v54 = vld [vmem:[%s10496_s7 + $0x34] sm:$0xf] }
 0x91b   :  { %v8700_v46 = vpack.c.bf16 %v8696_v33, %v8696_v33  ;;  %2288 = vmatpush.bf16.msra.mxu0 %v5596_v20  ;;  %v5703_v20 = vld [vmem:[%s10496_s7 + $0x9c] sm:$0xf0] }
 0x91d   :  { %2053 = vmatmul.bf16.vlgmr.msrb.gmra.mxu1 %v8700_v46 }
 0x92d   :  { %2467 = vmatmul.bf16.vlgmr.msra.gmra.mxu1 %v8700_v46 }
 0x99a   :  { %v2054_v0 = vpop.f32.mrf.mxu1 }
 0x99b   :  { %v2055_v6 = vadd.f32 %v8329_v44, %v2054_v0  ;;  %v5565_v0 = vld [vmem:[%s10495_s5 + $0x54] sm:$0xf0] }
 0x99d   :  { %5520 = vst [vmem:[%s10501_s11 + $0x10] sm:$0xff] %v2055_v6  ;;  %v2062_v12 = vxor.u32 2147483647, %v2055_v6  ;;  %vm2061_vm9 = vcmp.lt.s32.totalorder %v2055_v6, 0 }
 0x99f   :  { %v2063_v43 = vsel %vm2061_vm9, %v2062_v12, %v2055_v6  ;;  %v5583_v6 = vld [vmem:[%s10495_s5 + $0x68] sm:$0xf]  ;;  %v6857_v12 = vld [vmem:[%s10495_s5 + $0x70] sm:$0xf0] }
 0x9a0   :  { %v2064_v10 = vand.u32 4294967168, %v2063_v43  ;;  %v5564_v43 = vor.u32 %v6853_v15, %v5563_v30  ;;  %v5718_v30 = vor.u32 %v6888_v51, %v5715_v8  ;;  %v5722_v15 = vor.u32 %v6890_v62, %v5721_v16  ;;  %v5649_v51 = vld [vmem:[%s10496_s7 + $0x20] sm:$0xf]  ;;  %v6872_v8 = vld [vmem:[%s10496_s7 + $0x28] sm:$0xf0] }
 0x9a1   :  { %v5646_v16 = vor.u32 %v6870_v32, %v5643_v9  ;;  %v5650_v62 = vor.u32 %v6872_v8, %v5649_v51  ;;  %v5902_v51 = vld [vmem:[%s10496_s7 + $0x48] sm:$0xf]  ;;  %v6933_v8 = vld [vmem:[%s10496_s7 + $0x50] sm:$0xf0] }
 0x9a2   :  { %v2056_v17 = vpop.f32.mrf.mxu1  ;;  %v2065_v19 = vor.u32 %v2064_v10, %v8336_v49  ;;  %v5568_v10 = vor.u32 %v6852_v21, %v5565_v0  ;;  %2264 = vmatpush.bf16.msrb.mxu2 %v5564_v43  ;;  %v6885_v21 = vld [vmem:[%s10496_s7 + $0x94] sm:$0xf]  ;;  %v5709_v0 = vld [vmem:[%s10496_s7 + $0x98] sm:$0xf] }
 0x9a3   :  { %v5551_v17 = vld [vmem:[%s10495_s5 + $0x30] sm:$0xf] }
 0x9a4   :  { %v2067_v28 = vshra.s32 %v2065_v19, 16  ;;  %v2066_v47 = vand.u32 65535, %v2065_v19  ;;  %v6850_v19 = vld [vmem:[%s10495_s5 + $0x38] sm:$0xf0]  ;;  %2277 = vmatpush.bf16.msrb.mxu3 %v5568_v10  ;;  %v5535_v10 = vld [vmem:[%s10495_s5 + $0x8] sm:$0xf] }
 0x9a5   :  { %v5552_v59 = vor.u32 %v6850_v19, %v5551_v17  ;;  %v6845_v17 = vld [vmem:[%s10495_s5 + $0x10] sm:$0xf0]  ;;  %v5706_v19 = vor.u32 %v6885_v21, %v5703_v20  ;;  %v6895_v21 = vld [vmem:[%s10498_s9 + $0x20] sm:$0xff]  ;;  %v6894_v20 = vld [vmem:[%s10498_s9 + $0x18] sm:$0xff] }
 0x9a6   :  { %v2069_v34 = vcvt.s32.f32 %v2067_v28  ;;  %v2068_v44 = vcvt.s32.f32 %v2066_v47  ;;  %v6849_v28 = vld [vmem:[%s10495_s5 + $0x34] sm:$0xf]  ;;  %v5571_v47 = vld [vmem:[%s10495_s5 + $0x50] sm:$0xf] }
 0x9a7   :  { %2265 = vmatpush.bf16.msrb.mxu2 %v5552_v59 }
 0x9a8   :  { %2070 = vmax.xlane.f32.xlu2 %v2069_v34 }
 0x9aa   :  { %v8709_v38 = vpop.f32.mrf.mxu1 }
 0x9ab   :  { %2266 = vmatpush.bf16.msrb.mxu2 %v5540_v52 }
 0x9af   :  { %2267 = vmatpush.bf16.msrb.mxu2 %v5528_v18  ;;  %v5631_v18 = vld [vmem:[%s10496_s7 + $0xc] sm:$0xf0] }
 0x9b2   :  { %v2470_v41 = vpop.f32.mrf.mxu1 }
 0x9b3   :  { %v5553_v41 = vld [vmem:[%s10495_s5 + $0x3c] sm:$0xf0]  ;;  %2472 = vmatpush.bf16.msra.mxu2 %v5718_v30  ;;  %v6897_v30 = vld [vmem:[%s10498_s9 + $0x30] sm:$0xff] }
 0x9b4   :  { %v5556_v3 = vor.u32 %v6849_v28, %v5553_v41  ;;  %v5691_v41 = vld [vmem:[%s10496_s7 + $0x84] sm:$0xf0] }
 0x9b6   :  { %2278 = vmatpush.bf16.msrb.mxu3 %v5556_v3  ;;  %v6879_v3 = vld [vmem:[%s10496_s7 + $0x64] sm:$0xf] }
 0x9b7   :  { %2473 = vmatpush.bf16.msra.mxu2 %v5706_v19 }
 0x9ba   :  { %2279 = vmatpush.bf16.msrb.mxu3 %v5544_v57  ;;  %v5655_v57 = vld [vmem:[%s10496_s7 + $0x3c] sm:$0xf0] }
 0x9bb   :  { %v5658_v60 = vor.u32 %v6873_v54, %v5655_v57 }
 0x9be   :  { %2280 = vmatpush.bf16.msrb.mxu3 %v5532_v2 }
 0x9c2   :  { %2485 = vmatpush.bf16.msra.mxu3 %v5722_v15  ;;  %v6896_v15 = vld [vmem:[%s10498_s9 + $0x28] sm:$0xff] }
 0xa1b   :  { %v8711_v27 = vpop.xlane.xlu2 %2070 }
 0xa1c   :  { %vm2072_vm10 = vcmp.eq.f32.partialorder %v2069_v34, %v8711_v27  ;;  %v5584_v34 = vor.u32 %v6857_v12, %v5583_v6  ;;  %v6887_v6 = vld [vmem:[%s10496_s7 + $0xa0] sm:$0xf0]  ;;  %v5548_v12 = vor.u32 %v6848_v25, %v5547_v24  ;;  %v5637_v24 = vld [vmem:[%s10496_s7 + $0x8] sm:$0xf]  ;;  %v6869_v25 = vld [vmem:[%s10496_s7 + $0x10] sm:$0xf0] }
 0xa1d   :  { %v2073_v50 = vsel %vm2072_vm10, %v2068_v44, -inf  ;;  %v6854_v44 = vld [vmem:[%s10495_s5 + $0x58] sm:$0xf0]  ;;  %v5710_v28 = vor.u32 %v6887_v6, %v5709_v0  ;;  %v5638_v23 = vor.u32 %v6869_v25, %v5637_v24 }
 0xa1e   :  { %2074 = vmax.xlane.f32.xlu2 %v2073_v50  ;;  %v2077_v50 = vcvt.f32.s32 %v8711_v27  ;;  %2289 = vmatpush.bf16.msra.mxu0 %v5584_v34  ;;  %v5572_v27 = vor.u32 %v6854_v44, %v5571_v47  ;;  %v6882_v34 = vld [vmem:[%s10496_s7 + $0x7c] sm:$0xf]  ;;  %v5697_v47 = vld [vmem:[%s10496_s7 + $0x80] sm:$0xf]  ;;  %v6884_v44 = vld [vmem:[%s10496_s7 + $0x88] sm:$0xf0] }
 0xa1f   :  { %2486 = vmatpush.bf16.msra.mxu3 %v5710_v28  ;;  %v5694_v56 = vor.u32 %v6882_v34, %v5691_v41  ;;  %v5698_v59 = vor.u32 %v6884_v44, %v5697_v47  ;;  %v6892_v28 = vld [vmem:[%s10498_s9 + $0x8] sm:$0xff]  ;;  %v6891_v44 = vld [vmem:[%s10498_s9] sm:$0xff] }
 0xa20   :  { %v2078_v45 = vshll.u32 %v2077_v50, 16  ;;  %v5536_v50 = vor.u32 %v6845_v17, %v5535_v10 }
 0xa21   :  { %2474 = vmatpush.bf16.msra.mxu2 %v5694_v56 }
 0xa22   :  { %2290 = vmatpush.bf16.msra.mxu0 %v5572_v27  ;;  %v5682_v27 = vor.u32 %v6879_v3, %v5679_v1  ;;  %v6942_v3 = vld [vmem:[%s10496_s7 + $0x98] sm:$0xf0] }
 0xa23   :  { %2487 = vmatpush.bf16.msra.mxu3 %v5698_v59  ;;  %v5938_v59 = vld [vmem:[%s10496_s7 + $0x90] sm:$0xf] }
 0xa24   :  { %v5939_v1 = vor.u32 %v6942_v3, %v5938_v59 }
 0xa25   :  { %2475 = vmatpush.bf16.msra.mxu2 %v5682_v27 }
 0xa26   :  { %2291 = vmatpush.bf16.msra.mxu0 %v5560_v61  ;;  %v6875_v61 = vld [vmem:[%s10496_s7 + $0x40] sm:$0xf0] }
 0xa27   :  { %2488 = vmatpush.bf16.msra.mxu3 %v5686_v13 }
 0xa2a   :  { %2292 = vmatpush.bf16.msra.mxu0 %v5548_v12  ;;  %v6893_v12 = vld [vmem:[%s10498_s9 + $0x10] sm:$0xff] }
 0xa2e   :  { %2293 = vmatpush.bf16.msra.mxu0 %v5536_v50  ;;  %v6945_v50 = vld [vmem:[%s10496_s7 + $0xb0] sm:$0xf0] }
 0xa91   :  { %v2075_v40 = vpop.xlane.xlu2 %2074 }
 0xa92   :  { %v2076_v14 = vcvt.f32.s32 %v2075_v40  ;;  %v5673_v40 = vld [vmem:[%s10496_s7 + $0x50] sm:$0xf] }
 0xa94   :  { %v2079_v63 = vadd.s32 %v2078_v45, %v2076_v14  ;;  %v5670_v45 = vor.u32 %v6876_v39, %v5667_v42  ;;  %v6878_v14 = vld [vmem:[%s10496_s7 + $0x58] sm:$0xf0]  ;;  %v5927_v39 = vor.u32 %v6939_v29, %v5926_v5 }
 0xa95   :  { %v5674_v52 = vor.u32 %v6878_v14, %v5673_v40  ;;  %v6936_v14 = vld [vmem:[%s10496_s7 + $0x68] sm:$0xf0] }
 0xa96   :  { %v2080_v53 = vand.u32 127, %v2079_v63  ;;  %2476 = vmatpush.bf16.msra.mxu2 %v5670_v45  ;;  %v5662_v63 = vor.u32 %v6875_v61, %v5661_v58  ;;  %v5914_v45 = vld [vmem:[%s10496_s7 + $0x60] sm:$0xf] }
 0xa97   :  { %2489 = vmatpush.bf16.msra.mxu3 %v5674_v52  ;;  %v5915_v58 = vor.u32 %v6936_v14, %v5914_v45  ;;  %v9072_v14 = vld [vmem:[%s10497_s10] ss:$0 sm:$0xff] }
 0xa98   :  { %v2081_v26 = vsub.s32 127, %v2080_v53  ;;  %v6867_v53 = vld [vmem:[%s10496_s7 + $0x4] sm:$0xf] }
 0xa9a   :  { %5521 = vst.msk [vmem:[%s10502_s12 + $0x10] sm:$0xff] %vm959_vm11, %v2081_v26  ;;  %v2092_v43 = vsel %vm8872_vm13, %v5523_v4, %v2081_v26  ;;  %2477 = vmatpush.bf16.msra.mxu2 %v5658_v60  ;;  %v5634_v4 = vor.u32 %v6867_v53, %v5631_v18  ;;  %v6898_v26 = vld [vmem:[%s10498_s9 + $0x38] sm:$0xff]  ;;  %v5890_v53 = vld [vmem:[%s10496_s7 + $0x30] sm:$0xf] }
 0xa9b   :  { %2094 = vperm.xlu2 %7128, %v2092_v43   ;;  %2490 = vmatpush.bf16.msra.mxu3 %v5662_v63  ;;  %v2469_v43 = vadd.f32 %v8709_v38, %v8239_v11  ;;  %v5950_v38 = vld [vmem:[%s10496_s7 + $0xa8] sm:$0xf]  ;;  %v6930_v18 = vld [vmem:[%s10496_s7 + $0x38] sm:$0xf0] }
 0xa9c   :  { %2610 = vmatpush.bf16.msrb.mxu0 %v6898_v26  ;;  %v5951_v56 = vor.u32 %v6945_v50, %v5950_v38  ;;  %v6927_v26 = vld [vmem:[%s10496_s7 + $0x20] sm:$0xf0] }
 0xa9e   :  { %2478 = vmatpush.bf16.msra.mxu2 %v5646_v16 }
 0xa9f   :  { %2491 = vmatpush.bf16.msra.mxu3 %v5650_v62  ;;  %v5903_v62 = vor.u32 %v6933_v8, %v5902_v51 }
 0xaa0   :  { %2611 = vmatpush.bf16.msrb.mxu0 %v6897_v30 }
 0xaa2   :  { %2479 = vmatpush.bf16.msra.mxu2 %v5634_v4  ;;  %v5891_v4 = vor.u32 %v6930_v18, %v5890_v53  ;;  %v5848_v53 = vld [vmem:[%s10495_s5 + $0xa8] sm:$0xf]  ;;  %v6921_v18 = vld [vmem:[%s10495_s5 + $0xb0] sm:$0xf0] }
 0xaa3   :  { %2492 = vmatpush.bf16.msra.mxu3 %v5638_v23 }
 0xaa4   :  { %2612 = vmatpush.bf16.msrb.mxu0 %v6896_v15 }
 0xaa8   :  { %2613 = vmatpush.bf16.msrb.mxu0 %v6895_v21 }
 0xaac   :  { %2614 = vmatpush.bf16.msrb.mxu0 %v6894_v20 }
 0xab0   :  { %2615 = vmatpush.bf16.msrb.mxu0 %v6893_v12  ;;  %v5866_v12 = vld [vmem:[%s10496_s7] sm:$0xf] }
 0xab4   :  { %2616 = vmatpush.bf16.msrb.mxu0 %v6892_v28 }
 0xab8   :  { %2617 = vmatpush.bf16.msrb.mxu0 %v6891_v44 }
 0xaf5   :  { %v2095_v2 = vpop.permute.xlu2 %2094 }
 0xaf6   :  { %vm2096_vm14 = vcmp.eq.s32.totalorder %v8078_v31, %v2095_v2  ;;  %v5878_v2 = vld [vmem:[%s10496_s7 + $0x18] sm:$0xf] }
 0xaf7   :  { %vm5621_vm15 = vmpackc.low %vm2096_vm14, %vm2096_vm14 }
 0xaf8   :  { %5622 = vmatmul.msk.bf16.vlgmr.msrb.gmra.mxu2 %vm5621_vm15, %v7284_v48  ;;  %5624 = vmatmul.msk.bf16.vlgmr.msrb.gmra.mxu3 %vm5621_vm15, %v7284_v48 }
 0xaf9   :  { %5626 = vmatmul.msk.bf16.vlgmr.msra.gmra.mxu0 %vm5621_vm15, %v7284_v48 }
 0xafa   :  { %3024 = vmatpush.bf16.msra.mxu0 %v5951_v56 }
 0xafe   :  { %3025 = vmatpush.bf16.msra.mxu0 %v5939_v1 }
 0xb02   :  { %3026 = vmatpush.bf16.msra.mxu0 %v5927_v39 }
 0xb06   :  { %3027 = vmatpush.bf16.msra.mxu0 %v5915_v58 }
 0xb08   :  { %2480 = vmatmul.bf16.vlgmr.msra.gmra.mxu2 %v8700_v46  ;;  %2493 = vmatmul.bf16.vlgmr.msra.gmra.mxu3 %v8700_v46 }
 0xb0a   :  { %3028 = vmatpush.bf16.msra.mxu0 %v5903_v62 }
 0xb0e   :  { %3029 = vmatpush.bf16.msra.mxu0 %v5891_v4  ;;  %v5850_v4 = vld [vmem:[%s10495_s5 + $0xb4] sm:$0xf0] }
 0xb76   :  { %v8990_v46 = vpop.f32.mrf.mxu0 }
 0xb7b   :  { %v2269_v0 = vpop.f32.mrf.mxu2  ;;  %v2282_v6 = vpop.f32.mrf.mxu3 }
 0xb7c   :  { %v2270_v10 = vadd.f32 %v2269_v0, %v8236_v7  ;;  %v2283_v52 = vadd.f32 %v2282_v6, %v8220_v36  ;;  %v5879_v6 = vor.u32 %v6927_v26, %v5878_v2  ;;  %v6918_v2 = vld [vmem:[%s10495_s5 + $0x98] sm:$0xf0] }
 0xb7e   :  { %v2498_v17 = vadd.f32 %v2469_v43, %v2270_v10  ;;  %v2297_v19 = vpop.f32.mrf.mxu0  ;;  %v6924_v43 = vld [vmem:[%s10496_s7 + $0x8] sm:$0xf0]  ;;  %3030 = vmatpush.bf16.msra.mxu0 %v5879_v6  ;;  %v6915_v6 = vld [vmem:[%s10495_s5 + $0x80] sm:$0xf0] }
 0xb7f   :  { %v5867_v19 = vor.u32 %v6924_v43, %v5866_v12  ;;  %v6914_v12 = vld [vmem:[%s10495_s5 + $0x7c] sm:$0xf]  ;;  %v5826_v43 = vld [vmem:[%s10495_s5 + $0x84] sm:$0xf0] }
 0xb80   :  { %v5723_v34 = vmul.f32 -1.442695, %v2498_v17 }
 0xb82   :  { %7230 = vpow2.f32 %v5723_v34  ;;  %3031 = vmatpush.bf16.msra.mxu0 %v5867_v19 }
 0xb83   :  { %v2271_v41 = vpop.f32.mrf.mxu2  ;;  %v2284_v47 = vpop.f32.mrf.mxu3 }
 0xb84   :  { %v2296_v41 = vadd.f32 %v8990_v46, %v8305_v35 }
 0xb88   :  { %v7231_v27 = vpop.eup %7230 }
 0xb89   :  { %v2502_v13 = vadd.f32 1.0, %v7231_v27 }
 0xb8b   :  { %7232 = vrcp.f32 %v2502_v13  ;;  %v2481_v42 = vpop.f32.mrf.mxu2  ;;  %v2494_v40 = vpop.f32.mrf.mxu3  ;;  %v2514_v25 = vand.u32 2147483648, %v2502_v13  ;;  %v2512_v23 = vand.u32 2147483647, %v2502_v13  ;;  %vm2508_vm1 = vweird.f32 %v2502_v13 }
 0xb8c   :  { %v2482_v54 = vadd.f32 %v2481_v42, %v8226_v55  ;;  %v2495_v17 = vadd.f32 %v2494_v40, %v8302_v22 }
 0xb8d   :  { %v2515_v0 = vor.u32 1.1754944e-38, %v2514_v25  ;;  %vm2513_vm3 = vcmp.eq.f32.partialorder %v2512_v23, 8.507059e+37  ;;  %v5849_v25 = vor.u32 %v6921_v18, %v5848_v53  ;;  %v5836_v23 = vld [vmem:[%s10495_s5 + $0x90] sm:$0xf] }
 0xb8e   :  { %v2518_v57 = vadd.f32 %v2482_v54, %v2283_v52 }
 0xb8f   :  { %2825 = vmatpush.bf16.msrb.mxu1 %v5849_v25 }
 0xb90   :  { %v5724_v60 = vmul.f32 -1.442695, %v2518_v57 }
 0xb91   :  { %v7233_v61 = vpop.eup %7232 }
 0xb92   :  { %7234 = vpow2.f32 %v5724_v60  ;;  %v2504_v63 = vmul.f32 %v7233_v61, %v2502_v13  ;;  %vm2509_vm0 = vweird.f32 %v7233_v61 }
 0xb93   :  { %v2483_v32 = vpop.f32.mrf.mxu2  ;;  %v2496_v9 = vpop.f32.mrf.mxu3  ;;  %vm2510_vm2 = vmor %vm2508_vm1, %vm2509_vm0 }
 0xb94   :  { %v2505_v16 = vsub.f32 1.0, %v2504_v63 }
 0xb96   :  { %v2506_v24 = vmul.f32 %v7233_v61, %v2505_v16 }
 0xb98   :  { %v7235_v30 = vpop.eup %7234  ;;  %v2507_v15 = vadd.f32 %v7233_v61, %v2506_v24  ;;  %v6920_v24 = vld [vmem:[%s10495_s5 + $0xac] sm:$0xf] }
 0xb99   :  { %v2522_v21 = vadd.f32 1.0, %v7235_v30  ;;  %v5853_v26 = vor.u32 %v6920_v24, %v5850_v4  ;;  %v6917_v30 = vld [vmem:[%s10495_s5 + $0x94] sm:$0xf]  ;;  %v5776_v4 = vld [vmem:[%s10495_s5 + $0x18] sm:$0xf] }
 0xb9a   :  { %v2511_v20 = vsel %vm2510_vm2, %v7233_v61, %v2507_v15  ;;  %v5838_v15 = vld [vmem:[%s10495_s5 + $0x9c] sm:$0xf0] }
 0xb9b   :  { %7236 = vrcp.f32 %v2522_v21  ;;  %v2516_v10 = vsel %vm2513_vm3, %v2515_v0, %v2511_v20  ;;  %v2534_v50 = vand.u32 2147483648, %v2522_v21  ;;  %v2532_v59 = vand.u32 2147483647, %v2522_v21  ;;  %2838 = vmatpush.bf16.msrb.mxu2 %v5853_v26  ;;  %v5824_v0 = vld [vmem:[%s10495_s5 + $0x78] sm:$0xf] }
 0xb9c   :  { %v2538_v28 = vmul.f32 %v2516_v10, %v2495_v17  ;;  %vm2528_vm5 = vweird.f32 %v2522_v21  ;;  %v5841_v20 = vor.u32 %v6917_v30, %v5838_v15  ;;  %v5856_v10 = vld [vmem:[%s10495_s5 + $0xb0] sm:$0xf]  ;;  %v6922_v17 = vld [vmem:[%s10495_s5 + $0xb8] sm:$0xf0]  ;;  %v5778_v26 = vld [vmem:[%s10495_s5 + $0x24] sm:$0xf0] }
 0xb9d   :  { %v2535_v1 = vor.u32 1.1754944e-38, %v2534_v50  ;;  %vm2533_vm7 = vcmp.eq.f32.partialorder %v2532_v59, 8.507059e+37  ;;  %v5857_v19 = vor.u32 %v6922_v17, %v5856_v10  ;;  %v6911_v50 = vld [vmem:[%s10495_s5 + $0x64] sm:$0xf]  ;;  %v5814_v59 = vld [vmem:[%s10495_s5 + $0x6c] sm:$0xf0] }
 0xb9e   :  { %v2539_v44 = vadd.f32 %v2538_v28, %v2296_v41  ;;  %v5825_v28 = vor.u32 %v6915_v6, %v5824_v0  ;;  %v6919_v41 = vld [vmem:[%s10495_s5 + $0xa0] sm:$0xf0]  ;;  %v5796_v30 = vld [vmem:[%s10495_s5 + $0x38] sm:$0xf]  ;;  %v5764_v10 = vld [vmem:[%s10495_s5] sm:$0xf] }
 0xb9f   :  { %2839 = vmatpush.bf16.msrb.mxu2 %v5841_v20  ;;  %2851 = vmatpush.bf16.msrb.mxu3 %v5857_v19  ;;  %v6907_v15 = vld [vmem:[%s10495_s5 + $0x40] sm:$0xf0]  ;;  %v6900_v17 = vld [vmem:[%s10495_s5 + $0x8] sm:$0xf0] }
 0xba0   :  { %7238 = vtanh.f32 %v2539_v44  ;;  %v5812_v44 = vld [vmem:[%s10495_s5 + $0x60] sm:$0xf]  ;;  %v5797_v19 = vor.u32 %v6907_v15, %v5796_v30  ;;  %v6932_v15 = vld [vmem:[%s10496_s7 + $0x4c] sm:$0xf] }
 0xba1   :  { %v7237_v34 = vpop.eup %7236 }
 0xba2   :  { %v2524_v47 = vmul.f32 %v7237_v34, %v2522_v21  ;;  %vm2529_vm4 = vweird.f32 %v7237_v34  ;;  %v5837_v21 = vor.u32 %v6918_v2, %v5836_v23  ;;  %v6903_v23 = vld [vmem:[%s10495_s5 + $0x20] sm:$0xf0]  ;;  %v6902_v2 = vld [vmem:[%s10495_s5 + $0x1c] sm:$0xf] }
 0xba3   :  { %vm2530_vm6 = vmor %vm2528_vm5, %vm2529_vm4  ;;  %v5777_v6 = vor.u32 %v6903_v23, %v5776_v4  ;;  %v6935_v4 = vld [vmem:[%s10496_s7 + $0x64] sm:$0xf]  ;;  %v5916_v23 = vld [vmem:[%s10496_s7 + $0x6c] sm:$0xf0] }
 0xba4   :  { %v2525_v38 = vsub.f32 1.0, %v2524_v47  ;;  %2826 = vmatpush.bf16.msrb.mxu1 %v5837_v21  ;;  %v5829_v47 = vor.u32 %v6914_v12, %v5826_v43  ;;  %v5781_v43 = vor.u32 %v6902_v2, %v5778_v26  ;;  %v5922_v2 = vld [vmem:[%s10496_s7 + $0x68] sm:$0xf]  ;;  %v5919_v26 = vor.u32 %v6935_v4, %v5916_v23 }
 0xba6   :  { %v2526_v56 = vmul.f32 %v7237_v34, %v2525_v38  ;;  %v7239_v13 = vpop.eup %7238  ;;  %v6912_v38 = vld [vmem:[%s10495_s5 + $0x68] sm:$0xf0]  ;;  %2840 = vmatpush.bf16.msrb.mxu2 %v5829_v47 }
 0xba7   :  { %v6944_v47 = vld [vmem:[%s10496_s7 + $0xac] sm:$0xf] }
 0xba8   :  { %v2527_v3 = vadd.f32 %v7237_v34, %v2526_v56  ;;  %2827 = vmatpush.bf16.msrb.mxu1 %v5825_v28 }
 0xbaa   :  { %v2531_v5 = vsel %vm2530_vm6, %v7237_v34, %v2527_v3  ;;  %v5844_v34 = vld [vmem:[%s10495_s5 + $0x98] sm:$0xf]  ;;  %v5832_v3 = vld [vmem:[%s10495_s5 + $0x80] sm:$0xf] }
 0xbab   :  { %v2536_v29 = vsel %vm2533_vm7, %v2535_v1, %v2531_v5  ;;  %v5845_v56 = vor.u32 %v6919_v41, %v5844_v34  ;;  %v6916_v1 = vld [vmem:[%s10495_s5 + $0x88] sm:$0xf0]  ;;  %v5759_v5 = vld [vmem:[%s10503_s4 + $0x3] sm:$0x1]  ;;  %v6899_v34 = vld [vmem:[%s10495_s5 + $0x4] sm:$0xf] }
 0xbac   :  { %v2541_v27 = vsub.f32 1.0, %v2536_v29  ;;  %v2543_v46 = vmul.f32 %v2536_v29, %v8696_v33  ;;  %v5813_v29 = vor.u32 %v6912_v38, %v5812_v44  ;;  %vm2651_vm10 = vcmp.gt.s32.totalorder %v5759_v5, 0  ;;  %v5766_v41 = vld [vmem:[%s10495_s5 + $0xc] sm:$0xf0]  ;;  %v5952_v44 = vld [vmem:[%s10496_s7 + $0xb4] sm:$0xf0] }
 0xbad   :  { %2852 = vmatpush.bf16.msrb.mxu3 %v5845_v56  ;;  %v2654_v18 = vsel %vm2651_vm10, 1, %v7283_v37  ;;  %v5958_v38 = vld [vmem:[%s10496_s7 + $0xb0] sm:$0xf]  ;;  %v5760_v5 = vld [vmem:[%s10494_s3 + $0x18] sm:$0xff] }
 0xbae   :  { %v2542_v39 = vmul.f32 %v7239_v13, %v2541_v27  ;;  %v5817_v27 = vor.u32 %v6911_v50, %v5814_v59  ;;  %v5800_v13 = vld [vmem:[%s10495_s5 + $0x48] sm:$0xf]  ;;  %2828 = vmatpush.bf16.msrb.mxu1 %v5813_v29  ;;  %v2655_v12 = vperm.slane %v2654_v18, 0  ;;  %v6946_v50 = vld [vmem:[%s10496_s7 + $0xb8] sm:$0xf0]  ;;  %v5765_v59 = vor.u32 %v6900_v17, %v5764_v10 }
 0xbaf   :  { %v5892_v10 = vld [vmem:[%s10496_s7 + $0x3c] sm:$0xf0]  ;;  %v5898_v17 = vld [vmem:[%s10496_s7 + $0x38] sm:$0xf] }
 0xbb0   :  { %v9061_v42 = vadd.f32 %v2543_v46, %v2542_v39  ;;  %v6909_v39 = vld [vmem:[%s10495_s5 + $0x50] sm:$0xf0]  ;;  %v6908_v46 = vld [vmem:[%s10495_s5 + $0x4c] sm:$0xf]  ;;  %2841 = vmatpush.bf16.msrb.mxu2 %v5817_v27  ;;  %vm9242_vm12 = vcmp.eq.s32.totalorder %v2655_v12, 1  ;;  %v5769_v27 = vor.u32 %v6899_v34, %v5766_v41 }
 0xbb1   :  { %v6926_v41 = vld [vmem:[%s10496_s7 + $0x1c] sm:$0xf] }
 0xbb2   :  { %v9065_v40 = vpack.c.bf16 %v9061_v42, %v9061_v42 }
 0xbb4   :  { %2618 = vmatmul.bf16.vlgmr.msrb.gmra.mxu0 %v9065_v40 }
 0xbc4   :  { %3032 = vmatmul.bf16.vlgmr.msra.gmra.mxu0 %v9065_v40 }
 0xc31   :  { %v2619_v45 = vpop.f32.mrf.mxu0 }
 0xc32   :  { %v2620_v52 = vadd.f32 %v9072_v14, %v2619_v45  ;;  %v5833_v45 = vor.u32 %v6916_v1, %v5832_v3  ;;  %v5784_v3 = vld [vmem:[%s10495_s5 + $0x20] sm:$0xf]  ;;  %v6904_v1 = vld [vmem:[%s10495_s5 + $0x28] sm:$0xf0] }
 0xc34   :  { %5757 = vst [vmem:[%s10501_s11 + $0x18] sm:$0xff] %v2620_v52  ;;  %v2627_v33 = vxor.u32 2147483647, %v2620_v52  ;;  %vm2626_vm8 = vcmp.lt.s32.totalorder %v2620_v52, 0  ;;  %2853 = vmatpush.bf16.msrb.mxu3 %v5833_v45  ;;  %v6941_v45 = vld [vmem:[%s10496_s7 + $0x94] sm:$0xf] }
 0xc36   :  { %v2628_v54 = vsel %vm2626_vm8, %v2627_v33, %v2620_v52  ;;  %v5802_v52 = vld [vmem:[%s10495_s5 + $0x54] sm:$0xf0]  ;;  %v5820_v33 = vld [vmem:[%s10495_s5 + $0x68] sm:$0xf] }
 0xc37   :  { %v2629_v57 = vand.u32 4294967168, %v2628_v54  ;;  %v6913_v54 = vld [vmem:[%s10495_s5 + $0x70] sm:$0xf0] }
 0xc39   :  { %v2621_v58 = vpop.f32.mrf.mxu0  ;;  %v2630_v60 = vor.u32 %v2629_v57, %v8336_v49  ;;  %v5801_v57 = vor.u32 %v6909_v39, %v5800_v13  ;;  %v5955_v39 = vor.u32 %v6944_v47, %v5952_v44  ;;  %v5880_v47 = vld [vmem:[%s10496_s7 + $0x24] sm:$0xf0]  ;;  %v5886_v44 = vld [vmem:[%s10496_s7 + $0x20] sm:$0xf] }
 0xc3a   :  { %v5805_v58 = vor.u32 %v6908_v46, %v5802_v52  ;;  %v5959_v46 = vor.u32 %v6946_v50, %v5958_v38  ;;  %v5940_v52 = vld [vmem:[%s10496_s7 + $0x9c] sm:$0xf0]  ;;  %v6928_v38 = vld [vmem:[%s10496_s7 + $0x28] sm:$0xf0]  ;;  %v5883_v50 = vor.u32 %v6926_v41, %v5880_v47 }
 0xc3b   :  { %v2632_v61 = vshra.s32 %v2630_v60, 16  ;;  %v2631_v51 = vand.u32 65535, %v2630_v60  ;;  %v5788_v60 = vld [vmem:[%s10495_s5 + $0x30] sm:$0xf]  ;;  %2829 = vmatpush.bf16.msrb.mxu1 %v5801_v57  ;;  %v5785_v57 = vor.u32 %v6904_v1, %v5784_v3  ;;  %v5874_v1 = vld [vmem:[%s10496_s7 + $0x8] sm:$0xf] }
 0xc3c   :  { %2842 = vmatpush.bf16.msrb.mxu2 %v5805_v58  ;;  %v5868_v3 = vld [vmem:[%s10496_s7 + $0xc] sm:$0xf0] }
 0xc3d   :  { %v2634_v63 = vcvt.s32.f32 %v2632_v61  ;;  %v2633_v16 = vcvt.s32.f32 %v2631_v51  ;;  %v6906_v61 = vld [vmem:[%s10495_s5 + $0x38] sm:$0xf0]  ;;  %v5790_v51 = vld [vmem:[%s10495_s5 + $0x3c] sm:$0xf0] }
 0xc3e   :  { %v5789_v24 = vor.u32 %v6906_v61, %v5788_v60  ;;  %v5772_v60 = vld [vmem:[%s10495_s5 + $0x8] sm:$0xf]  ;;  %v6901_v61 = vld [vmem:[%s10495_s5 + $0x10] sm:$0xf0] }
 0xc3f   :  { %2635 = vmax.xlane.f32.xlu1 %v2634_v63  ;;  %v5773_v18 = vor.u32 %v6901_v61, %v5772_v60  ;;  %v6948_v61 = vld [vmem:[%s10498_s9 + $0x8] sm:$0xff] }
 0xc40   :  { %2830 = vmatpush.bf16.msrb.mxu1 %v5789_v24 }
 0xc41   :  { %v9079_v32 = vpop.f32.mrf.mxu0 }
 0xc44   :  { %2831 = vmatpush.bf16.msrb.mxu1 %v5777_v6  ;;  %v6934_v6 = vld [vmem:[%s10496_s7 + $0x58] sm:$0xf0] }
 0xc48   :  { %2832 = vmatpush.bf16.msrb.mxu1 %v5765_v59  ;;  %v6923_v59 = vld [vmem:[%s10496_s7 + $0x4] sm:$0xf] }
 0xc49   :  { %v3035_v9 = vpop.f32.mrf.mxu0  ;;  %v5871_v29 = vor.u32 %v6923_v59, %v5868_v3  ;;  %v6127_v59 = vld [vmem:[%s10496_s7 + $0x30] sm:$0xf]  ;;  %v6986_v3 = vld [vmem:[%s10496_s7 + $0x38] sm:$0xf0] }
 0xc4a   :  { %v5821_v9 = vor.u32 %v6913_v54, %v5820_v33  ;;  %v5946_v33 = vld [vmem:[%s10496_s7 + $0x98] sm:$0xf]  ;;  %v6943_v54 = vld [vmem:[%s10496_s7 + $0xa0] sm:$0xf0] }
 0xc4c   :  { %2854 = vmatpush.bf16.msrb.mxu3 %v5821_v9  ;;  %3037 = vmatpush.bf16.msra.mxu1 %v5955_v39  ;;  %v5947_v9 = vor.u32 %v6943_v54, %v5946_v33  ;;  %v6954_v39 = vld [vmem:[%s10498_s9 + $0x38] sm:$0xff]  ;;  %v6949_v54 = vld [vmem:[%s10498_s9 + $0x10] sm:$0xff] }
 0xcb2   :  { %v9081_v8 = vpop.xlane.xlu1 %2635 }
 0xcb3   :  { %vm2637_vm9 = vcmp.eq.f32.partialorder %v2634_v63, %v9081_v8  ;;  %v6905_v63 = vld [vmem:[%s10495_s5 + $0x34] sm:$0xf]  ;;  %v2642_v53 = vcvt.f32.s32 %v9081_v8 }
 0xcb4   :  { %v2638_v62 = vsel %vm2637_vm9, %v2633_v16, -inf  ;;  %v5808_v16 = vld [vmem:[%s10495_s5 + $0x50] sm:$0xf]  ;;  %v5793_v25 = vor.u32 %v6905_v63, %v5790_v51  ;;  %v5943_v63 = vor.u32 %v6941_v45, %v5940_v52  ;;  %v6938_v51 = vld [vmem:[%s10496_s7 + $0x7c] sm:$0xf]  ;;  %v6952_v45 = vld [vmem:[%s10498_s9 + $0x28] sm:$0xff] }
 0xcb5   :  { %2639 = vmax.xlane.f32.xlu2 %v2638_v62  ;;  %v6910_v62 = vld [vmem:[%s10495_s5 + $0x58] sm:$0xf0]  ;;  %v2643_v20 = vshll.u32 %v2642_v53, 16  ;;  %v6940_v53 = vld [vmem:[%s10496_s7 + $0x88] sm:$0xf0]  ;;  %v6951_v52 = vld [vmem:[%s10498_s9 + $0x20] sm:$0xff] }
 0xcb6   :  { %v5809_v8 = vor.u32 %v6910_v62, %v5808_v16  ;;  %2843 = vmatpush.bf16.msrb.mxu2 %v5793_v25  ;;  %v5928_v16 = vld [vmem:[%s10496_s7 + $0x84] sm:$0xf0]  ;;  %v5934_v62 = vld [vmem:[%s10496_s7 + $0x80] sm:$0xf]  ;;  %3038 = vmatpush.bf16.msra.mxu1 %v5943_v63 }
 0xcb7   :  { %v5931_v24 = vor.u32 %v6938_v51, %v5928_v16  ;;  %v5935_v25 = vor.u32 %v6940_v53, %v5934_v62  ;;  %v6947_v62 = vld [vmem:[%s10498_s9] sm:$0xff]  ;;  %v7001_v53 = vld [vmem:[%s10496_s7 + $0xb0] sm:$0xf0] }
 0xcb8   :  { %2855 = vmatpush.bf16.msrb.mxu3 %v5809_v8  ;;  %v6937_v8 = vld [vmem:[%s10496_s7 + $0x70] sm:$0xf0] }
 0xcb9   :  { %v5923_v30 = vor.u32 %v6937_v8, %v5922_v2 }
 0xcba   :  { %2844 = vmatpush.bf16.msrb.mxu2 %v5781_v43  ;;  %3039 = vmatpush.bf16.msra.mxu1 %v5931_v24  ;;  %v6929_v43 = vld [vmem:[%s10496_s7 + $0x34] sm:$0xf]  ;;  %v6175_v24 = vld [vmem:[%s10496_s7 + $0x90] sm:$0xf] }
 0xcbc   :  { %2856 = vmatpush.bf16.msrb.mxu3 %v5797_v19  ;;  %v5895_v19 = vor.u32 %v6929_v43, %v5892_v10  ;;  %v6151_v43 = vld [vmem:[%s10496_s7 + $0x60] sm:$0xf]  ;;  %v6992_v10 = vld [vmem:[%s10496_s7 + $0x68] sm:$0xf0] }
 0xcbe   :  { %2845 = vmatpush.bf16.msrb.mxu2 %v5769_v27  ;;  %3040 = vmatpush.bf16.msra.mxu1 %v5919_v26 }
 0xcc0   :  { %2857 = vmatpush.bf16.msrb.mxu3 %v5785_v57  ;;  %v3034_v57 = vadd.f32 %v9079_v32, %v8239_v11  ;;  %v6187_v32 = vld [vmem:[%s10496_s7 + $0xa8] sm:$0xf] }
 0xcc2   :  { %3050 = vmatpush.bf16.msra.mxu2 %v5959_v46  ;;  %v6953_v46 = vld [vmem:[%s10498_s9 + $0x30] sm:$0xff] }
 0xcc4   :  { %2858 = vmatpush.bf16.msrb.mxu3 %v5773_v18  ;;  %v6188_v18 = vor.u32 %v7001_v53, %v6187_v32 }
 0xcc6   :  { %3051 = vmatpush.bf16.msra.mxu2 %v5947_v9 }
 0xcc8   :  { %3175 = vmatpush.bf16.msra.mxu3 %v6954_v39 }
 0xcca   :  { %3052 = vmatpush.bf16.msra.mxu2 %v5935_v25  ;;  %v6998_v25 = vld [vmem:[%s10496_s7 + $0x98] sm:$0xf0] }
 0xccb   :  { %v6176_v23 = vor.u32 %v6998_v25, %v6175_v24 }
 0xccc   :  { %3176 = vmatpush.bf16.msra.mxu3 %v6953_v46  ;;  %v6115_v46 = vld [vmem:[%s10496_s7 + $0x18] sm:$0xf] }
 0xcce   :  { %3053 = vmatpush.bf16.msra.mxu2 %v5923_v30 }
 0xcd0   :  { %3177 = vmatpush.bf16.msra.mxu3 %v6952_v45  ;;  %v6983_v45 = vld [vmem:[%s10496_s7 + $0x20] sm:$0xf0] }
 0xcd4   :  { %3178 = vmatpush.bf16.msra.mxu3 %v6951_v52 }
 0xd28   :  { %v2640_v21 = vpop.xlane.xlu2 %2639 }
 0xd29   :  { %v2641_v0 = vcvt.f32.s32 %v2640_v21  ;;  %v5904_v21 = vld [vmem:[%s10496_s7 + $0x54] sm:$0xf0] }
 0xd2b   :  { %v2644_v28 = vadd.s32 %v2643_v20, %v2641_v0  ;;  %v5910_v20 = vld [vmem:[%s10496_s7 + $0x50] sm:$0xf]  ;;  %v5907_v0 = vor.u32 %v6932_v15, %v5904_v21  ;;  %v6163_v15 = vld [vmem:[%s10496_s7 + $0x78] sm:$0xf] }
 0xd2c   :  { %v5911_v12 = vor.u32 %v6934_v6, %v5910_v20 }
 0xd2d   :  { %v2645_v56 = vand.u32 127, %v2644_v28  ;;  %3041 = vmatpush.bf16.msra.mxu1 %v5907_v0  ;;  %v6931_v28 = vld [vmem:[%s10496_s7 + $0x40] sm:$0xf0] }
 0xd2e   :  { %3054 = vmatpush.bf16.msra.mxu2 %v5911_v12  ;;  %v5899_v34 = vor.u32 %v6931_v28, %v5898_v17  ;;  %v6995_v0 = vld [vmem:[%s10496_s7 + $0x80] sm:$0xf0]  ;;  %v6152_v17 = vor.u32 %v6992_v10, %v6151_v43 }
 0xd2f   :  { %v2646_v13 = vsub.s32 127, %v2645_v56  ;;  %v5887_v56 = vor.u32 %v6928_v38, %v5886_v44  ;;  %v6164_v6 = vor.u32 %v6995_v0, %v6163_v15  ;;  %v6139_v44 = vld [vmem:[%s10496_s7 + $0x48] sm:$0xf]  ;;  %v6989_v38 = vld [vmem:[%s10496_s7 + $0x50] sm:$0xf0] }
 0xd31   :  { %5758 = vst.msk [vmem:[%s10502_s12 + $0x18] sm:$0xff] %vm959_vm11, %v2646_v13  ;;  %v2657_v58 = vsel %vm9242_vm12, %v5760_v5, %v2646_v13  ;;  %3042 = vmatpush.bf16.msra.mxu1 %v5895_v19  ;;  %v6925_v5 = vld [vmem:[%s10496_s7 + $0x10] sm:$0xf0] }
 0xd32   :  { %2659 = vperm.xlu0 %7126, %v2657_v58   ;;  %3055 = vmatpush.bf16.msra.mxu2 %v5899_v34  ;;  %v5875_v27 = vor.u32 %v6925_v5, %v5874_v1 }
 0xd35   :  { %3043 = vmatpush.bf16.msra.mxu1 %v5883_v50 }
 0xd36   :  { %3056 = vmatpush.bf16.msra.mxu2 %v5887_v56  ;;  %v6140_v56 = vor.u32 %v6989_v38, %v6139_v44 }
 0xd39   :  { %3044 = vmatpush.bf16.msra.mxu1 %v5871_v29 }
 0xd3a   :  { %3057 = vmatpush.bf16.msra.mxu2 %v5875_v27  ;;  %v6128_v27 = vor.u32 %v6986_v3, %v6127_v59  ;;  %v6085_v59 = vld [vmem:[%s10495_s5 + $0xa8] sm:$0xf]  ;;  %v6977_v3 = vld [vmem:[%s10495_s5 + $0xb0] sm:$0xf0] }
 0xda4   :  { %v2660_v13 = vpop.permute.xlu0 %2659 }
 0xda5   :  { %vm2661_vm13 = vcmp.eq.s32.totalorder %v8078_v31, %v2660_v13 }
 0xda6   :  { %vm5858_vm14 = vmpackc.low %vm2661_vm13, %vm2661_vm13 }
 0xda7   :  { %5859 = vmatmul.msk.bf16.vlgmr.msrb.gmra.mxu1 %vm5858_vm14, %v7284_v48  ;;  %5861 = vmatmul.msk.bf16.vlgmr.msrb.gmra.mxu2 %vm5858_vm14, %v7284_v48 }
 0xda8   :  { %5863 = vmatmul.msk.bf16.vlgmr.msrb.gmra.mxu3 %vm5858_vm14, %v7284_v48 }
 0xdb7   :  { %3045 = vmatmul.bf16.vlgmr.msra.gmra.mxu1 %v9065_v40  ;;  %3058 = vmatmul.bf16.vlgmr.msra.gmra.mxu2 %v9065_v40  ;;  %v6950_v40 = vld [vmem:[%s10498_s9 + $0x18] sm:$0xff] }
 0xdb8   :  { %3179 = vmatpush.bf16.msra.mxu3 %v6950_v40 }
 0xdbc   :  { %3180 = vmatpush.bf16.msra.mxu3 %v6949_v54 }
 0xdc0   :  { %3181 = vmatpush.bf16.msra.mxu3 %v6948_v61  ;;  %v6980_v61 = vld [vmem:[%s10496_s7 + $0x8] sm:$0xf0] }
 0xdc4   :  { %3182 = vmatpush.bf16.msra.mxu3 %v6947_v62 }
 0xdc8   :  { %3589 = vmatpush.bf16.msrb.mxu3 %v6188_v18 }
 0xdcc   :  { %3590 = vmatpush.bf16.msrb.mxu3 %v6176_v23 }
 0xdd0   :  { %3591 = vmatpush.bf16.msrb.mxu3 %v6164_v6 }
 0xdd4   :  { %3592 = vmatpush.bf16.msrb.mxu3 %v6152_v17 }
 0xdd8   :  { %3593 = vmatpush.bf16.msrb.mxu3 %v6140_v56 }
 0xddc   :  { %3594 = vmatpush.bf16.msrb.mxu3 %v6128_v27  ;;  %v6073_v27 = vld [vmem:[%s10495_s5 + $0x90] sm:$0xf] }
 0xe24   :  { %v2834_v33 = vpop.f32.mrf.mxu1 }
 0xe25   :  { %v2835_v58 = vadd.f32 %v2834_v33, %v8236_v7 }
 0xe27   :  { %v3063_v60 = vadd.f32 %v3034_v57, %v2835_v58  ;;  %v6116_v57 = vor.u32 %v6983_v45, %v6115_v46  ;;  %v6973_v46 = vld [vmem:[%s10495_s5 + $0x94] sm:$0xf]  ;;  %v6075_v45 = vld [vmem:[%s10495_s5 + $0x9c] sm:$0xf0] }
 0xe29   :  { %v5960_v63 = vmul.f32 -1.442695, %v3063_v60  ;;  %v6103_v60 = vld [vmem:[%s10496_s7] sm:$0xf]  ;;  %3595 = vmatpush.bf16.msrb.mxu3 %v6116_v57  ;;  %v6970_v57 = vld [vmem:[%s10495_s5 + $0x7c] sm:$0xf] }
 0xe2a   :  { %v2847_v9 = vpop.f32.mrf.mxu2 }
 0xe2b   :  { %7240 = vpow2.f32 %v5960_v63  ;;  %v9372_v51 = vpop.f32.mrf.mxu3  ;;  %v2848_v21 = vadd.f32 %v2847_v9, %v8220_v36 }
 0xe2c   :  { %v2836_v16 = vpop.f32.mrf.mxu1  ;;  %v2861_v32 = vadd.f32 %v9372_v51, %v8305_v35 }
 0xe2d   :  { %v6104_v16 = vor.u32 %v6980_v61, %v6103_v60  ;;  %v6093_v60 = vld [vmem:[%s10495_s5 + $0xb0] sm:$0xf]  ;;  %v6978_v61 = vld [vmem:[%s10495_s5 + $0xb8] sm:$0xf0] }
 0xe2f   :  { %3596 = vmatpush.bf16.msrb.mxu3 %v6104_v16  ;;  %v6081_v16 = vld [vmem:[%s10495_s5 + $0x98] sm:$0xf] }
 0xe31   :  { %v7241_v4 = vpop.eup %7240 }
 0xe32   :  { %v3067_v2 = vadd.f32 1.0, %v7241_v4  ;;  %v2849_v8 = vpop.f32.mrf.mxu2 }
 0xe33   :  { %v2862_v26 = vpop.f32.mrf.mxu3 }
 0xe34   :  { %7242 = vrcp.f32 %v3067_v2  ;;  %v3046_v30 = vpop.f32.mrf.mxu1  ;;  %v3079_v5 = vand.u32 2147483648, %v3067_v2  ;;  %v3077_v29 = vand.u32 2147483647, %v3067_v2  ;;  %vm3073_vm0 = vweird.f32 %v3067_v2 }
 0xe35   :  { %v3047_v20 = vadd.f32 %v3046_v30, %v8226_v55 }
 0xe36   :  { %v3080_v54 = vor.u32 1.1754944e-38, %v3079_v5  ;;  %vm3078_vm2 = vcmp.eq.f32.partialorder %v3077_v29, 8.507059e+37  ;;  %v6086_v5 = vor.u32 %v6977_v3, %v6085_v59  ;;  %v6087_v29 = vld [vmem:[%s10495_s5 + $0xb4] sm:$0xf0] }
 0xe37   :  { %v3083_v12 = vadd.f32 %v3047_v20, %v2848_v21 }
 0xe38   :  { %3390 = vmatpush.bf16.msrb.mxu0 %v6086_v5  ;;  %v6013_v5 = vld [vmem:[%s10495_s5 + $0x18] sm:$0xf] }
 0xe39   :  { %v5961_v19 = vmul.f32 -1.442695, %v3083_v12 }
 0xe3a   :  { %v7243_v28 = vpop.eup %7242  ;;  %v3059_v34 = vpop.f32.mrf.mxu2 }
 0xe3b   :  { %7244 = vpow2.f32 %v5961_v19  ;;  %v3069_v41 = vmul.f32 %v7243_v28, %v3067_v2  ;;  %vm3074_vm15 = vweird.f32 %v7243_v28  ;;  %v3060_v63 = vadd.f32 %v3059_v34, %v8302_v22 }
 0xe3c   :  { %v3048_v47 = vpop.f32.mrf.mxu1  ;;  %vm3075_vm1 = vmor %vm3073_vm0, %vm3074_vm15 }
 0xe3d   :  { %v3070_v50 = vsub.f32 1.0, %v3069_v41 }
 0xe3f   :  { %v3071_v1 = vmul.f32 %v7243_v28, %v3070_v50 }
 0xe41   :  { %v7245_v13 = vpop.eup %7244  ;;  %v3072_v39 = vadd.f32 %v7243_v28, %v3071_v1  ;;  %v6976_v1 = vld [vmem:[%s10495_s5 + $0xac] sm:$0xf] }
 0xe42   :  { %v3087_v52 = vadd.f32 1.0, %v7245_v13  ;;  %v3061_v40 = vpop.f32.mrf.mxu2  ;;  %v6974_v13 = vld [vmem:[%s10495_s5 + $0x98] sm:$0xf0] }
 0xe43   :  { %v3076_v33 = vsel %vm3075_vm1, %v7243_v28, %v3072_v39  ;;  %v6090_v39 = vor.u32 %v6976_v1, %v6087_v29  ;;  %v6078_v40 = vor.u32 %v6973_v46, %v6075_v45  ;;  %v6959_v29 = vld [vmem:[%s10495_s5 + $0x20] sm:$0xf0] }
 0xe44   :  { %7246 = vrcp.f32 %v3087_v52  ;;  %v3081_v58 = vsel %vm3078_vm2, %v3080_v54, %v3076_v33  ;;  %v3099_v25 = vand.u32 2147483648, %v3087_v52  ;;  %v3097_v23 = vand.u32 2147483647, %v3087_v52  ;;  %v6061_v33 = vld [vmem:[%s10495_s5 + $0x78] sm:$0xf] }
 0xe45   :  { %v3103_v9 = vmul.f32 %v3081_v58, %v3060_v63  ;;  %vm3093_vm4 = vweird.f32 %v3087_v52  ;;  %3403 = vmatpush.bf16.msrb.mxu1 %v6090_v39  ;;  %v6971_v54 = vld [vmem:[%s10495_s5 + $0x80] sm:$0xf0]  ;;  %v6063_v58 = vld [vmem:[%s10495_s5 + $0x84] sm:$0xf0]  ;;  %v6094_v63 = vor.u32 %v6978_v61, %v6093_v60  ;;  %v6033_v39 = vld [vmem:[%s10495_s5 + $0x38] sm:$0xf] }
 0xe46   :  { %v3100_v8 = vor.u32 1.1754944e-38, %v3099_v25  ;;  %vm3098_vm6 = vcmp.eq.f32.partialorder %v3097_v23, 8.507059e+37  ;;  %v6069_v23 = vld [vmem:[%s10495_s5 + $0x80] sm:$0xf]  ;;  %v6963_v46 = vld [vmem:[%s10495_s5 + $0x40] sm:$0xf0] }
 0xe47   :  { %v3104_v18 = vadd.f32 %v3103_v9, %v2861_v32  ;;  %v6062_v9 = vor.u32 %v6971_v54, %v6061_v33  ;;  %v6066_v32 = vor.u32 %v6970_v57, %v6063_v58  ;;  %3416 = vmatpush.bf16.msrb.mxu2 %v6094_v63  ;;  %v6014_v33 = vor.u32 %v6959_v29, %v6013_v5  ;;  %v6001_v58 = vld [vmem:[%s10495_s5] sm:$0xf]  ;;  %v6956_v60 = vld [vmem:[%s10495_s5 + $0x8] sm:$0xf0]  ;;  %v6153_v5 = vld [vmem:[%s10496_s7 + $0x6c] sm:$0xf0] }
 0xe48   :  { %v6034_v61 = vor.u32 %v6963_v46, %v6033_v39  ;;  %v6159_v29 = vld [vmem:[%s10496_s7 + $0x68] sm:$0xf]  ;;  %v6988_v39 = vld [vmem:[%s10496_s7 + $0x4c] sm:$0xf]  ;;  %v6141_v46 = vld [vmem:[%s10496_s7 + $0x54] sm:$0xf0] }
 0xe49   :  { %7248 = vtanh.f32 %v3104_v18  ;;  %3404 = vmatpush.bf16.msrb.mxu1 %v6078_v40  ;;  %v6968_v18 = vld [vmem:[%s10495_s5 + $0x68] sm:$0xf0] }
 0xe4a   :  { %v7247_v62 = vpop.eup %7246 }
 0xe4b   :  { %v3089_v53 = vmul.f32 %v7247_v62, %v3087_v52  ;;  %vm3094_vm3 = vweird.f32 %v7247_v62  ;;  %v6074_v52 = vor.u32 %v6974_v13, %v6073_v27  ;;  %v6958_v27 = vld [vmem:[%s10495_s5 + $0x1c] sm:$0xf]  ;;  %v6015_v13 = vld [vmem:[%s10495_s5 + $0x24] sm:$0xf0] }
 0xe4c   :  { %vm3095_vm5 = vmor %vm3093_vm4, %vm3094_vm3  ;;  %v6018_v57 = vor.u32 %v6958_v27, %v6015_v13  ;;  %v6993_v27 = vld [vmem:[%s10496_s7 + $0x70] sm:$0xf0] }
 0xe4d   :  { %v3090_v24 = vsub.f32 1.0, %v3089_v53  ;;  %3391 = vmatpush.bf16.msrb.mxu0 %v6074_v52  ;;  %v6049_v53 = vld [vmem:[%s10495_s5 + $0x60] sm:$0xf]  ;;  %3405 = vmatpush.bf16.msrb.mxu1 %v6066_v32  ;;  %v6189_v32 = vld [vmem:[%s10496_s7 + $0xb4] sm:$0xf0]  ;;  %v6160_v13 = vor.u32 %v6993_v27, %v6159_v29 }
 0xe4f   :  { %v3091_v4 = vmul.f32 %v7247_v62, %v3090_v24  ;;  %v7249_v21 = vpop.eup %7248  ;;  %v6967_v24 = vld [vmem:[%s10495_s5 + $0x64] sm:$0xf] }
 0xe51   :  { %v3092_v2 = vadd.f32 %v7247_v62, %v3091_v4  ;;  %v6051_v4 = vld [vmem:[%s10495_s5 + $0x6c] sm:$0xf0]  ;;  %3392 = vmatpush.bf16.msrb.mxu0 %v6062_v9  ;;  %v6955_v9 = vld [vmem:[%s10495_s5 + $0x4] sm:$0xf] }
 0xe53   :  { %v3096_v26 = vsel %vm3095_vm5, %v7247_v62, %v3092_v2  ;;  %v6975_v62 = vld [vmem:[%s10495_s5 + $0xa0] sm:$0xf0]  ;;  %v6972_v2 = vld [vmem:[%s10495_s5 + $0x88] sm:$0xf0] }
 0xe54   :  { %v3101_v30 = vsel %vm3098_vm6, %v3100_v8, %v3096_v26  ;;  %v6082_v25 = vor.u32 %v6975_v62, %v6081_v16  ;;  %v5996_v8 = vld [vmem:[%s10503_s4 + $0x4] sm:$0x1]  ;;  %v6050_v26 = vor.u32 %v6968_v18, %v6049_v53  ;;  %v6003_v16 = vld [vmem:[%s10495_s5 + $0xc] sm:$0xf0]  ;;  %v7000_v62 = vld [vmem:[%s10496_s7 + $0xac] sm:$0xf] }
 0xe55   :  { %v3106_v15 = vsub.f32 1.0, %v3101_v30  ;;  %v3108_v51 = vmul.f32 %v3101_v30, %v9061_v42  ;;  %v6054_v30 = vor.u32 %v6967_v24, %v6051_v4  ;;  %vm3216_vm9 = vcmp.gt.s32.totalorder %v5996_v8, 0  ;;  %v6195_v53 = vld [vmem:[%s10496_s7 + $0xb0] sm:$0xf]  ;;  %v7002_v18 = vld [vmem:[%s10496_s7 + $0xb8] sm:$0xf0] }
 0xe56   :  { %3417 = vmatpush.bf16.msrb.mxu2 %v6082_v25  ;;  %3393 = vmatpush.bf16.msrb.mxu0 %v6050_v26  ;;  %v3219_v59 = vsel %vm3216_vm9, 1, %v7283_v37  ;;  %v6002_v25 = vor.u32 %v6956_v60, %v6001_v58  ;;  %v6021_v4 = vld [vmem:[%s10495_s5 + $0x20] sm:$0xf]  ;;  %v6006_v26 = vor.u32 %v6955_v9, %v6003_v16  ;;  %v6135_v58 = vld [vmem:[%s10496_s7 + $0x38] sm:$0xf] }
 0xe57   :  { %v3107_v20 = vmul.f32 %v7249_v21, %v3106_v15  ;;  %v6037_v15 = vld [vmem:[%s10495_s5 + $0x48] sm:$0xf]  ;;  %v6965_v21 = vld [vmem:[%s10495_s5 + $0x50] sm:$0xf0]  ;;  %3406 = vmatpush.bf16.msrb.mxu1 %v6054_v30  ;;  %v3220_v54 = vperm.slane %v3219_v59, 0 }
 0xe58   :  { %v6982_v9 = vld [vmem:[%s10496_s7 + $0x1c] sm:$0xf]  ;;  %v6117_v16 = vld [vmem:[%s10496_s7 + $0x24] sm:$0xf0] }
 0xe59   :  { %v9431_v0 = vadd.f32 %v3108_v51, %v3107_v20  ;;  %v6964_v20 = vld [vmem:[%s10495_s5 + $0x4c] sm:$0xf]  ;;  %v6070_v51 = vor.u32 %v6972_v2, %v6069_v23  ;;  %v5997_v2 = vld [vmem:[%s10494_s3 + $0x20] sm:$0xff]  ;;  %vm9607_vm10 = vcmp.eq.s32.totalorder %v3220_v54, 1  ;;  %v6985_v54 = vld [vmem:[%s10496_s7 + $0x34] sm:$0xf] }
 0xe5a   :  { %v6960_v23 = vld [vmem:[%s10495_s5 + $0x28] sm:$0xf0] }
 0xe5b   :  { %v9435_v6 = vpack.c.bf16 %v9431_v0, %v9431_v0  ;;  %3418 = vmatpush.bf16.msrb.mxu2 %v6070_v51  ;;  %v6177_v51 = vld [vmem:[%s10496_s7 + $0x9c] sm:$0xf0] }
 0xe5d   :  { %3183 = vmatmul.bf16.vlgmr.msra.gmra.mxu3 %v9435_v6 }
 0xe6d   :  { %3597 = vmatmul.bf16.vlgmr.msrb.gmra.mxu3 %v9435_v6 }
 0xee0   :  { %v3184_v12 = vpop.f32.mrf.mxu3 }
 0xee1   :  { %v3185_v43 = vadd.f32 %v9072_v14, %v3184_v12  ;;  %v6039_v12 = vld [vmem:[%s10495_s5 + $0x54] sm:$0xf0] }
 0xee3   :  { %5994 = vst [vmem:[%s10501_s11 + $0x20] sm:$0xff] %v3185_v43  ;;  %v3192_v10 = vxor.u32 2147483647, %v3185_v43  ;;  %vm3191_vm7 = vcmp.lt.s32.totalorder %v3185_v43, 0 }
 0xee5   :  { %v3193_v42 = vsel %vm3191_vm7, %v3192_v10, %v3185_v43  ;;  %v6057_v43 = vld [vmem:[%s10495_s5 + $0x68] sm:$0xf]  ;;  %v6969_v10 = vld [vmem:[%s10495_s5 + $0x70] sm:$0xf0] }
 0xee6   :  { %v3194_v17 = vand.u32 4294967168, %v3193_v42  ;;  %v6038_v42 = vor.u32 %v6965_v21, %v6037_v15  ;;  %v6192_v15 = vor.u32 %v7000_v62, %v6189_v32  ;;  %v6196_v21 = vor.u32 %v7002_v18, %v6195_v53  ;;  %v6123_v62 = vld [vmem:[%s10496_s7 + $0x20] sm:$0xf]  ;;  %v6984_v32 = vld [vmem:[%s10496_s7 + $0x28] sm:$0xf0] }
 0xee7   :  { %v6120_v53 = vor.u32 %v6982_v9, %v6117_v16  ;;  %v6124_v18 = vor.u32 %v6984_v32, %v6123_v62  ;;  %v6376_v62 = vld [vmem:[%s10496_s7 + $0x48] sm:$0xf]  ;;  %v7045_v32 = vld [vmem:[%s10496_s7 + $0x50] sm:$0xf0] }
 0xee8   :  { %v3186_v19 = vpop.f32.mrf.mxu3  ;;  %v3195_v28 = vor.u32 %v3194_v17, %v8336_v49  ;;  %v6042_v17 = vor.u32 %v6964_v20, %v6039_v12  ;;  %3394 = vmatpush.bf16.msrb.mxu0 %v6038_v42  ;;  %v6997_v20 = vld [vmem:[%s10496_s7 + $0x94] sm:$0xf]  ;;  %v6183_v12 = vld [vmem:[%s10496_s7 + $0x98] sm:$0xf] }
 0xee9   :  { %v6025_v19 = vld [vmem:[%s10495_s5 + $0x30] sm:$0xf] }
 0xeea   :  { %v3197_v34 = vshra.s32 %v3195_v28, 16  ;;  %v3196_v38 = vand.u32 65535, %v3195_v28  ;;  %v6962_v28 = vld [vmem:[%s10495_s5 + $0x38] sm:$0xf0]  ;;  %3407 = vmatpush.bf16.msrb.mxu1 %v6042_v17  ;;  %v6009_v17 = vld [vmem:[%s10495_s5 + $0x8] sm:$0xf] }
 0xeeb   :  { %v6026_v3 = vor.u32 %v6962_v28, %v6025_v19  ;;  %v6957_v19 = vld [vmem:[%s10495_s5 + $0x10] sm:$0xf0]  ;;  %v6180_v28 = vor.u32 %v6997_v20, %v6177_v51  ;;  %v7007_v20 = vld [vmem:[%s10498_s9 + $0x20] sm:$0xff] }
 0xeec   :  { %v3199_v41 = vcvt.s32.f32 %v3197_v34  ;;  %v3198_v14 = vcvt.s32.f32 %v3196_v38  ;;  %v6961_v34 = vld [vmem:[%s10495_s5 + $0x34] sm:$0xf]  ;;  %v6045_v38 = vld [vmem:[%s10495_s5 + $0x50] sm:$0xf] }
 0xeed   :  { %3395 = vmatpush.bf16.msrb.mxu0 %v6026_v3 }
 0xeee   :  { %3200 = vmax.xlane.f32.xlu0 %v3199_v41 }
 0xef0   :  { %v9444_v47 = vpop.f32.mrf.mxu3 }
 0xef1   :  { %3396 = vmatpush.bf16.msrb.mxu0 %v6014_v33 }
 0xef5   :  { %3397 = vmatpush.bf16.msrb.mxu0 %v6002_v25  ;;  %v6105_v25 = vld [vmem:[%s10496_s7 + $0xc] sm:$0xf0] }
 0xef8   :  { %v3600_v44 = vpop.f32.mrf.mxu3 }
 0xef9   :  { %v6027_v44 = vld [vmem:[%s10495_s5 + $0x3c] sm:$0xf0]  ;;  %3602 = vmatpush.bf16.msra.mxu0 %v6192_v15  ;;  %v7009_v15 = vld [vmem:[%s10498_s9 + $0x30] sm:$0xff] }
 0xefa   :  { %v6030_v1 = vor.u32 %v6961_v34, %v6027_v44  ;;  %v6165_v44 = vld [vmem:[%s10496_s7 + $0x84] sm:$0xf0] }
 0xefc   :  { %3408 = vmatpush.bf16.msrb.mxu1 %v6030_v1  ;;  %v6991_v1 = vld [vmem:[%s10496_s7 + $0x64] sm:$0xf] }
 0xefd   :  { %3603 = vmatpush.bf16.msra.mxu0 %v6180_v28 }
 0xf00   :  { %3409 = vmatpush.bf16.msrb.mxu1 %v6018_v57  ;;  %v6129_v57 = vld [vmem:[%s10496_s7 + $0x3c] sm:$0xf0] }
 0xf01   :  { %v6132_v60 = vor.u32 %v6985_v54, %v6129_v57  ;;  %v6388_v54 = vld [vmem:[%s10496_s7 + $0x60] sm:$0xf]  ;;  %v7048_v57 = vld [vmem:[%s10496_s7 + $0x68] sm:$0xf0] }
 0xf04   :  { %3410 = vmatpush.bf16.msrb.mxu1 %v6006_v26 }
 0xf08   :  { %3615 = vmatpush.bf16.msra.mxu1 %v6196_v21  ;;  %v7008_v21 = vld [vmem:[%s10498_s9 + $0x28] sm:$0xff] }
 0xf61   :  { %v9446_v50 = vpop.xlane.xlu0 %3200 }
 0xf62   :  { %vm3202_vm8 = vcmp.eq.f32.partialorder %v3199_v41, %v9446_v50  ;;  %v6058_v41 = vor.u32 %v6969_v10, %v6057_v43  ;;  %v6999_v43 = vld [vmem:[%s10496_s7 + $0xa0] sm:$0xf0]  ;;  %v6022_v10 = vor.u32 %v6960_v23, %v6021_v4  ;;  %v6111_v4 = vld [vmem:[%s10496_s7 + $0x8] sm:$0xf]  ;;  %v6981_v23 = vld [vmem:[%s10496_s7 + $0x10] sm:$0xf0] }
 0xf63   :  { %v3203_v56 = vsel %vm3202_vm8, %v3198_v14, -inf  ;;  %v6966_v14 = vld [vmem:[%s10495_s5 + $0x58] sm:$0xf0]  ;;  %v6184_v34 = vor.u32 %v6999_v43, %v6183_v12  ;;  %v6112_v8 = vor.u32 %v6981_v23, %v6111_v4  ;;  %v7005_v43 = vld [vmem:[%s10498_s9 + $0x10] sm:$0xff] }
 0xf64   :  { %3204 = vmax.xlane.f32.xlu1 %v3203_v56  ;;  %v3207_v56 = vcvt.f32.s32 %v9446_v50  ;;  %3419 = vmatpush.bf16.msrb.mxu2 %v6058_v41  ;;  %v6046_v50 = vor.u32 %v6966_v14, %v6045_v38  ;;  %v6994_v41 = vld [vmem:[%s10496_s7 + $0x7c] sm:$0xf]  ;;  %v6171_v38 = vld [vmem:[%s10496_s7 + $0x80] sm:$0xf]  ;;  %v6996_v14 = vld [vmem:[%s10496_s7 + $0x88] sm:$0xf0] }
 0xf65   :  { %3616 = vmatpush.bf16.msra.mxu1 %v6184_v34  ;;  %v6168_v59 = vor.u32 %v6994_v41, %v6165_v44  ;;  %v6172_v3 = vor.u32 %v6996_v14, %v6171_v38  ;;  %v7003_v38 = vld [vmem:[%s10498_s9] sm:$0xff]  ;;  %v7057_v14 = vld [vmem:[%s10496_s7 + $0xb0] sm:$0xf0] }
 0xf66   :  { %v3208_v52 = vshll.u32 %v3207_v56, 16  ;;  %v6010_v56 = vor.u32 %v6957_v19, %v6009_v17  ;;  %v7004_v19 = vld [vmem:[%s10498_s9 + $0x8] sm:$0xff] }
 0xf67   :  { %3604 = vmatpush.bf16.msra.mxu0 %v6168_v59  ;;  %v6412_v59 = vld [vmem:[%s10496_s7 + $0x90] sm:$0xf] }
 0xf68   :  { %3420 = vmatpush.bf16.msrb.mxu2 %v6046_v50  ;;  %v6156_v50 = vor.u32 %v6991_v1, %v6153_v5 }
 0xf69   :  { %3617 = vmatpush.bf16.msra.mxu1 %v6172_v3  ;;  %v7054_v3 = vld [vmem:[%s10496_s7 + $0x98] sm:$0xf0] }
 0xf6a   :  { %v6413_v5 = vor.u32 %v7054_v3, %v6412_v59 }
 0xf6b   :  { %3605 = vmatpush.bf16.msra.mxu0 %v6156_v50 }
 0xf6c   :  { %3421 = vmatpush.bf16.msrb.mxu2 %v6034_v61  ;;  %v6987_v61 = vld [vmem:[%s10496_s7 + $0x40] sm:$0xf0] }
 0xf6d   :  { %3618 = vmatpush.bf16.msra.mxu1 %v6160_v13 }
 0xf70   :  { %3422 = vmatpush.bf16.msrb.mxu2 %v6022_v10  ;;  %v3599_v10 = vadd.f32 %v9444_v47, %v8239_v11  ;;  %v6424_v47 = vld [vmem:[%s10496_s7 + $0xa8] sm:$0xf] }
 0xf74   :  { %3423 = vmatpush.bf16.msrb.mxu2 %v6010_v56  ;;  %v6425_v56 = vor.u32 %v7057_v14, %v6424_v47 }
 0xfd7   :  { %v3205_v45 = vpop.xlane.xlu1 %3204 }
 0xfd8   :  { %v3206_v40 = vcvt.f32.s32 %v3205_v45  ;;  %v6147_v45 = vld [vmem:[%s10496_s7 + $0x50] sm:$0xf] }
 0xfda   :  { %v3209_v63 = vadd.s32 %v3208_v52, %v3206_v40  ;;  %v6144_v52 = vor.u32 %v6988_v39, %v6141_v46  ;;  %v6990_v40 = vld [vmem:[%s10496_s7 + $0x58] sm:$0xf0]  ;;  %v6400_v39 = vld [vmem:[%s10496_s7 + $0x78] sm:$0xf] }
 0xfdb   :  { %v6148_v33 = vor.u32 %v6990_v40, %v6147_v45 }
 0xfdc   :  { %v3210_v24 = vand.u32 127, %v3209_v63  ;;  %3606 = vmatpush.bf16.msra.mxu0 %v6144_v52  ;;  %v6136_v63 = vor.u32 %v6987_v61, %v6135_v58  ;;  %v7051_v52 = vld [vmem:[%s10496_s7 + $0x80] sm:$0xf0]  ;;  %v6389_v58 = vor.u32 %v7048_v57, %v6388_v54 }
 0xfdd   :  { %3619 = vmatpush.bf16.msra.mxu1 %v6148_v33  ;;  %v6401_v40 = vor.u32 %v7051_v52, %v6400_v39 }
 0xfde   :  { %v3211_v30 = vsub.s32 127, %v3210_v24  ;;  %v6979_v24 = vld [vmem:[%s10496_s7 + $0x4] sm:$0xf] }
 0xfe0   :  { %5995 = vst.msk [vmem:[%s10502_s12 + $0x20] sm:$0xff] %vm959_vm11, %v3211_v30  ;;  %v3222_v42 = vsel %vm9607_vm10, %v5997_v2, %v3211_v30  ;;  %3607 = vmatpush.bf16.msra.mxu0 %v6132_v60  ;;  %v6108_v2 = vor.u32 %v6979_v24, %v6105_v25  ;;  %v7010_v30 = vld [vmem:[%s10498_s9 + $0x38] sm:$0xff]  ;;  %v6364_v24 = vld [vmem:[%s10496_s7 + $0x30] sm:$0xf] }
 0xfe1   :  { %3224 = vperm.xlu2 %7128, %v3222_v42   ;;  %3620 = vmatpush.bf16.msra.mxu1 %v6136_v63  ;;  %v7042_v25 = vld [vmem:[%s10496_s7 + $0x38] sm:$0xf0] }
 0xfe2   :  { %3740 = vmatpush.bf16.msra.mxu2 %v7010_v30 }
 0xfe4   :  { %3608 = vmatpush.bf16.msra.mxu0 %v6120_v53 }
 0xfe5   :  { %3621 = vmatpush.bf16.msra.mxu1 %v6124_v18  ;;  %v6377_v18 = vor.u32 %v7045_v32, %v6376_v62 }
 0xfe6   :  { %3741 = vmatpush.bf16.msra.mxu2 %v7009_v15  ;;  %v6352_v15 = vld [vmem:[%s10496_s7 + $0x18] sm:$0xf] }
 0xfe8   :  { %3609 = vmatpush.bf16.msra.mxu0 %v6108_v2 }
 0xfe9   :  { %3622 = vmatpush.bf16.msra.mxu1 %v6112_v8  ;;  %v6365_v8 = vor.u32 %v7042_v25, %v6364_v24  ;;  %v6322_v24 = vld [vmem:[%s10495_s5 + $0xa8] sm:$0xf]  ;;  %v7033_v25 = vld [vmem:[%s10495_s5 + $0xb0] sm:$0xf0] }
 0xfea   :  { %3742 = vmatpush.bf16.msra.mxu2 %v7008_v21  ;;  %v7039_v21 = vld [vmem:[%s10496_s7 + $0x20] sm:$0xf0] }
 0xfee   :  { %3743 = vmatpush.bf16.msra.mxu2 %v7007_v20 }
0x103b   :  { %v3225_v26 = vpop.permute.xlu2 %3224 }
0x103c   :  { %vm3226_vm12 = vcmp.eq.s32.totalorder %v8078_v31, %v3225_v26 }
0x103d   :  { %vm6095_vm13 = vmpackc.low %vm3226_vm12, %vm3226_vm12 }
0x103e   :  { %6096 = vmatmul.msk.bf16.vlgmr.msrb.gmra.mxu0 %vm6095_vm13, %v7284_v48  ;;  %6098 = vmatmul.msk.bf16.vlgmr.msrb.gmra.mxu1 %vm6095_vm13, %v7284_v48 }
0x103f   :  { %6100 = vmatmul.msk.bf16.vlgmr.msrb.gmra.mxu2 %vm6095_vm13, %v7284_v48 }
0x104e   :  { %3610 = vmatmul.bf16.vlgmr.msra.gmra.mxu0 %v9435_v6  ;;  %3623 = vmatmul.bf16.vlgmr.msra.gmra.mxu1 %v9435_v6  ;;  %v7006_v6 = vld [vmem:[%s10498_s9 + $0x18] sm:$0xff] }
0x104f   :  { %3744 = vmatpush.bf16.msra.mxu2 %v7006_v6 }
0x1053   :  { %3745 = vmatpush.bf16.msra.mxu2 %v7005_v43 }
0x1057   :  { %3746 = vmatpush.bf16.msra.mxu2 %v7004_v19 }
0x105b   :  { %3747 = vmatpush.bf16.msra.mxu2 %v7003_v38 }
0x105f   :  { %4154 = vmatpush.bf16.msrb.mxu2 %v6425_v56 }
0x1063   :  { %4155 = vmatpush.bf16.msrb.mxu2 %v6413_v5 }
0x1067   :  { %4156 = vmatpush.bf16.msrb.mxu2 %v6401_v40  ;;  %v9807_v40 = vld [vmem:[%s10497_s10] ss:$0 sm:$0xff] }
0x106b   :  { %4157 = vmatpush.bf16.msrb.mxu2 %v6389_v58 }
0x106f   :  { %4158 = vmatpush.bf16.msrb.mxu2 %v6377_v18 }
0x1073   :  { %4159 = vmatpush.bf16.msrb.mxu2 %v6365_v8  ;;  %v6310_v8 = vld [vmem:[%s10495_s5 + $0x90] sm:$0xf] }
0x10bb   :  { %v3399_v51 = vpop.f32.mrf.mxu0  ;;  %v3412_v12 = vpop.f32.mrf.mxu1 }
0x10bc   :  { %v3400_v42 = vadd.f32 %v3399_v51, %v8236_v7  ;;  %v3413_v46 = vadd.f32 %v3412_v12, %v8220_v36  ;;  %v6353_v12 = vor.u32 %v7039_v21, %v6352_v15  ;;  %v7029_v15 = vld [vmem:[%s10495_s5 + $0x94] sm:$0xf]  ;;  %v6312_v21 = vld [vmem:[%s10495_s5 + $0x9c] sm:$0xf0] }
0x10be   :  { %v3628_v17 = vadd.f32 %v3599_v10, %v3400_v42  ;;  %v6340_v10 = vld [vmem:[%s10496_s7] sm:$0xf]  ;;  %v7036_v42 = vld [vmem:[%s10496_s7 + $0x8] sm:$0xf0]  ;;  %4160 = vmatpush.bf16.msrb.mxu2 %v6353_v12  ;;  %v7027_v12 = vld [vmem:[%s10495_s5 + $0x80] sm:$0xf0] }
0x10c0   :  { %v6197_v28 = vmul.f32 -1.442695, %v3628_v17 }
0x10c2   :  { %7250 = vpow2.f32 %v6197_v28  ;;  %v9737_v34 = vpop.f32.mrf.mxu2  ;;  %v6341_v28 = vor.u32 %v7036_v42, %v6340_v10  ;;  %v6300_v10 = vld [vmem:[%s10495_s5 + $0x84] sm:$0xf0]  ;;  %v6330_v42 = vld [vmem:[%s10495_s5 + $0xb0] sm:$0xf] }
0x10c3   :  { %v3401_v41 = vpop.f32.mrf.mxu0  ;;  %v3414_v44 = vpop.f32.mrf.mxu1 }
0x10c4   :  { %v3426_v44 = vadd.f32 %v9737_v34, %v8305_v35  ;;  %4161 = vmatpush.bf16.msrb.mxu2 %v6341_v28 }
0x10c8   :  { %v7251_v1 = vpop.eup %7250 }
0x10c9   :  { %v3632_v29 = vadd.f32 1.0, %v7251_v1 }
0x10ca   :  { %v3427_v27 = vpop.f32.mrf.mxu2 }
0x10cb   :  { %7252 = vrcp.f32 %v3632_v29  ;;  %v3611_v50 = vpop.f32.mrf.mxu0  ;;  %v3624_v13 = vpop.f32.mrf.mxu1  ;;  %v3644_v23 = vand.u32 2147483648, %v3632_v29  ;;  %v3642_v2 = vand.u32 2147483647, %v3632_v29  ;;  %vm3638_vm15 = vweird.f32 %v3632_v29 }
0x10cc   :  { %v3612_v45 = vadd.f32 %v3611_v50, %v8226_v55  ;;  %v3625_v17 = vadd.f32 %v3624_v13, %v8302_v22 }
0x10cd   :  { %v3645_v51 = vor.u32 1.1754944e-38, %v3644_v23  ;;  %vm3643_vm1 = vcmp.eq.f32.partialorder %v3642_v2, 8.507059e+37  ;;  %v6323_v23 = vor.u32 %v7033_v25, %v6322_v24  ;;  %v6324_v2 = vld [vmem:[%s10495_s5 + $0xb4] sm:$0xf0] }
0x10ce   :  { %v3648_v33 = vadd.f32 %v3612_v45, %v3413_v46 }
0x10cf   :  { %3955 = vmatpush.bf16.msra.mxu3 %v6323_v23 }
0x10d0   :  { %v6198_v60 = vmul.f32 -1.442695, %v3648_v33 }
0x10d1   :  { %v7253_v61 = vpop.eup %7252 }
0x10d2   :  { %7254 = vpow2.f32 %v6198_v60  ;;  %v3634_v63 = vmul.f32 %v7253_v61, %v3632_v29  ;;  %vm3639_vm14 = vweird.f32 %v7253_v61 }
0x10d3   :  { %v3613_v9 = vpop.f32.mrf.mxu0  ;;  %v3626_v16 = vpop.f32.mrf.mxu1  ;;  %vm3640_vm0 = vmor %vm3638_vm15, %vm3639_vm14 }
0x10d4   :  { %v3635_v53 = vsub.f32 1.0, %v3634_v63 }
0x10d6   :  { %v3636_v4 = vmul.f32 %v7253_v61, %v3635_v53 }
0x10d8   :  { %v7255_v26 = vpop.eup %7254  ;;  %v3637_v30 = vadd.f32 %v7253_v61, %v3636_v4  ;;  %v7032_v4 = vld [vmem:[%s10495_s5 + $0xac] sm:$0xf] }
0x10d9   :  { %v3652_v20 = vadd.f32 1.0, %v7255_v26  ;;  %v7030_v26 = vld [vmem:[%s10495_s5 + $0x98] sm:$0xf0] }
0x10da   :  { %v3641_v6 = vsel %vm3640_vm0, %v7253_v61, %v3637_v30  ;;  %v6327_v30 = vor.u32 %v7032_v4, %v6324_v2  ;;  %v6250_v2 = vld [vmem:[%s10495_s5 + $0x18] sm:$0xf] }
0x10db   :  { %7256 = vrcp.f32 %v3652_v20  ;;  %v3646_v43 = vsel %vm3643_vm1, %v3645_v51, %v3641_v6  ;;  %v3664_v56 = vand.u32 2147483648, %v3652_v20  ;;  %v3662_v3 = vand.u32 2147483647, %v3652_v20  ;;  %v6298_v51 = vld [vmem:[%s10495_s5 + $0x78] sm:$0xf] }
0x10dc   :  { %v3668_v19 = vmul.f32 %v3646_v43, %v3625_v17  ;;  %vm3658_vm3 = vweird.f32 %v3652_v20  ;;  %3968 = vmatpush.bf16.msrb.mxu0 %v6327_v30  ;;  %v6315_v6 = vor.u32 %v7029_v15, %v6312_v21  ;;  %v7026_v43 = vld [vmem:[%s10495_s5 + $0x7c] sm:$0xf]  ;;  %v6299_v28 = vor.u32 %v7027_v12, %v6298_v51  ;;  %v6252_v30 = vld [vmem:[%s10495_s5 + $0x24] sm:$0xf0]  ;;  %v6270_v15 = vld [vmem:[%s10495_s5 + $0x38] sm:$0xf] }
0x10dd   :  { %v3665_v5 = vor.u32 1.1754944e-38, %v3664_v56  ;;  %vm3663_vm5 = vcmp.eq.f32.partialorder %v3662_v3, 8.507059e+37  ;;  %v7034_v17 = vld [vmem:[%s10495_s5 + $0xb8] sm:$0xf0]  ;;  %v7023_v56 = vld [vmem:[%s10495_s5 + $0x64] sm:$0xf] }
0x10de   :  { %v3669_v47 = vadd.f32 %v3668_v19, %v3426_v44  ;;  %v6331_v19 = vor.u32 %v7034_v17, %v6330_v42  ;;  %v7031_v44 = vld [vmem:[%s10495_s5 + $0xa0] sm:$0xf0]  ;;  %v6288_v3 = vld [vmem:[%s10495_s5 + $0x6c] sm:$0xf0]  ;;  %v6238_v42 = vld [vmem:[%s10495_s5] sm:$0xf] }
0x10df   :  { %v7019_v21 = vld [vmem:[%s10495_s5 + $0x40] sm:$0xf0]  ;;  %v7012_v17 = vld [vmem:[%s10495_s5 + $0x8] sm:$0xf0] }
0x10e0   :  { %7258 = vtanh.f32 %v3669_v47  ;;  %3969 = vmatpush.bf16.msrb.mxu0 %v6315_v6  ;;  %v6286_v47 = vld [vmem:[%s10495_s5 + $0x60] sm:$0xf]  ;;  %3981 = vmatpush.bf16.msrb.mxu1 %v6331_v19  ;;  %v6271_v19 = vor.u32 %v7019_v21, %v6270_v15  ;;  %v7044_v21 = vld [vmem:[%s10496_s7 + $0x4c] sm:$0xf] }
0x10e1   :  { %v7257_v41 = vpop.eup %7256 }
0x10e2   :  { %v3654_v38 = vmul.f32 %v7257_v41, %v3652_v20  ;;  %vm3659_vm2 = vweird.f32 %v7257_v41  ;;  %v6311_v20 = vor.u32 %v7030_v26, %v6310_v8  ;;  %v7015_v8 = vld [vmem:[%s10495_s5 + $0x20] sm:$0xf0]  ;;  %v7014_v26 = vld [vmem:[%s10495_s5 + $0x1c] sm:$0xf] }
0x10e3   :  { %vm3660_vm4 = vmor %vm3658_vm3, %vm3659_vm2  ;;  %v6251_v12 = vor.u32 %v7015_v8, %v6250_v2  ;;  %v7047_v2 = vld [vmem:[%s10496_s7 + $0x64] sm:$0xf]  ;;  %v6390_v8 = vld [vmem:[%s10496_s7 + $0x6c] sm:$0xf0] }
0x10e4   :  { %v3655_v14 = vsub.f32 1.0, %v3654_v38  ;;  %3956 = vmatpush.bf16.msra.mxu3 %v6311_v20  ;;  %v6303_v38 = vor.u32 %v7026_v43, %v6300_v10  ;;  %v6255_v10 = vor.u32 %v7014_v26, %v6252_v30  ;;  %v6396_v26 = vld [vmem:[%s10496_s7 + $0x68] sm:$0xf]  ;;  %v6393_v30 = vor.u32 %v7047_v2, %v6390_v8  ;;  %v6649_v8 = vld [vmem:[%s10496_s7 + $0x90] sm:$0xf] }
0x10e6   :  { %v3656_v59 = vmul.f32 %v7257_v41, %v3655_v14  ;;  %v7259_v13 = vpop.eup %7258  ;;  %v7024_v14 = vld [vmem:[%s10495_s5 + $0x68] sm:$0xf0]  ;;  %3970 = vmatpush.bf16.msrb.mxu0 %v6303_v38 }
0x10e7   :  { %v7056_v38 = vld [vmem:[%s10496_s7 + $0xac] sm:$0xf] }
0x10e8   :  { %v3657_v1 = vadd.f32 %v7257_v41, %v3656_v59  ;;  %3957 = vmatpush.bf16.msra.mxu3 %v6299_v28 }
0x10ea   :  { %v3661_v29 = vsel %vm3660_vm4, %v7257_v41, %v3657_v1  ;;  %v6318_v41 = vld [vmem:[%s10495_s5 + $0x98] sm:$0xf]  ;;  %v6306_v1 = vld [vmem:[%s10495_s5 + $0x80] sm:$0xf] }
0x10eb   :  { %v3666_v27 = vsel %vm3663_vm5, %v3665_v5, %v3661_v29  ;;  %v6319_v59 = vor.u32 %v7031_v44, %v6318_v41  ;;  %v7028_v5 = vld [vmem:[%s10495_s5 + $0x88] sm:$0xf0]  ;;  %v6233_v29 = vld [vmem:[%s10503_s4 + $0x5] sm:$0x1]  ;;  %v6240_v44 = vld [vmem:[%s10495_s5 + $0xc] sm:$0xf0] }
0x10ec   :  { %v3671_v50 = vsub.f32 1.0, %v3666_v27  ;;  %v3673_v34 = vmul.f32 %v3666_v27, %v9431_v0  ;;  %v6287_v27 = vor.u32 %v7024_v14, %v6286_v47  ;;  %vm3781_vm8 = vcmp.gt.s32.totalorder %v6233_v29, 0  ;;  %v7011_v41 = vld [vmem:[%s10495_s5 + $0x4] sm:$0xf]  ;;  %v6426_v47 = vld [vmem:[%s10496_s7 + $0xb4] sm:$0xf0] }
0x10ed   :  { %3982 = vmatpush.bf16.msrb.mxu1 %v6319_v59  ;;  %v3784_v25 = vsel %vm3781_vm8, 1, %v7283_v37  ;;  %v6432_v14 = vld [vmem:[%s10496_s7 + $0xb0] sm:$0xf]  ;;  %v6234_v29 = vld [vmem:[%s10494_s3 + $0x28] sm:$0xff] }
0x10ee   :  { %v3672_v39 = vmul.f32 %v7259_v13, %v3671_v50  ;;  %v6291_v50 = vor.u32 %v7023_v56, %v6288_v3  ;;  %v6274_v13 = vld [vmem:[%s10495_s5 + $0x48] sm:$0xf]  ;;  %3958 = vmatpush.bf16.msra.mxu3 %v6287_v27  ;;  %v3785_v43 = vperm.slane %v3784_v25, 0  ;;  %v7058_v56 = vld [vmem:[%s10496_s7 + $0xb8] sm:$0xf0]  ;;  %v6239_v3 = vor.u32 %v7012_v17, %v6238_v42 }
0x10ef   :  { %v6366_v42 = vld [vmem:[%s10496_s7 + $0x3c] sm:$0xf0]  ;;  %v6372_v17 = vld [vmem:[%s10496_s7 + $0x38] sm:$0xf] }
0x10f0   :  { %v9796_v46 = vadd.f32 %v3673_v34, %v3672_v39  ;;  %v7021_v39 = vld [vmem:[%s10495_s5 + $0x50] sm:$0xf0]  ;;  %v7020_v34 = vld [vmem:[%s10495_s5 + $0x4c] sm:$0xf]  ;;  %3971 = vmatpush.bf16.msrb.mxu0 %v6291_v50  ;;  %vm9977_vm9 = vcmp.eq.s32.totalorder %v3785_v43, 1  ;;  %v6243_v50 = vor.u32 %v7011_v41, %v6240_v44 }
0x10f1   :  { %v7038_v44 = vld [vmem:[%s10496_s7 + $0x1c] sm:$0xf] }
0x10f2   :  { %v9800_v45 = vpack.c.bf16 %v9796_v46, %v9796_v46 }
0x10f4   :  { %3748 = vmatmul.bf16.vlgmr.msra.gmra.mxu2 %v9800_v45 }
0x1104   :  { %4162 = vmatmul.bf16.vlgmr.msrb.gmra.mxu2 %v9800_v45 }
0x1177   :  { %v3749_v52 = vpop.f32.mrf.mxu2 }
0x1178   :  { %v3750_v33 = vadd.f32 %v9807_v40, %v3749_v52  ;;  %v6307_v52 = vor.u32 %v7028_v5, %v6306_v1  ;;  %v6258_v1 = vld [vmem:[%s10495_s5 + $0x20] sm:$0xf]  ;;  %v7016_v5 = vld [vmem:[%s10495_s5 + $0x28] sm:$0xf0] }
0x117a   :  { %6231 = vst [vmem:[%s10501_s11 + $0x28] sm:$0xff] %v3750_v33  ;;  %v3757_v0 = vxor.u32 2147483647, %v3750_v33  ;;  %vm3756_vm6 = vcmp.lt.s32.totalorder %v3750_v33, 0  ;;  %3983 = vmatpush.bf16.msrb.mxu1 %v6307_v52  ;;  %v7053_v52 = vld [vmem:[%s10496_s7 + $0x94] sm:$0xf] }
0x117c   :  { %v3758_v54 = vsel %vm3756_vm6, %v3757_v0, %v3750_v33  ;;  %v6276_v33 = vld [vmem:[%s10495_s5 + $0x54] sm:$0xf0]  ;;  %v6294_v0 = vld [vmem:[%s10495_s5 + $0x68] sm:$0xf] }
0x117d   :  { %v3759_v57 = vand.u32 4294967168, %v3758_v54  ;;  %v7025_v54 = vld [vmem:[%s10495_s5 + $0x70] sm:$0xf0] }
0x117f   :  { %v3751_v58 = vpop.f32.mrf.mxu2  ;;  %v3760_v60 = vor.u32 %v3759_v57, %v8336_v49  ;;  %v6275_v57 = vor.u32 %v7021_v39, %v6274_v13  ;;  %v6429_v39 = vor.u32 %v7056_v38, %v6426_v47  ;;  %v6354_v38 = vld [vmem:[%s10496_s7 + $0x24] sm:$0xf0]  ;;  %v6360_v47 = vld [vmem:[%s10496_s7 + $0x20] sm:$0xf] }
0x1180   :  { %v6279_v58 = vor.u32 %v7020_v34, %v6276_v33  ;;  %v6433_v34 = vor.u32 %v7058_v56, %v6432_v14  ;;  %v6414_v33 = vld [vmem:[%s10496_s7 + $0x9c] sm:$0xf0]  ;;  %v7040_v14 = vld [vmem:[%s10496_s7 + $0x28] sm:$0xf0]  ;;  %v6357_v56 = vor.u32 %v7038_v44, %v6354_v38 }
0x1181   :  { %v3762_v61 = vshra.s32 %v3760_v60, 16  ;;  %v3761_v62 = vand.u32 65535, %v3760_v60  ;;  %v6262_v60 = vld [vmem:[%s10495_s5 + $0x30] sm:$0xf]  ;;  %3959 = vmatpush.bf16.msra.mxu3 %v6275_v57  ;;  %v6259_v57 = vor.u32 %v7016_v5, %v6258_v1  ;;  %v6348_v5 = vld [vmem:[%s10496_s7 + $0x8] sm:$0xf] }
0x1182   :  { %3972 = vmatpush.bf16.msrb.mxu0 %v6279_v58  ;;  %v6342_v1 = vld [vmem:[%s10496_s7 + $0xc] sm:$0xf0] }
0x1183   :  { %v3764_v63 = vcvt.s32.f32 %v3762_v61  ;;  %v3763_v53 = vcvt.s32.f32 %v3761_v62  ;;  %v7018_v61 = vld [vmem:[%s10495_s5 + $0x38] sm:$0xf0]  ;;  %v6264_v62 = vld [vmem:[%s10495_s5 + $0x3c] sm:$0xf0] }
0x1184   :  { %v6263_v4 = vor.u32 %v7018_v61, %v6262_v60  ;;  %v6246_v60 = vld [vmem:[%s10495_s5 + $0x8] sm:$0xf]  ;;  %v7013_v61 = vld [vmem:[%s10495_s5 + $0x10] sm:$0xf0] }
0x1185   :  { %3765 = vmax.xlane.f32.xlu1 %v3764_v63  ;;  %v6247_v25 = vor.u32 %v7013_v61, %v6246_v60 }
0x1186   :  { %3960 = vmatpush.bf16.msra.mxu3 %v6263_v4 }
0x1187   :  { %v9814_v9 = vpop.f32.mrf.mxu2 }
0x1188   :  { %v4164_v60 = vadd.f32 %v9814_v9, %v8239_v11  ;;  %v6661_v9 = vld [vmem:[%s10496_s7 + $0xa8] sm:$0xf] }
0x118a   :  { %3961 = vmatpush.bf16.msra.mxu3 %v6251_v12  ;;  %v7046_v12 = vld [vmem:[%s10496_s7 + $0x58] sm:$0xf0] }
0x118e   :  { %3962 = vmatpush.bf16.msra.mxu3 %v6239_v3  ;;  %v7035_v3 = vld [vmem:[%s10496_s7 + $0x4] sm:$0xf] }
0x118f   :  { %v4165_v16 = vpop.f32.mrf.mxu2  ;;  %v6345_v27 = vor.u32 %v7035_v3, %v6342_v1  ;;  %v6601_v1 = vld [vmem:[%s10496_s7 + $0x30] sm:$0xf] }
0x1190   :  { %v6295_v16 = vor.u32 %v7025_v54, %v6294_v0  ;;  %v6420_v0 = vld [vmem:[%s10496_s7 + $0x98] sm:$0xf]  ;;  %v7055_v54 = vld [vmem:[%s10496_s7 + $0xa0] sm:$0xf0] }
0x1192   :  { %3984 = vmatpush.bf16.msrb.mxu1 %v6295_v16  ;;  %4167 = vmatpush.bf16.msrb.mxu3 %v6429_v39  ;;  %v6421_v16 = vor.u32 %v7055_v54, %v6420_v0  ;;  %v7066_v39 = vld [vmem:[%s10498_s9 + $0x38] sm:$0xff] }
0x1193   :  { %v7062_v54 = vld [vmem:[%s10498_s9 + $0x18] sm:$0xff] }
0x11f8   :  { %v9816_v32 = vpop.xlane.xlu1 %3765 }
0x11f9   :  { %vm3767_vm7 = vcmp.eq.f32.partialorder %v3764_v63, %v9816_v32  ;;  %v7017_v63 = vld [vmem:[%s10495_s5 + $0x34] sm:$0xf]  ;;  %v3772_v24 = vcvt.f32.s32 %v9816_v32 }
0x11fa   :  { %v3768_v18 = vsel %vm3767_vm7, %v3763_v53, -inf  ;;  %v6282_v53 = vld [vmem:[%s10495_s5 + $0x50] sm:$0xf]  ;;  %v6267_v23 = vor.u32 %v7017_v63, %v6264_v62  ;;  %v6417_v63 = vor.u32 %v7053_v52, %v6414_v33  ;;  %v7050_v62 = vld [vmem:[%s10496_s7 + $0x7c] sm:$0xf]  ;;  %v7064_v52 = vld [vmem:[%s10498_s9 + $0x28] sm:$0xff] }
0x11fb   :  { %3769 = vmax.xlane.f32.xlu1 %v3768_v18  ;;  %v7022_v18 = vld [vmem:[%s10495_s5 + $0x58] sm:$0xf0]  ;;  %v3773_v6 = vshll.u32 %v3772_v24, 16  ;;  %v7052_v24 = vld [vmem:[%s10496_s7 + $0x88] sm:$0xf0]  ;;  %v7063_v33 = vld [vmem:[%s10498_s9 + $0x20] sm:$0xff] }
0x11fc   :  { %v6283_v32 = vor.u32 %v7022_v18, %v6282_v53  ;;  %3973 = vmatpush.bf16.msrb.mxu0 %v6267_v23  ;;  %v6402_v53 = vld [vmem:[%s10496_s7 + $0x84] sm:$0xf0]  ;;  %v6408_v18 = vld [vmem:[%s10496_s7 + $0x80] sm:$0xf]  ;;  %4168 = vmatpush.bf16.msrb.mxu3 %v6417_v63 }
0x11fd   :  { %v6405_v4 = vor.u32 %v7050_v62, %v6402_v53  ;;  %v6409_v23 = vor.u32 %v7052_v24, %v6408_v18  ;;  %v7060_v53 = vld [vmem:[%s10498_s9 + $0x8] sm:$0xff] }
0x11fe   :  { %3985 = vmatpush.bf16.msrb.mxu1 %v6283_v32  ;;  %v7049_v32 = vld [vmem:[%s10496_s7 + $0x70] sm:$0xf0] }
0x11ff   :  { %v6397_v15 = vor.u32 %v7049_v32, %v6396_v26  ;;  %v7110_v26 = vld [vmem:[%s10496_s7 + $0x98] sm:$0xf0] }
0x1200   :  { %3974 = vmatpush.bf16.msrb.mxu0 %v6255_v10  ;;  %4169 = vmatpush.bf16.msrb.mxu3 %v6405_v4  ;;  %v7041_v10 = vld [vmem:[%s10496_s7 + $0x34] sm:$0xf] }
0x1201   :  { %v7113_v4 = vld [vmem:[%s10496_s7 + $0xb0] sm:$0xf0] }
0x1202   :  { %3986 = vmatpush.bf16.msrb.mxu1 %v6271_v19  ;;  %v6369_v19 = vor.u32 %v7041_v10, %v6366_v42 }
0x1204   :  { %3975 = vmatpush.bf16.msrb.mxu0 %v6243_v50  ;;  %4170 = vmatpush.bf16.msrb.mxu3 %v6393_v30  ;;  %v6650_v30 = vor.u32 %v7110_v26, %v6649_v8 }
0x1206   :  { %3987 = vmatpush.bf16.msrb.mxu1 %v6259_v57 }
0x1208   :  { %4180 = vmatpush.bf16.msra.mxu0 %v6433_v34  ;;  %v7065_v34 = vld [vmem:[%s10498_s9 + $0x30] sm:$0xff] }
0x120a   :  { %3988 = vmatpush.bf16.msrb.mxu1 %v6247_v25  ;;  %v7059_v25 = vld [vmem:[%s10498_s9] sm:$0xff] }
0x120c   :  { %4181 = vmatpush.bf16.msra.mxu0 %v6421_v16 }
0x120e   :  { %4305 = vmatpush.bf16.msra.mxu1 %v7066_v39  ;;  %v6589_v39 = vld [vmem:[%s10496_s7 + $0x18] sm:$0xf] }
0x1210   :  { %4182 = vmatpush.bf16.msra.mxu0 %v6409_v23  ;;  %v6662_v23 = vor.u32 %v7113_v4, %v6661_v9 }
0x1212   :  { %4306 = vmatpush.bf16.msra.mxu1 %v7065_v34  ;;  %v7095_v34 = vld [vmem:[%s10496_s7 + $0x20] sm:$0xf0] }
0x1214   :  { %4183 = vmatpush.bf16.msra.mxu0 %v6397_v15  ;;  %v6637_v15 = vld [vmem:[%s10496_s7 + $0x78] sm:$0xf] }
0x1216   :  { %4307 = vmatpush.bf16.msra.mxu1 %v7064_v52 }
0x121a   :  { %4308 = vmatpush.bf16.msra.mxu1 %v7063_v33 }
0x121e   :  { %4309 = vmatpush.bf16.msra.mxu1 %v7062_v54 }
0x126e   :  { %v3770_v20 = vpop.xlane.xlu1 %3769 }
0x126f   :  { %v3771_v51 = vcvt.f32.s32 %v3770_v20  ;;  %v6378_v20 = vld [vmem:[%s10496_s7 + $0x54] sm:$0xf0] }
0x1271   :  { %v3774_v28 = vadd.s32 %v3773_v6, %v3771_v51  ;;  %v6384_v6 = vld [vmem:[%s10496_s7 + $0x50] sm:$0xf]  ;;  %v6381_v51 = vor.u32 %v7044_v21, %v6378_v20  ;;  %v7107_v21 = vld [vmem:[%s10496_s7 + $0x80] sm:$0xf0] }
0x1272   :  { %v6385_v43 = vor.u32 %v7046_v12, %v6384_v6  ;;  %v6638_v6 = vor.u32 %v7107_v21, %v6637_v15  ;;  %v6625_v12 = vld [vmem:[%s10496_s7 + $0x60] sm:$0xf] }
0x1273   :  { %v3775_v59 = vand.u32 127, %v3774_v28  ;;  %4171 = vmatpush.bf16.msrb.mxu3 %v6381_v51  ;;  %v7043_v28 = vld [vmem:[%s10496_s7 + $0x40] sm:$0xf0] }
0x1274   :  { %4184 = vmatpush.bf16.msra.mxu0 %v6385_v43  ;;  %v6373_v41 = vor.u32 %v7043_v28, %v6372_v17  ;;  %v7104_v43 = vld [vmem:[%s10496_s7 + $0x68] sm:$0xf0] }
0x1275   :  { %v3776_v13 = vsub.s32 127, %v3775_v59  ;;  %v6361_v59 = vor.u32 %v7040_v14, %v6360_v47  ;;  %v6626_v28 = vor.u32 %v7104_v43, %v6625_v12  ;;  %v6613_v14 = vld [vmem:[%s10496_s7 + $0x48] sm:$0xf] }
0x1277   :  { %6232 = vst.msk [vmem:[%s10502_s12 + $0x28] sm:$0xff] %vm959_vm11, %v3776_v13  ;;  %v3787_v58 = vsel %vm9977_vm9, %v6234_v29, %v3776_v13  ;;  %4172 = vmatpush.bf16.msrb.mxu3 %v6369_v19  ;;  %v7037_v29 = vld [vmem:[%s10496_s7 + $0x10] sm:$0xf0] }
0x1278   :  { %3789 = vperm.xlu1 %7127, %v3787_v58   ;;  %4185 = vmatpush.bf16.msra.mxu0 %v6373_v41  ;;  %v6349_v50 = vor.u32 %v7037_v29, %v6348_v5  ;;  %v7061_v58 = vld [vmem:[%s10498_s9 + $0x10] sm:$0xff]  ;;  %v7098_v5 = vld [vmem:[%s10496_s7 + $0x38] sm:$0xf0] }
0x1279   :  { %4310 = vmatpush.bf16.msra.mxu1 %v7061_v58  ;;  %v6590_v58 = vor.u32 %v7095_v34, %v6589_v39  ;;  %v7085_v34 = vld [vmem:[%s10495_s5 + $0x94] sm:$0xf] }
0x127b   :  { %4173 = vmatpush.bf16.msrb.mxu3 %v6357_v56  ;;  %v7101_v56 = vld [vmem:[%s10496_s7 + $0x50] sm:$0xf0] }
0x127c   :  { %4186 = vmatpush.bf16.msra.mxu0 %v6361_v59  ;;  %v6614_v3 = vor.u32 %v7101_v56, %v6613_v14 }
0x127d   :  { %4311 = vmatpush.bf16.msra.mxu1 %v7060_v53 }
0x127f   :  { %4174 = vmatpush.bf16.msrb.mxu3 %v6345_v27 }
0x1280   :  { %4187 = vmatpush.bf16.msra.mxu0 %v6349_v50  ;;  %v6602_v50 = vor.u32 %v7098_v5, %v6601_v1  ;;  %v7089_v1 = vld [vmem:[%s10495_s5 + $0xb0] sm:$0xf0]  ;;  %v7088_v5 = vld [vmem:[%s10495_s5 + $0xac] sm:$0xf] }
0x1281   :  { %4312 = vmatpush.bf16.msra.mxu1 %v7059_v25 }
0x12ea   :  { %v3790_v13 = vpop.permute.xlu1 %3789 }
0x12eb   :  { %vm3791_vm10 = vcmp.eq.s32.totalorder %v8078_v31, %v3790_v13 }
0x12ec   :  { %vm6332_vm12 = vmpackc.low %vm3791_vm10, %vm3791_vm10 }
0x12ed   :  { %6333 = vmatmul.msk.bf16.vlgmr.msra.gmra.mxu3 %vm6332_vm12, %v7284_v48  ;;  %6335 = vmatmul.msk.bf16.vlgmr.msrb.gmra.mxu0 %vm6332_vm12, %v7284_v48 }
0x12ee   :  { %6337 = vmatmul.msk.bf16.vlgmr.msrb.gmra.mxu1 %vm6332_vm12, %v7284_v48 }
0x12ef   :  { %4719 = vmatpush.bf16.msrb.mxu1 %v6662_v23 }
0x12f3   :  { %4720 = vmatpush.bf16.msrb.mxu1 %v6650_v30 }
0x12f7   :  { %4721 = vmatpush.bf16.msrb.mxu1 %v6638_v6 }
0x12fb   :  { %4722 = vmatpush.bf16.msrb.mxu1 %v6626_v28 }
0x12fd   :  { %4175 = vmatmul.bf16.vlgmr.msrb.gmra.mxu3 %v9800_v45  ;;  %4188 = vmatmul.bf16.vlgmr.msra.gmra.mxu0 %v9800_v45 }
0x12ff   :  { %4723 = vmatpush.bf16.msrb.mxu1 %v6614_v3  ;;  %v6559_v3 = vld [vmem:[%s10495_s5 + $0xa8] sm:$0xf] }
0x1303   :  { %4724 = vmatpush.bf16.msrb.mxu1 %v6602_v50  ;;  %v6547_v50 = vld [vmem:[%s10495_s5 + $0x90] sm:$0xf] }
0x1307   :  { %4725 = vmatpush.bf16.msrb.mxu1 %v6590_v58  ;;  %v7082_v58 = vld [vmem:[%s10495_s5 + $0x7c] sm:$0xf] }
0x136a   :  { %v3977_v45 = vpop.f32.mrf.mxu0 }
0x136b   :  { %v10095_v0 = vpop.f32.mrf.mxu1  ;;  %v3978_v10 = vadd.f32 %v3977_v45, %v8220_v36 }
0x1370   :  { %v3964_v57 = vpop.f32.mrf.mxu3 }
0x1371   :  { %v3965_v61 = vadd.f32 %v3964_v57, %v8236_v7 }
0x1372   :  { %v3979_v63 = vpop.f32.mrf.mxu0 }
0x1373   :  { %v4193_v16 = vadd.f32 %v4164_v60, %v3965_v61  ;;  %v3992_v62 = vpop.f32.mrf.mxu1  ;;  %v6577_v60 = vld [vmem:[%s10496_s7] sm:$0xf]  ;;  %v7092_v61 = vld [vmem:[%s10496_s7 + $0x8] sm:$0xf0] }
0x1374   :  { %v6578_v62 = vor.u32 %v7092_v61, %v6577_v60  ;;  %v6537_v60 = vld [vmem:[%s10495_s5 + $0x84] sm:$0xf0]  ;;  %v6567_v61 = vld [vmem:[%s10495_s5 + $0xb0] sm:$0xf] }
0x1375   :  { %v6434_v18 = vmul.f32 -1.442695, %v4193_v16 }
0x1376   :  { %4726 = vmatpush.bf16.msrb.mxu1 %v6578_v62 }
0x1377   :  { %7260 = vpow2.f32 %v6434_v18 }
0x1378   :  { %v3966_v24 = vpop.f32.mrf.mxu3 }
0x1379   :  { %v3991_v24 = vadd.f32 %v10095_v0, %v8305_v35 }
0x137a   :  { %v4189_v2 = vpop.f32.mrf.mxu0 }
0x137b   :  { %v4190_v16 = vadd.f32 %v4189_v2, %v8302_v22 }
0x137d   :  { %v7261_v32 = vpop.eup %7260 }
0x137e   :  { %v4197_v20 = vadd.f32 1.0, %v7261_v32 }
0x1380   :  { %7262 = vrcp.f32 %v4197_v20  ;;  %v4176_v51 = vpop.f32.mrf.mxu3  ;;  %v4209_v27 = vand.u32 2147483648, %v4197_v20  ;;  %v4207_v13 = vand.u32 2147483647, %v4197_v20  ;;  %vm4203_vm14 = vweird.f32 %v4197_v20 }
0x1381   :  { %v4177_v42 = vadd.f32 %v4176_v51, %v8226_v55 }
0x1382   :  { %v4191_v17 = vpop.f32.mrf.mxu0  ;;  %v4210_v57 = vor.u32 1.1754944e-38, %v4209_v27  ;;  %vm4208_vm0 = vcmp.eq.f32.partialorder %v4207_v13, 8.507059e+37  ;;  %v6561_v27 = vld [vmem:[%s10495_s5 + $0xb4] sm:$0xf0]  ;;  %v7086_v13 = vld [vmem:[%s10495_s5 + $0x98] sm:$0xf0] }
0x1383   :  { %v4213_v19 = vadd.f32 %v4177_v42, %v3978_v10  ;;  %v6564_v39 = vor.u32 %v7088_v5, %v6561_v27  ;;  %v7071_v27 = vld [vmem:[%s10495_s5 + $0x20] sm:$0xf0] }
0x1385   :  { %v6435_v41 = vmul.f32 -1.442695, %v4213_v19  ;;  %4533 = vmatpush.bf16.msra.mxu3 %v6564_v39  ;;  %v7075_v39 = vld [vmem:[%s10495_s5 + $0x40] sm:$0xf0] }
0x1386   :  { %v7263_v44 = vpop.eup %7262 }
0x1387   :  { %v4199_v38 = vmul.f32 %v7263_v44, %v4197_v20  ;;  %7264 = vpow2.f32 %v6435_v41  ;;  %vm4204_vm13 = vweird.f32 %v7263_v44 }
0x1388   :  { %v4178_v47 = vpop.f32.mrf.mxu3  ;;  %vm4205_vm15 = vmor %vm4203_vm14, %vm4204_vm13 }
0x1389   :  { %v4200_v59 = vsub.f32 1.0, %v4199_v38 }
0x138b   :  { %v4201_v29 = vmul.f32 %v7263_v44, %v4200_v59 }
0x138d   :  { %v7265_v52 = vpop.eup %7264  ;;  %v4202_v33 = vadd.f32 %v7263_v44, %v4201_v29  ;;  %v6560_v29 = vor.u32 %v7089_v1, %v6559_v3 }
0x138e   :  { %v4217_v45 = vadd.f32 1.0, %v7265_v52  ;;  %v6549_v52 = vld [vmem:[%s10495_s5 + $0x9c] sm:$0xf0] }
0x138f   :  { %v4206_v54 = vsel %vm4205_vm15, %v7263_v44, %v4202_v33  ;;  %4520 = vmatpush.bf16.msra.mxu2 %v6560_v29  ;;  %v6548_v33 = vor.u32 %v7086_v13, %v6547_v50  ;;  %v6487_v29 = vld [vmem:[%s10495_s5 + $0x18] sm:$0xf]  ;;  %v7070_v50 = vld [vmem:[%s10495_s5 + $0x1c] sm:$0xf] }
0x1390   :  { %7266 = vrcp.f32 %v4217_v45  ;;  %v4211_v63 = vsel %vm4208_vm0, %v4210_v57, %v4206_v54  ;;  %v4229_v23 = vand.u32 2147483648, %v4217_v45  ;;  %v4227_v26 = vand.u32 2147483647, %v4217_v45  ;;  %v6535_v54 = vld [vmem:[%s10495_s5 + $0x78] sm:$0xf] }
0x1391   :  { %v4233_v53 = vmul.f32 %v4211_v63, %v4190_v16  ;;  %vm4223_vm2 = vweird.f32 %v4217_v45  ;;  %v7083_v57 = vld [vmem:[%s10495_s5 + $0x80] sm:$0xf0]  ;;  %v7090_v63 = vld [vmem:[%s10495_s5 + $0xb8] sm:$0xf0]  ;;  %v6507_v13 = vld [vmem:[%s10495_s5 + $0x38] sm:$0xf] }
0x1392   :  { %v4230_v2 = vor.u32 1.1754944e-38, %v4229_v23  ;;  %vm4228_vm4 = vcmp.eq.f32.partialorder %v4227_v26, 8.507059e+37  ;;  %v6568_v16 = vor.u32 %v7090_v63, %v6567_v61  ;;  %v6536_v62 = vor.u32 %v7083_v57, %v6535_v54  ;;  %v6543_v26 = vld [vmem:[%s10495_s5 + $0x80] sm:$0xf] }
0x1393   :  { %v4234_v9 = vadd.f32 %v4233_v53, %v3991_v24  ;;  %4521 = vmatpush.bf16.msra.mxu2 %v6548_v33  ;;  %v6555_v53 = vld [vmem:[%s10495_s5 + $0x98] sm:$0xf]  ;;  %v6540_v24 = vor.u32 %v7082_v58, %v6537_v60  ;;  %v6475_v58 = vld [vmem:[%s10495_s5] sm:$0xf]  ;;  %v7068_v60 = vld [vmem:[%s10495_s5 + $0x8] sm:$0xf0]  ;;  %v6508_v61 = vor.u32 %v7075_v39, %v6507_v13 }
0x1394   :  { %4546 = vmatpush.bf16.msrb.mxu0 %v6568_v16  ;;  %v7067_v16 = vld [vmem:[%s10495_s5 + $0x4] sm:$0xf]  ;;  %v6615_v13 = vld [vmem:[%s10496_s7 + $0x54] sm:$0xf0]  ;;  %v6621_v39 = vld [vmem:[%s10496_s7 + $0x50] sm:$0xf] }
0x1395   :  { %7268 = vtanh.f32 %v4234_v9  ;;  %v7080_v9 = vld [vmem:[%s10495_s5 + $0x68] sm:$0xf0] }
0x1396   :  { %v7267_v18 = vpop.eup %7266 }
0x1397   :  { %v4219_v25 = vmul.f32 %v7267_v18, %v4217_v45  ;;  %vm4224_vm1 = vweird.f32 %v7267_v18  ;;  %v6552_v45 = vor.u32 %v7085_v34, %v6549_v52  ;;  %4522 = vmatpush.bf16.msra.mxu2 %v6536_v62  ;;  %v6477_v62 = vld [vmem:[%s10495_s5 + $0xc] sm:$0xf0] }
0x1398   :  { %vm4225_vm3 = vmor %vm4223_vm2, %vm4224_vm1 }
0x1399   :  { %v4220_v4 = vsub.f32 1.0, %v4219_v25  ;;  %4534 = vmatpush.bf16.msra.mxu3 %v6552_v45  ;;  %v6523_v25 = vld [vmem:[%s10495_s5 + $0x60] sm:$0xf]  ;;  %v6488_v45 = vor.u32 %v7071_v27, %v6487_v29  ;;  %v6633_v29 = vld [vmem:[%s10496_s7 + $0x68] sm:$0xf] }
0x139a   :  { %v7105_v27 = vld [vmem:[%s10496_s7 + $0x70] sm:$0xf0] }
0x139b   :  { %v4221_v8 = vmul.f32 %v7267_v18, %v4220_v4  ;;  %v7269_v20 = vpop.eup %7268  ;;  %v7079_v4 = vld [vmem:[%s10495_s5 + $0x64] sm:$0xf] }
0x139d   :  { %v4222_v32 = vadd.f32 %v7267_v18, %v4221_v8  ;;  %v6525_v8 = vld [vmem:[%s10495_s5 + $0x6c] sm:$0xf0]  ;;  %4535 = vmatpush.bf16.msra.mxu3 %v6540_v24 }
0x139e   :  { %v6669_v24 = vld [vmem:[%s10496_s7 + $0xb0] sm:$0xf] }
0x139f   :  { %v4226_v30 = vsel %vm4225_vm3, %v7267_v18, %v4222_v32  ;;  %v7087_v18 = vld [vmem:[%s10495_s5 + $0xa0] sm:$0xf0]  ;;  %v7084_v32 = vld [vmem:[%s10495_s5 + $0x88] sm:$0xf0] }
0x13a0   :  { %v4231_v15 = vsel %vm4228_vm4, %v4230_v2, %v4226_v30  ;;  %v6556_v23 = vor.u32 %v7087_v18, %v6555_v53  ;;  %v6470_v2 = vld [vmem:[%s10503_s4 + $0x6] sm:$0x1]  ;;  %v6524_v30 = vor.u32 %v7080_v9, %v6523_v25  ;;  %v7112_v53 = vld [vmem:[%s10496_s7 + $0xac] sm:$0xf]  ;;  %v6663_v18 = vld [vmem:[%s10496_s7 + $0xb4] sm:$0xf0] }
0x13a1   :  { %v4236_v21 = vsub.f32 1.0, %v4231_v15  ;;  %v4238_v0 = vmul.f32 %v4231_v15, %v9796_v46  ;;  %v6528_v15 = vor.u32 %v7079_v4, %v6525_v8  ;;  %vm4346_vm7 = vcmp.gt.s32.totalorder %v6470_v2, 0  ;;  %v7114_v25 = vld [vmem:[%s10496_s7 + $0xb8] sm:$0xf0]  ;;  %v7072_v8 = vld [vmem:[%s10495_s5 + $0x28] sm:$0xf0] }
0x13a2   :  { %4547 = vmatpush.bf16.msrb.mxu0 %v6556_v23  ;;  %4523 = vmatpush.bf16.msra.mxu2 %v6524_v30  ;;  %v4349_v3 = vsel %vm4346_vm7, 1, %v7283_v37  ;;  %v6489_v37 = vld [vmem:[%s10495_s5 + $0x24] sm:$0xf0]  ;;  %v6476_v4 = vor.u32 %v7068_v60, %v6475_v58  ;;  %v6495_v23 = vld [vmem:[%s10495_s5 + $0x20] sm:$0xf]  ;;  %v6480_v2 = vor.u32 %v7067_v16, %v6477_v62 }
0x13a3   :  { %v4237_v6 = vmul.f32 %v7269_v20, %v4236_v21  ;;  %v6511_v21 = vld [vmem:[%s10495_s5 + $0x48] sm:$0xf]  ;;  %v7077_v20 = vld [vmem:[%s10495_s5 + $0x50] sm:$0xf0]  ;;  %4536 = vmatpush.bf16.msra.mxu3 %v6528_v15  ;;  %v4350_v54 = vperm.slane %v4349_v3, 0  ;;  %v6492_v57 = vor.u32 %v7070_v50, %v6489_v37  ;;  %v6666_v15 = vor.u32 %v7112_v53, %v6663_v18 }
0x13a4   :  { %v7100_v37 = vld [vmem:[%s10496_s7 + $0x4c] sm:$0xf]  ;;  %v7099_v60 = vld [vmem:[%s10496_s7 + $0x40] sm:$0xf0]  ;;  %v6591_v16 = vld [vmem:[%s10496_s7 + $0x24] sm:$0xf0] }
0x13a5   :  { %v10166_v51 = vadd.f32 %v4238_v0, %v4237_v6  ;;  %v7076_v6 = vld [vmem:[%s10495_s5 + $0x4c] sm:$0xf]  ;;  %v6544_v0 = vor.u32 %v7084_v32, %v6543_v26  ;;  %v6471_v26 = vld [vmem:[%s10494_s3 + $0x30] sm:$0xff]  ;;  %vm10342_vm8 = vcmp.eq.s32.totalorder %v4350_v54, 1  ;;  %v6603_v54 = vld [vmem:[%s10496_s7 + $0x3c] sm:$0xf0] }
0x13a6   :  { %v6597_v62 = vld [vmem:[%s10496_s7 + $0x20] sm:$0xf]  ;;  %v7096_v53 = vld [vmem:[%s10496_s7 + $0x28] sm:$0xf0] }
0x13a7   :  { %v10170_v12 = vpack.c.bf16 %v10166_v51, %v10166_v51  ;;  %4548 = vmatpush.bf16.msrb.mxu0 %v6544_v0  ;;  %v6657_v0 = vld [vmem:[%s10496_s7 + $0x98] sm:$0xf] }
0x13a9   :  { %4313 = vmatmul.bf16.vlgmr.msra.gmra.mxu1 %v10170_v12 }
0x13b9   :  { %4727 = vmatmul.bf16.vlgmr.msrb.gmra.mxu1 %v10170_v12 }
0x1426   :  { %v4314_v43 = vpop.f32.mrf.mxu1 }
0x1427   :  { %v4315_v10 = vadd.f32 %v9807_v40, %v4314_v43  ;;  %v6513_v43 = vld [vmem:[%s10495_s5 + $0x54] sm:$0xf0] }
0x1429   :  { %6468 = vst [vmem:[%s10501_s11 + $0x30] sm:$0xff] %v4315_v10  ;;  %v4322_v42 = vxor.u32 2147483647, %v4315_v10  ;;  %vm4321_vm5 = vcmp.lt.s32.totalorder %v4315_v10, 0 }
0x142b   :  { %v4323_v46 = vsel %vm4321_vm5, %v4322_v42, %v4315_v10  ;;  %v6531_v10 = vld [vmem:[%s10495_s5 + $0x68] sm:$0xf]  ;;  %v7081_v42 = vld [vmem:[%s10495_s5 + $0x70] sm:$0xf0] }
0x142c   :  { %v4324_v17 = vand.u32 4294967168, %v4323_v46  ;;  %v6512_v46 = vor.u32 %v7077_v20, %v6511_v21  ;;  %v6670_v21 = vor.u32 %v7114_v25, %v6669_v24  ;;  %v7109_v20 = vld [vmem:[%s10496_s7 + $0x94] sm:$0xf]  ;;  %v6598_v24 = vor.u32 %v7096_v53, %v6597_v62  ;;  %v7091_v25 = vld [vmem:[%s10496_s7 + $0x4] sm:$0xf] }
0x142e   :  { %v4316_v19 = vpop.f32.mrf.mxu1  ;;  %v4325_v28 = vor.u32 %v4324_v17, %v8336_v49  ;;  %v6516_v17 = vor.u32 %v7076_v6, %v6513_v43  ;;  %4524 = vmatpush.bf16.msra.mxu2 %v6512_v46  ;;  %v6651_v6 = vld [vmem:[%s10496_s7 + $0x9c] sm:$0xf0]  ;;  %v7111_v43 = vld [vmem:[%s10496_s7 + $0xa0] sm:$0xf0]  ;;  %v6483_v46 = vld [vmem:[%s10495_s5 + $0x8] sm:$0xf] }
0x142f   :  { %v6499_v19 = vld [vmem:[%s10495_s5 + $0x30] sm:$0xf] }
0x1430   :  { %v4327_v41 = vshra.s32 %v4325_v28, 16  ;;  %v4326_v14 = vand.u32 65535, %v4325_v28  ;;  %v7074_v28 = vld [vmem:[%s10495_s5 + $0x38] sm:$0xf0]  ;;  %4537 = vmatpush.bf16.msra.mxu3 %v6516_v17  ;;  %v7069_v17 = vld [vmem:[%s10495_s5 + $0x10] sm:$0xf0] }
0x1431   :  { %v6500_v1 = vor.u32 %v7074_v28, %v6499_v19  ;;  %v6654_v19 = vor.u32 %v7109_v20, %v6651_v6  ;;  %v6658_v28 = vor.u32 %v7111_v43, %v6657_v0 }
0x1432   :  { %v4329_v44 = vcvt.s32.f32 %v4327_v41  ;;  %v4328_v40 = vcvt.s32.f32 %v4326_v14  ;;  %v7073_v41 = vld [vmem:[%s10495_s5 + $0x34] sm:$0xf]  ;;  %v6519_v14 = vld [vmem:[%s10495_s5 + $0x50] sm:$0xf] }
0x1433   :  { %4525 = vmatpush.bf16.msra.mxu2 %v6500_v1  ;;  %v7103_v1 = vld [vmem:[%s10496_s7 + $0x64] sm:$0xf] }
0x1434   :  { %4330 = vmax.xlane.f32.xlu2 %v4329_v44 }
0x1436   :  { %v10179_v38 = vpop.f32.mrf.mxu1 }
0x1437   :  { %4526 = vmatpush.bf16.msra.mxu2 %v6488_v45  ;;  %v7097_v45 = vld [vmem:[%s10496_s7 + $0x34] sm:$0xf] }
0x1438   :  { %v6606_v58 = vor.u32 %v7097_v45, %v6603_v54 }
0x143b   :  { %4527 = vmatpush.bf16.msra.mxu2 %v6476_v4  ;;  %v6585_v4 = vld [vmem:[%s10496_s7 + $0x8] sm:$0xf] }
0x143e   :  { %v4730_v47 = vpop.f32.mrf.mxu1 }
0x143f   :  { %v6501_v47 = vld [vmem:[%s10495_s5 + $0x3c] sm:$0xf0]  ;;  %4732 = vmatpush.bf16.msrb.mxu2 %v6666_v15 }
0x1440   :  { %v6504_v5 = vor.u32 %v7073_v41, %v6501_v47  ;;  %v7106_v41 = vld [vmem:[%s10496_s7 + $0x7c] sm:$0xf]  ;;  %v6645_v47 = vld [vmem:[%s10496_s7 + $0x80] sm:$0xf] }
0x1442   :  { %4538 = vmatpush.bf16.msra.mxu3 %v6504_v5  ;;  %v6627_v5 = vld [vmem:[%s10496_s7 + $0x6c] sm:$0xf0] }
0x1443   :  { %4733 = vmatpush.bf16.msrb.mxu2 %v6654_v19  ;;  %v6630_v50 = vor.u32 %v7103_v1, %v6627_v5 }
0x1446   :  { %4539 = vmatpush.bf16.msra.mxu3 %v6492_v57  ;;  %v6609_v57 = vld [vmem:[%s10496_s7 + $0x38] sm:$0xf] }
0x144a   :  { %4540 = vmatpush.bf16.msra.mxu3 %v6480_v2  ;;  %v7122_v2 = vld [vmem:[%s10498_s9 + $0x38] sm:$0xff] }
0x144e   :  { %4745 = vmatpush.bf16.msrb.mxu3 %v6670_v21 }
0x1452   :  { %4746 = vmatpush.bf16.msrb.mxu3 %v6658_v28 }
0x14a7   :  { %v10181_v56 = vpop.xlane.xlu2 %4330 }
0x14a8   :  { %vm4332_vm6 = vcmp.eq.f32.partialorder %v4329_v44, %v10181_v56  ;;  %v6532_v44 = vor.u32 %v7081_v42, %v6531_v10  ;;  %v6496_v10 = vor.u32 %v7072_v8, %v6495_v23  ;;  %v7093_v23 = vld [vmem:[%s10496_s7 + $0x10] sm:$0xf0] }
0x14a9   :  { %v4333_v59 = vsel %vm4332_vm6, %v4328_v40, -inf  ;;  %v7078_v40 = vld [vmem:[%s10495_s5 + $0x58] sm:$0xf0] }
0x14aa   :  { %4334 = vmax.xlane.f32.xlu0 %v4333_v59  ;;  %v4337_v59 = vcvt.f32.s32 %v10181_v56  ;;  %4549 = vmatpush.bf16.msrb.mxu0 %v6532_v44  ;;  %v6520_v56 = vor.u32 %v7078_v40, %v6519_v14  ;;  %v6639_v44 = vld [vmem:[%s10496_s7 + $0x84] sm:$0xf0]  ;;  %v7108_v14 = vld [vmem:[%s10496_s7 + $0x88] sm:$0xf0]  ;;  %v6484_v40 = vor.u32 %v7069_v17, %v6483_v46 }
0x14ab   :  { %v6646_v3 = vor.u32 %v7108_v14, %v6645_v47  ;;  %v7116_v47 = vld [vmem:[%s10498_s9 + $0x8] sm:$0xff] }
0x14ac   :  { %v4338_v52 = vshll.u32 %v4337_v59, 16  ;;  %v6642_v59 = vor.u32 %v7106_v41, %v6639_v44 }
0x14ad   :  { %4747 = vmatpush.bf16.msrb.mxu3 %v6646_v3 }
0x14ae   :  { %4550 = vmatpush.bf16.msrb.mxu0 %v6520_v56  ;;  %4734 = vmatpush.bf16.msrb.mxu2 %v6642_v59  ;;  %v6634_v56 = vor.u32 %v7105_v27, %v6633_v29 }
0x14b1   :  { %4748 = vmatpush.bf16.msrb.mxu3 %v6634_v56 }
0x14b2   :  { %4551 = vmatpush.bf16.msrb.mxu0 %v6508_v61  ;;  %4735 = vmatpush.bf16.msrb.mxu2 %v6630_v50  ;;  %v6610_v61 = vor.u32 %v7099_v60, %v6609_v57 }
0x14b6   :  { %4552 = vmatpush.bf16.msrb.mxu0 %v6496_v10  ;;  %v7119_v10 = vld [vmem:[%s10498_s9 + $0x20] sm:$0xff] }
0x14ba   :  { %4553 = vmatpush.bf16.msrb.mxu0 %v6484_v40  ;;  %v7115_v40 = vld [vmem:[%s10498_s9] sm:$0xff] }
0x14be   :  { %4870 = vmatpush.bf16.msra.mxu0 %v7122_v2 }
0x151d   :  { %v4335_v34 = vpop.xlane.xlu0 %4334 }
0x151e   :  { %v4336_v33 = vcvt.f32.s32 %v4335_v34  ;;  %v6618_v34 = vor.u32 %v7100_v37, %v6615_v13 }
0x1520   :  { %v4339_v63 = vadd.s32 %v4338_v52, %v4336_v33  ;;  %v7102_v52 = vld [vmem:[%s10496_s7 + $0x58] sm:$0xf0]  ;;  %4736 = vmatpush.bf16.msrb.mxu2 %v6618_v34 }
0x1521   :  { %v6622_v33 = vor.u32 %v7102_v52, %v6621_v39 }
0x1522   :  { %v4340_v9 = vand.u32 127, %v4339_v63  ;;  %v7094_v63 = vld [vmem:[%s10496_s7 + $0x1c] sm:$0xf] }
0x1523   :  { %4749 = vmatpush.bf16.msrb.mxu3 %v6622_v33  ;;  %v6594_v18 = vor.u32 %v7094_v63, %v6591_v16 }
0x1524   :  { %v4341_v30 = vsub.s32 127, %v4340_v9  ;;  %4737 = vmatpush.bf16.msrb.mxu2 %v6606_v58  ;;  %v6579_v9 = vld [vmem:[%s10496_s7 + $0xc] sm:$0xf0] }
0x1525   :  { %v6582_v8 = vor.u32 %v7091_v25, %v6579_v9 }
0x1526   :  { %6469 = vst.msk [vmem:[%s10502_s12 + $0x30] sm:$0xff] %vm959_vm11, %v4341_v30  ;;  %v4352_v42 = vsel %vm10342_vm8, %v6471_v26, %v4341_v30  ;;  %v6586_v26 = vor.u32 %v7093_v23, %v6585_v4 }
0x1527   :  { %4354 = vperm.xlu0 %7126, %v4352_v42   ;;  %4750 = vmatpush.bf16.msrb.mxu3 %v6610_v61 }
0x1528   :  { %4738 = vmatpush.bf16.msrb.mxu2 %v6594_v18 }
0x152b   :  { %4751 = vmatpush.bf16.msrb.mxu3 %v6598_v24 }
0x152c   :  { %4739 = vmatpush.bf16.msrb.mxu2 %v6582_v8 }
0x152f   :  { %4752 = vmatpush.bf16.msrb.mxu3 %v6586_v26 }
0x1599   :  { %v4355_v32 = vpop.permute.xlu0 %4354 }
0x159a   :  { %vm4356_vm9 = vcmp.eq.s32.totalorder %v8078_v31, %v4355_v32  ;;  %v7121_v31 = vld [vmem:[%s10498_s9 + $0x30] sm:$0xff]  ;;  %v7282_v32 = vld [vmem:[%s10497_s10] ss:$0 sm:$0xff] }
0x159b   :  { %vm6569_vm10 = vmpackc.low %vm4356_vm9, %vm4356_vm9  ;;  %4871 = vmatpush.bf16.msra.mxu0 %v7121_v31 }
0x159c   :  { %6570 = vmatmul.msk.bf16.vlgmr.msra.gmra.mxu2 %vm6569_vm10, %v7284_v48  ;;  %6572 = vmatmul.msk.bf16.vlgmr.msra.gmra.mxu3 %vm6569_vm10, %v7284_v48 }
0x159d   :  { %6574 = vmatmul.msk.bf16.vlgmr.msrb.gmra.mxu0 %vm6569_vm10, %v7284_v48  ;;  %v4729_v48 = vadd.f32 %v10179_v38, %v8239_v11  ;;  %v7117_v38 = vld [vmem:[%s10498_s9 + $0x10] sm:$0xff] }
0x15ac   :  { %4740 = vmatmul.bf16.vlgmr.msrb.gmra.mxu2 %v10170_v12  ;;  %4753 = vmatmul.bf16.vlgmr.msrb.gmra.mxu3 %v10170_v12  ;;  %v7120_v12 = vld [vmem:[%s10498_s9 + $0x28] sm:$0xff] }
0x15ad   :  { %4872 = vmatpush.bf16.msra.mxu0 %v7120_v12 }
0x15b1   :  { %4873 = vmatpush.bf16.msra.mxu0 %v7119_v10 }
0x161a   :  { %v4555_v30 = vpop.f32.mrf.mxu0 }
0x161b   :  { %v4556_v57 = vadd.f32 %v4555_v30, %v8305_v35 }
0x161f   :  { %v4529_v15 = vpop.f32.mrf.mxu2  ;;  %v4542_v21 = vpop.f32.mrf.mxu3 }
0x1620   :  { %v4530_v20 = vadd.f32 %v4529_v15, %v8236_v7  ;;  %v7118_v7 = vld [vmem:[%s10498_s9 + $0x18] sm:$0xff]  ;;  %v4543_v41 = vadd.f32 %v4542_v21, %v8220_v36 }
0x1621   :  { %4874 = vmatpush.bf16.msra.mxu0 %v7118_v7 }
0x1622   :  { %v4758_v6 = vadd.f32 %v4729_v48, %v4530_v20  ;;  %v4557_v0 = vpop.f32.mrf.mxu0 }
0x1624   :  { %v6671_v43 = vmul.f32 -1.442695, %v4758_v6 }
0x1625   :  { %4875 = vmatpush.bf16.msra.mxu0 %v7117_v38 }
0x1626   :  { %7270 = vpow2.f32 %v6671_v43 }
0x1627   :  { %v4531_v42 = vpop.f32.mrf.mxu2  ;;  %v4544_v46 = vpop.f32.mrf.mxu3 }
0x1629   :  { %4876 = vmatpush.bf16.msra.mxu0 %v7116_v47 }
0x162c   :  { %v7271_v11 = vpop.eup %7270 }
0x162d   :  { %v4762_v17 = vadd.f32 1.0, %v7271_v11  ;;  %4877 = vmatpush.bf16.msra.mxu0 %v7115_v40 }
0x162f   :  { %7272 = vrcp.f32 %v4762_v17  ;;  %v4741_v19 = vpop.f32.mrf.mxu2  ;;  %v4754_v28 = vpop.f32.mrf.mxu3  ;;  %v4772_v50 = vand.u32 2147483647, %v4762_v17  ;;  %vm4768_vm13 = vweird.f32 %v4762_v17 }
0x1630   :  { %v4742_v44 = vadd.f32 %v4741_v19, %v8226_v55  ;;  %v4774_v55 = vand.u32 2147483648, %v4762_v17  ;;  %v4755_v33 = vadd.f32 %v4754_v28, %v8302_v22 }
0x1631   :  { %vm4773_vm15 = vcmp.eq.f32.partialorder %v4772_v50, 8.507059e+37 }
0x1632   :  { %v4778_v14 = vadd.f32 %v4742_v44, %v4543_v41  ;;  %v4775_v34 = vor.u32 1.1754944e-38, %v4774_v55 }
0x1634   :  { %v6672_v59 = vmul.f32 -1.442695, %v4778_v14 }
0x1635   :  { %v7273_v3 = vpop.eup %7272 }
0x1636   :  { %7274 = vpow2.f32 %v6672_v59  ;;  %v4764_v1 = vmul.f32 %v7273_v3, %v4762_v17  ;;  %vm4769_vm12 = vweird.f32 %v7273_v3 }
0x1637   :  { %v4743_v5 = vpop.f32.mrf.mxu2  ;;  %v4756_v29 = vpop.f32.mrf.mxu3  ;;  %vm4770_vm14 = vmor %vm4768_vm13, %vm4769_vm12 }
0x1638   :  { %v4765_v36 = vsub.f32 1.0, %v4764_v1 }
0x163a   :  { %v4766_v27 = vmul.f32 %v7273_v3, %v4765_v36 }
0x163c   :  { %v7275_v56 = vpop.eup %7274  ;;  %v4767_v37 = vadd.f32 %v7273_v3, %v4766_v27 }
0x163d   :  { %v4782_v13 = vadd.f32 1.0, %v7275_v56 }
0x163e   :  { %v4771_v39 = vsel %vm4770_vm14, %v7273_v3, %v4767_v37 }
0x163f   :  { %7276 = vrcp.f32 %v4782_v13  ;;  %v4776_v52 = vsel %vm4773_vm15, %v4775_v34, %v4771_v39  ;;  %v4794_v63 = vand.u32 2147483648, %v4782_v13  ;;  %v4792_v62 = vand.u32 2147483647, %v4782_v13 }
0x1640   :  { %v4798_v45 = vmul.f32 %v4776_v52, %v4755_v33  ;;  %vm4788_vm1 = vweird.f32 %v4782_v13 }
0x1641   :  { %v4795_v18 = vor.u32 1.1754944e-38, %v4794_v63  ;;  %vm4793_vm3 = vcmp.eq.f32.partialorder %v4792_v62, 8.507059e+37 }
0x1642   :  { %v4799_v60 = vadd.f32 %v4798_v45, %v4556_v57 }
0x1644   :  { %7278 = vtanh.f32 %v4799_v60 }
0x1645   :  { %v7277_v54 = vpop.eup %7276 }
0x1646   :  { %v4784_v58 = vmul.f32 %v7277_v54, %v4782_v13  ;;  %vm4789_vm0 = vweird.f32 %v7277_v54 }
0x1647   :  { %vm4790_vm2 = vmor %vm4788_vm1, %vm4789_vm0 }
0x1648   :  { %v4785_v61 = vsub.f32 1.0, %v4784_v58 }
0x164a   :  { %v4786_v16 = vmul.f32 %v7277_v54, %v4785_v61  ;;  %v7279_v9 = vpop.eup %7278 }
0x164c   :  { %v4787_v53 = vadd.f32 %v7277_v54, %v4786_v16 }
0x164e   :  { %v4791_v24 = vsel %vm4790_vm2, %v7277_v54, %v4787_v53 }
0x164f   :  { %v4796_v25 = vsel %vm4793_vm3, %v4795_v18, %v4791_v24 }
0x1650   :  { %v4801_v22 = vsub.f32 1.0, %v4796_v25  ;;  %v4803_v35 = vmul.f32 %v4796_v25, %v10166_v51 }
0x1652   :  { %v4802_v4 = vmul.f32 %v7279_v9, %v4801_v22 }
0x1654   :  { %v4804_v23 = vadd.f32 %v4803_v35, %v4802_v4 }
0x1656   :  { %v4805_v8 = vpack.c.bf16 %v4804_v23, %v4804_v23 }
0x1658   :  { %4878 = vmatmul.bf16.vlgmr.msra.gmra.mxu0 %v4805_v8 }
0x16d5   :  { %v4879_v26 = vpop.f32.mrf.mxu0 }
0x16d6   :  { %v4880_v2 = vadd.f32 %v7282_v32, %v4879_v26 }
0x16d8   :  { %6705 = vst [vmem:[%s10501_s11 + $0x38] sm:$0xff] %v4880_v2  ;;  %v4887_v30 = vxor.u32 2147483647, %v4880_v2  ;;  %vm4886_vm4 = vcmp.lt.s32.totalorder %v4880_v2, 0 }
0x16da   :  { %v4888_v31 = vsel %vm4886_vm4, %v4887_v30, %v4880_v2 }
0x16db   :  { %v4889_v15 = vand.u32 4294967168, %v4888_v31 }
0x16dd   :  { %v4881_v21 = vpop.f32.mrf.mxu0  ;;  %v4890_v51 = vor.u32 %v4889_v15, %v8336_v49 }
0x16df   :  { %v4892_v48 = vshra.s32 %v4890_v51, 16  ;;  %v4891_v12 = vand.u32 65535, %v4890_v51 }
0x16e1   :  { %v4894_v20 = vcvt.s32.f32 %v4892_v48  ;;  %v4893_v0 = vcvt.s32.f32 %v4891_v12 }
0x16e3   :  { %4895 = vmax.xlane.f32.xlu1 %v4894_v20 }
0x1756   :  { %v4896_v6 = vpop.xlane.xlu1 %4895 }
0x1757   :  { %vm4897_vm5 = vcmp.eq.f32.partialorder %v4894_v20, %v4896_v6  ;;  %v4902_v10 = vcvt.f32.s32 %v4896_v6 }
0x1758   :  { %v4898_v43 = vsel %vm4897_vm5, %v4893_v0, -inf }
0x1759   :  { %4899 = vmax.xlane.f32.xlu0 %v4898_v43  ;;  %v4903_v46 = vshll.u32 %v4902_v10, 16 }
0x17cc   :  { %v4900_v42 = vpop.xlane.xlu0 %4899 }
0x17cd   :  { %v4901_v7 = vcvt.f32.s32 %v4900_v42 }
0x17cf   :  { %v4904_v11 = vadd.s32 %v4903_v46, %v4901_v7 }
0x17d1   :  { %v4905_v38 = vand.u32 127, %v4904_v11 }
0x17d3   :  { %v4906_v17 = vsub.s32 127, %v4905_v38 }
0x17d5   :  { %6706 = vst.msk [vmem:[%s10502_s12 + $0x38] sm:$0xff] %vm959_vm11, %v4906_v17 }

</bundles_post_ra>
